<compile_context>
chip_gen: v6e
topology: v6e:2x2x1
jax: 0.10.0
libtpu: 0.0.40
codegen_flags: <defaults>
</compile_context>

<pallas_src>
from functools import partial

import jax
import jax.numpy as jnp
from jax.experimental import pallas as pl
from jax.experimental.pallas import tpu as pltpu

BN_EPS = 1e-5
KERNEL_SIZE = 5
LANE = 128
ROW_ALIGN = 16           # bf16 sublane tile


# --------------------------------------------------------------------------- helpers
def _round_up(x, m):
    return ((x + m - 1) // m) * m


def _pad2(a, rows, cols):
    r, c = a.shape
    if r == rows and c == cols:
        return a
    return jnp.pad(a, ((0, rows - r), (0, cols - c)))


def _fold_bn(w, b, gamma, beta, mean, var, eps=BN_EPS):
    """Fold eval-mode BatchNorm1d into the preceding linear/conv (f32 math)."""
    scale = gamma * jax.lax.rsqrt(var + eps)
    return w * scale[None, :], (b - mean) * scale + beta


def _batch_tiling(batch, cap=256, min_steps=2):
    """(row_tile, padded_rows).  Rows aligned to 16; >=2 grid steps when the batch is big
    enough so v7x's second TensorCore is used (dimension_semantics='parallel')."""
    mp = _round_up(max(batch, 1), ROW_ALIGN)
    if mp // ROW_ALIGN >= min_steps:
        tb = min(cap, _round_up(pl.cdiv(mp, min_steps), ROW_ALIGN))
        mp = _round_up(mp, tb)
    else:
        tb = mp
    return tb, mp


# --------------------------------------------------------------------------- encoder kernel
def _encoder_kernel(x_ref, w1_ref, b1_ref, w2_ref, b2_ref, w3_ref, b3_ref,
                    out_ref, hpad_ref, *, tb, t, cp, k, off):
    """Three fused Conv1d(k,'same')+BN(folded)+ReLU layers (im2col fused in VMEM).

    x_ref   : (tb, t+k-1, cp) bf16 — time halo + channel padding baked in by the wrapper
    w*_ref  : (k, cp, cp)     bf16 — per-tap conv weights, BN folded
    b*_ref  : (1, cp)         f32  — folded bias
    out_ref : (tb, t, cp)     f32  — layer-3 activations (flattened to emb by the wrapper)
    hpad_ref: (tb, off+t+k//2, cp) bf16 scratch — activation tile with zero time halo
    """
    half = k // 2
    rows = tb * t

    def conv_bn_relu(src_ref, start, w_ref, b_ref):
        acc = jnp.zeros((rows, cp), jnp.float32)
        for d in range(k):                                    # k shifted matmuls
            xd = src_ref[:, start + d:start + d + t, :].reshape(rows, cp)
            acc = acc + jnp.dot(xd, w_ref[d], preferred_element_type=jnp.float32)
        return jnp.maximum(acc + b_ref[...], 0.0)             # (rows, cp) f32

    # Zero the scratch every step (no cross-step init dependency -> safe under megacore).
    hpad_ref[...] = jnp.zeros_like(hpad_ref)

    h = conv_bn_relu(x_ref, 0, w1_ref, b1_ref)                                 # layer 1
    hpad_ref[:, off:off + t, :] = h.astype(jnp.bfloat16).reshape(tb, t, cp)
    h = conv_bn_relu(hpad_ref, off - half, w2_ref, b2_ref)                     # layer 2
    hpad_ref[:, off:off + t, :] = h.astype(jnp.bfloat16).reshape(tb, t, cp)
    h = conv_bn_relu(hpad_ref, off - half, w3_ref, b3_ref)                     # layer 3
    out_ref[...] = h.reshape(tb, t, cp)


def pallas_encoder(x, enc_params):
    """x: (B, n_bands, T) f32 -> emb_pad (MP, hidden*T) f32 (PyTorch Flatten order;
    rows >= B are batch padding)."""
    b, c_in, t = x.shape
    k = KERNEL_SIZE
    half = k // 2
    assert len(enc_params) == 3
    hidden = enc_params[0][0].shape[1]
    assert t % ROW_ALIGN == 0, "ts_length must be a multiple of 16 for this kernel"
    cp = _round_up(max(c_in, hidden), LANE)
    tb, mp = _batch_tiling(b)
    off = ROW_ALIGN                       # body offset in the halo scratch (tile aligned)
    tp = t + 2 * half

    # (B, C, T) -> (B, T, C); zero time halo, channel + batch padding; cast once to bf16.
    xt = jnp.transpose(x, (0, 2, 1))
    xt = jnp.pad(xt, ((0, mp - b), (half, half), (0, cp - c_in))).astype(jnp.bfloat16)

    # Fold BN and lay conv weights out as per-tap (k, Cin_p, Cout_p) matrices.
    ws, bs = [], []
    cin = c_in
    for (w, bias, gamma, beta, mean, var) in enc_params:
        wf, bf = _fold_bn(w, bias, gamma, beta, mean, var)        # (cin*k, hidden)
        wt = wf.reshape(cin, k, hidden).transpose(1, 0, 2)        # (k, cin, hidden)
        wt = jnp.pad(wt, ((0, 0), (0, cp - cin), (0, cp - hidden)))
        ws.append(wt.astype(jnp.bfloat16))
        bs.append(_pad2(bf.reshape(1, -1), 1, cp).astype(jnp.float32))
        cin = hidden

    const3 = lambda i: (0, 0, 0)
    const2 = lambda i: (0, 0)
    out = pl.pallas_call(
        partial(_encoder_kernel, tb=tb, t=t, cp=cp, k=k, off=off),
        out_shape=jax.ShapeDtypeStruct((mp, t, cp), jnp.float32),
        grid=(mp // tb,),
        in_specs=[
            pl.BlockSpec((tb, tp, cp), lambda i: (i, 0, 0)),
            pl.BlockSpec((k, cp, cp), const3), pl.BlockSpec((1, cp), const2),
            pl.BlockSpec((k, cp, cp), const3), pl.BlockSpec((1, cp), const2),
            pl.BlockSpec((k, cp, cp), const3), pl.BlockSpec((1, cp), const2),
        ],
        out_specs=pl.BlockSpec((tb, t, cp), lambda i: (i, 0, 0)),
        scratch_shapes=[pltpu.VMEM((tb, off + t + half, cp), jnp.bfloat16)],
        compiler_params=pltpu.CompilerParams(dimension_semantics=("parallel",)),
    )(xt, ws[0], bs[0], ws[1], bs[1], ws[2], bs[2])

    # PyTorch Flatten is channel-major; padded channels land past hidden*t and are cut.
    emb_pad = jnp.transpose(out, (0, 2, 1)).reshape(mp, cp * t)[:, :hidden * t]
    return emb_pad


# --------------------------------------------------------------------------- heads kernel
def _heads_kernel(emb_ref, w1c_ref, b1c_ref, w2c_ref, b2c_ref,
                  w1r_ref, b1r_ref, w2r_ref, b2r_ref, cls_ref, reco_ref):
    emb = emb_ref[...]                                                    # (tb, ep) bf16
    # Three FC_Classifier heads fused: block-structured first layer, block-diagonal second.
    h = jnp.dot(emb, w1c_ref[...], preferred_element_type=jnp.float32) + b1c_ref[...]
    h = jnp.maximum(h, 0.0)
    cls_ref[...] = jnp.dot(h.astype(jnp.bfloat16), w2c_ref[...],
                           preferred_element_type=jnp.float32) + b2c_ref[...]
    # Reco head: Linear -> BN(folded) -> Dropout(identity) -> Linear (no ReLU).
    hr = jnp.dot(emb, w1r_ref[...], preferred_element_type=jnp.float32) + b1r_ref[...]
    reco_ref[...] = jnp.dot(hr.astype(jnp.bfloat16), w2r_ref[...],
                            preferred_element_type=jnp.float32) + b2r_ref[...]


def pallas_heads(emb_pad, params, *, batch, final_dim):
    """emb_pad: (MP, E) f32.  Returns (out_t, out_d_inv, out_d_spec, reco_flat)."""
    mp, e = emb_pad.shape
    tb, mp2 = _batch_tiling(batch)
    assert mp2 == mp
    half = e // 2

    def fold_head(p):
        w1, b1, gamma, beta, mean, var, w2, b2 = p
        w1f, b1f = _fold_bn(w1, b1, gamma, beta, mean, var)
        return w1f, b1f, w2, b2

    w1t, b1t, w2t, b2t = fold_head(params["cls_t"])          # inv_emb -> num_classes
    w1i, b1i, w2i, b2i = fold_head(params["cls_d_inv"])      # inv_emb -> 2
    w1s, b1s, w2s, b2s = fold_head(params["cls_d_spec"])     # spec_emb -> 2
    w1r, b1r, w2r, b2r = fold_head(params["reco"])           # emb -> final_dim

    hc = w1t.shape[1]
    hcc = 3 * hc
    nt, ni, ns = w2t.shape[1], w2i.shape[1], w2s.shape[1]
    ctot = nt + ni + ns
    rh = w1r.shape[1]

    ep = _round_up(e, LANE)
    hccp = _round_up(hcc, LANE)
    clsp = _round_up(ctot, LANE)
    rhp = _round_up(rh, LANE)
    finp = _round_up(final_dim, LANE)

    # Combined first layer: cls_t / cls_d_inv read emb[:, half:], cls_d_spec reads emb[:, :half].
    zcol = jnp.zeros((half, hc), jnp.float32)
    w1c = jnp.concatenate([
        jnp.concatenate([zcol, w1t], axis=0),
        jnp.concatenate([zcol, w1i], axis=0),
        jnp.concatenate([w1s, zcol], axis=0)], axis=1)                    # (e, 3*hc)
    b1c = jnp.concatenate([b1t, b1i, b1s]).reshape(1, -1)

    # Block-diagonal second layer keeps the heads isolated.
    w2c = jnp.zeros((hcc, ctot), jnp.float32)
    w2c = w2c.at[0:hc, 0:nt].set(w2t)
    w2c = w2c.at[hc:2 * hc, nt:nt + ni].set(w2i)
    w2c = w2c.at[2 * hc:hcc, nt + ni:ctot].set(w2s)
    b2c = jnp.concatenate([b2t, b2i, b2s]).reshape(1, -1)

    embp = _pad2(emb_pad, mp, ep).astype(jnp.bfloat16)                    # cast once
    args = (
        embp,
        _pad2(w1c, ep, hccp).astype(jnp.bfloat16),
        _pad2(b1c, 1, hccp).astype(jnp.float32),
        _pad2(w2c, hccp, clsp).astype(jnp.bfloat16),
        _pad2(b2c, 1, clsp).astype(jnp.float32),
        _pad2(w1r, ep, rhp).astype(jnp.bfloat16),
        _pad2(b1r.reshape(1, -1), 1, rhp).astype(jnp.float32),
        _pad2(w2r, rhp, finp).astype(jnp.bfloat16),
        _pad2(b2r.reshape(1, -1), 1, finp).astype(jnp.float32),
    )
    const2 = lambda i: (0, 0)
    cls_out, reco_out = pl.pallas_call(
        _heads_kernel,
        out_shape=[jax.ShapeDtypeStruct((mp, clsp), jnp.float32),
                   jax.ShapeDtypeStruct((mp, finp), jnp.float32)],
        grid=(mp // tb,),
        in_specs=[
            pl.BlockSpec((tb, ep), lambda i: (i, 0)),
            pl.BlockSpec((ep, hccp), const2), pl.BlockSpec((1, hccp), const2),
            pl.BlockSpec((hccp, clsp), const2), pl.BlockSpec((1, clsp), const2),
            pl.BlockSpec((ep, rhp), const2), pl.BlockSpec((1, rhp), const2),
            pl.BlockSpec((rhp, finp), const2), pl.BlockSpec((1, finp), const2),
        ],
        out_specs=[pl.BlockSpec((tb, clsp), lambda i: (i, 0)),
                   pl.BlockSpec((tb, finp), lambda i: (i, 0))],
        compiler_params=pltpu.CompilerParams(dimension_semantics=("parallel",)),
    )(*args)

    out_t = cls_out[:batch, 0:nt]
    out_d_inv = cls_out[:batch, nt:nt + ni]
    out_d_spec = cls_out[:batch, nt + ni:ctot]
    reco_flat = reco_out[:batch, :final_dim]
    return out_t, out_d_inv, out_d_spec, reco_flat


# --------------------------------------------------------------------------- full forward
def tempcnn_forward(x, params):
    """Eval-mode forward of TempCNNDisentangle. x: (B, n_bands, ts_length) f32."""
    b, n_bands, ts_length = x.shape
    final_dim = ts_length * n_bands

    emb_pad = pallas_encoder(x, params["enc"])               # (MP, hidden*T) f32
    emb = emb_pad[:b]
    half = emb.shape[1] // 2
    inv_emb = emb[:, half:]
    spec_emb = emb[:, :half]

    # grad_reverse(inv_emb, 1.0) is identity in the forward pass.
    out_t, out_d_inv, out_d_spec, reco_flat = pallas_heads(
        emb_pad, params, batch=b, final_dim=final_dim)
    reco = reco_flat.reshape(b, n_bands, ts_length)
    return out_t, inv_emb, spec_emb, reco, out_d_inv, out_d_spec


# --------------------------------------------------------------------------- params & reference
def init_params(key, n_bands, ts_length, hidden_dims=64, num_classes=8, kernel_size=5):
    keys = iter(jax.random.split(key, 64))

    def linear(fan_in, fan_out):
        bound = fan_in ** -0.5
        w = jax.random.uniform(next(keys), (fan_in, fan_out), jnp.float32, -bound, bound)
        bb = jax.random.uniform(next(keys), (fan_out,), jnp.float32, -bound, bound)
        return w, bb

    def bn(n):
        gamma = jax.random.uniform(next(keys), (n,), jnp.float32, 0.5, 1.5)
        beta = jax.random.uniform(next(keys), (n,), jnp.float32, -0.2, 0.2)
        mean = jax.random.uniform(next(keys), (n,), jnp.float32, -0.2, 0.2)
        var = jax.random.uniform(next(keys), (n,), jnp.float32, 0.5, 1.5)
        return gamma, beta, mean, var

    enc = []
    cin = n_bands
    for _ in range(3):
        w, bb = linear(cin * kernel_size, hidden_dims)
        enc.append((w, bb) + bn(hidden_dims))
        cin = hidden_dims

    emb_dim = hidden_dims * ts_length
    half = emb_dim // 2
    final_dim = ts_length * n_bands

    def head(in_dim, hidden, out_dim):
        w1, b1 = linear(in_dim, hidden)
        w2, b2 = linear(hidden, out_dim)
        return (w1, b1) + bn(hidden) + (w2, b2)

    return {
        "enc": enc,
        "cls_t": head(half, 256, num_classes),
        "cls_d_inv": head(half, 256, 2),
        "cls_d_spec": head(half, 256, 2),
        "reco": head(emb_dim, final_dim // 2, final_dim),
    }


def _ref_conv_bn_relu(h, w_flat, bias, gamma, beta, mean, var, k):
    cin, cout = h.shape[1], w_flat.shape[1]
    w_conv = w_flat.reshape(cin, k, cout).transpose(2, 0, 1)     # (Cout, Cin, K)
    y = jax.lax.conv_general_dilated(
        h, w_conv, window_strides=(1,), padding=[(k // 2, k // 2)],
        dimension_numbers=("NCH", "OIH", "NCH"),
        precision=jax.lax.Precision.HIGHEST)
    y = y + bias[None, :, None]
    scale = gamma * jax.lax.rsqrt(var + BN_EPS)
    y = (y - mean[None, :, None]) * scale[None, :, None] + beta[None, :, None]
    return jnp.maximum(y, 0.0)


def _ref_head(x, p, relu_hidden):
    w1, b1, gamma, beta, mean, var, w2, b2 = p
    h = jnp.dot(x, w1, precision=jax.lax.Precision.HIGHEST) + b1
    h = (h - mean) * jax.lax.rsqrt(var + BN_EPS) * gamma + beta
    if relu_hidden:
        h = jnp.maximum(h, 0.0)
    return jnp.dot(h, w2, precision=jax.lax.Precision.HIGHEST) + b2


def reference_forward(x, params, ts_length, n_bands):
    h = x
    for (w, bias, gamma, beta, mean, var) in params["enc"]:
        h = _ref_conv_bn_relu(h, w, bias, gamma, beta, mean, var, KERNEL_SIZE)
    b = x.shape[0]
    emb = h.reshape(b, -1)
    half = emb.shape[1] // 2
    inv_emb = emb[:, half:]
    spec_emb = emb[:, :half]
    return (_ref_head(inv_emb, params["cls_t"], True),
            inv_emb, spec_emb,
            _ref_head(emb, params["reco"], False).reshape(b, n_bands, ts_length),
            _ref_head(inv_emb, params["cls_d_inv"], True),
            _ref_head(spec_emb, params["cls_d_spec"], True))


# --------------------------------------------------------------------------- main
if __name__ == "__main__":
    ts_length = 16
    n_bands = 4
    num_classes = 8
    hidden_dims = 64
    batch = 2

    key = jax.random.PRNGKey(0)
    kx, kp = jax.random.split(key)
    x = jax.random.normal(kx, (batch, n_bands, ts_length), jnp.float32)
    params = init_params(kp, n_bands, ts_length, hidden_dims, num_classes, KERNEL_SIZE)

    fwd = jax.jit(tempcnn_forward)
    outs = jax.block_until_ready(fwd(x, params))
    out_t, inv_emb, spec_emb, reco, out_d_inv, out_d_spec = outs

    assert out_t.shape == (batch, num_classes), out_t.shape
    assert inv_emb.shape == (batch, hidden_dims * ts_length // 2), inv_emb.shape
    assert spec_emb.shape == (batch, hidden_dims * ts_length // 2), spec_emb.shape
    assert reco.shape == (batch, n_bands, ts_length), reco.shape
    assert out_d_inv.shape == (batch, 2), out_d_inv.shape
    assert out_d_spec.shape == (batch, 2), out_d_spec.shape

    refs = reference_forward(x, params, ts_length, n_bands)
    names = ["cls_t", "inv_emb", "spec_emb", "reco", "cls_d_inv", "cls_d_spec"]
    for name, got, ref in zip(names, outs, refs):
        assert got.shape == ref.shape, (name, got.shape, ref.shape)
        # bf16 weights/activations (f32 accumulation) vs f32 reference -> loose tolerance
        err = jnp.max(jnp.abs(got - ref))
        assert jnp.allclose(got, ref, atol=5e-2, rtol=5e-2), (name, float(err))

    print("KERNEL_OK")
</pallas_src>

<mosaic_0001>
module attributes {stable_mosaic.version = 11 : i64} {
  func.func @_encoder_kernel(%arg0: i32, %arg1: memref<16x20x128xbf16, #tpu.memory_space<vmem>>, %arg2: memref<5x128x128xbf16, #tpu.memory_space<vmem>>, %arg3: memref<1x128xf32, #tpu.memory_space<vmem>>, %arg4: memref<5x128x128xbf16, #tpu.memory_space<vmem>>, %arg5: memref<1x128xf32, #tpu.memory_space<vmem>>, %arg6: memref<5x128x128xbf16, #tpu.memory_space<vmem>>, %arg7: memref<1x128xf32, #tpu.memory_space<vmem>>, %arg8: memref<16x16x128xf32, #tpu.memory_space<vmem>>, %arg9: memref<16x34x128xbf16, #tpu.memory_space<vmem>>) attributes {dimension_semantics = [#tpu.dimension_semantics<parallel>], iteration_bounds = array<i64: 1>, scalar_prefetch = 0 : i64, scratch_operands = 1 : i64, tpu.core_type = #tpu.core_type<tc>, window_params = [{transform_indices = @transform_0, window_bounds = array<i64: 16, 20, 128>}, {pipeline_mode = #tpu.pipeline_mode<synchronous>, transform_indices = @transform_1, window_bounds = array<i64: 5, 128, 128>}, {pipeline_mode = #tpu.pipeline_mode<synchronous>, transform_indices = @transform_2, window_bounds = array<i64: 1, 128>}, {pipeline_mode = #tpu.pipeline_mode<synchronous>, transform_indices = @transform_3, window_bounds = array<i64: 5, 128, 128>}, {pipeline_mode = #tpu.pipeline_mode<synchronous>, transform_indices = @transform_4, window_bounds = array<i64: 1, 128>}, {pipeline_mode = #tpu.pipeline_mode<synchronous>, transform_indices = @transform_5, window_bounds = array<i64: 5, 128, 128>}, {pipeline_mode = #tpu.pipeline_mode<synchronous>, transform_indices = @transform_6, window_bounds = array<i64: 1, 128>}, {transform_indices = @transform_7, window_bounds = array<i64: 16, 16, 128>}]} {
    %cst = arith.constant 0.000000e+00 : bf16
    %0 = vector.broadcast %cst : bf16 to vector<16x34x128xbf16>
    %c0 = arith.constant 0 : index
    %c0_0 = arith.constant 0 : index
    %c0_1 = arith.constant 0 : index
    %1 = vector.load %arg9[%c0, %c0_0, %c0_1] : memref<16x34x128xbf16, #tpu.memory_space<vmem>>, vector<16x34x128xbf16>
    tpu.vector_store %arg9[%c0, %c0_0, %c0_1], %0 {strides = array<i32>} : memref<16x34x128xbf16, #tpu.memory_space<vmem>>, vector<16x34x128xbf16>,
    %cst_2 = arith.constant 0.000000e+00 : f32
    %2 = vector.broadcast %cst_2 : f32 to vector<256x128xf32>
    %c0_3 = arith.constant 0 : index
    %c0_4 = arith.constant 0 : index
    %c0_5 = arith.constant 0 : index
    %3 = vector.load %arg1[%c0_3, %c0_4, %c0_5] : memref<16x20x128xbf16, #tpu.memory_space<vmem>>, vector<16x16x128xbf16>
    %4 = vector.shape_cast %3 : vector<16x16x128xbf16> to vector<256x128xbf16>
    %c0_6 = arith.constant 0 : index
    %c0_7 = arith.constant 0 : index
    %c0_8 = arith.constant 0 : index
    %5 = vector.load %arg2[%c0_6, %c0_7, %c0_8] : memref<5x128x128xbf16, #tpu.memory_space<vmem>>, vector<1x128x128xbf16>
    %6 = vector.shape_cast %5 : vector<1x128x128xbf16> to vector<128x128xbf16>
    %cst_9 = arith.constant dense<0.000000e+00> : vector<256x128xf32>
    %7 = tpu.matmul %4, %6, %cst_9 {dimension_numbers = #tpu.dot_dimension_numbers<[1], [0], [0], [1], [0, 0, 1, 1], [], []>} : vector<256x128xbf16>, vector<128x128xbf16>, vector<256x128xf32> -> vector<256x128xf32>
    %8 = arith.addf %2, %7 : vector<256x128xf32>
    %c0_10 = arith.constant 0 : index
    %c1 = arith.constant 1 : index
    %c0_11 = arith.constant 0 : index
    %9 = vector.load %arg1[%c0_10, %c1, %c0_11] : memref<16x20x128xbf16, #tpu.memory_space<vmem>>, vector<16x16x128xbf16>
    %10 = vector.shape_cast %9 : vector<16x16x128xbf16> to vector<256x128xbf16>
    %c1_12 = arith.constant 1 : index
    %c0_13 = arith.constant 0 : index
    %c0_14 = arith.constant 0 : index
    %11 = vector.load %arg2[%c1_12, %c0_13, %c0_14] : memref<5x128x128xbf16, #tpu.memory_space<vmem>>, vector<1x128x128xbf16>
    %12 = vector.shape_cast %11 : vector<1x128x128xbf16> to vector<128x128xbf16>
    %cst_15 = arith.constant dense<0.000000e+00> : vector<256x128xf32>
    %13 = tpu.matmul %10, %12, %cst_15 {dimension_numbers = #tpu.dot_dimension_numbers<[1], [0], [0], [1], [0, 0, 1, 1], [], []>} : vector<256x128xbf16>, vector<128x128xbf16>, vector<256x128xf32> -> vector<256x128xf32>
    %14 = arith.addf %8, %13 : vector<256x128xf32>
    %c0_16 = arith.constant 0 : index
    %c2 = arith.constant 2 : index
    %c0_17 = arith.constant 0 : index
    %15 = vector.load %arg1[%c0_16, %c2, %c0_17] : memref<16x20x128xbf16, #tpu.memory_space<vmem>>, vector<16x16x128xbf16>
    %16 = vector.shape_cast %15 : vector<16x16x128xbf16> to vector<256x128xbf16>
    %c2_18 = arith.constant 2 : index
    %c0_19 = arith.constant 0 : index
    %c0_20 = arith.constant 0 : index
    %17 = vector.load %arg2[%c2_18, %c0_19, %c0_20] : memref<5x128x128xbf16, #tpu.memory_space<vmem>>, vector<1x128x128xbf16>
    %18 = vector.shape_cast %17 : vector<1x128x128xbf16> to vector<128x128xbf16>
    %cst_21 = arith.constant dense<0.000000e+00> : vector<256x128xf32>
    %19 = tpu.matmul %16, %18, %cst_21 {dimension_numbers = #tpu.dot_dimension_numbers<[1], [0], [0], [1], [0, 0, 1, 1], [], []>} : vector<256x128xbf16>, vector<128x128xbf16>, vector<256x128xf32> -> vector<256x128xf32>
    %20 = arith.addf %14, %19 : vector<256x128xf32>
    %c0_22 = arith.constant 0 : index
    %c3 = arith.constant 3 : index
    %c0_23 = arith.constant 0 : index
    %21 = vector.load %arg1[%c0_22, %c3, %c0_23] : memref<16x20x128xbf16, #tpu.memory_space<vmem>>, vector<16x16x128xbf16>
    %22 = vector.shape_cast %21 : vector<16x16x128xbf16> to vector<256x128xbf16>
    %c3_24 = arith.constant 3 : index
    %c0_25 = arith.constant 0 : index
    %c0_26 = arith.constant 0 : index
    %23 = vector.load %arg2[%c3_24, %c0_25, %c0_26] : memref<5x128x128xbf16, #tpu.memory_space<vmem>>, vector<1x128x128xbf16>
    %24 = vector.shape_cast %23 : vector<1x128x128xbf16> to vector<128x128xbf16>
    %cst_27 = arith.constant dense<0.000000e+00> : vector<256x128xf32>
    %25 = tpu.matmul %22, %24, %cst_27 {dimension_numbers = #tpu.dot_dimension_numbers<[1], [0], [0], [1], [0, 0, 1, 1], [], []>} : vector<256x128xbf16>, vector<128x128xbf16>, vector<256x128xf32> -> vector<256x128xf32>
    %26 = arith.addf %20, %25 : vector<256x128xf32>
    %c0_28 = arith.constant 0 : index
    %c4 = arith.constant 4 : index
    %c0_29 = arith.constant 0 : index
    %27 = vector.load %arg1[%c0_28, %c4, %c0_29] : memref<16x20x128xbf16, #tpu.memory_space<vmem>>, vector<16x16x128xbf16>
    %28 = vector.shape_cast %27 : vector<16x16x128xbf16> to vector<256x128xbf16>
    %c4_30 = arith.constant 4 : index
    %c0_31 = arith.constant 0 : index
    %c0_32 = arith.constant 0 : index
    %29 = vector.load %arg2[%c4_30, %c0_31, %c0_32] : memref<5x128x128xbf16, #tpu.memory_space<vmem>>, vector<1x128x128xbf16>
    %30 = vector.shape_cast %29 : vector<1x128x128xbf16> to vector<128x128xbf16>
    %cst_33 = arith.constant dense<0.000000e+00> : vector<256x128xf32>
    %31 = tpu.matmul %28, %30, %cst_33 {dimension_numbers = #tpu.dot_dimension_numbers<[1], [0], [0], [1], [0, 0, 1, 1], [], []>} : vector<256x128xbf16>, vector<128x128xbf16>, vector<256x128xf32> -> vector<256x128xf32>
    %32 = arith.addf %26, %31 : vector<256x128xf32>
    %c0_34 = arith.constant 0 : index
    %c0_35 = arith.constant 0 : index
    %33 = vector.load %arg3[%c0_34, %c0_35] : memref<1x128xf32, #tpu.memory_space<vmem>>, vector<1x128xf32>
    %34 = vector.broadcast %33 : vector<1x128xf32> to vector<256x128xf32>
    %35 = arith.addf %32, %34 : vector<256x128xf32>
    %cst_36 = arith.constant 0.000000e+00 : f32
    %36 = vector.broadcast %cst_36 : f32 to vector<256x128xf32>
    %37 = arith.maximumf %35, %36 : vector<256x128xf32>
    %38 = arith.truncf %37 : vector<256x128xf32> to vector<256x128xbf16>
    %39 = vector.shape_cast %38 : vector<256x128xbf16> to vector<16x16x128xbf16>
    %c0_37 = arith.constant 0 : index
    %c16 = arith.constant 16 : index
    %c0_38 = arith.constant 0 : index
    %40 = vector.load %arg9[%c0_37, %c16, %c0_38] : memref<16x34x128xbf16, #tpu.memory_space<vmem>>, vector<16x16x128xbf16>
    tpu.vector_store %arg9[%c0_37, %c16, %c0_38], %39 {strides = array<i32>} : memref<16x34x128xbf16, #tpu.memory_space<vmem>>, vector<16x16x128xbf16>,
    %cst_39 = arith.constant 0.000000e+00 : f32
    %41 = vector.broadcast %cst_39 : f32 to vector<256x128xf32>
    %c0_40 = arith.constant 0 : index
    %c14 = arith.constant 14 : index
    %c0_41 = arith.constant 0 : index
    %42 = vector.load %arg9[%c0_40, %c14, %c0_41] : memref<16x34x128xbf16, #tpu.memory_space<vmem>>, vector<16x16x128xbf16>
    %43 = vector.shape_cast %42 : vector<16x16x128xbf16> to vector<256x128xbf16>
    %c0_42 = arith.constant 0 : index
    %c0_43 = arith.constant 0 : index
    %c0_44 = arith.constant 0 : index
    %44 = vector.load %arg4[%c0_42, %c0_43, %c0_44] : memref<5x128x128xbf16, #tpu.memory_space<vmem>>, vector<1x128x128xbf16>
    %45 = vector.shape_cast %44 : vector<1x128x128xbf16> to vector<128x128xbf16>
    %cst_45 = arith.constant dense<0.000000e+00> : vector<256x128xf32>
    %46 = tpu.matmul %43, %45, %cst_45 {dimension_numbers = #tpu.dot_dimension_numbers<[1], [0], [0], [1], [0, 0, 1, 1], [], []>} : vector<256x128xbf16>, vector<128x128xbf16>, vector<256x128xf32> -> vector<256x128xf32>
    %47 = arith.addf %41, %46 : vector<256x128xf32>
    %c0_46 = arith.constant 0 : index
    %c15 = arith.constant 15 : index
    %c0_47 = arith.constant 0 : index
    %48 = vector.load %arg9[%c0_46, %c15, %c0_47] : memref<16x34x128xbf16, #tpu.memory_space<vmem>>, vector<16x16x128xbf16>
    %49 = vector.shape_cast %48 : vector<16x16x128xbf16> to vector<256x128xbf16>
    %c1_48 = arith.constant 1 : index
    %c0_49 = arith.constant 0 : index
    %c0_50 = arith.constant 0 : index
    %50 = vector.load %arg4[%c1_48, %c0_49, %c0_50] : memref<5x128x128xbf16, #tpu.memory_space<vmem>>, vector<1x128x128xbf16>
    %51 = vector.shape_cast %50 : vector<1x128x128xbf16> to vector<128x128xbf16>
    %cst_51 = arith.constant dense<0.000000e+00> : vector<256x128xf32>
    %52 = tpu.matmul %49, %51, %cst_51 {dimension_numbers = #tpu.dot_dimension_numbers<[1], [0], [0], [1], [0, 0, 1, 1], [], []>} : vector<256x128xbf16>, vector<128x128xbf16>, vector<256x128xf32> -> vector<256x128xf32>
    %53 = arith.addf %47, %52 : vector<256x128xf32>
    %c0_52 = arith.constant 0 : index
    %c16_53 = arith.constant 16 : index
    %c0_54 = arith.constant 0 : index
    %54 = vector.load %arg9[%c0_52, %c16_53, %c0_54] : memref<16x34x128xbf16, #tpu.memory_space<vmem>>, vector<16x16x128xbf16>
    %55 = vector.shape_cast %54 : vector<16x16x128xbf16> to vector<256x128xbf16>
    %c2_55 = arith.constant 2 : index
    %c0_56 = arith.constant 0 : index
    %c0_57 = arith.constant 0 : index
    %56 = vector.load %arg4[%c2_55, %c0_56, %c0_57] : memref<5x128x128xbf16, #tpu.memory_space<vmem>>, vector<1x128x128xbf16>
    %57 = vector.shape_cast %56 : vector<1x128x128xbf16> to vector<128x128xbf16>
    %cst_58 = arith.constant dense<0.000000e+00> : vector<256x128xf32>
    %58 = tpu.matmul %55, %57, %cst_58 {dimension_numbers = #tpu.dot_dimension_numbers<[1], [0], [0], [1], [0, 0, 1, 1], [], []>} : vector<256x128xbf16>, vector<128x128xbf16>, vector<256x128xf32> -> vector<256x128xf32>
    %59 = arith.addf %53, %58 : vector<256x128xf32>
    %c0_59 = arith.constant 0 : index
    %c17 = arith.constant 17 : index
    %c0_60 = arith.constant 0 : index
    %60 = vector.load %arg9[%c0_59, %c17, %c0_60] : memref<16x34x128xbf16, #tpu.memory_space<vmem>>, vector<16x16x128xbf16>
    %61 = vector.shape_cast %60 : vector<16x16x128xbf16> to vector<256x128xbf16>
    %c3_61 = arith.constant 3 : index
    %c0_62 = arith.constant 0 : index
    %c0_63 = arith.constant 0 : index
    %62 = vector.load %arg4[%c3_61, %c0_62, %c0_63] : memref<5x128x128xbf16, #tpu.memory_space<vmem>>, vector<1x128x128xbf16>
    %63 = vector.shape_cast %62 : vector<1x128x128xbf16> to vector<128x128xbf16>
    %cst_64 = arith.constant dense<0.000000e+00> : vector<256x128xf32>
    %64 = tpu.matmul %61, %63, %cst_64 {dimension_numbers = #tpu.dot_dimension_numbers<[1], [0], [0], [1], [0, 0, 1, 1], [], []>} : vector<256x128xbf16>, vector<128x128xbf16>, vector<256x128xf32> -> vector<256x128xf32>
    %65 = arith.addf %59, %64 : vector<256x128xf32>
    %c0_65 = arith.constant 0 : index
    %c18 = arith.constant 18 : index
    %c0_66 = arith.constant 0 : index
    %66 = vector.load %arg9[%c0_65, %c18, %c0_66] : memref<16x34x128xbf16, #tpu.memory_space<vmem>>, vector<16x16x128xbf16>
    %67 = vector.shape_cast %66 : vector<16x16x128xbf16> to vector<256x128xbf16>
    %c4_67 = arith.constant 4 : index
    %c0_68 = arith.constant 0 : index
    %c0_69 = arith.constant 0 : index
    %68 = vector.load %arg4[%c4_67, %c0_68, %c0_69] : memref<5x128x128xbf16, #tpu.memory_space<vmem>>, vector<1x128x128xbf16>
    %69 = vector.shape_cast %68 : vector<1x128x128xbf16> to vector<128x128xbf16>
    %cst_70 = arith.constant dense<0.000000e+00> : vector<256x128xf32>
    %70 = tpu.matmul %67, %69, %cst_70 {dimension_numbers = #tpu.dot_dimension_numbers<[1], [0], [0], [1], [0, 0, 1, 1], [], []>} : vector<256x128xbf16>, vector<128x128xbf16>, vector<256x128xf32> -> vector<256x128xf32>
    %71 = arith.addf %65, %70 : vector<256x128xf32>
    %c0_71 = arith.constant 0 : index
    %c0_72 = arith.constant 0 : index
    %72 = vector.load %arg5[%c0_71, %c0_72] : memref<1x128xf32, #tpu.memory_space<vmem>>, vector<1x128xf32>
    %73 = vector.broadcast %72 : vector<1x128xf32> to vector<256x128xf32>
    %74 = arith.addf %71, %73 : vector<256x128xf32>
    %cst_73 = arith.constant 0.000000e+00 : f32
    %75 = vector.broadcast %cst_73 : f32 to vector<256x128xf32>
    %76 = arith.maximumf %74, %75 : vector<256x128xf32>
    %77 = arith.truncf %76 : vector<256x128xf32> to vector<256x128xbf16>
    %78 = vector.shape_cast %77 : vector<256x128xbf16> to vector<16x16x128xbf16>
    %c0_74 = arith.constant 0 : index
    %c16_75 = arith.constant 16 : index
    %c0_76 = arith.constant 0 : index
    %79 = vector.load %arg9[%c0_74, %c16_75, %c0_76] : memref<16x34x128xbf16, #tpu.memory_space<vmem>>, vector<16x16x128xbf16>
    tpu.vector_store %arg9[%c0_74, %c16_75, %c0_76], %78 {strides = array<i32>} : memref<16x34x128xbf16, #tpu.memory_space<vmem>>, vector<16x16x128xbf16>,
    %cst_77 = arith.constant 0.000000e+00 : f32
    %80 = vector.broadcast %cst_77 : f32 to vector<256x128xf32>
    %c0_78 = arith.constant 0 : index
    %c14_79 = arith.constant 14 : index
    %c0_80 = arith.constant 0 : index
    %81 = vector.load %arg9[%c0_78, %c14_79, %c0_80] : memref<16x34x128xbf16, #tpu.memory_space<vmem>>, vector<16x16x128xbf16>
    %82 = vector.shape_cast %81 : vector<16x16x128xbf16> to vector<256x128xbf16>
    %c0_81 = arith.constant 0 : index
    %c0_82 = arith.constant 0 : index
    %c0_83 = arith.constant 0 : index
    %83 = vector.load %arg6[%c0_81, %c0_82, %c0_83] : memref<5x128x128xbf16, #tpu.memory_space<vmem>>, vector<1x128x128xbf16>
    %84 = vector.shape_cast %83 : vector<1x128x128xbf16> to vector<128x128xbf16>
    %cst_84 = arith.constant dense<0.000000e+00> : vector<256x128xf32>
    %85 = tpu.matmul %82, %84, %cst_84 {dimension_numbers = #tpu.dot_dimension_numbers<[1], [0], [0], [1], [0, 0, 1, 1], [], []>} : vector<256x128xbf16>, vector<128x128xbf16>, vector<256x128xf32> -> vector<256x128xf32>
    %86 = arith.addf %80, %85 : vector<256x128xf32>
    %c0_85 = arith.constant 0 : index
    %c15_86 = arith.constant 15 : index
    %c0_87 = arith.constant 0 : index
    %87 = vector.load %arg9[%c0_85, %c15_86, %c0_87] : memref<16x34x128xbf16, #tpu.memory_space<vmem>>, vector<16x16x128xbf16>
    %88 = vector.shape_cast %87 : vector<16x16x128xbf16> to vector<256x128xbf16>
    %c1_88 = arith.constant 1 : index
    %c0_89 = arith.constant 0 : index
    %c0_90 = arith.constant 0 : index
    %89 = vector.load %arg6[%c1_88, %c0_89, %c0_90] : memref<5x128x128xbf16, #tpu.memory_space<vmem>>, vector<1x128x128xbf16>
    %90 = vector.shape_cast %89 : vector<1x128x128xbf16> to vector<128x128xbf16>
    %cst_91 = arith.constant dense<0.000000e+00> : vector<256x128xf32>
    %91 = tpu.matmul %88, %90, %cst_91 {dimension_numbers = #tpu.dot_dimension_numbers<[1], [0], [0], [1], [0, 0, 1, 1], [], []>} : vector<256x128xbf16>, vector<128x128xbf16>, vector<256x128xf32> -> vector<256x128xf32>
    %92 = arith.addf %86, %91 : vector<256x128xf32>
    %c0_92 = arith.constant 0 : index
    %c16_93 = arith.constant 16 : index
    %c0_94 = arith.constant 0 : index
    %93 = vector.load %arg9[%c0_92, %c16_93, %c0_94] : memref<16x34x128xbf16, #tpu.memory_space<vmem>>, vector<16x16x128xbf16>
    %94 = vector.shape_cast %93 : vector<16x16x128xbf16> to vector<256x128xbf16>
    %c2_95 = arith.constant 2 : index
    %c0_96 = arith.constant 0 : index
    %c0_97 = arith.constant 0 : index
    %95 = vector.load %arg6[%c2_95, %c0_96, %c0_97] : memref<5x128x128xbf16, #tpu.memory_space<vmem>>, vector<1x128x128xbf16>
    %96 = vector.shape_cast %95 : vector<1x128x128xbf16> to vector<128x128xbf16>
    %cst_98 = arith.constant dense<0.000000e+00> : vector<256x128xf32>
    %97 = tpu.matmul %94, %96, %cst_98 {dimension_numbers = #tpu.dot_dimension_numbers<[1], [0], [0], [1], [0, 0, 1, 1], [], []>} : vector<256x128xbf16>, vector<128x128xbf16>, vector<256x128xf32> -> vector<256x128xf32>
    %98 = arith.addf %92, %97 : vector<256x128xf32>
    %c0_99 = arith.constant 0 : index
    %c17_100 = arith.constant 17 : index
    %c0_101 = arith.constant 0 : index
    %99 = vector.load %arg9[%c0_99, %c17_100, %c0_101] : memref<16x34x128xbf16, #tpu.memory_space<vmem>>, vector<16x16x128xbf16>
    %100 = vector.shape_cast %99 : vector<16x16x128xbf16> to vector<256x128xbf16>
    %c3_102 = arith.constant 3 : index
    %c0_103 = arith.constant 0 : index
    %c0_104 = arith.constant 0 : index
    %101 = vector.load %arg6[%c3_102, %c0_103, %c0_104] : memref<5x128x128xbf16, #tpu.memory_space<vmem>>, vector<1x128x128xbf16>
    %102 = vector.shape_cast %101 : vector<1x128x128xbf16> to vector<128x128xbf16>
    %cst_105 = arith.constant dense<0.000000e+00> : vector<256x128xf32>
    %103 = tpu.matmul %100, %102, %cst_105 {dimension_numbers = #tpu.dot_dimension_numbers<[1], [0], [0], [1], [0, 0, 1, 1], [], []>} : vector<256x128xbf16>, vector<128x128xbf16>, vector<256x128xf32> -> vector<256x128xf32>
    %104 = arith.addf %98, %103 : vector<256x128xf32>
    %c0_106 = arith.constant 0 : index
    %c18_107 = arith.constant 18 : index
    %c0_108 = arith.constant 0 : index
    %105 = vector.load %arg9[%c0_106, %c18_107, %c0_108] : memref<16x34x128xbf16, #tpu.memory_space<vmem>>, vector<16x16x128xbf16>
    %106 = vector.shape_cast %105 : vector<16x16x128xbf16> to vector<256x128xbf16>
    %c4_109 = arith.constant 4 : index
    %c0_110 = arith.constant 0 : index
    %c0_111 = arith.constant 0 : index
    %107 = vector.load %arg6[%c4_109, %c0_110, %c0_111] : memref<5x128x128xbf16, #tpu.memory_space<vmem>>, vector<1x128x128xbf16>
    %108 = vector.shape_cast %107 : vector<1x128x128xbf16> to vector<128x128xbf16>
    %cst_112 = arith.constant dense<0.000000e+00> : vector<256x128xf32>
    %109 = tpu.matmul %106, %108, %cst_112 {dimension_numbers = #tpu.dot_dimension_numbers<[1], [0], [0], [1], [0, 0, 1, 1], [], []>} : vector<256x128xbf16>, vector<128x128xbf16>, vector<256x128xf32> -> vector<256x128xf32>
    %110 = arith.addf %104, %109 : vector<256x128xf32>
    %c0_113 = arith.constant 0 : index
    %c0_114 = arith.constant 0 : index
    %111 = vector.load %arg7[%c0_113, %c0_114] : memref<1x128xf32, #tpu.memory_space<vmem>>, vector<1x128xf32>
    %112 = vector.broadcast %111 : vector<1x128xf32> to vector<256x128xf32>
    %113 = arith.addf %110, %112 : vector<256x128xf32>
    %cst_115 = arith.constant 0.000000e+00 : f32
    %114 = vector.broadcast %cst_115 : f32 to vector<256x128xf32>
    %115 = arith.maximumf %113, %114 : vector<256x128xf32>
    %116 = vector.shape_cast %115 : vector<256x128xf32> to vector<16x16x128xf32>
    %c0_116 = arith.constant 0 : index
    %c0_117 = arith.constant 0 : index
    %c0_118 = arith.constant 0 : index
    %117 = vector.load %arg8[%c0_116, %c0_117, %c0_118] : memref<16x16x128xf32, #tpu.memory_space<vmem>>, vector<16x16x128xf32>
    tpu.vector_store %arg8[%c0_116, %c0_117, %c0_118], %116 {strides = array<i32>} : memref<16x16x128xf32, #tpu.memory_space<vmem>>, vector<16x16x128xf32>,
    return
  }
  func.func @transform_0(%arg0: i32) -> (i32, i32, i32) {
    %c0_i32 = arith.constant 0 : i32
    %c0_i32_0 = arith.constant 0 : i32
    %c0_i32_1 = arith.constant 0 : i32
    return %arg0, %c0_i32, %c0_i32_0 : i32, i32, i32
  }
  func.func @transform_1(%arg0: i32) -> (i32, i32, i32) {
    %c0_i32 = arith.constant 0 : i32
    %c0_i32_0 = arith.constant 0 : i32
    %c0_i32_1 = arith.constant 0 : i32
    %c0_i32_2 = arith.constant 0 : i32
    return %c0_i32, %c0_i32_0, %c0_i32_1 : i32, i32, i32
  }
  func.func @transform_2(%arg0: i32) -> (i32, i32) {
    %c0_i32 = arith.constant 0 : i32
    %c0_i32_0 = arith.constant 0 : i32
    %c0_i32_1 = arith.constant 0 : i32
    return %c0_i32, %c0_i32_0 : i32, i32
  }
  func.func @transform_3(%arg0: i32) -> (i32, i32, i32) {
    %c0_i32 = arith.constant 0 : i32
    %c0_i32_0 = arith.constant 0 : i32
    %c0_i32_1 = arith.constant 0 : i32
    %c0_i32_2 = arith.constant 0 : i32
    return %c0_i32, %c0_i32_0, %c0_i32_1 : i32, i32, i32
  }
  func.func @transform_4(%arg0: i32) -> (i32, i32) {
    %c0_i32 = arith.constant 0 : i32
    %c0_i32_0 = arith.constant 0 : i32
    %c0_i32_1 = arith.constant 0 : i32
    return %c0_i32, %c0_i32_0 : i32, i32
  }
  func.func @transform_5(%arg0: i32) -> (i32, i32, i32) {
    %c0_i32 = arith.constant 0 : i32
    %c0_i32_0 = arith.constant 0 : i32
    %c0_i32_1 = arith.constant 0 : i32
    %c0_i32_2 = arith.constant 0 : i32
    return %c0_i32, %c0_i32_0, %c0_i32_1 : i32, i32, i32
  }
  func.func @transform_6(%arg0: i32) -> (i32, i32) {
    %c0_i32 = arith.constant 0 : i32
    %c0_i32_0 = arith.constant 0 : i32
    %c0_i32_1 = arith.constant 0 : i32
    return %c0_i32, %c0_i32_0 : i32, i32
  }
  func.func @transform_7(%arg0: i32) -> (i32, i32, i32) {
    %c0_i32 = arith.constant 0 : i32
    %c0_i32_0 = arith.constant 0 : i32
    %c0_i32_1 = arith.constant 0 : i32
    return %arg0, %c0_i32, %c0_i32_0 : i32, i32, i32
  }
}

module attributes {stable_mosaic.version = 11 : i64} {
  func.func @_heads_kernel(%arg0: i32, %arg1: memref<16x1024xbf16, #tpu.memory_space<vmem>>, %arg2: memref<1024x768xbf16, #tpu.memory_space<vmem>>, %arg3: memref<1x768xf32, #tpu.memory_space<vmem>>, %arg4: memref<768x128xbf16, #tpu.memory_space<vmem>>, %arg5: memref<1x128xf32, #tpu.memory_space<vmem>>, %arg6: memref<1024x128xbf16, #tpu.memory_space<vmem>>, %arg7: memref<1x128xf32, #tpu.memory_space<vmem>>, %arg8: memref<128x128xbf16, #tpu.memory_space<vmem>>, %arg9: memref<1x128xf32, #tpu.memory_space<vmem>>, %arg10: memref<16x128xf32, #tpu.memory_space<vmem>>, %arg11: memref<16x128xf32, #tpu.memory_space<vmem>>) attributes {dimension_semantics = [#tpu.dimension_semantics<parallel>], iteration_bounds = array<i64: 1>, scalar_prefetch = 0 : i64, scratch_operands = 0 : i64, tpu.core_type = #tpu.core_type<tc>, window_params = [{transform_indices = @transform_0, window_bounds = array<i64: 16, 1024>}, {pipeline_mode = #tpu.pipeline_mode<synchronous>, transform_indices = @transform_1, window_bounds = array<i64: 1024, 768>}, {pipeline_mode = #tpu.pipeline_mode<synchronous>, transform_indices = @transform_2, window_bounds = array<i64: 1, 768>}, {pipeline_mode = #tpu.pipeline_mode<synchronous>, transform_indices = @transform_3, window_bounds = array<i64: 768, 128>}, {pipeline_mode = #tpu.pipeline_mode<synchronous>, transform_indices = @transform_4, window_bounds = array<i64: 1, 128>}, {pipeline_mode = #tpu.pipeline_mode<synchronous>, transform_indices = @transform_5, window_bounds = array<i64: 1024, 128>}, {pipeline_mode = #tpu.pipeline_mode<synchronous>, transform_indices = @transform_6, window_bounds = array<i64: 1, 128>}, {pipeline_mode = #tpu.pipeline_mode<synchronous>, transform_indices = @transform_7, window_bounds = array<i64: 128, 128>}, {pipeline_mode = #tpu.pipeline_mode<synchronous>, transform_indices = @transform_8, window_bounds = array<i64: 1, 128>}, {transform_indices = @transform_9, window_bounds = array<i64: 16, 128>}, {transform_indices = @transform_10, window_bounds = array<i64: 16, 128>}]} {
    %c0 = arith.constant 0 : index
    %c0_0 = arith.constant 0 : index
    %0 = vector.load %arg1[%c0, %c0_0] : memref<16x1024xbf16, #tpu.memory_space<vmem>>, vector<16x1024xbf16>
    %c0_1 = arith.constant 0 : index
    %c0_2 = arith.constant 0 : index
    %1 = vector.load %arg2[%c0_1, %c0_2] : memref<1024x768xbf16, #tpu.memory_space<vmem>>, vector<1024x768xbf16>
    %cst = arith.constant dense<0.000000e+00> : vector<16x768xf32>
    %2 = tpu.matmul %0, %1, %cst {dimension_numbers = #tpu.dot_dimension_numbers<[1], [0], [0], [1], [0, 0, 1, 1], [], []>} : vector<16x1024xbf16>, vector<1024x768xbf16>, vector<16x768xf32> -> vector<16x768xf32>
    %c0_3 = arith.constant 0 : index
    %c0_4 = arith.constant 0 : index
    %3 = vector.load %arg3[%c0_3, %c0_4] : memref<1x768xf32, #tpu.memory_space<vmem>>, vector<1x768xf32>
    %4 = vector.broadcast %3 : vector<1x768xf32> to vector<16x768xf32>
    %5 = arith.addf %2, %4 : vector<16x768xf32>
    %cst_5 = arith.constant 0.000000e+00 : f32
    %6 = vector.broadcast %cst_5 : f32 to vector<16x768xf32>
    %7 = arith.maximumf %5, %6 : vector<16x768xf32>
    %8 = arith.truncf %7 : vector<16x768xf32> to vector<16x768xbf16>
    %c0_6 = arith.constant 0 : index
    %c0_7 = arith.constant 0 : index
    %9 = vector.load %arg4[%c0_6, %c0_7] : memref<768x128xbf16, #tpu.memory_space<vmem>>, vector<768x128xbf16>
    %cst_8 = arith.constant dense<0.000000e+00> : vector<16x128xf32>
    %10 = tpu.matmul %8, %9, %cst_8 {dimension_numbers = #tpu.dot_dimension_numbers<[1], [0], [0], [1], [0, 0, 1, 1], [], []>} : vector<16x768xbf16>, vector<768x128xbf16>, vector<16x128xf32> -> vector<16x128xf32>
    %c0_9 = arith.constant 0 : index
    %c0_10 = arith.constant 0 : index
    %11 = vector.load %arg5[%c0_9, %c0_10] : memref<1x128xf32, #tpu.memory_space<vmem>>, vector<1x128xf32>
    %12 = vector.broadcast %11 : vector<1x128xf32> to vector<16x128xf32>
    %13 = arith.addf %10, %12 : vector<16x128xf32>
    %c0_11 = arith.constant 0 : index
    %c0_12 = arith.constant 0 : index
    %14 = vector.load %arg10[%c0_11, %c0_12] : memref<16x128xf32, #tpu.memory_space<vmem>>, vector<16x128xf32>
    tpu.vector_store %arg10[%c0_11, %c0_12], %13 {strides = array<i32>} : memref<16x128xf32, #tpu.memory_space<vmem>>, vector<16x128xf32>,
    %c0_13 = arith.constant 0 : index
    %c0_14 = arith.constant 0 : index
    %15 = vector.load %arg6[%c0_13, %c0_14] : memref<1024x128xbf16, #tpu.memory_space<vmem>>, vector<1024x128xbf16>
    %cst_15 = arith.constant dense<0.000000e+00> : vector<16x128xf32>
    %16 = tpu.matmul %0, %15, %cst_15 {dimension_numbers = #tpu.dot_dimension_numbers<[1], [0], [0], [1], [0, 0, 1, 1], [], []>} : vector<16x1024xbf16>, vector<1024x128xbf16>, vector<16x128xf32> -> vector<16x128xf32>
    %c0_16 = arith.constant 0 : index
    %c0_17 = arith.constant 0 : index
    %17 = vector.load %arg7[%c0_16, %c0_17] : memref<1x128xf32, #tpu.memory_space<vmem>>, vector<1x128xf32>
    %18 = vector.broadcast %17 : vector<1x128xf32> to vector<16x128xf32>
    %19 = arith.addf %16, %18 : vector<16x128xf32>
    %20 = arith.truncf %19 : vector<16x128xf32> to vector<16x128xbf16>
    %c0_18 = arith.constant 0 : index
    %c0_19 = arith.constant 0 : index
    %21 = vector.load %arg8[%c0_18, %c0_19] : memref<128x128xbf16, #tpu.memory_space<vmem>>, vector<128x128xbf16>
    %cst_20 = arith.constant dense<0.000000e+00> : vector<16x128xf32>
    %22 = tpu.matmul %20, %21, %cst_20 {dimension_numbers = #tpu.dot_dimension_numbers<[1], [0], [0], [1], [0, 0, 1, 1], [], []>} : vector<16x128xbf16>, vector<128x128xbf16>, vector<16x128xf32> -> vector<16x128xf32>
    %c0_21 = arith.constant 0 : index
    %c0_22 = arith.constant 0 : index
    %23 = vector.load %arg9[%c0_21, %c0_22] : memref<1x128xf32, #tpu.memory_space<vmem>>, vector<1x128xf32>
    %24 = vector.broadcast %23 : vector<1x128xf32> to vector<16x128xf32>
    %25 = arith.addf %22, %24 : vector<16x128xf32>
    %c0_23 = arith.constant 0 : index
    %c0_24 = arith.constant 0 : index
    %26 = vector.load %arg11[%c0_23, %c0_24] : memref<16x128xf32, #tpu.memory_space<vmem>>, vector<16x128xf32>
    tpu.vector_store %arg11[%c0_23, %c0_24], %25 {strides = array<i32>} : memref<16x128xf32, #tpu.memory_space<vmem>>, vector<16x128xf32>,
    return
  }
  func.func @transform_0(%arg0: i32) -> (i32, i32) {
    %c0_i32 = arith.constant 0 : i32
    %c0_i32_0 = arith.constant 0 : i32
    return %arg0, %c0_i32 : i32, i32
  }
  func.func @transform_1(%arg0: i32) -> (i32, i32) {
    %c0_i32 = arith.constant 0 : i32
    %c0_i32_0 = arith.constant 0 : i32
    %c0_i32_1 = arith.constant 0 : i32
    return %c0_i32, %c0_i32_0 : i32, i32
  }
  func.func @transform_2(%arg0: i32) -> (i32, i32) {
    %c0_i32 = arith.constant 0 : i32
    %c0_i32_0 = arith.constant 0 : i32
    %c0_i32_1 = arith.constant 0 : i32
    return %c0_i32, %c0_i32_0 : i32, i32
  }
  func.func @transform_3(%arg0: i32) -> (i32, i32) {
    %c0_i32 = arith.constant 0 : i32
    %c0_i32_0 = arith.constant 0 : i32
    %c0_i32_1 = arith.constant 0 : i32
    return %c0_i32, %c0_i32_0 : i32, i32
  }
  func.func @transform_4(%arg0: i32) -> (i32, i32) {
    %c0_i32 = arith.constant 0 : i32
    %c0_i32_0 = arith.constant 0 : i32
    %c0_i32_1 = arith.constant 0 : i32
    return %c0_i32, %c0_i32_0 : i32, i32
  }
  func.func @transform_5(%arg0: i32) -> (i32, i32) {
    %c0_i32 = arith.constant 0 : i32
    %c0_i32_0 = arith.constant 0 : i32
    %c0_i32_1 = arith.constant 0 : i32
    return %c0_i32, %c0_i32_0 : i32, i32
  }
  func.func @transform_6(%arg0: i32) -> (i32, i32) {
    %c0_i32 = arith.constant 0 : i32
    %c0_i32_0 = arith.constant 0 : i32
    %c0_i32_1 = arith.constant 0 : i32
    return %c0_i32, %c0_i32_0 : i32, i32
  }
  func.func @transform_7(%arg0: i32) -> (i32, i32) {
    %c0_i32 = arith.constant 0 : i32
    %c0_i32_0 = arith.constant 0 : i32
    %c0_i32_1 = arith.constant 0 : i32
    return %c0_i32, %c0_i32_0 : i32, i32
  }
  func.func @transform_8(%arg0: i32) -> (i32, i32) {
    %c0_i32 = arith.constant 0 : i32
    %c0_i32_0 = arith.constant 0 : i32
    %c0_i32_1 = arith.constant 0 : i32
    return %c0_i32, %c0_i32_0 : i32, i32
  }
  func.func @transform_9(%arg0: i32) -> (i32, i32) {
    %c0_i32 = arith.constant 0 : i32
    %c0_i32_0 = arith.constant 0 : i32
    return %arg0, %c0_i32 : i32, i32
  }
  func.func @transform_10(%arg0: i32) -> (i32, i32) {
    %c0_i32 = arith.constant 0 : i32
    %c0_i32_0 = arith.constant 0 : i32
    return %arg0, %c0_i32 : i32, i32
  }
}

</mosaic_0001>

<bundles_post_ra>
// kernel: tempcnn_forward.2
= control target key start
LH: loop header
LB: loop body
LE: loop exit
PB: predicated region body
PF: predicated region fallthrough
CT: control target
= control target key end

     0   :  { %vm171_vm0 = vsmask.f32 3328  ;;  %vm172_vm1 = vsmask.f32 7440  ;;  %v15844_v31 = vmov 0  ;;  %vm1201_vm3 = vcmask 1042432   ;;  %s15731_s1 = inlined_call_operand.vmem [shape: bf16[5,128,128], index: 1, kind: input, shape index: {}]   ;;  %s15732_s0 = inlined_call_operand.vmem [shape: bf16[16,20,128], index: 0, kind: input, shape index: {}]   ;;  %s15733_s3 = inlined_call_operand.vmem [shape: bf16[5,128,128], index: 3, kind: input, shape index: {}]   ;;  %s15734_s2 = inlined_call_operand.vmem [shape: f32[1,128], index: 2, kind: input, shape index: {}]   ;;  %s15735_s5 = inlined_call_operand.vmem [shape: bf16[5,128,128], index: 5, kind: input, shape index: {}]   ;;  %s15736_s4 = inlined_call_operand.vmem [shape: f32[1,128], index: 4, kind: input, shape index: {}]   ;;  %s15737_s6 = inlined_call_operand.vmem [shape: f32[1,128], index: 6, kind: input, shape index: {}]   ;;  %s15738_s7 = inlined_call_operand.vmem [shape: f32[16,16,128], index: 7, kind: output, shape index: {}]  }
   0x1   :  { %v10901_v0 = vld [vmem:[%s15731_s1 + $0x78] sm:$0xff]   ;;  %v10902_v1 = vld [vmem:[%s15731_s1 + $0x70] sm:$0xff]   ;;  %v10903_v2 = vld [vmem:[%s15731_s1 + $0x68] sm:$0xff]   ;;  %vm1202_vm4 = vcmask 1046532   ;;  %vm1654_vm6 = vsmask.f32 2304 }
   0x2   :  { %10164 = vmatprep.subr.bf16.mxu0 %v10901_v0  ;;  %10884 = vmatprep.subr.bf16.mxu1 %v10901_v0  ;;  %v10904_v3 = vld [vmem:[%s15731_s1 + $0x60] sm:$0xff]   ;;  %v11177_v6 = vld [vmem:[%s15732_s0 + $0x8] sm:$0x1]  ;;  %v10905_v21 = vld [vmem:[%s15731_s1 + $0x58] sm:$0xff]   ;;  %vm1655_vm7 = vsmask.f32 6416 }
   0x3   :  { %10165 = vmatpush3.bf16.msra.mxu0 %v10901_v0  ;;  %10892 = vmatpush3.bf16.msra.mxu1 %v10901_v0  ;;  %v11167_v4 = vld [vmem:[%s15732_s0] sm:$0xf]  ;;  %v11172_v5 = vld [vmem:[%s15732_s0 + $0x4] sm:$0xf]  ;;  %v194_v12 = vshll.u32 %v11177_v6, 16  ;;  %vm11216_vm2 = vmor %vm171_vm0, %vm172_vm1  ;;  %vm2395_vm9 = vcmask 1041408  }
   0x4   :  { %10166 = vmatprep.subr.bf16.mxu0 %v10902_v1  ;;  %10885 = vmatprep.subr.bf16.mxu1 %v10902_v1  ;;  %v175_v7 = vshrl.u32 %v11167_v4, 16  ;;  %v178_v8 = vshll.u32 %v11167_v4, 16  ;;  %v184_v9 = vshll.u32 %v11172_v5, 16  ;;  %v15757_v10 = vshrl.u32 %v11172_v5, 16  ;;  %v123_v11 = vld [vmem:[%s15732_s0 + $0x60] sm:$0xf]  ;;  %vm11686_vm5 = vmor %vm1201_vm3, %vm1202_vm4 }
   0x5   :  { %v11191_v14 = vld [vmem:[%s15732_s0 + $0x64] sm:$0xf]  ;;  %v11200_v20 = vld [vmem:[%s15732_s0 + $0x68] sm:$0x1]  ;;  %v196_v22 = vrot.slane %v194_v12, 5  ;;  %v367_v24 = vshrl.u32 %v123_v11, 16  ;;  %vm12098_vm8 = vmor %vm1654_vm6, %vm1655_vm7 }
   0x6   :  { %15842 = vst [vmem:[#allocation3_spill] sm:$0xff] %v11191_v14  ;;  %v177_v16 = vrot.slane %v175_v7, 4  ;;  %v180_v17 = vrot.slane %v178_v8, 5  ;;  %v186_v18 = vrot.slane %v184_v9, 5  ;;  %v190_v19 = vrot.slane %v15757_v10, 4  ;;  %v10906_v42 = vld [vmem:[%s15731_s1 + $0x50] sm:$0xff]  }
   0x7   :  { %10167 = vmatpush3.bf16.msra.mxu0 %v10902_v1  ;;  %10893 = vmatpush3.bf16.msra.mxu1 %v10902_v1  ;;  %v11205_v23 = vrot.slane %v184_v9, 6  ;;  %v370_v25 = vshll.u32 %v123_v11, 16  ;;  %v376_v28 = vshll.u32 %v11191_v14, 16  ;;  %v15745_v29 = vshrl.u32 %v11191_v14, 16  ;;  %v11212_v30 = vld [vmem:[%s15732_s0 + $0xc] sm:$0xf] }
   0x8   :  { %10168 = vmatprep.subr.bf16.mxu0 %v10903_v2  ;;  %10886 = vmatprep.subr.bf16.mxu1 %v10903_v2  ;;  %v181_v26 = vor.u32 %v180_v17, %v177_v16  ;;  %v191_v27 = vor.u32 %v190_v19, %v186_v18  ;;  %v15845_v31 = vsel %vm11216_vm2, 4294967295, %v15844_v31  ;;  %v369_v32 = vrot.slane %v367_v24, 4  ;;  %v11225_v36 = vld [vmem:[%s15732_s0 + $0x10] sm:$0xf]  ;;  %v11232_v41 = vld [vmem:[%s15732_s0 + $0x14] sm:$0x1] }
   0x9   :  { %15843 = vst [vmem:[#allocation4_spill] sm:$0xff] %v11205_v23  ;;  %15846 = vst [vmem:[#allocation5_spill] sm:$0xff] %v15845_v31  ;;  %v372_v33 = vrot.slane %v370_v25, 5  ;;  %v386_v34 = vshll.u32 %v11200_v20, 16  ;;  %v378_v39 = vrot.slane %v376_v28, 5  ;;  %v382_v40 = vrot.slane %v15745_v29, 4 }
   0xa   :  { %v182_v37 = vrot.slane %v181_v26, 4  ;;  %v192_v38 = vrot.slane %v191_v27, 4  ;;  %v11237_v45 = vrot.slane %v376_v28, 6  ;;  %v199_v46 = vshrl.u32 %v11212_v30, 16  ;;  %v125_v51 = vld [vmem:[%s15732_s0 + $0x6c] sm:$0xf] }
   0xb   :  { %10169 = vmatpush3.bf16.msra.mxu0 %v10903_v2  ;;  %10894 = vmatpush3.bf16.msra.mxu1 %v10903_v2  ;;  %v373_v43 = vor.u32 %v372_v33, %v369_v32  ;;  %v388_v44 = vrot.slane %v386_v34, 5  ;;  %v383_v49 = vor.u32 %v382_v40, %v378_v39  ;;  %v202_v50 = vshll.u32 %v11212_v30, 16  ;;  %v11252_v56 = vld [vmem:[%s15732_s0 + $0x70] sm:$0xf]  ;;  %v164_v61 = vld [vmem:[%s15732_s0 + $0x74] sm:$0x1] }
   0xc   :  { %10170 = vmatprep.subr.bf16.mxu0 %v10904_v3  ;;  %10887 = vmatprep.subr.bf16.mxu1 %v10904_v3  ;;  %15847 = vst [vmem:[#allocation6_spill] sm:$0xff] %v11237_v45  ;;  %v187_v47 = vsel %vm11216_vm2, %v182_v37, %v186_v18  ;;  %v197_v48 = vsel %vm11216_vm2, %v192_v38, %v196_v22  ;;  %v201_v54 = vrot.slane %v199_v46, 4  ;;  %v208_v55 = vshll.u32 %v11225_v36, 16  ;;  %v10907_v62 = vld [vmem:[%s15731_s1 + $0x48] sm:$0xff]   ;;  %v11272_v24 = vld [vmem:[%s15732_s0 + $0x18] sm:$0xf] }
   0xd   :  { %v8913_v52 = vcombine.low %v187_v47, %v197_v48  ;;  %v374_v53 = vrot.slane %v373_v43, 4  ;;  %v384_v57 = vrot.slane %v383_v49, 4  ;;  %v204_v58 = vrot.slane %v202_v50, 5  ;;  %v10908_v25 = vld [vmem:[%s15731_s1 + $0x40] sm:$0xff]   ;;  %v11282_v33 = vld [vmem:[%s15732_s0 + $0x1c] sm:$0xf] }
   0xe   :  { %v212_v59 = vshrl.u32 %v11225_v36, 16  ;;  %v218_v60 = vshll.u32 %v11232_v41, 16  ;;  %v210_v0 = vrot.slane %v208_v55, 5  ;;  %v1690_v2 = vrot.slane %v208_v55, 6  ;;  %v11293_v43 = vld [vmem:[%s15732_s0 + $0x20] sm:$0x1] }
   0xf   :  { %10171 = vmatpush3.bf16.msra.mxu0 %v10904_v3  ;;  %10895 = vmatpush3.bf16.msra.mxu1 %v10904_v3  ;;  %v379_v63 = vsel %vm11216_vm2, %v374_v53, %v378_v39  ;;  %v389_v3 = vsel %vm11216_vm2, %v384_v57, %v388_v44  ;;  %v205_v7 = vor.u32 %v204_v58, %v201_v54  ;;  %v391_v16 = vshrl.u32 %v125_v51, 16  ;;  %v10909_v49 = vld [vmem:[%s15731_s1 + $0x38] sm:$0xff]  }
  0x10   :  { %10172 = vmatprep.subr.bf16.mxu0 %v10905_v21  ;;  %10888 = vmatprep.subr.bf16.mxu1 %v10905_v21  ;;  %v214_v8 = vrot.slane %v212_v59, 4  ;;  %v220_v9 = vrot.slane %v218_v60, 5  ;;  %v8921_v11 = vcombine.low %v379_v63, %v389_v3  ;;  %v1689_v12 = vrot.slane %v212_v59, 5  ;;  %v10910_v55 = vld [vmem:[%s15731_s1 + $0xb8] sm:$0xff]  }
  0x11   :  { %10180 = vmatprep.mubr.bf16.mxu0 %v8913_v52  ;;  %v394_v17 = vshll.u32 %v125_v51, 16  ;;  %v206_v18 = vrot.slane %v205_v7, 4  ;;  %v15744_v22 = vshrl.u32 %v11252_v56, 16  ;;  %v393_v27 = vrot.slane %v391_v16, 4  ;;  %v11307_v52 = vld [vmem:[%s15732_s0 + $0x78] sm:$0xf] }
  0x12   :  { %v215_v19 = vor.u32 %v214_v8, %v210_v0  ;;  %v11277_v26 = vor.u32 %v1690_v2, %v1689_v12  ;;  %v410_v32 = vshll.u32 %v164_v61, 16  ;;  %10196 = vmatprep.mubr.bf16.mxu1 %v8921_v11  ;;  %v223_v44 = vshrl.u32 %v11272_v24, 16  ;;  %v11315_v59 = vld [vmem:[%s15732_s0 + $0x7c] sm:$0xf]  ;;  %v10911_v2 = vld [vmem:[%s15731_s1 + $0x30] sm:$0xff]  }
  0x13   :  { %10173 = vmatpush3.bf16.msra.mxu0 %v10905_v21  ;;  %10896 = vmatpush3.bf16.msra.mxu1 %v10905_v21  ;;  %v15743_v21 = vshll.u32 %v11252_v56, 16  ;;  %v396_v28 = vrot.slane %v394_v17, 5  ;;  %v211_v34 = vsel %vm11216_vm2, %v206_v18, %v210_v0  ;;  %v406_v39 = vrot.slane %v15744_v22, 4  ;;  %v11330_v7 = vld [vmem:[%s15732_s0 + $0x80] sm:$0x1] }
  0x14   :  { %10174 = vmatprep.subr.bf16.mxu0 %v10906_v42  ;;  %10889 = vmatprep.subr.bf16.mxu1 %v10906_v42  ;;  %15848 = vst [vmem:[#allocation7_spill] sm:$0xff] %v11277_v26  ;;  %v216_v37 = vrot.slane %v215_v19, 4  ;;  %v226_v46 = vshll.u32 %v11272_v24, 16  ;;  %v15752_v50 = vshll.u32 %v11282_v33, 16  ;;  %v15753_v51 = vshrl.u32 %v11282_v33, 16 }
  0x15   :  { %v402_v38 = vrot.slane %v15743_v21, 5  ;;  %v397_v40 = vor.u32 %v396_v28, %v393_v27  ;;  %v225_v57 = vrot.slane %v223_v44, 4  ;;  %v242_v63 = vshll.u32 %v11293_v43, 16  ;;  %v11337_v11 = vld [vmem:[%s15732_s0 + $0x24] sm:$0xf]  ;;  %v10912_v28 = vld [vmem:[%s15731_s1 + $0xb0] sm:$0xff]  }
  0x16   :  { %v221_v47 = vsel %vm11216_vm2, %v216_v37, %v220_v9  ;;  %v228_v58 = vrot.slane %v226_v46, 5  ;;  %v234_v61 = vrot.slane %v15752_v50, 5  ;;  %v415_v8 = vshrl.u32 %v11307_v52, 16  ;;  %v11345_v19 = vld [vmem:[%s15732_s0 + $0x28] sm:$0xf] }
  0x17   :  { %10175 = vmatpush3.bf16.msra.mxu0 %v10906_v42  ;;  %10897 = vmatpush3.bf16.msra.mxu1 %v10906_v42  ;;  %v412_v42 = vrot.slane %v410_v32, 5  ;;  %v407_v48 = vor.u32 %v406_v39, %v402_v38  ;;  %v8914_v53 = vcombine.low %v211_v34, %v221_v47  ;;  %v398_v54 = vrot.slane %v397_v40, 4  ;;  %v11353_v37 = vld [vmem:[%s15732_s0 + $0x2c] sm:$0x1]  ;;  %v11362_v44 = vld [vmem:[%s15732_s0 + $0x84] sm:$0xf] }
  0x18   :  { %10176 = vmatprep.subr.bf16.mxu0 %v10907_v62  ;;  %10890 = vmatprep.subr.bf16.mxu1 %v10907_v62  ;;  %v229_v3 = vor.u32 %v228_v58, %v225_v57  ;;  %v418_v9 = vshll.u32 %v11307_v52, 16  ;;  %v244_v17 = vrot.slane %v242_v63, 5  ;;  %v15741_v18 = vshll.u32 %v11315_v59, 16  ;;  %v11371_v57 = vld [vmem:[%s15732_s0 + $0x88] sm:$0xf] }
  0x19   :  { %v408_v60 = vrot.slane %v407_v48, 4  ;;  %v403_v0 = vsel %vm11216_vm2, %v398_v54, %v402_v38  ;;  %v417_v32 = vrot.slane %v415_v8, 4  ;;  %v15742_v40 = vshrl.u32 %v11315_v59, 16 }
  0x1a   :  { %v420_v34 = vrot.slane %v418_v9, 5  ;;  %v426_v39 = vrot.slane %v15741_v18, 5  ;;  %v247_v48 = vshrl.u32 %v11337_v11, 16  ;;  %v250_v54 = vshll.u32 %v11337_v11, 16 }
  0x1b   :  { %10177 = vmatpush3.bf16.msra.mxu0 %v10907_v62  ;;  %10898 = vmatpush3.bf16.msra.mxu1 %v10907_v62  ;;  %v238_v62 = vrot.slane %v15753_v51, 4  ;;  %v413_v12 = vsel %vm11216_vm2, %v408_v60, %v412_v42  ;;  %v434_v42 = vshll.u32 %v11330_v7, 16  ;;  %v10924_v51 = vld [vmem:[%s15731_s1 + $0x80] sm:$0xff]   ;;  %vm2396_vm10 = vcmask 1045508  }
  0x1c   :  { %10178 = vmatprep.subr.bf16.mxu0 %v10908_v25  ;;  %10891 = vmatprep.subr.bf16.mxu1 %v10908_v25  ;;  %v8922_v27 = vcombine.low %v403_v0, %v413_v12  ;;  %v421_v47 = vor.u32 %v420_v34, %v417_v32  ;;  %v15751_v12 = vshrl.u32 %v11345_v19, 16  ;;  %v439_v32 = vshrl.u32 %v11362_v44, 16  ;;  %vm12105_vm11 = vmor %vm2395_vm9, %vm2396_vm10 }
  0x1d   :  { %v239_v16 = vor.u32 %v238_v62, %v234_v61  ;;  %v436_v60 = vrot.slane %v434_v42, 5  ;;  %v10913_v62 = vld [vmem:[%s15731_s1 + $0x28] sm:$0xff]   ;;  %v442_v34 = vshll.u32 %v11362_v44, 16  ;;  %vm3159_vm12 = vcmask 1040384  }
  0x1e   :  { %v422_v0 = vrot.slane %v421_v47, 4  ;;  %v262_v42 = vrot.slane %v15751_v12, 4  ;;  %v15739_v47 = vshll.u32 %v11371_v57, 16  ;;  %vm3160_vm13 = vcmask 1044484  }
  0x1f   :  { %10179 = vmatpush3.bf16.msra.mxu0 %v10908_v25  ;;  %10899 = vmatpush3.bf16.msra.mxu1 %v10908_v25  ;;  %v230_v25 = vrot.slane %v229_v3, 4  ;;  %v240_v38 = vrot.slane %v239_v16, 4  ;;  %v249_v3 = vrot.slane %v247_v48, 4  ;;  %v266_v16 = vshll.u32 %v11353_v37, 16  ;;  %vm13147_vm14 = vmor %vm3159_vm12, %vm3160_vm13 }
  0x20   :  { %10212 = vmatprep.subr.bf16.mxu1 %v10909_v49  ;;  %10260 = vmatprep.subr.bf16.mxu0 %v10910_v55  ;;  %vm3306_vm15 = vsmask.f32 256  ;;  %vm3307_vm0 = vsmask.f32 4368 }
  0x21   :  { %v235_v46 = vsel %vm11216_vm2, %v230_v25, %v234_v61  ;;  %v245_v58 = vsel %vm11216_vm2, %v240_v38, %v244_v17  ;;  %v15748_v61 = vshll.u32 %v11345_v19, 16  ;;  %v427_v17 = vsel %vm11216_vm2, %v422_v0, %v426_v39  ;;  %v11393_v25 = vld [vmem:[%s15732_s0 + $0x8c] sm:$0x1]  ;;  %vm13189_vm1 = vmor %vm3306_vm15, %vm3307_vm0 }
  0x22   :  { %10181 = vmatmul.mubr.bf16.vlgmr.msra.gmra.mxu0 %v8914_v53  ;;  %10197 = vmatmul.mubr.bf16.vlgmr.msra.gmra.mxu1 %v8922_v27  ;;  %v430_v53 = vrot.slane %v15742_v40, 4  ;;  %v8915_v63 = vcombine.low %v235_v46, %v245_v58  ;;  %v268_v46 = vrot.slane %v266_v16, 5  ;;  %v444_v58 = vrot.slane %v442_v34, 5  ;;  %v11429_v34 = vld [vmem:[%s15732_s0 + $0x38] sm:$0x1] }
  0x23   :  { %10213 = vmatpush3.bf16.msra.mxu1 %v10909_v49  ;;  %10261 = vmatpush3.bf16.msra.mxu0 %v10910_v55  ;;  %v252_v49 = vrot.slane %v250_v54, 5  ;;  %v10914_v55 = vld [vmem:[%s15731_s1 + $0xa8] sm:$0xff]   ;;  %v258_v9 = vrot.slane %v15748_v61, 5  ;;  %v441_v54 = vrot.slane %v439_v32, 4  ;;  %v450_v0 = vrot.slane %v15739_v47, 5 }
  0x24   :  { %10214 = vmatprep.subr.bf16.mxu1 %v10911_v2  ;;  %10262 = vmatprep.subr.bf16.mxu0 %v10912_v28  ;;  %v431_v8 = vor.u32 %v430_v53, %v426_v39  ;;  %v10915_v39 = vld [vmem:[%s15731_s1 + $0x20] sm:$0xff]   ;;  %v15740_v53 = vshrl.u32 %v11371_v57, 16 }
  0x25   :  { %10184 = vmatprep.mubr.bf16.mxu0 %v8915_v63  ;;  %v253_v27 = vor.u32 %v252_v49, %v249_v3  ;;  %v263_v63 = vor.u32 %v262_v42, %v258_v9  ;;  %v458_v3 = vshll.u32 %v11393_v25, 16  ;;  %v10916_v49 = vld [vmem:[%s15731_s1 + $0xa0] sm:$0xff]  }
  0x26   :  { %v432_v38 = vrot.slane %v431_v8, 4  ;;  %v11420_v8 = vld [vmem:[%s15732_s0 + $0x34] sm:$0xf]  ;;  %v454_v32 = vrot.slane %v15740_v53, 4  ;;  %v10918_v53 = vld [vmem:[%s15731_s1 + $0x98] sm:$0xff]  }
  0x27   :  { %10215 = vmatpush3.bf16.msra.mxu1 %v10911_v2  ;;  %10263 = vmatpush3.bf16.msra.mxu0 %v10912_v28  ;;  %v254_v48 = vrot.slane %v253_v27, 4  ;;  %v11407_v2 = vld [vmem:[%s15732_s0 + $0x30] sm:$0xf]  ;;  %v460_v42 = vrot.slane %v458_v3, 5  ;;  %v11495_v61 = vld [vmem:[%s15732_s0 + $0x44] sm:$0x1] }
  0x28   :  { %10216 = vmatprep.subr.bf16.mxu1 %v10913_v62  ;;  %10264 = vmatprep.subr.bf16.mxu0 %v10914_v55  ;;  %v437_v28 = vsel %vm11216_vm2, %v432_v38, %v436_v60  ;;  %v445_v60 = vor.u32 %v444_v58, %v441_v54  ;;  %v264_v38 = vrot.slane %v263_v63, 4  ;;  %v271_v47 = vshrl.u32 %v11407_v2, 16 }
  0x29   :  { %v8923_v16 = vcombine.low %v427_v17, %v437_v28  ;;  %v259_v27 = vsel %vm11216_vm2, %v254_v48, %v258_v9  ;;  %v274_v17 = vshll.u32 %v11407_v2, 16  ;;  %v11436_v9 = vld [vmem:[%s15732_s0 + $0x90] sm:$0xf]  ;;  %v455_v54 = vor.u32 %v454_v32, %v450_v0  ;;  %v11454_v32 = vld [vmem:[%s15732_s0 + $0x98] sm:$0x1] }
  0x2a   :  { %v446_v48 = vrot.slane %v445_v60, 4  ;;  %v15746_v58 = vshll.u32 %v11420_v8, 16  ;;  %v15747_v28 = vshrl.u32 %v11420_v8, 16  ;;  %v269_v63 = vsel %vm11216_vm2, %v264_v38, %v268_v46 }
  0x2b   :  { %10217 = vmatpush3.bf16.msra.mxu1 %v10913_v62  ;;  %10265 = vmatpush3.bf16.msra.mxu0 %v10914_v55  ;;  %v11443_v62 = vld [vmem:[%s15732_s0 + $0x94] sm:$0xf]  ;;  %v10917_v55 = vld [vmem:[%s15731_s1 + $0x18] sm:$0xff]   ;;  %v273_v3 = vrot.slane %v271_v47, 4  ;;  %v290_v60 = vshll.u32 %v11429_v34, 16  ;;  %v8916_v18 = vcombine.low %v259_v27, %v269_v63  ;;  %v456_v21 = vrot.slane %v455_v54, 4 }
  0x2c   :  { %10200 = vmatprep.mubr.bf16.mxu1 %v8923_v16  ;;  %10218 = vmatprep.subr.bf16.mxu1 %v10915_v39  ;;  %v276_v16 = vrot.slane %v274_v17, 5  ;;  %v451_v40 = vsel %vm11216_vm2, %v446_v48, %v450_v0  ;;  %v282_v46 = vrot.slane %v15746_v58, 5  ;;  %v11466_v47 = vld [vmem:[%s15732_s0 + $0x3c] sm:$0xf]  ;;  %v286_v17 = vrot.slane %v15747_v28, 4  ;;  %v10919_v48 = vld [vmem:[%s15731_s1 + $0x10] sm:$0xff]  }
  0x2d   :  { %10266 = vmatprep.subr.bf16.mxu0 %v10916_v49  ;;  %v292_v22 = vrot.slane %v290_v60, 5  ;;  %v463_v27 = vshrl.u32 %v11436_v9, 16  ;;  %v11474_v0 = vld [vmem:[%s15732_s0 + $0x40] sm:$0xf]  ;;  %10185 = vmatmul.mubr.bf16.gmra.mxu0 %v8916_v18  ;;  %v15749_v54 = vshll.u32 %v11443_v62, 16  ;;  %v15750_v63 = vshrl.u32 %v11443_v62, 16 }
  0x2e   :  { %v277_v38 = vor.u32 %v276_v16, %v273_v3  ;;  %v10920_v3 = vld [vmem:[%s15731_s1 + $0x90] sm:$0xff]   ;;  %v287_v29 = vor.u32 %v286_v17, %v282_v46  ;;  %v482_v28 = vshll.u32 %v11454_v32, 16  ;;  %v295_v17 = vshrl.u32 %v11466_v47, 16 }
  0x2f   :  { %10219 = vmatpush3.bf16.msra.mxu1 %v10915_v39  ;;  %10267 = vmatpush3.bf16.msra.mxu0 %v10916_v49  ;;  %v461_v39 = vsel %vm11216_vm2, %v456_v21, %v460_v42  ;;  %v466_v49 = vshll.u32 %v11436_v9, 16  ;;  %v465_v58 = vrot.slane %v463_v27, 4  ;;  %v474_v21 = vrot.slane %v15749_v54, 5 }
  0x30   :  { %10220 = vmatprep.subr.bf16.mxu1 %v10917_v55  ;;  %v8924_v16 = vcombine.low %v451_v40, %v461_v39  ;;  %v278_v60 = vrot.slane %v277_v38, 4  ;;  %10268 = vmatprep.subr.bf16.mxu0 %v10918_v53  ;;  %v478_v42 = vrot.slane %v15750_v63, 4  ;;  %v288_v38 = vrot.slane %v287_v29, 4  ;;  %v10921_v39 = vld [vmem:[%s15731_s1 + $0x8] sm:$0xff]  }
  0x31   :  { %v468_v18 = vrot.slane %v466_v49, 5  ;;  %v298_v27 = vshll.u32 %v11466_v47, 16  ;;  %v484_v63 = vrot.slane %v482_v28, 5  ;;  %v15754_v12 = vshll.u32 %v11474_v0, 16  ;;  %v10922_v28 = vld [vmem:[%s15731_s1 + $0x88] sm:$0xff]  }
  0x32   :  { %10201 = vmatmul.mubr.bf16.gmra.mxu1 %v8924_v16  ;;  %v283_v40 = vsel %vm11216_vm2, %v278_v60, %v282_v46  ;;  %v479_v54 = vor.u32 %v478_v42, %v474_v21  ;;  %v11508_v16 = vld [vmem:[%s15732_s0 + $0x9c] sm:$0xf]  ;;  %v293_v29 = vsel %vm11216_vm2, %v288_v38, %v292_v22  ;;  %v15755_v60 = vshrl.u32 %v11474_v0, 16 }
  0x33   :  { %10269 = vmatpush3.bf16.msra.mxu0 %v10918_v53  ;;  %v469_v49 = vor.u32 %v468_v18, %v465_v58  ;;  %15849 = vst [vmem:[#allocation8_spill] sm:$0xff] %v11508_v16  ;;  %10221 = vmatpush3.bf16.msra.mxu1 %v10917_v55  ;;  %v297_v53 = vrot.slane %v295_v17, 4  ;;  %v300_v46 = vrot.slane %v298_v27, 5  ;;  %v11516_v58 = vld [vmem:[%s15732_s0 + $0xa0] sm:$0xf]  ;;  %v8917_v18 = vcombine.low %v283_v40, %v293_v29 }
  0x34   :  { %10270 = vmatprep.subr.bf16.mxu0 %v10920_v3  ;;  %15850 = vst [vmem:[#allocation9_spill] sm:$0xff] %v11516_v58  ;;  %10222 = vmatprep.subr.bf16.mxu1 %v10919_v48  ;;  %v480_v42 = vrot.slane %v479_v54, 4  ;;  %v306_v22 = vrot.slane %v15754_v12, 5  ;;  %v310_v17 = vrot.slane %v15755_v60, 4  ;;  %v314_v27 = vshll.u32 %v11495_v61, 16 }
  0x35   :  { %v470_v55 = vrot.slane %v469_v49, 4  ;;  %v301_v38 = vor.u32 %v300_v46, %v297_v53  ;;  %v487_v50 = vshrl.u32 %v11508_v16, 16  ;;  %10188 = vmatprep.mubr.bf16.mxu0 %v8917_v18  ;;  %v11537_v49 = vld [vmem:[%s15732_s0 + $0xa4] sm:$0x1]  ;;  %v490_v29 = vshll.u32 %v11508_v16, 16 }
  0x36   :  { %v485_v40 = vsel %vm11216_vm2, %v480_v42, %v484_v63  ;;  %15851 = vst [vmem:[#allocation10_spill] sm:$0xff] %v11537_v49  ;;  %v11544_v53 = vld [vmem:[%s15732_s0 + $0x48] sm:$0xf]  ;;  %v311_v18 = vor.u32 %v310_v17, %v306_v22  ;;  %v11549_v63 = vld [vmem:[%s15732_s0 + $0x4c] sm:$0xf] }
  0x37   :  { %10271 = vmatpush3.bf16.msra.mxu0 %v10920_v3  ;;  %v475_v54 = vsel %vm11216_vm2, %v470_v55, %v474_v21  ;;  %v15756_v3 = vshll.u32 %v11516_v58, 16  ;;  %10223 = vmatpush3.bf16.msra.mxu1 %v10919_v48  ;;  %v302_v21 = vrot.slane %v301_v38, 4  ;;  %v316_v55 = vrot.slane %v314_v27, 5  ;;  %v10923_v48 = vld [vmem:[%s15731_s1] sm:$0xff]  }
  0x38   :  { %v8925_v46 = vcombine.low %v475_v54, %v485_v40  ;;  %10224 = vmatprep.subr.bf16.mxu1 %v10921_v39  ;;  %10272 = vmatprep.subr.bf16.mxu0 %v10922_v28  ;;  %v489_v42 = vrot.slane %v487_v50, 4  ;;  %v492_v12 = vrot.slane %v490_v29, 5  ;;  %v15758_v38 = vshrl.u32 %v11516_v58, 16  ;;  %v11563_v40 = vld [vmem:[%s15732_s0 + $0x50] sm:$0x1] }
  0x39   :  { %v498_v60 = vrot.slane %v15756_v3, 5  ;;  %v307_v17 = vsel %vm11216_vm2, %v302_v21, %v306_v22  ;;  %v312_v27 = vrot.slane %v311_v18, 4  ;;  %v506_v54 = vshll.u32 %v11537_v49, 16  ;;  %v11573_v22 = vld [vmem:[%s15732_s0 + $0xa8] sm:$0xf]  ;;  %v11578_v21 = vld [vmem:[%s15731_s1 + $0xf8] sm:$0xff]  }
  0x3a   :  { %10204 = vmatprep.mubr.bf16.mxu1 %v8925_v46  ;;  %v319_v50 = vshrl.u32 %v11544_v53, 16  ;;  %v493_v29 = vor.u32 %v492_v12, %v489_v42  ;;  %v502_v3 = vrot.slane %v15758_v38, 4  ;;  %v322_v46 = vshll.u32 %v11544_v53, 16  ;;  %15852 = vst [vmem:[#allocation11_spill] sm:$0xff] %v11573_v22  ;;  %v11586_v38 = vld [vmem:[%s15732_s0 + $0xac] sm:$0xf] }
  0x3b   :  { %10273 = vmatpush3.bf16.msra.mxu0 %v10922_v28  ;;  %v15759_v10 = vshll.u32 %v11549_v63, 16  ;;  %10225 = vmatpush3.bf16.msra.mxu1 %v10921_v39  ;;  %v317_v12 = vsel %vm11216_vm2, %v312_v27, %v316_v55  ;;  %v508_v28 = vrot.slane %v506_v54, 5  ;;  %v15760_v42 = vshrl.u32 %v11549_v63, 16  ;;  %15853 = vst [vmem:[#allocation12_spill] sm:$0xff] %v11586_v38  ;;  %v11591_v39 = vld [vmem:[%s15731_s1 + $0x138] sm:$0xff]  }
  0x3c   :  { %10274 = vmatprep.subr.bf16.mxu0 %v10924_v51  ;;  %v321_v18 = vrot.slane %v319_v50, 4  ;;  %10226 = vmatprep.subr.bf16.mxu1 %v10923_v48  ;;  %v8918_v35 = vcombine.low %v307_v17, %v317_v12  ;;  %v494_v15 = vrot.slane %v493_v29, 4  ;;  %v503_v1 = vor.u32 %v502_v3, %v498_v60  ;;  %v11596_v55 = vld [vmem:[%s15732_s0 + $0xb0] sm:$0x1]  ;;  %v11607_v3 = vld [vmem:[%s15732_s0 + $0x54] sm:$0xf] }
  0x3d   :  { %v324_v13 = vrot.slane %v322_v46, 5  ;;  %15854 = vst [vmem:[#allocation13_spill] sm:$0xff] %v11596_v55  ;;  %v330_v27 = vrot.slane %v15759_v10, 5  ;;  %v334_v54 = vrot.slane %v15760_v42, 4  ;;  %v338_v50 = vshll.u32 %v11563_v40, 16 }
  0x3e   :  { %v511_v45 = vshrl.u32 %v11573_v22, 16  ;;  %10189 = vmatmul.mubr.bf16.gmra.mxu0 %v8918_v35  ;;  %v499_v17 = vsel %vm11216_vm2, %v494_v15, %v498_v60  ;;  %v504_v29 = vrot.slane %v503_v1, 4  ;;  %v514_v12 = vshll.u32 %v11573_v22, 16  ;;  %v11615_v10 = vld [vmem:[%s15732_s0 + $0x58] sm:$0xf] }
  0x3f   :  { %10275 = vmatpush3.bf16.msra.mxu0 %v10924_v51  ;;  %v325_v46 = vor.u32 %v324_v13, %v321_v18  ;;  %10227 = vmatpush3.bf16.msra.mxu1 %v10923_v48  ;;  %v335_v42 = vor.u32 %v334_v54, %v330_v27  ;;  %v340_v14 = vrot.slane %v338_v50, 5  ;;  %v15763_v23 = vshll.u32 %v11586_v38, 16  ;;  %v11626_v51 = vld [vmem:[%s15732_s0 + $0x5c] sm:$0x1] }
  0x40   :  { %v513_v26 = vrot.slane %v511_v45, 4  ;;  %10308 = vmatprep.subr.bf16.mxu1 %v11578_v21  ;;  %10356 = vmatprep.subr.bf16.mxu0 %v11591_v39  ;;  %v509_v13 = vsel %vm11216_vm2, %v504_v29, %v508_v28  ;;  %v516_v35 = vrot.slane %v514_v12, 5  ;;  %v15764_v1 = vshrl.u32 %v11586_v38, 16 }
  0x41   :  { %v326_v15 = vrot.slane %v325_v46, 4  ;;  %v8926_v45 = vcombine.low %v499_v17, %v509_v13  ;;  %v336_v60 = vrot.slane %v335_v42, 4  ;;  %v522_v48 = vrot.slane %v15763_v23, 5  ;;  %v11639_v46 = vld [vmem:[%s15732_s0 + $0xb4] sm:$0xf] }
  0x42   :  { %v530_v18 = vshll.u32 %v11596_v55, 16  ;;  %v517_v28 = vor.u32 %v516_v35, %v513_v26  ;;  %v526_v50 = vrot.slane %v15764_v1, 4  ;;  %v343_v29 = vshrl.u32 %v11607_v3, 16  ;;  %15855 = vst [vmem:[#allocation14_spill] sm:$0xff] %v11639_v46  ;;  %v11644_v42 = vld [vmem:[%s15732_s0 + $0xb8] sm:$0xf] }
  0x43   :  { %v331_v54 = vsel %vm11216_vm2, %v326_v15, %v330_v27  ;;  %15856 = vst [vmem:[#allocation15_spill] sm:$0xff] %v11644_v42  ;;  %10205 = vmatmul.mubr.bf16.gmra.mxu1 %v8926_v45  ;;  %v341_v27 = vsel %vm11216_vm2, %v336_v60, %v340_v14  ;;  %v346_v17 = vshll.u32 %v11607_v3, 16  ;;  %v15768_v12 = vshll.u32 %v11615_v10, 16  ;;  %v11657_v14 = vld [vmem:[%s15732_s0 + $0xbc] sm:$0x1] }
  0x44   :  { %v532_v26 = vrot.slane %v530_v18, 5  ;;  %v8919_v13 = vcombine.low %v331_v54, %v341_v27  ;;  %v518_v15 = vrot.slane %v517_v28, 4  ;;  %v527_v35 = vor.u32 %v526_v50, %v522_v48  ;;  %v11666_v50 = vld [vmem:[%s15732_s0] sm:$0xe] }
  0x45   :  { %v345_v23 = vrot.slane %v343_v29, 4  ;;  %v348_v1 = vrot.slane %v346_v17, 5  ;;  %v354_v55 = vrot.slane %v15768_v12, 5  ;;  %v15773_v22 = vshrl.u32 %v11615_v10, 16  ;;  %15857 = vst [vmem:[#allocation16_spill] sm:$0xff] %v11666_v50 }
  0x46   :  { %v362_v45 = vshll.u32 %v11626_v51, 16  ;;  %10192 = vmatprep.mubr.bf16.mxu0 %v8919_v13  ;;  %v523_v60 = vsel %vm11216_vm2, %v518_v15, %v522_v48  ;;  %v528_v18 = vrot.slane %v527_v35, 4  ;;  %v535_v54 = vshrl.u32 %v11639_v46, 16  ;;  %v11674_v48 = vld [vmem:[%s15732_s0 + $0xc] sm:$0xe] }
  0x47   :  { %v538_v28 = vshll.u32 %v11639_v46, 16  ;;  %v349_v29 = vor.u32 %v348_v1, %v345_v23  ;;  %v358_v27 = vrot.slane %v15773_v22, 4  ;;  %v15777_v13 = vshll.u32 %v11644_v42, 16 }
  0x48   :  { %v364_v17 = vrot.slane %v362_v45, 5  ;;  %v533_v15 = vsel %vm11216_vm2, %v528_v18, %v532_v26  ;;  %v537_v35 = vrot.slane %v535_v54, 4  ;;  %v15778_v46 = vshrl.u32 %v11644_v42, 16 }
  0x49   :  { %v540_v12 = vrot.slane %v538_v28, 5  ;;  %v8927_v38 = vcombine.low %v523_v60, %v533_v15  ;;  %v350_v23 = vrot.slane %v349_v29, 4  ;;  %v359_v1 = vor.u32 %v358_v27, %v354_v55  ;;  %v11699_v29 = vld [vmem:[%s15732_s0 + $0x18] sm:$0xe] }
  0x4a   :  { %v546_v45 = vrot.slane %v15777_v13, 5  ;;  %v550_v49 = vrot.slane %v15778_v46, 4  ;;  %v554_v16 = vshll.u32 %v11657_v14, 16  ;;  %v15858_v26 = vmov 0 }
  0x4b   :  { %v541_v22 = vor.u32 %v540_v12, %v537_v35  ;;  %v15859_v26 = vsel %vm11686_vm5, 4294967295, %v15858_v26  ;;  %v8961_v18 = vrot.slane %v11666_v50, 9  ;;  %10208 = vmatprep.mubr.bf16.mxu1 %v8927_v38  ;;  %v355_v60 = vsel %vm11216_vm2, %v350_v23, %v354_v55 }
  0x4c   :  { %15860 = vst [vmem:[#allocation17_spill] sm:$0xff] %v15859_v26  ;;  %v360_v54 = vrot.slane %v359_v1, 4  ;;  %v1206_v12 = vrot.slane %v11172_v5, 5  ;;  %v551_v15 = vor.u32 %v550_v49, %v546_v45  ;;  %v556_v35 = vrot.slane %v554_v16, 5  ;;  %v11714_v16 = vld [vmem:[%s15732_s0 + $0x24] sm:$0xe] }
  0x4d   :  { %v542_v27 = vrot.slane %v541_v22, 4  ;;  %v8962_v13 = vrot.slane %v11674_v48, 9  ;;  %v1213_v1 = vrot.slane %v11225_v36, 5  ;;  %v8939_v49 = vcombine.low %v11272_v24, %v11282_v33  ;;  %v11879_v24 = vld [vmem:[%s15732_s0 + $0x78] sm:$0xe] }
  0x4e   :  { %v365_v38 = vsel %vm11216_vm2, %v360_v54, %v364_v17  ;;  %v1207_v55 = vsel %vm11686_vm5, %v8961_v18, %v1206_v12  ;;  %v1208_v23 = vrot.slane %v1206_v12, 4  ;;  %v552_v50 = vrot.slane %v551_v15, 4  ;;  %v11726_v54 = vld [vmem:[%s15732_s0 + $0x30] sm:$0xe]  ;;  %15870 = vst [vmem:[#allocation23_spill] sm:$0xff] %v11879_v24 }
  0x4f   :  { %v8920_v46 = vcombine.low %v355_v60, %v365_v38  ;;  %v547_v28 = vsel %vm11216_vm2, %v542_v27, %v546_v45  ;;  %v15861_v22 = vrot.slane %v11177_v6, 5  ;;  %v1214_v18 = vsel %vm11686_vm5, %v8962_v13, %v1213_v1 }
  0x50   :  { %v1215_v60 = vrot.slane %v1213_v1, 4  ;;  %v8963_v45 = vrot.slane %v11699_v29, 9  ;;  %v557_v12 = vsel %vm11216_vm2, %v552_v50, %v556_v35  ;;  %v1220_v6 = vrot.slane %v11282_v33, 5  ;;  %v11750_v35 = vld [vmem:[%s15732_s0 + $0x48] sm:$0xe]  ;;  %v10940_v1 = vld [vmem:[%s15731_s1 + $0x120] sm:$0xff]  }
  0x51   :  { %v1210_v17 = vsel %vm11686_vm5, %v1208_v23, %v15861_v22  ;;  %10193 = vmatmul.mubr.bf16.gmra.mxu0 %v8920_v46  ;;  %v1223_v15 = vrot.slane %v11293_v43, 5  ;;  %v8928_v38 = vcombine.low %v547_v28, %v557_v12  ;;  %v15862_v13 = vrot.slane %v11232_v41, 5  ;;  %v11742_v46 = vld [vmem:[%s15732_s0 + $0x3c] sm:$0xe]  ;;  %15864 = vst [vmem:[#allocation19_spill] sm:$0xff] %v11750_v35 }
  0x52   :  { %v8993_v27 = vcombine.low %v1207_v55, %v1210_v17  ;;  %v8964_v22 = vrot.slane %v11714_v16, 9  ;;  %15863 = vst [vmem:[#allocation18_spill] sm:$0xff] %v11742_v46  ;;  %v1221_v43 = vsel %vm11686_vm5, %v8963_v45, %v1220_v6  ;;  %v1222_v28 = vrot.slane %v1220_v6, 4  ;;  %v10935_v17 = vld [vmem:[%s15731_s1 + $0xe8] sm:$0xff]  }
  0x53   :  { %v1217_v23 = vsel %vm11686_vm5, %v1215_v60, %v15862_v13  ;;  %v1227_v41 = vrot.slane %v11345_v19, 5  ;;  %10209 = vmatmul.mubr.bf16.gmra.mxu1 %v8928_v38  ;;  %v1230_v55 = vrot.slane %v11353_v37, 5  ;;  %v8965_v60 = vrot.slane %v11726_v54, 9 }
  0x54   :  { %10276 = vmatprep.mubr.bf16.mxu0 %v8993_v27  ;;  %v8994_v50 = vcombine.low %v1214_v18, %v1217_v23  ;;  %v1234_v18 = vrot.slane %v11420_v8, 5  ;;  %v15865_v45 = vcombine.low %v11167_v4, %v11172_v5  ;;  %v1224_v12 = vsel %vm11686_vm5, %v1222_v28, %v1223_v15  ;;  %v11776_v15 = vld [vmem:[%s15732_s0 + $0x54] sm:$0xe] }
  0x55   :  { %v11764_v27 = vsel %vm11686_vm5, %v8964_v22, %v1227_v41  ;;  %v1229_v6 = vrot.slane %v1227_v41, 4  ;;  %v1237_v37 = vrot.slane %v11429_v34, 5  ;;  %v8995_v38 = vcombine.low %v1221_v43, %v1224_v12  ;;  %15866 = vst [vmem:[#allocation20_spill] sm:$0xff] %v11776_v15  ;;  %v10932_v34 = vld [vmem:[%s15731_s1 + $0x130] sm:$0xff]  }
  0x56   :  { %10228 = vmatprep.mubr.bf16.mxu1 %v15865_v45  ;;  %v11769_v13 = vsel %vm11686_vm5, %v8965_v60, %v1234_v18  ;;  %v1236_v23 = vrot.slane %v1234_v18, 4  ;;  %v8966_v43 = vrot.slane %v11742_v46, 9  ;;  %v1241_v28 = vrot.slane %v11474_v0, 5  ;;  %v10931_v18 = vld [vmem:[%s15731_s1 + $0xf0] sm:$0xff]  }
  0x57   :  { %v11780_v22 = vsel %vm11686_vm5, %v1229_v6, %v1230_v55  ;;  %v1244_v41 = vrot.slane %v11495_v61, 5  ;;  %v8967_v12 = vrot.slane %v11750_v35, 9  ;;  %v15869_v45 = vcombine.low %v11212_v30, %v11225_v36  ;;  %v11855_v30 = vld [vmem:[%s15732_s0 + $0x64] sm:$0xf] }
  0x58   :  { %v8996_v60 = vcombine.low %v11764_v27, %v11780_v22  ;;  %v11795_v55 = vsel %vm11686_vm5, %v1236_v23, %v1237_v37  ;;  %v11804_v27 = vsel %vm11686_vm5, %v8966_v43, %v1241_v28  ;;  %v1243_v6 = vrot.slane %v1241_v28, 4  ;;  %v11810_v37 = vld [vmem:[%s15732_s0 + $0x60] sm:$0xe] }
  0x59   :  { %10277 = vmatmul.mubr.bf16.vlgmr.msra.gmra.mxu0 %v8994_v50  ;;  %v8997_v61 = vcombine.low %v11769_v13, %v11795_v55  ;;  %v1248_v22 = vrot.slane %v11549_v63, 5  ;;  %15867 = vst [vmem:[#allocation21_spill] sm:$0xff] %v11810_v37  ;;  %v10936_v50 = vld [vmem:[%s15731_s1 + $0x128] sm:$0xff]   ;;  %v1251_v13 = vrot.slane %v11563_v40, 5  ;;  %v8968_v43 = vrot.slane %v11776_v15, 9 }
  0x5a   :  { %10357 = vmatpush3.bf16.msra.mxu0 %v11591_v39  ;;  %10280 = vmatprep.mubr.bf16.mxu0 %v8995_v38  ;;  %v1255_v28 = vrot.slane %v11615_v10, 5  ;;  %v11824_v55 = vld [vmem:[%s15732_s0 + $0x6c] sm:$0xe]  ;;  %v11828_v39 = vsel %vm11686_vm5, %v1243_v6, %v1244_v41  ;;  %v1258_v23 = vrot.slane %v11626_v51, 5  ;;  %v11850_v51 = vld [vmem:[%s15732_s0 + $0x60] sm:$0xf] }
  0x5b   :  { %15868 = vst [vmem:[#allocation22_spill] sm:$0xff] %v11824_v55  ;;  %10358 = vmatprep.subr.bf16.mxu0 %v10932_v34  ;;  %v11832_v40 = vsel %vm11686_vm5, %v8967_v12, %v1248_v22  ;;  %v1250_v38 = vrot.slane %v1248_v22, 4  ;;  %10229 = vmatmul.mubr.bf16.vlgmr.msra.gmra.mxu1 %v15869_v45  ;;  %v8969_v6 = vrot.slane %v11810_v37, 9  ;;  %v1262_v22 = vrot.slane %v11855_v30, 5 }
  0x5c   :  { %v11845_v41 = vsel %vm11686_vm5, %v8968_v43, %v1255_v28  ;;  %v1257_v12 = vrot.slane %v1255_v28, 4  ;;  %10309 = vmatpush3.bf16.msra.mxu1 %v11578_v21  ;;  %10232 = vmatprep.mubr.bf16.mxu1 %v8939_v49  ;;  %v11872_v43 = vld [vmem:[%s15732_s0 + $0x6c] sm:$0xf]  ;;  %v11884_v49 = vld [vmem:[%s15732_s0 + $0x84] sm:$0xe]  ;;  %v1279_v37 = vrot.slane %v11330_v7, 5 }
  0x5d   :  { %v11865_v45 = vsel %vm11686_vm5, %v1250_v38, %v1251_v13  ;;  %15871 = vst [vmem:[#allocation24_spill] sm:$0xff] %v11884_v49  ;;  %10310 = vmatprep.subr.bf16.mxu1 %v10931_v18  ;;  %v8970_v38 = vrot.slane %v11824_v55, 9  ;;  %v11896_v21 = vld [vmem:[%s15732_s0 + $0x70] sm:$0xf]  ;;  %v11903_v13 = vsel %vm11686_vm5, %v8969_v6, %v1262_v22  ;;  %v1264_v4 = vrot.slane %v1262_v22, 4 }
  0x5e   :  { %10359 = vmatpush3.bf16.msra.mxu0 %v10932_v34  ;;  %v11890_v28 = vsel %vm11686_vm5, %v1257_v12, %v1258_v23  ;;  %15872 = vst [vmem:[#allocation25_spill] sm:$0xff] %v11896_v21  ;;  %v1269_v36 = vrot.slane %v11896_v21, 5  ;;  %v11073_v23 = vld [vmem:[%s15732_s0 + $0x74] sm:$0x1]  ;;  %v8971_v6 = vrot.slane %v11879_v24, 9  ;;  %v15873_v22 = vrot.slane %v11200_v20, 5 }
  0x5f   :  { %10360 = vmatprep.subr.bf16.mxu0 %v10936_v50  ;;  %v1272_v12 = vrot.slane %v11073_v23, 5  ;;  %v1276_v55 = vrot.slane %v11315_v59, 5  ;;  %v10939_v20 = vld [vmem:[%s15731_s1 + $0xe0] sm:$0xff]   ;;  %v1286_v34 = vrot.slane %v11393_v25, 5  ;;  %v11983_v25 = vld [vmem:[%s15732_s0 + $0xa8] sm:$0xe] }
  0x60   :  { %v11913_v31 = vsel %vm11686_vm5, %v8970_v38, %v1269_v36  ;;  %v1271_v21 = vrot.slane %v1269_v36, 4  ;;  %10311 = vmatpush3.bf16.msra.mxu1 %v10931_v18  ;;  %v11922_v23 = vsel %vm11686_vm5, %v1264_v4, %v15873_v22  ;;  %v11931_v38 = vld [vmem:[%s15732_s0 + $0x90] sm:$0xe]  ;;  %v1283_v18 = vrot.slane %v11371_v57, 5  ;;  %15879 = vst [vmem:[#allocation28_spill] sm:$0xff] %v11983_v25  ;;  %v15880_v24 = vld [vmem:[#allocation10_spill] sm:$0xff] }
  0x61   :  { %10281 = vmatmul.mubr.bf16.gmra.mxu0 %v8996_v60  ;;  %15874 = vst [vmem:[#allocation26_spill] sm:$0xff] %v11931_v38  ;;  %10312 = vmatprep.subr.bf16.mxu1 %v10935_v17  ;;  %v8972_v60 = vrot.slane %v11884_v49, 9  ;;  %v11948_v22 = vsel %vm11686_vm5, %v8971_v6, %v1276_v55  ;;  %v1278_v36 = vrot.slane %v1276_v55, 4  ;;  %v15877_v4 = vcombine.low %v11407_v2, %v11420_v8  ;;  %v10943_v2 = vld [vmem:[%s15731_s1 + $0xd8] sm:$0xff]  }
  0x62   :  { %10284 = vmatprep.mubr.bf16.mxu0 %v8997_v61  ;;  %v11940_v7 = vsel %vm11686_vm5, %v1271_v21, %v1272_v12  ;;  %10361 = vmatpush3.bf16.msra.mxu0 %v10936_v50  ;;  %v11954_v21 = vld [vmem:[%s15732_s0 + $0x9c] sm:$0xe]  ;;  %v15876_v12 = vcombine.low %v11337_v11, %v11345_v19  ;;  %v1285_v55 = vrot.slane %v1283_v18, 4  ;;  %v8973_v61 = vrot.slane %v11931_v38, 9 }
  0x63   :  { %15875 = vst [vmem:[#allocation27_spill] sm:$0xff] %v11954_v21  ;;  %10362 = vmatprep.subr.bf16.mxu0 %v10940_v1  ;;  %v10944_v50 = vld [vmem:[%s15731_s1 + $0x118] sm:$0xff]   ;;  %v11964_v6 = vsel %vm11686_vm5, %v8972_v60, %v1283_v18  ;;  %v11974_v11 = vsel %vm11686_vm5, %v1278_v36, %v1279_v37  ;;  %v1293_v60 = vrot.slane %v11454_v32, 5  ;;  %v8974_v32 = vrot.slane %v11954_v21, 9  ;;  %v15885_v18 = vld [vmem:[#allocation13_spill] sm:$0xff] }
  0x64   :  { %10233 = vmatmul.mubr.bf16.gmra.mxu1 %v15876_v12  ;;  %v1290_v12 = vrot.slane %v11443_v62, 5  ;;  %v11992_v37 = vsel %vm11686_vm5, %v1285_v55, %v1286_v34  ;;  %v1297_v36 = vrot.slane %v11516_v58, 5  ;;  %v1300_v15 = vrot.slane %v15880_v24, 5  ;;  %v12006_v34 = vld [vmem:[%s15732_s0 + $0xb4] sm:$0xe] }
  0x65   :  { %10236 = vmatprep.mubr.bf16.mxu1 %v15877_v4  ;;  %10313 = vmatpush3.bf16.msra.mxu1 %v10935_v17  ;;  %15881 = vst [vmem:[#allocation10_spill] sm:$0xff] %v12006_v34  ;;  %v15883_v17 = vld [vmem:[#allocation11_spill] sm:$0xff]  ;;  %v8975_v24 = vrot.slane %v11983_v25, 9  ;;  %v15884_v21 = vcombine.low %v11804_v27, %v11828_v39  ;;  %v10947_v27 = vld [vmem:[%s15731_s1 + $0xd0] sm:$0xff]   ;;  %v15892_v39 = vld [vmem:[#allocation4_spill] sm:$0xff] }
  0x66   :  { %10314 = vmatprep.subr.bf16.mxu1 %v10939_v20  ;;  %10363 = vmatpush3.bf16.msra.mxu0 %v10940_v1  ;;  %v12000_v49 = vsel %vm11686_vm5, %v8973_v61, %v1290_v12  ;;  %v1292_v38 = vrot.slane %v1290_v12, 4  ;;  %v10948_v1 = vld [vmem:[%s15731_s1 + $0x110] sm:$0xff]   ;;  %v12013_v55 = vsel %vm11686_vm5, %v8974_v32, %v1297_v36  ;;  %v1299_v4 = vrot.slane %v1297_v36, 4  ;;  %v15882_v61 = vld [vmem:[#allocation12_spill] sm:$0xff]  ;;  %v15886_v36 = vld [vmem:[#allocation14_spill] sm:$0xff] }
  0x67   :  { %10364 = vmatprep.subr.bf16.mxu0 %v10944_v50  ;;  %v1304_v58 = vrot.slane %v15882_v61, 5  ;;  %v1307_v32 = vrot.slane %v15885_v18, 5  ;;  %v15887_v12 = vcombine.low %v11832_v40, %v11865_v45  ;;  %v1314_v18 = vrot.slane %v11657_v14, 5 }
  0x68   :  { %v12023_v35 = vsel %vm11686_vm5, %v1292_v38, %v1293_v60  ;;  %v12039_v38 = vsel %vm11686_vm5, %v1299_v4, %v1300_v15  ;;  %v12053_v15 = vld [vmem:[%s15732_s0 + $0x8] sm:$0x3]  ;;  %v15888_v4 = vcombine.low %v11466_v47, %v11474_v0  ;;  %v15889_v14 = vcombine.low %v11544_v53, %v11549_v63 }
  0x69   :  { %10285 = vmatmul.mubr.bf16.gmra.mxu0 %v15884_v21  ;;  %10315 = vmatpush3.bf16.msra.mxu1 %v10939_v20  ;;  %v8976_v20 = vrot.slane %v12006_v34, 9  ;;  %v1311_v21 = vrot.slane %v11644_v42, 5  ;;  %v12047_v45 = vsel %vm11686_vm5, %v8975_v24, %v1304_v58  ;;  %v1306_v60 = vrot.slane %v1304_v58, 4  ;;  %v15890_v24 = vld [vmem:[#allocation16_spill] sm:$0xff]  ;;  %v11074_v34 = vld [vmem:[%s15732_s0 + $0x4] sm:$0xf] }
  0x6a   :  { %10288 = vmatprep.mubr.bf16.mxu0 %v15887_v12  ;;  %10316 = vmatprep.subr.bf16.mxu1 %v10943_v2  ;;  %v1661_v46 = vshll.u32 %v15890_v24, 16  ;;  %v15891_v40 = vshrl.u32 %v11172_v5, 16  ;;  %v2347_v5 = vld [vmem:[%s15732_s0] sm:$0xc] }
  0x6b   :  { %10365 = vmatpush3.bf16.msra.mxu0 %v10944_v50  ;;  %v10952_v50 = vld [vmem:[%s15731_s1 + $0x108] sm:$0xff]   ;;  %v12063_v12 = vsel %vm11686_vm5, %v8976_v20, %v1311_v21  ;;  %v1313_v58 = vrot.slane %v1311_v21, 4  ;;  %v12070_v47 = vsel %vm11686_vm5, %v1306_v60, %v1307_v32  ;;  %v1672_v32 = vshrl.u32 %v12053_v15, 16 }
  0x6c   :  { %10237 = vmatmul.mubr.bf16.gmra.mxu1 %v15888_v4  ;;  %10366 = vmatprep.subr.bf16.mxu0 %v10948_v1  ;;  %v1658_v4 = vshrl.u32 %v15890_v24, 16  ;;  %v1666_v20 = vrot.slane %v15891_v40, 5  ;;  %v10951_v21 = vld [vmem:[%s15731_s1 + $0xc8] sm:$0xff]   ;;  %v1675_v60 = vshll.u32 %v12053_v15, 16  ;;  %v1663_v24 = vrot.slane %v1661_v46, 6 }
  0x6d   :  { %10240 = vmatprep.mubr.bf16.mxu1 %v15889_v14  ;;  %10317 = vmatpush3.bf16.msra.mxu1 %v10943_v2  ;;  %v12083_v2 = vsel %vm11686_vm5, %v1313_v58, %v1314_v18  ;;  %v10956_v18 = vld [vmem:[%s15731_s1 + $0x100] sm:$0xff]   ;;  %v1674_v26 = vrot.slane %v1672_v32, 5  ;;  %v15895_v46 = vcombine.low %v11845_v41, %v11890_v28  ;;  %v9057_v40 = vrot.slane %v2347_v5, 10  ;;  %v12636_v58 = vld [vmem:[%s15733_s3 + $0x38] sm:$0xff]  }
  0x6e   :  { %10318 = vmatprep.subr.bf16.mxu1 %v10947_v27  ;;  %v1660_v14 = vrot.slane %v1658_v4, 5  ;;  %v1668_v53 = vor.u32 %v15892_v39, %v1666_v20  ;;  %v2400_v32 = vrot.slane %v11074_v34, 6  ;;  %v15898_v41 = vcombine.low %v11903_v13, %v11922_v23  ;;  %v10955_v28 = vld [vmem:[%s15731_s1 + $0xc0] sm:$0xff]   ;;  %v10963_v20 = vld [vmem:[%s15733_s3 + $0x30] sm:$0xff]  }
  0x6f   :  { %10367 = vmatpush3.bf16.msra.mxu0 %v10948_v1  ;;  %v1677_v1 = vrot.slane %v1675_v60, 6  ;;  %v1639_v60 = vld [vmem:[%s15732_s0 + $0x14] sm:$0x3]  ;;  %v2403_v5 = vrot.slane %v12053_v15, 6  ;;  %v1684_v34 = vshll.u32 %v11674_v48, 16 }
  0x70   :  { %10368 = vmatprep.subr.bf16.mxu0 %v10952_v50  ;;  %v1664_v39 = vor.u32 %v1663_v24, %v1660_v14  ;;  %v1670_v4 = vrot.slane %v1668_v53, 4  ;;  %v1681_v14 = vshrl.u32 %v11674_v48, 16  ;;  %v2348_v24 = vld [vmem:[%s15732_s0 + $0xc] sm:$0xc]  ;;  %v12129_v13 = vsel %vm12105_vm11, %v9057_v40, %v2400_v32 }
  0x71   :  { %10289 = vmatmul.mubr.bf16.gmra.mxu0 %v15895_v46  ;;  %10319 = vmatpush3.bf16.msra.mxu1 %v10947_v27  ;;  %v1678_v27 = vor.u32 %v1677_v1, %v1674_v26  ;;  %v2402_v23 = vrot.slane %v2400_v32, 4  ;;  %v15900_v26 = vcombine.low %v11607_v3, %v11615_v10  ;;  %v1686_v1 = vrot.slane %v1684_v34, 6 }
  0x72   :  { %10292 = vmatprep.mubr.bf16.mxu0 %v15898_v41  ;;  %10320 = vmatprep.subr.bf16.mxu1 %v10951_v21  ;;  %v1665_v46 = vrot.slane %v1664_v39, 4  ;;  %v15899_v41 = vld [vmem:[#allocation7_spill] sm:$0xff]  ;;  %v1683_v15 = vrot.slane %v1681_v14, 5  ;;  %v1695_v42 = vshrl.u32 %v1639_v60, 16  ;;  %v1698_v3 = vshll.u32 %v1639_v60, 16 }
  0x73   :  { %10369 = vmatpush3.bf16.msra.mxu0 %v10952_v50  ;;  %v1693_v25 = vrot.slane %v15899_v41, 4  ;;  %v1679_v48 = vsel %vm12098_vm8, %v1670_v4, %v1678_v27  ;;  %v15901_v50 = vcombine.low %v11850_v51, %v11855_v30  ;;  %v12144_v39 = vsel %vm12105_vm11, %v2402_v23, %v2403_v5  ;;  %v1640_v5 = vld [vmem:[%s15732_s0 + $0x20] sm:$0x3] }
  0x74   :  { %10241 = vmatmul.mubr.bf16.gmra.mxu1 %v15900_v26  ;;  %10370 = vmatprep.subr.bf16.mxu0 %v10956_v18  ;;  %v1669_v40 = vsel %vm12098_vm8, %v1665_v46, %v1668_v53  ;;  %v9058_v32 = vrot.slane %v2348_v24, 10  ;;  %v9089_v4 = vcombine.low %v12129_v13, %v12144_v39  ;;  %v1687_v27 = vor.u32 %v1686_v1, %v1683_v15  ;;  %v2349_v1 = vld [vmem:[%s15732_s0 + $0x18] sm:$0xc] }
  0x75   :  { %10244 = vmatprep.mubr.bf16.mxu1 %v15901_v50  ;;  %10321 = vmatpush3.bf16.msra.mxu1 %v10951_v21  ;;  %v12146_v26 = vcombine.low %v1669_v40, %v1679_v48  ;;  %v1697_v14 = vrot.slane %v1695_v42, 5  ;;  %v1700_v51 = vrot.slane %v1698_v3, 6  ;;  %v11075_v21 = vld [vmem:[%s15732_s0 + $0x10] sm:$0xf]  ;;  %v2410_v34 = vrot.slane %v1639_v60, 6 }
  0x76   :  { %10322 = vmatprep.subr.bf16.mxu1 %v10955_v28  ;;  %v2407_v53 = vrot.slane %v11075_v21, 6  ;;  %v1704_v24 = vshrl.u32 %v11699_v29, 16  ;;  %v1688_v46 = vrot.slane %v1687_v27, 4  ;;  %v1707_v23 = vshll.u32 %v11699_v29, 16 }
  0x77   :  { %10371 = vmatpush3.bf16.msra.mxu0 %v10956_v18  ;;  %v15902_v48 = vshrl.u32 %v11282_v33, 16  ;;  %v15903_v18 = vshll.u32 %v11282_v33, 16  ;;  %v15904_v60 = vcombine.low %v11913_v31, %v11940_v7  ;;  %v1701_v50 = vor.u32 %v1700_v51, %v1697_v14 }
  0x78   :  { %v12170_v40 = vsel %vm12105_vm11, %v9058_v32, %v2407_v53  ;;  %v2409_v29 = vrot.slane %v2407_v53, 4  ;;  %v1706_v3 = vrot.slane %v1704_v24, 5  ;;  %v15905_v33 = vcombine.low %v11948_v22, %v11974_v11  ;;  %10452 = vmatprep.subr.bf16.mxu0 %v12636_v58 }
  0x79   :  { %v1712_v42 = vrot.slane %v15902_v48, 5  ;;  %v1713_v15 = vrot.slane %v15903_v18, 6  ;;  %10293 = vmatmul.mubr.bf16.gmra.mxu0 %v15904_v60  ;;  %10323 = vmatpush3.bf16.msra.mxu1 %v10955_v28  ;;  %v1692_v27 = vsel %vm12098_vm8, %v1688_v46, %v15899_v41  ;;  %v1709_v21 = vrot.slane %v1707_v23, 6  ;;  %v11076_v46 = vld [vmem:[%s15732_s0 + $0x1c] sm:$0xf] }
  0x7a   :  { %10296 = vmatprep.mubr.bf16.mxu0 %v15905_v33  ;;  %v1718_v31 = vshrl.u32 %v1640_v5, 16  ;;  %v1702_v7 = vsel %vm12098_vm8, %v1693_v25, %v1701_v50  ;;  %v12182_v28 = vsel %vm12105_vm11, %v2409_v29, %v2410_v34  ;;  %v1721_v32 = vshll.u32 %v1640_v5, 16 }
  0x7b   :  { %v1714_v48 = vor.u32 %v1713_v15, %v1712_v42  ;;  %v9059_v14 = vrot.slane %v2349_v1, 10  ;;  %v15906_v22 = vcombine.low %v11872_v43, %v11252_v56  ;;  %v12187_v11 = vcombine.low %v1692_v27, %v1702_v7  ;;  %v1641_v42 = vld [vmem:[%s15732_s0 + $0x2c] sm:$0x3] }
  0x7c   :  { %v9090_v41 = vcombine.low %v12170_v40, %v12182_v28  ;;  %v1710_v51 = vor.u32 %v1709_v21, %v1706_v3  ;;  %v15907_v25 = vcombine.low %v11307_v52, %v11315_v59  ;;  %v1720_v24 = vrot.slane %v1718_v31, 5 }
  0x7d   :  { %10245 = vmatmul.mubr.bf16.gmra.mxu1 %v15906_v22  ;;  %v1716_v53 = vrot.slane %v1714_v48, 4  ;;  %v1723_v34 = vrot.slane %v1721_v32, 6  ;;  %v2414_v23 = vrot.slane %v11076_v46, 6  ;;  %v2417_v43 = vrot.slane %v1640_v5, 6 }
  0x7e   :  { %10248 = vmatprep.mubr.bf16.mxu1 %v15907_v25  ;;  %v1711_v18 = vrot.slane %v1710_v51, 4  ;;  %v1727_v15 = vshrl.u32 %v11714_v16, 16  ;;  %v1730_v1 = vshll.u32 %v11714_v16, 16  ;;  %v15908_v52 = vshrl.u32 %v11345_v19, 16  ;;  %v2350_v16 = vld [vmem:[%s15732_s0 + $0x24] sm:$0xc] }
  0x7f   :  { %v1724_v50 = vor.u32 %v1723_v34, %v1720_v24  ;;  %v12206_v29 = vsel %vm12105_vm11, %v9059_v14, %v2414_v23  ;;  %v2416_v3 = vrot.slane %v2414_v23, 4  ;;  %v15909_v5 = vshll.u32 %v11345_v19, 16  ;;  %v11077_v23 = vld [vmem:[%s15732_s0 + $0x28] sm:$0xf] }
  0x80   :  { %v1735_v60 = vrot.slane %v15908_v52, 5  ;;  %v1715_v27 = vsel %vm12098_vm8, %v1711_v18, %v1714_v48  ;;  %v1729_v21 = vrot.slane %v1727_v15, 5  ;;  %v1732_v31 = vrot.slane %v1730_v1, 6  ;;  %v1642_v15 = vld [vmem:[%s15732_s0 + $0x38] sm:$0x3] }
  0x81   :  { %v1736_v33 = vrot.slane %v15909_v5, 6  ;;  %v1741_v7 = vshrl.u32 %v1641_v42, 16  ;;  %v15910_v32 = vcombine.low %v11964_v6, %v11992_v37  ;;  %v1725_v14 = vsel %vm12098_vm8, %v1716_v53, %v1724_v50 }
  0x82   :  { %v12222_v19 = vsel %vm12105_vm11, %v2416_v3, %v2417_v43  ;;  %v1744_v48 = vshll.u32 %v1641_v42, 16  ;;  %v15911_v51 = vcombine.low %v12000_v49, %v12023_v35  ;;  %v12227_v25 = vcombine.low %v1715_v27, %v1725_v14 }
  0x83   :  { %10297 = vmatmul.mubr.bf16.gmra.mxu0 %v15910_v32  ;;  %v1737_v22 = vor.u32 %v1736_v33, %v1735_v60  ;;  %v9091_v24 = vcombine.low %v12206_v29, %v12222_v19  ;;  %v1733_v6 = vor.u32 %v1732_v31, %v1729_v21  ;;  %v1743_v37 = vrot.slane %v1741_v7, 5 }
  0x84   :  { %10300 = vmatprep.mubr.bf16.mxu0 %v15911_v51  ;;  %v1746_v46 = vrot.slane %v1744_v48, 6  ;;  %v9060_v53 = vrot.slane %v2350_v16, 10  ;;  %v2421_v43 = vrot.slane %v11077_v23, 6  ;;  %v15912_v18 = vcombine.low %v11362_v44, %v11371_v57 }
  0x85   :  { %v1739_v34 = vrot.slane %v1737_v22, 4  ;;  %v1734_v35 = vrot.slane %v1733_v6, 4  ;;  %v2424_v49 = vrot.slane %v1641_v42, 6  ;;  %v1750_v1 = vshrl.u32 %v11726_v54, 16 }
  0x86   :  { %10249 = vmatmul.mubr.bf16.gmra.mxu1 %v15912_v18  ;;  %v1753_v52 = vshll.u32 %v11726_v54, 16  ;;  %v15913_v60 = vcombine.low %v11436_v9, %v11443_v62  ;;  %v1747_v50 = vor.u32 %v1746_v46, %v1743_v37  ;;  %v12247_v3 = vsel %vm12105_vm11, %v9060_v53, %v2421_v43  ;;  %v2351_v9 = vld [vmem:[%s15732_s0 + $0x30] sm:$0xc]  ;;  %v11078_v53 = vld [vmem:[%s15732_s0 + $0x34] sm:$0xf] }
  0x87   :  { %v2423_v44 = vrot.slane %v2421_v43, 4  ;;  %v15914_v42 = vshrl.u32 %v11420_v8, 16  ;;  %v1738_v33 = vsel %vm12098_vm8, %v1734_v35, %v1737_v22  ;;  %v1752_v27 = vrot.slane %v1750_v1, 5 }
  0x88   :  { %10252 = vmatprep.mubr.bf16.mxu1 %v15913_v60  ;;  %v1755_v21 = vrot.slane %v1753_v52, 6  ;;  %v15915_v54 = vshll.u32 %v11420_v8, 16  ;;  %v1748_v7 = vsel %vm12098_vm8, %v1739_v34, %v1747_v50  ;;  %v1764_v32 = vshrl.u32 %v1642_v15, 16 }
  0x89   :  { %v1758_v5 = vrot.slane %v15914_v42, 5  ;;  %v12262_v16 = vsel %vm12105_vm11, %v2423_v44, %v2424_v49  ;;  %v1767_v14 = vshll.u32 %v1642_v15, 16  ;;  %v12264_v48 = vcombine.low %v1738_v33, %v1748_v7  ;;  %v15919_v42 = vld [vmem:[#allocation8_spill] sm:$0xff] }
  0x8a   :  { %v1759_v31 = vrot.slane %v15915_v54, 6  ;;  %v9092_v22 = vcombine.low %v12247_v3, %v12262_v16  ;;  %v1756_v8 = vor.u32 %v1755_v21, %v1752_v27  ;;  %v15916_v6 = vcombine.low %v12013_v55, %v12039_v38  ;;  %v1643_v55 = vld [vmem:[%s15732_s0 + $0x44] sm:$0x3]  ;;  %v15918_v38 = vld [vmem:[#allocation18_spill] sm:$0xff]  ;;  %v1647_v3 = vld [vmem:[%s15732_s0 + $0x74] sm:$0x3] }
  0x8b   :  { %v1766_v37 = vrot.slane %v1764_v32, 5  ;;  %v1769_v46 = vrot.slane %v1767_v14, 6  ;;  %v9061_v34 = vrot.slane %v2351_v9, 10  ;;  %v2428_v23 = vrot.slane %v11078_v53, 6  ;;  %v11079_v53 = vld [vmem:[%s15732_s0 + $0x40] sm:$0xf] }
  0x8c   :  { %v1760_v51 = vor.u32 %v1759_v31, %v1758_v5  ;;  %10301 = vmatmul.mubr.bf16.gmra.mxu0 %v15916_v6  ;;  %v15917_v43 = vcombine.low %v12047_v45, %v12070_v47  ;;  %v1757_v18 = vrot.slane %v1756_v8, 4  ;;  %v2431_v49 = vrot.slane %v1642_v15, 6  ;;  %v15920_v45 = vld [vmem:[#allocation9_spill] sm:$0xff]  ;;  %v2352_v31 = vld [vmem:[%s15732_s0 + $0x3c] sm:$0xc] }
  0x8d   :  { %v1773_v1 = vshrl.u32 %v15918_v38, 16  ;;  %v1770_v52 = vor.u32 %v1769_v46, %v1766_v37  ;;  %v12283_v60 = vsel %vm12105_vm11, %v9061_v34, %v2428_v23  ;;  %v2430_v50 = vrot.slane %v2428_v23, 4  ;;  %v15938_v16 = vld [vmem:[#allocation22_spill] sm:$0xff] }
  0x8e   :  { %10304 = vmatprep.mubr.bf16.mxu0 %v15917_v43  ;;  %v1762_v35 = vrot.slane %v1760_v51, 4  ;;  %v1776_v44 = vshll.u32 %v15918_v38, 16  ;;  %v15921_v47 = vcombine.low %v15919_v42, %v15920_v45  ;;  %v1761_v15 = vsel %vm12098_vm8, %v1757_v18, %v1760_v51  ;;  %v15925_v38 = vld [vmem:[#allocation19_spill] sm:$0xff] }
  0x8f   :  { %v1775_v5 = vrot.slane %v1773_v1, 5  ;;  %v15922_v33 = vshrl.u32 %v11474_v0, 16  ;;  %v15923_v21 = vshll.u32 %v11474_v0, 16  ;;  %v15924_v9 = vcombine.low %v15883_v17, %v15882_v61 }
  0x90   :  { %10253 = vmatmul.mubr.bf16.gmra.mxu1 %v15921_v47  ;;  %v1771_v7 = vsel %vm12098_vm8, %v1762_v35, %v1770_v52  ;;  %v12305_v32 = vsel %vm12105_vm11, %v2430_v50, %v2431_v49  ;;  %v1778_v14 = vrot.slane %v1776_v44, 6  ;;  %v1787_v8 = vshrl.u32 %v1643_v55, 16  ;;  %v1644_v49 = vld [vmem:[%s15732_s0 + $0x50] sm:$0x3] }
  0x91   :  { %v1781_v27 = vrot.slane %v15922_v33, 5  ;;  %v1782_v54 = vrot.slane %v15923_v21, 6  ;;  %10256 = vmatprep.mubr.bf16.mxu1 %v15924_v9  ;;  %v12307_v51 = vcombine.low %v1761_v15, %v1771_v7  ;;  %v9093_v0 = vcombine.low %v12283_v60, %v12305_v32 }
  0x92   :  { %v1790_v37 = vshll.u32 %v1643_v55, 16  ;;  %v1779_v46 = vor.u32 %v1778_v14, %v1775_v5  ;;  %v1789_v34 = vrot.slane %v1787_v8, 5  ;;  %v9062_v17 = vrot.slane %v2352_v31, 10 }
  0x93   :  { %v1783_v6 = vor.u32 %v1782_v54, %v1781_v27  ;;  %v2435_v23 = vrot.slane %v11079_v53, 6  ;;  %v2438_v35 = vrot.slane %v1643_v55, 6  ;;  %v1796_v1 = vshrl.u32 %v15925_v38, 16  ;;  %v2353_v27 = vld [vmem:[%s15732_s0 + $0x48] sm:$0xc] }
  0x94   :  { %v1792_v18 = vrot.slane %v1790_v37, 6  ;;  %v15926_v52 = vcombine.low %v12063_v12, %v12083_v2  ;;  %v1780_v50 = vrot.slane %v1779_v46, 4  ;;  %v1799_v47 = vshll.u32 %v15925_v38, 16 }
  0x95   :  { %v1785_v43 = vrot.slane %v1783_v6, 4  ;;  %v12323_v44 = vsel %vm12105_vm11, %v9062_v17, %v2435_v23  ;;  %v2437_v42 = vrot.slane %v2435_v23, 4  ;;  %v1798_v15 = vrot.slane %v1796_v1, 5 }
  0x96   :  { %10305 = vmatmul.mubr.bf16.gmra.mxu0 %v15926_v52  ;;  %v1793_v55 = vor.u32 %v1792_v18, %v1789_v34  ;;  %v15927_v5 = vshrl.u32 %v11549_v63, 16  ;;  %v15928_v12 = vshll.u32 %v11549_v63, 16  ;;  %v1784_v21 = vsel %vm12098_vm8, %v1780_v50, %v1783_v6 }
  0x97   :  { %10372 = vmatprep.mubr.bf16.mxu0 %v9089_v4  ;;  %v12340_v54 = vsel %vm12105_vm11, %v2437_v42, %v2438_v35  ;;  %v1801_v13 = vrot.slane %v1799_v47, 6  ;;  %v1810_v39 = vshrl.u32 %v1644_v49, 16  ;;  %v15929_v4 = vld [vmem:[#allocation15_spill] sm:$0xff]  ;;  %v1813_v14 = vshll.u32 %v1644_v49, 16  ;;  %v15931_v35 = vld [vmem:[#allocation20_spill] sm:$0xff] }
  0x98   :  { %v1804_v33 = vrot.slane %v15927_v5, 5  ;;  %v1805_v2 = vrot.slane %v15928_v12, 6  ;;  %v15930_v31 = vcombine.low %v15886_v36, %v15929_v4  ;;  %v1794_v63 = vsel %vm12098_vm8, %v1785_v43, %v1793_v55  ;;  %v11080_v36 = vld [vmem:[%s15732_s0 + $0x4c] sm:$0xf]  ;;  %v1645_v43 = vld [vmem:[%s15732_s0 + $0x5c] sm:$0x3] }
  0x99   :  { %v9094_v9 = vcombine.low %v12323_v44, %v12340_v54  ;;  %v12350_v8 = vcombine.low %v1784_v21, %v1794_v63  ;;  %v1802_v6 = vor.u32 %v1801_v13, %v1798_v15  ;;  %v1812_v37 = vrot.slane %v1810_v39, 5 }
  0x9a   :  { %10257 = vmatmul.mubr.bf16.gmra.mxu1 %v15930_v31  ;;  %v1806_v7 = vor.u32 %v1805_v2, %v1804_v33  ;;  %v9063_v46 = vrot.slane %v2353_v27, 10  ;;  %v1815_v17 = vrot.slane %v1813_v14, 6  ;;  %v2442_v53 = vrot.slane %v11080_v36, 6  ;;  %v2354_v2 = vld [vmem:[%s15732_s0 + $0x54] sm:$0xc] }
  0x9b   :  { %10324 = vmatprep.mubr.bf16.mxu1 %v12146_v26  ;;  %v2445_v23 = vrot.slane %v1644_v49, 6  ;;  %v1803_v18 = vrot.slane %v1802_v6, 4  ;;  %v1819_v26 = vshrl.u32 %v15931_v35, 16  ;;  %v1822_v38 = vshll.u32 %v15931_v35, 16  ;;  %v11081_v31 = vld [vmem:[%s15732_s0 + $0x58] sm:$0xf] }
  0x9c   :  { %v1808_v34 = vrot.slane %v1806_v7, 4  ;;  %v15932_v1 = vshrl.u32 %v11615_v10, 16  ;;  %v1816_v50 = vor.u32 %v1815_v17, %v1812_v37  ;;  %v12364_v42 = vsel %vm12105_vm11, %v9063_v46, %v2442_v53  ;;  %v15934_v37 = vld [vmem:[#allocation21_spill] sm:$0xff] }
  0x9d   :  { %v2444_v47 = vrot.slane %v2442_v53, 4  ;;  %v15933_v49 = vshll.u32 %v11615_v10, 16  ;;  %v1807_v15 = vsel %vm12098_vm8, %v1803_v18, %v1806_v7  ;;  %v1821_v5 = vrot.slane %v1819_v26, 5  ;;  %v1646_v7 = vld [vmem:[%s15732_s0 + $0x68] sm:$0x3]  ;;  %v15935_v53 = vld [vmem:[#allocation3_spill] sm:$0xff] }
  0x9e   :  { %v1827_v52 = vrot.slane %v15932_v1, 5  ;;  %10373 = vmatmul.mubr.bf16.vlgmr.msra.gmra.mxu0 %v9090_v41  ;;  %v1824_v33 = vrot.slane %v1822_v38, 6  ;;  %v1833_v12 = vshrl.u32 %v1645_v43, 16  ;;  %v1817_v10 = vsel %vm12098_vm8, %v1808_v34, %v1816_v50  ;;  %v15937_v50 = vld [vmem:[#allocation6_spill] sm:$0xff] }
  0x9f   :  { %v1828_v55 = vrot.slane %v15933_v49, 6  ;;  %10376 = vmatprep.mubr.bf16.mxu0 %v9091_v24  ;;  %v12383_v40 = vsel %vm12105_vm11, %v2444_v47, %v2445_v23  ;;  %v1836_v41 = vshll.u32 %v1645_v43, 16  ;;  %v12385_v27 = vcombine.low %v1807_v15, %v1817_v10  ;;  %10453 = vmatpush3.bf16.msra.mxu0 %v12636_v58 }
  0xa0   :  { %v9095_v21 = vcombine.low %v12364_v42, %v12383_v40  ;;  %v1825_v13 = vor.u32 %v1824_v33, %v1821_v5  ;;  %v1835_v39 = vrot.slane %v1833_v12, 5  ;;  %v9064_v24 = vrot.slane %v2354_v2, 10  ;;  %v2357_v42 = vld [vmem:[%s15732_s0 + $0x78] sm:$0xc]  ;;  %10454 = vmatprep.subr.bf16.mxu0 %v10963_v20 }
  0xa1   :  { %v1829_v28 = vor.u32 %v1828_v55, %v1827_v52  ;;  %v1838_v19 = vrot.slane %v1836_v41, 6  ;;  %v2449_v63 = vrot.slane %v11081_v31, 6  ;;  %v2452_v6 = vrot.slane %v1645_v43, 6  ;;  %v2355_v43 = vld [vmem:[%s15732_s0 + $0x60] sm:$0xc] }
  0xa2   :  { %10325 = vmatmul.mubr.bf16.vlgmr.msra.gmra.mxu1 %v12187_v11  ;;  %v1826_v14 = vrot.slane %v1825_v13, 4  ;;  %v1842_v46 = vshrl.u32 %v15934_v37, 16  ;;  %v1845_v11 = vshll.u32 %v15934_v37, 16  ;;  %v15936_v23 = vshrl.u32 %v15935_v53, 16 }
  0xa3   :  { %v1831_v29 = vrot.slane %v1829_v28, 4  ;;  %10328 = vmatprep.mubr.bf16.mxu1 %v12227_v25  ;;  %v1839_v34 = vor.u32 %v1838_v19, %v1835_v39  ;;  %v12401_v17 = vsel %vm12105_vm11, %v9064_v24, %v2449_v63  ;;  %v2451_v36 = vrot.slane %v2449_v63, 4  ;;  %10455 = vmatpush3.bf16.msra.mxu0 %v10963_v20 }
  0xa4   :  { %v1850_v18 = vrot.slane %v15936_v23, 5  ;;  %v1830_v35 = vsel %vm12098_vm8, %v1826_v14, %v1829_v28  ;;  %v1844_v26 = vrot.slane %v1842_v46, 5  ;;  %v1847_v25 = vrot.slane %v1845_v11, 6 }
  0xa5   :  { %v1856_v38 = vshrl.u32 %v1646_v7, 16  ;;  %v1840_v1 = vsel %vm12098_vm8, %v1831_v29, %v1839_v34  ;;  %v12414_v52 = vsel %vm12105_vm11, %v2451_v36, %v2452_v6  ;;  %v1859_v49 = vshll.u32 %v1646_v7, 16 }
  0xa6   :  { %v1852_v47 = vor.u32 %v15937_v50, %v1850_v18  ;;  %10377 = vmatmul.mubr.bf16.gmra.mxu0 %v9092_v22  ;;  %v12420_v55 = vcombine.low %v1830_v35, %v1840_v1  ;;  %v9096_v15 = vcombine.low %v12401_v17, %v12414_v52  ;;  %v1848_v5 = vor.u32 %v1847_v25, %v1844_v26  ;;  %v15941_v18 = vld [vmem:[#allocation25_spill] sm:$0xff]  ;;  %v15942_v1 = vld [vmem:[#allocation23_spill] sm:$0xff] }
  0xa7   :  { %v1858_v33 = vrot.slane %v1856_v38, 5  ;;  %10380 = vmatprep.mubr.bf16.mxu0 %v9093_v0  ;;  %v1861_v2 = vrot.slane %v1859_v49, 6  ;;  %v9065_v10 = vrot.slane %v2355_v43, 10  ;;  %v2456_v28 = vrot.slane %v11855_v30, 6  ;;  %v1648_v43 = vld [vmem:[%s15732_s0 + $0x80] sm:$0x3] }
  0xa8   :  { %v1854_v12 = vrot.slane %v1852_v47, 4  ;;  %v1849_v41 = vrot.slane %v1848_v5, 4  ;;  %v2459_v13 = vrot.slane %v1646_v7, 6  ;;  %v1865_v22 = vshrl.u32 %v15938_v16, 16 }
  0xa9   :  { %v1868_v39 = vshll.u32 %v15938_v16, 16  ;;  %v1862_v29 = vor.u32 %v1861_v2, %v1858_v33  ;;  %v12436_v60 = vsel %vm12105_vm11, %v9065_v10, %v2456_v28  ;;  %v2458_v32 = vrot.slane %v2456_v28, 4 }
  0xaa   :  { %10329 = vmatmul.mubr.bf16.gmra.mxu1 %v12264_v48  ;;  %v15939_v30 = vshrl.u32 %v11252_v56, 16  ;;  %v1853_v19 = vsel %vm12098_vm8, %v1849_v41, %v1852_v47  ;;  %v1867_v24 = vrot.slane %v1865_v22, 5  ;;  %v15940_v63 = vshll.u32 %v11252_v56, 16  ;;  %v2356_v48 = vld [vmem:[%s15732_s0 + $0x6c] sm:$0xc] }
  0xab   :  { %10332 = vmatprep.mubr.bf16.mxu1 %v12307_v51  ;;  %v1870_v31 = vrot.slane %v1868_v39, 6  ;;  %v1863_v14 = vsel %vm12098_vm8, %v1854_v12, %v1862_v29  ;;  %v2460_v6 = vsel %vm12105_vm11, %v2458_v32, %v2459_v13  ;;  %v1879_v37 = vshrl.u32 %v1647_v3, 16 }
  0xac   :  { %v1873_v0 = vrot.slane %v15939_v30, 5  ;;  %v1874_v7 = vrot.slane %v15940_v63, 6  ;;  %v1882_v51 = vshll.u32 %v1647_v3, 16  ;;  %v12452_v46 = vcombine.low %v1853_v19, %v1863_v14  ;;  %v15945_v19 = vld [vmem:[#allocation24_spill] sm:$0xff] }
  0xad   :  { %v9097_v11 = vcombine.low %v12436_v60, %v2460_v6  ;;  %v1871_v34 = vor.u32 %v1870_v31, %v1867_v24  ;;  %v1881_v56 = vrot.slane %v1879_v37, 5  ;;  %v9066_v23 = vrot.slane %v2356_v48, 10 }
  0xae   :  { %v1875_v36 = vor.u32 %v1874_v7, %v1873_v0  ;;  %v1884_v53 = vrot.slane %v1882_v51, 6  ;;  %v2463_v35 = vrot.slane %v15941_v18, 6  ;;  %10381 = vmatmul.mubr.bf16.gmra.mxu0 %v9094_v9  ;;  %v2466_v38 = vrot.slane %v1647_v3, 6 }
  0xaf   :  { %v1872_v26 = vrot.slane %v1871_v34, 4  ;;  %v1888_v50 = vshrl.u32 %v15942_v1, 16  ;;  %10384 = vmatprep.mubr.bf16.mxu0 %v9095_v21  ;;  %v1891_v54 = vshll.u32 %v15942_v1, 16  ;;  %v15943_v33 = vshrl.u32 %v11315_v59, 16 }
  0xb0   :  { %v1877_v25 = vrot.slane %v1875_v36, 4  ;;  %v1885_v47 = vor.u32 %v1884_v53, %v1881_v56  ;;  %v12468_v49 = vsel %vm12105_vm11, %v9066_v23, %v2463_v35  ;;  %v2465_v44 = vrot.slane %v2463_v35, 4  ;;  %v2358_v56 = vld [vmem:[%s15732_s0 + $0x84] sm:$0xc] }
  0xb1   :  { %v1876_v9 = vsel %vm12098_vm8, %v1872_v26, %v1875_v36  ;;  %v1890_v5 = vrot.slane %v1888_v50, 5  ;;  %v1896_v12 = vrot.slane %v15943_v33, 5  ;;  %v15944_v2 = vshll.u32 %v11315_v59, 16  ;;  %v11083_v50 = vld [vmem:[%s15732_s0 + $0x88] sm:$0xf] }
  0xb2   :  { %10333 = vmatmul.mubr.bf16.gmra.mxu1 %v12350_v8  ;;  %v1886_v40 = vsel %vm12098_vm8, %v1877_v25, %v1885_v47  ;;  %v2467_v21 = vsel %vm12105_vm11, %v2465_v44, %v2466_v38  ;;  %v1893_v28 = vrot.slane %v1891_v54, 6  ;;  %v1902_v41 = vshrl.u32 %v1648_v43, 16  ;;  %v11082_v8 = vld [vmem:[%s15732_s0 + $0x7c] sm:$0xf]  ;;  %v1650_v44 = vld [vmem:[%s15732_s0 + $0x98] sm:$0x3] }
  0xb3   :  { %v1897_v10 = vrot.slane %v15944_v2, 6  ;;  %10336 = vmatprep.mubr.bf16.mxu1 %v12385_v27  ;;  %v12486_v13 = vcombine.low %v1876_v9, %v1886_v40  ;;  %v9098_v59 = vcombine.low %v12468_v49, %v2467_v21  ;;  %v1905_v16 = vshll.u32 %v1648_v43, 16  ;;  %v1649_v27 = vld [vmem:[%s15732_s0 + $0x8c] sm:$0x3] }
  0xb4   :  { %v1894_v22 = vor.u32 %v1893_v28, %v1890_v5  ;;  %v1904_v39 = vrot.slane %v1902_v41, 5  ;;  %v9067_v29 = vrot.slane %v2357_v42, 10  ;;  %v2470_v60 = vrot.slane %v11082_v8, 6 }
  0xb5   :  { %v1898_v3 = vor.u32 %v1897_v10, %v1896_v12  ;;  %v1907_v30 = vrot.slane %v1905_v16, 6  ;;  %v2473_v0 = vrot.slane %v1648_v43, 6  ;;  %v1911_v24 = vshrl.u32 %v15945_v19, 16  ;;  %v2359_v16 = vld [vmem:[%s15732_s0 + $0x90] sm:$0xc] }
  0xb6   :  { %v1895_v31 = vrot.slane %v1894_v22, 4  ;;  %v2471_v63 = vsel %vm12105_vm11, %v9067_v29, %v2470_v60  ;;  %v2472_v7 = vrot.slane %v2470_v60, 4  ;;  %v1914_v48 = vshll.u32 %v15945_v19, 16  ;;  %10385 = vmatmul.mubr.bf16.gmra.mxu0 %v9096_v15 }
  0xb7   :  { %v1900_v32 = vrot.slane %v1898_v3, 4  ;;  %v1908_v14 = vor.u32 %v1907_v30, %v1904_v39  ;;  %v1913_v6 = vrot.slane %v1911_v24, 5  ;;  %v15946_v37 = vshrl.u32 %v11371_v57, 16  ;;  %10388 = vmatprep.mubr.bf16.mxu0 %v9097_v11 }
  0xb8   :  { %v15947_v34 = vshll.u32 %v11371_v57, 16  ;;  %v1899_v53 = vsel %vm12098_vm8, %v1895_v31, %v1898_v3  ;;  %v2474_v17 = vsel %vm12105_vm11, %v2472_v7, %v2473_v0  ;;  %v1916_v52 = vrot.slane %v1914_v48, 6  ;;  %v1651_v7 = vld [vmem:[%s15732_s0 + $0xa4] sm:$0x3] }
  0xb9   :  { %v1919_v51 = vrot.slane %v15946_v37, 5  ;;  %v1925_v15 = vshrl.u32 %v1649_v27, 16  ;;  %v1909_v23 = vsel %vm12098_vm8, %v1900_v32, %v1908_v14  ;;  %v9099_v18 = vcombine.low %v2471_v63, %v2474_v17  ;;  %v15951_v48 = vld [vmem:[#allocation27_spill] sm:$0xff] }
  0xba   :  { %v1920_v36 = vrot.slane %v15947_v34, 6  ;;  %v1928_v57 = vshll.u32 %v1649_v27, 16  ;;  %10337 = vmatmul.mubr.bf16.gmra.mxu1 %v12420_v55  ;;  %v9043_v26 = vcombine.low %v1899_v53, %v1909_v23  ;;  %v1917_v25 = vor.u32 %v1916_v52, %v1913_v6  ;;  %v15948_v55 = vld [vmem:[#allocation26_spill] sm:$0xff] }
  0xbb   :  { %v1927_v38 = vrot.slane %v1925_v15, 5  ;;  %v9068_v11 = vrot.slane %v2358_v56, 10  ;;  %10340 = vmatprep.mubr.bf16.mxu1 %v12452_v46  ;;  %v2477_v47 = vrot.slane %v11083_v50, 6  ;;  %v2480_v49 = vrot.slane %v1649_v27, 6  ;;  %v2360_v23 = vld [vmem:[%s15732_s0 + $0x9c] sm:$0xc] }
  0xbc   :  { %v1921_v35 = vor.u32 %v1920_v36, %v1919_v51  ;;  %v1930_v1 = vrot.slane %v1928_v57, 6  ;;  %v1918_v54 = vrot.slane %v1917_v25, 4  ;;  %v1934_v9 = vshrl.u32 %v15948_v55, 16 }
  0xbd   :  { %v1937_v5 = vshll.u32 %v15948_v55, 16  ;;  %v15949_v33 = vshrl.u32 %v11443_v62, 16  ;;  %v2478_v2 = vsel %vm12105_vm11, %v9068_v11, %v2477_v47  ;;  %v2479_v10 = vrot.slane %v2477_v47, 4  ;;  %v11085_v47 = vld [vmem:[%s15732_s0 + $0xa0] sm:$0xf] }
  0xbe   :  { %v1923_v43 = vrot.slane %v1921_v35, 4  ;;  %v1931_v12 = vor.u32 %v1930_v1, %v1927_v38  ;;  %v15950_v42 = vshll.u32 %v11443_v62, 16  ;;  %v1922_v21 = vsel %vm12098_vm8, %v1918_v54, %v1921_v35  ;;  %10389 = vmatmul.mubr.bf16.gmra.mxu0 %v9098_v59  ;;  %v11084_v59 = vld [vmem:[%s15732_s0 + $0x94] sm:$0xf] }
  0xbf   :  { %v1942_v46 = vrot.slane %v15949_v33, 5  ;;  %v1936_v28 = vrot.slane %v1934_v9, 5  ;;  %v1939_v41 = vrot.slane %v1937_v5, 6  ;;  %v1948_v3 = vshrl.u32 %v1650_v44, 16  ;;  %10392 = vmatprep.mubr.bf16.mxu0 %v9099_v18  ;;  %v15954_v5 = vld [vmem:[#allocation28_spill] sm:$0xff] }
  0xc0   :  { %v1943_v40 = vrot.slane %v15950_v42, 6  ;;  %v1932_v22 = vsel %vm12098_vm8, %v1923_v43, %v1931_v12  ;;  %v2481_v39 = vsel %vm12105_vm11, %v2479_v10, %v2480_v49  ;;  %v1951_v62 = vshll.u32 %v1650_v44, 16 }
  0xc1   :  { %v9044_v8 = vcombine.low %v1922_v21, %v1932_v22  ;;  %v9100_v60 = vcombine.low %v2478_v2, %v2481_v39  ;;  %v1940_v32 = vor.u32 %v1939_v41, %v1936_v28  ;;  %v1950_v30 = vrot.slane %v1948_v3, 5 }
  0xc2   :  { %v1944_v29 = vor.u32 %v1943_v40, %v1942_v46  ;;  %v1953_v27 = vrot.slane %v1951_v62, 6  ;;  %v9069_v19 = vrot.slane %v2359_v16, 10  ;;  %v2484_v24 = vrot.slane %v11084_v59, 6  ;;  %10341 = vmatmul.mubr.bf16.gmra.mxu1 %v12486_v13  ;;  %v2361_v46 = vld [vmem:[%s15732_s0 + $0xa8] sm:$0xc]  ;;  %v10957_v40 = vld [vmem:[%s15733_s3 + $0x78] sm:$0xff]  }
  0xc3   :  { %v1941_v31 = vrot.slane %v1940_v32, 4  ;;  %v2487_v63 = vrot.slane %v1650_v44, 6  ;;  %v1957_v14 = vshrl.u32 %v15951_v48, 16  ;;  %v1960_v6 = vshll.u32 %v15951_v48, 16  ;;  %10344 = vmatprep.mubr.bf16.mxu1 %v9043_v26  ;;  %v1652_v44 = vld [vmem:[%s15732_s0 + $0xb0] sm:$0x3]  ;;  %10404 = vmatprep.subr.bf16.mxu1 %v10957_v40 }
  0xc4   :  { %v1946_v0 = vrot.slane %v1944_v29, 4  ;;  %v1954_v37 = vor.u32 %v1953_v27, %v1950_v30  ;;  %v2485_v51 = vsel %vm12105_vm11, %v9069_v19, %v2484_v24  ;;  %v2486_v34 = vrot.slane %v2484_v24, 4  ;;  %v1653_v27 = vld [vmem:[%s15732_s0 + $0xbc] sm:$0x3]  ;;  %10405 = vmatpush3.bf16.msra.mxu1 %v10957_v40  ;;  %v11086_v24 = vld [vmem:[%s15732_s0 + $0xac] sm:$0xf] }
  0xc5   :  { %v15952_v36 = vshrl.u32 %v15920_v45, 16  ;;  %v1945_v13 = vsel %vm12098_vm8, %v1941_v31, %v1944_v29  ;;  %v1959_v53 = vrot.slane %v1957_v14, 5  ;;  %v1962_v17 = vrot.slane %v1960_v6, 6  ;;  %v15957_v14 = vld [vmem:[#allocation10_spill] sm:$0xff] }
  0xc6   :  { %v15953_v52 = vshll.u32 %v15920_v45, 16  ;;  %v1955_v18 = vsel %vm12098_vm8, %v1946_v0, %v1954_v37  ;;  %v2488_v35 = vsel %vm12105_vm11, %v2486_v34, %v2487_v63  ;;  %v1971_v57 = vshrl.u32 %v1651_v7, 16  ;;  %10393 = vmatmul.mubr.bf16.gmra.mxu0 %v9100_v60  ;;  %v2362_v37 = vld [vmem:[%s15732_s0 + $0xb4] sm:$0xc] }
  0xc7   :  { %v1965_v56 = vrot.slane %v15952_v36, 5  ;;  %v1974_v26 = vshll.u32 %v1651_v7, 16  ;;  %v9045_v25 = vcombine.low %v1945_v13, %v1955_v18  ;;  %v9101_v38 = vcombine.low %v2485_v51, %v2488_v35  ;;  %v10958_v13 = vld [vmem:[%s15733_s3 + $0x70] sm:$0xff]  }
  0xc8   :  { %v1966_v15 = vrot.slane %v15953_v52, 6  ;;  %v1963_v11 = vor.u32 %v1962_v17, %v1959_v53  ;;  %v1973_v1 = vrot.slane %v1971_v57, 5  ;;  %v9070_v50 = vrot.slane %v2360_v23, 10  ;;  %10406 = vmatprep.subr.bf16.mxu1 %v10958_v13 }
  0xc9   :  { %v1976_v45 = vrot.slane %v1974_v26, 6  ;;  %v2491_v49 = vrot.slane %v11085_v47, 6  ;;  %10396 = vmatprep.mubr.bf16.mxu0 %v9101_v38  ;;  %v2494_v9 = vrot.slane %v1651_v7, 6  ;;  %v1980_v33 = vshrl.u32 %v15954_v5, 16  ;;  %10407 = vmatpush3.bf16.msra.mxu1 %v10958_v13 }
  0xca   :  { %v1967_v43 = vor.u32 %v1966_v15, %v1965_v56  ;;  %v1964_v54 = vrot.slane %v1963_v11, 4  ;;  %v1983_v42 = vshll.u32 %v15954_v5, 16  ;;  %10345 = vmatmul.mubr.bf16.gmra.mxu1 %v9044_v8  ;;  %v15955_v41 = vshrl.u32 %v15882_v61, 16 }
  0xcb   :  { %v1977_v12 = vor.u32 %v1976_v45, %v1973_v1  ;;  %v2492_v2 = vsel %vm12105_vm11, %v9070_v50, %v2491_v49  ;;  %v2493_v10 = vrot.slane %v2491_v49, 4  ;;  %v1982_v28 = vrot.slane %v1980_v33, 5  ;;  %10348 = vmatprep.mubr.bf16.mxu1 %v9045_v25 }
  0xcc   :  { %v1969_v55 = vrot.slane %v1967_v43, 4  ;;  %v1968_v21 = vsel %vm12098_vm8, %v1964_v54, %v1967_v43  ;;  %v1988_v3 = vrot.slane %v15955_v41, 5  ;;  %v15956_v16 = vshll.u32 %v15882_v61, 16  ;;  %v11087_v54 = vld [vmem:[%s15732_s0 + $0xb8] sm:$0xf]  ;;  %v10960_v41 = vld [vmem:[%s15733_s3 + $0x60] sm:$0xff]  }
  0xcd   :  { %v2495_v29 = vsel %vm12105_vm11, %v2493_v10, %v2494_v9  ;;  %v1985_v62 = vrot.slane %v1983_v42, 6  ;;  %v1994_v60 = vshrl.u32 %v1652_v44, 16  ;;  %v1997_v0 = vshll.u32 %v1652_v44, 16  ;;  %v10959_v10 = vld [vmem:[%s15733_s3 + $0x68] sm:$0xff]  }
  0xce   :  { %v1989_v22 = vrot.slane %v15956_v16, 6  ;;  %v1978_v39 = vsel %vm12098_vm8, %v1969_v55, %v1977_v12  ;;  %v9102_v32 = vcombine.low %v2492_v2, %v2495_v29  ;;  %v9071_v59 = vrot.slane %v2361_v46, 10  ;;  %10408 = vmatprep.subr.bf16.mxu1 %v10959_v10 }
  0xcf   :  { %v9046_v8 = vcombine.low %v1968_v21, %v1978_v39  ;;  %v1986_v61 = vor.u32 %v1985_v62, %v1982_v28  ;;  %v1996_v19 = vrot.slane %v1994_v60, 5  ;;  %v2498_v31 = vrot.slane %v11086_v24, 6  ;;  %10409 = vmatpush3.bf16.msra.mxu1 %v10959_v10  ;;  %v10964_v39 = vld [vmem:[%s15733_s3 + $0x28] sm:$0xff]   ;;  %v10962_v62 = vld [vmem:[%s15733_s3 + $0x58] sm:$0xff]  }
  0xd0   :  { %v1990_v30 = vor.u32 %v1989_v22, %v1988_v3  ;;  %v1999_v7 = vrot.slane %v1997_v0, 6  ;;  %v2501_v48 = vrot.slane %v1652_v44, 6  ;;  %v2003_v6 = vshrl.u32 %v15957_v14, 16  ;;  %10397 = vmatmul.mubr.bf16.gmra.mxu0 %v9102_v32  ;;  %10410 = vmatprep.subr.bf16.mxu1 %v10960_v41  ;;  %v10967_v0 = vld [vmem:[%s15733_s3 + $0x18] sm:$0xff]  }
  0xd1   :  { %v1987_v51 = vrot.slane %v1986_v61, 4  ;;  %v2499_v34 = vsel %vm12105_vm11, %v9071_v59, %v2498_v31  ;;  %v2500_v36 = vrot.slane %v2498_v31, 4  ;;  %v2006_v56 = vshll.u32 %v15957_v14, 16  ;;  %10456 = vmatprep.subr.bf16.mxu0 %v10964_v39  ;;  %v10969_v59 = vld [vmem:[%s15733_s3 + $0x10] sm:$0xff]  }
  0xd2   :  { %v1992_v63 = vrot.slane %v1990_v30, 4  ;;  %v2000_v53 = vor.u32 %v1999_v7, %v1996_v19  ;;  %v2005_v17 = vrot.slane %v2003_v6, 5  ;;  %v15958_v52 = vshrl.u32 %v15929_v4, 16  ;;  %10349 = vmatmul.mubr.bf16.gmra.mxu1 %v9046_v8  ;;  %10457 = vmatpush3.bf16.msra.mxu0 %v10964_v39  ;;  %v10966_v8 = vld [vmem:[%s15733_s3 + $0x20] sm:$0xff]   ;;  %v10965_v19 = vld [vmem:[%s15733_s3 + $0x50] sm:$0xff]  }
  0xd3   :  { %v15959_v23 = vshll.u32 %v15929_v4, 16  ;;  %v1991_v35 = vsel %vm12098_vm8, %v1987_v51, %v1990_v30  ;;  %v2502_v57 = vsel %vm12105_vm11, %v2500_v36, %v2501_v48  ;;  %v2008_v26 = vrot.slane %v2006_v56, 6  ;;  %10411 = vmatpush3.bf16.msra.mxu1 %v10960_v41  ;;  %10458 = vmatprep.subr.bf16.mxu0 %v10966_v8  ;;  %v10968_v48 = vld [vmem:[%s15733_s3 + $0x48] sm:$0xff]   ;;  %v10972_v6 = vld [vmem:[%s15733_s3] sm:$0xff]  }
  0xd4   :  { %v2011_v15 = vrot.slane %v15958_v52, 5  ;;  %v2017_v25 = vshrl.u32 %v1653_v27, 16  ;;  %v2001_v38 = vsel %vm12098_vm8, %v1992_v63, %v2000_v53  ;;  %v9103_v11 = vcombine.low %v2499_v34, %v2502_v57  ;;  %10412 = vmatprep.subr.bf16.mxu1 %v10962_v62  ;;  %v10970_v63 = vld [vmem:[%s15733_s3 + $0x8] sm:$0xff]   ;;  %v10971_v51 = vld [vmem:[%s15733_s3 + $0x40] sm:$0xff]  }
  0xd5   :  { %v2012_v18 = vrot.slane %v15959_v23, 6  ;;  %v2020_v1 = vshll.u32 %v1653_v27, 16  ;;  %v9047_v45 = vcombine.low %v1991_v35, %v2001_v38  ;;  %v2009_v50 = vor.u32 %v2008_v26, %v2005_v17  ;;  %v12778_v23 = vld [vmem:[%s15733_s3 + $0xb8] sm:$0xff]  }
  0xd6   :  { %v2019_v4 = vrot.slane %v2017_v25, 5  ;;  %v9072_v47 = vrot.slane %v2362_v37, 10  ;;  %10400 = vmatprep.mubr.bf16.mxu0 %v9103_v11  ;;  %v2505_v55 = vrot.slane %v11087_v54, 6  ;;  %v2508_v9 = vrot.slane %v1653_v27, 6  ;;  %10459 = vmatpush3.bf16.msra.mxu0 %v10966_v8  ;;  %15964 = vst [vmem:[#allocation16_spill] sm:$0xff] %v12778_v23 }
  0xd7   :  { %v2013_v43 = vor.u32 %v2012_v18, %v2011_v15  ;;  %v2022_v44 = vrot.slane %v2020_v1, 6  ;;  %10352 = vmatprep.mubr.bf16.mxu1 %v9047_v45  ;;  %v2010_v5 = vrot.slane %v2009_v50, 4  ;;  %v11111_v3 = vmov 0   ;;  %10413 = vmatpush3.bf16.msra.mxu1 %v10962_v62 }
  0xd8   :  { %v2506_v46 = vsel %vm12105_vm11, %v9072_v47, %v2505_v55  ;;  %v2507_v12 = vrot.slane %v2505_v55, 4  ;;  %34 = vst [vmem:[#allocation2 + $0x1c] sm:$0xf] %v11111_v3  ;;  %28 = vst [vmem:[#allocation2 + $0x4] sm:$0xf] %v11111_v3  ;;  %10460 = vmatprep.subr.bf16.mxu0 %v10967_v0  ;;  %10414 = vmatprep.subr.bf16.mxu1 %v10965_v19 }
  0xd9   :  { %v2015_v49 = vrot.slane %v2013_v43, 4  ;;  %v2023_v33 = vor.u32 %v2022_v44, %v2019_v4  ;;  %v2014_v2 = vsel %vm12098_vm8, %v2010_v5, %v2013_v43  ;;  %29 = vst [vmem:[#allocation2 + $0x8] sm:$0xf] %v11111_v3  ;;  %30 = vst [vmem:[#allocation2 + $0xc] sm:$0xf] %v11111_v3 }
  0xda   :  { %v2509_v40 = vsel %vm12105_vm11, %v2507_v12, %v2508_v9  ;;  %31 = vst [vmem:[#allocation2 + $0x10] sm:$0x1] %v11111_v3  ;;  %33 = vst [vmem:[#allocation2 + $0x18] sm:$0xf] %v11111_v3  ;;  %10461 = vmatpush3.bf16.msra.mxu0 %v10967_v0 }
  0xdb   :  { %v2024_v42 = vsel %vm12098_vm8, %v2015_v49, %v2023_v33  ;;  %v9104_v28 = vcombine.low %v2506_v46, %v2509_v40  ;;  %35 = vst [vmem:[#allocation2 + $0x20] sm:$0xf] %v11111_v3  ;;  %36 = vst [vmem:[#allocation2 + $0x24] sm:$0x1] %v11111_v3  ;;  %10462 = vmatprep.subr.bf16.mxu0 %v10969_v59  ;;  %10415 = vmatpush3.bf16.msra.mxu1 %v10965_v19 }
  0xdc   :  { %v9048_v21 = vcombine.low %v2014_v2, %v2024_v42  ;;  %38 = vst [vmem:[#allocation2 + $0x2c] sm:$0xf] %v11111_v3  ;;  %39 = vst [vmem:[#allocation2 + $0x30] sm:$0xf] %v11111_v3  ;;  %10416 = vmatprep.subr.bf16.mxu1 %v10968_v48 }
  0xdd   :  { %10401 = vmatmul.mubr.bf16.gmra.mxu0 %v9104_v28  ;;  %40 = vst [vmem:[#allocation2 + $0x34] sm:$0xf] %v11111_v3  ;;  %41 = vst [vmem:[#allocation2 + $0x38] sm:$0x1] %v11111_v3 }
  0xde   :  { %10353 = vmatmul.mubr.bf16.gmra.mxu1 %v9048_v21  ;;  %43 = vst [vmem:[#allocation2 + $0x40] sm:$0xf] %v11111_v3  ;;  %44 = vst [vmem:[#allocation2 + $0x44] sm:$0xf] %v11111_v3  ;;  %10463 = vmatpush3.bf16.msra.mxu0 %v10969_v59 }
  0xdf   :  { %45 = vst [vmem:[#allocation2 + $0x48] sm:$0xf] %v11111_v3  ;;  %46 = vst [vmem:[#allocation2 + $0x4c] sm:$0x1] %v11111_v3  ;;  %10464 = vmatprep.subr.bf16.mxu0 %v10970_v63  ;;  %10417 = vmatpush3.bf16.msra.mxu1 %v10968_v48 }
  0xe0   :  { %48 = vst [vmem:[#allocation2 + $0x54] sm:$0xf] %v11111_v3  ;;  %49 = vst [vmem:[#allocation2 + $0x58] sm:$0xf] %v11111_v3  ;;  %10418 = vmatprep.subr.bf16.mxu1 %v10971_v51 }
  0xe1   :  { %50 = vst [vmem:[#allocation2 + $0x5c] sm:$0xf] %v11111_v3  ;;  %51 = vst [vmem:[#allocation2 + $0x60] sm:$0x1] %v11111_v3 }
  0xe2   :  { %53 = vst [vmem:[#allocation2 + $0x68] sm:$0xf] %v11111_v3  ;;  %54 = vst [vmem:[#allocation2 + $0x6c] sm:$0xf] %v11111_v3  ;;  %v12707_v16 = vpop.f32.mrf.mxu0  ;;  %v12709_v22 = vpop.f32.mrf.mxu1  ;;  %10465 = vmatpush3.bf16.msra.mxu0 %v10970_v63 }
  0xe3   :  { %55 = vst [vmem:[#allocation2 + $0x70] sm:$0xf] %v11111_v3  ;;  %56 = vst [vmem:[#allocation2 + $0x74] sm:$0x1] %v11111_v3  ;;  %10466 = vmatprep.subr.bf16.mxu0 %v10972_v6  ;;  %10419 = vmatpush3.bf16.msra.mxu1 %v10971_v51 }
  0xe4   :  { %58 = vst [vmem:[#allocation2 + $0x7c] sm:$0xf] %v11111_v3  ;;  %59 = vst [vmem:[#allocation2 + $0x80] sm:$0xf] %v11111_v3  ;;  %v12714_v29 = vpop.f32.mrf.mxu0  ;;  %v12719_v60 = vpop.f32.mrf.mxu1  ;;  %10500 = vmatprep.subr.bf16.mxu1 %v12778_v23 }
  0xe5   :  { %60 = vst [vmem:[#allocation2 + $0x84] sm:$0xf] %v11111_v3  ;;  %61 = vst [vmem:[#allocation2 + $0x88] sm:$0x1] %v11111_v3 }
  0xe6   :  { %63 = vst [vmem:[#allocation2 + $0x90] sm:$0xf] %v11111_v3  ;;  %64 = vst [vmem:[#allocation2 + $0x94] sm:$0xf] %v11111_v3  ;;  %v12724_v32 = vpop.f32.mrf.mxu0  ;;  %v12726_v30 = vpop.f32.mrf.mxu1  ;;  %10467 = vmatpush3.bf16.msra.mxu0 %v10972_v6 }
  0xe7   :  { %65 = vst [vmem:[#allocation2 + $0x98] sm:$0xf] %v11111_v3  ;;  %66 = vst [vmem:[#allocation2 + $0x9c] sm:$0x1] %v11111_v3 }
  0xe8   :  { %68 = vst [vmem:[#allocation2 + $0xa4] sm:$0xf] %v11111_v3  ;;  %69 = vst [vmem:[#allocation2 + $0xa8] sm:$0xf] %v11111_v3  ;;  %v12731_v27 = vpop.f32.mrf.mxu0  ;;  %v12733_v61 = vpop.f32.mrf.mxu1 }
  0xe9   :  { %70 = vst [vmem:[#allocation2 + $0xac] sm:$0xf] %v11111_v3  ;;  %71 = vst [vmem:[#allocation2 + $0xb0] sm:$0x1] %v11111_v3 }
  0xea   :  { %73 = vst [vmem:[#allocation2 + $0xb8] sm:$0xf] %v11111_v3  ;;  %74 = vst [vmem:[#allocation2 + $0xbc] sm:$0xf] %v11111_v3 }
  0xeb   :  { %75 = vst [vmem:[#allocation2 + $0xc0] sm:$0xf] %v11111_v3  ;;  %76 = vst [vmem:[#allocation2 + $0xc4] sm:$0x1] %v11111_v3 }
  0xec   :  { %78 = vst [vmem:[#allocation2 + $0xcc] sm:$0xf] %v11111_v3  ;;  %79 = vst [vmem:[#allocation2 + $0xd0] sm:$0xf] %v11111_v3 }
  0xed   :  { %80 = vst [vmem:[#allocation2 + $0xd4] sm:$0xf] %v11111_v3  ;;  %81 = vst [vmem:[#allocation2 + $0xd8] sm:$0x1] %v11111_v3  ;;  %v12741_v24 = vpop.f32.mrf.mxu0 }
  0xee   :  { %83 = vst [vmem:[#allocation2 + $0xe0] sm:$0xf] %v11111_v3  ;;  %84 = vst [vmem:[#allocation2 + $0xe4] sm:$0xf] %v11111_v3 }
  0xef   :  { %85 = vst [vmem:[#allocation2 + $0xe8] sm:$0xf] %v11111_v3  ;;  %86 = vst [vmem:[#allocation2 + $0xec] sm:$0x1] %v11111_v3  ;;  %v737_v7 = vpop.f32.mrf.mxu0 }
  0xf0   :  { %88 = vst [vmem:[#allocation2 + $0xf4] sm:$0xf] %v11111_v3  ;;  %89 = vst [vmem:[#allocation2 + $0xf8] sm:$0xf] %v11111_v3 }
  0xf1   :  { %90 = vst [vmem:[#allocation2 + $0xfc] sm:$0xf] %v11111_v3  ;;  %91 = vst [vmem:[#allocation2 + $0x100] sm:$0x1] %v11111_v3  ;;  %v12756_v37 = vpop.f32.mrf.mxu0 }
  0xf2   :  { %93 = vst [vmem:[#allocation2 + $0x108] sm:$0xf] %v11111_v3  ;;  %94 = vst [vmem:[#allocation2 + $0x10c] sm:$0xf] %v11111_v3  ;;  %v12743_v31 = vpop.f32.mrf.mxu1 }
  0xf3   :  { %95 = vst [vmem:[#allocation2 + $0x110] sm:$0xf] %v11111_v3  ;;  %96 = vst [vmem:[#allocation2 + $0x114] sm:$0x1] %v11111_v3  ;;  %v12763_v36 = vpop.f32.mrf.mxu0 }
  0xf4   :  { %98 = vst [vmem:[#allocation2 + $0x11c] sm:$0xf] %v11111_v3  ;;  %99 = vst [vmem:[#allocation2 + $0x120] sm:$0xf] %v11111_v3  ;;  %v12751_v14 = vpop.f32.mrf.mxu1 }
  0xf5   :  { %100 = vst [vmem:[#allocation2 + $0x124] sm:$0xf] %v11111_v3  ;;  %101 = vst [vmem:[#allocation2 + $0x128] sm:$0x1] %v11111_v3 }
  0xf6   :  { %103 = vst [vmem:[#allocation2 + $0x130] sm:$0xf] %v11111_v3  ;;  %104 = vst [vmem:[#allocation2 + $0x134] sm:$0xf] %v11111_v3  ;;  %v12761_v34 = vpop.f32.mrf.mxu1 }
  0xf7   :  { %105 = vst [vmem:[#allocation2 + $0x138] sm:$0xf] %v11111_v3  ;;  %106 = vst [vmem:[#allocation2 + $0x13c] sm:$0x1] %v11111_v3 }
  0xf8   :  { %15960 = vst [vmem:[#allocation12_spill] sm:$0xff] %v12726_v30  ;;  %15961 = vst [vmem:[#allocation11_spill] sm:$0xff] %v12733_v61  ;;  %v12765_v56 = vpop.f32.mrf.mxu1 }
  0xf9   :  { %15962 = vst [vmem:[#allocation13_spill] sm:$0xff] %v12743_v31  ;;  %15963 = vst [vmem:[#allocation14_spill] sm:$0xff] %v12765_v56 }
  0xfe   :  { %v12767_v13 = vpop.f32.mrf.mxu0 }
 0x100   :  { %v753_v17 = vpop.f32.mrf.mxu0 }
 0x102   :  { %v12773_v15 = vpop.f32.mrf.mxu0 }
 0x103   :  { %v12769_v53 = vpop.f32.mrf.mxu1 }
 0x104   :  { %v12783_v35 = vpop.f32.mrf.mxu0 }
 0x105   :  { %v12771_v52 = vpop.f32.mrf.mxu1 }
 0x107   :  { %v12781_v18 = vpop.f32.mrf.mxu1 }
 0x109   :  { %v12785_v57 = vpop.f32.mrf.mxu1 }
 0x10a   :  { %15965 = vst [vmem:[#allocation4_spill] sm:$0xff] %v12785_v57 }
 0x111   :  { %v12787_v26 = vpop.f32.mrf.mxu0 }
 0x113   :  { %v769_v25 = vpop.f32.mrf.mxu0  ;;  %v12789_v38 = vpop.f32.mrf.mxu1 }
 0x115   :  { %v12791_v11 = vpop.f32.mrf.mxu0  ;;  %v12793_v43 = vpop.f32.mrf.mxu1 }
 0x117   :  { %v12795_v1 = vpop.f32.mrf.mxu0  ;;  %v12797_v45 = vpop.f32.mrf.mxu1 }
 0x119   :  { %v12799_v50 = vpop.f32.mrf.mxu0  ;;  %v12801_v4 = vpop.f32.mrf.mxu1 }
 0x11a   :  { %15966 = vst [vmem:[#allocation7_spill] sm:$0xff] %v12801_v4 }
 0x11b   :  { %v1479_v47 = vpop.f32.mrf.mxu0  ;;  %v12803_v49 = vpop.f32.mrf.mxu1 }
 0x11d   :  { %v12805_v44 = vpop.f32.mrf.mxu0  ;;  %v1026_v54 = vpop.f32.mrf.mxu1 }
 0x11e   :  { %v1027_v55 = vadd.f32 %v1026_v54, %v12714_v29 }
 0x11f   :  { %v12808_v9 = vpop.f32.mrf.mxu0  ;;  %v12810_v5 = vpop.f32.mrf.mxu1 }
 0x120   :  { %v12812_v33 = vadd.f32 %v1479_v47, %v1027_v55 }
 0x121   :  { %v12814_v46 = vpop.f32.mrf.mxu0  ;;  %v12816_v12 = vpop.f32.mrf.mxu1 }
 0x122   :  { %15967 = vst [vmem:[#allocation18_spill] sm:$0xff] %v12812_v33 }
 0x123   :  { %v1495_v2 = vpop.f32.mrf.mxu0 }
 0x124   :  { %v12818_v10 = vpop.f32.mrf.mxu1 }
 0x125   :  { %v12820_v42 = vpop.f32.mrf.mxu0 }
 0x126   :  { %v1042_v40 = vpop.f32.mrf.mxu1 }
 0x127   :  { %v1043_v21 = vadd.f32 %v1042_v40, %v737_v7  ;;  %v12822_v28 = vpop.f32.mrf.mxu0 }
 0x128   :  { %v12824_v41 = vpop.f32.mrf.mxu1 }
 0x129   :  { %v12826_v58 = vadd.f32 %v1495_v2, %v1043_v21  ;;  %v12828_v3 = vpop.f32.mrf.mxu0 }
 0x12a   :  { %v12830_v20 = vpop.f32.mrf.mxu1 }
 0x12b   :  { %15968 = vst [vmem:[#allocation8_spill] sm:$0xff] %v12826_v58  ;;  %v1511_v39 = vpop.f32.mrf.mxu0 }
 0x12c   :  { %v12832_v29 = vpop.f32.mrf.mxu1 }
 0x12d   :  { %v12834_v62 = vpop.f32.mrf.mxu0 }
 0x12e   :  { %v1058_v8 = vpop.f32.mrf.mxu1 }
 0x12f   :  { %v1059_v0 = vadd.f32 %v1058_v8, %v753_v17  ;;  %v12836_v19 = vpop.f32.mrf.mxu0  ;;  %v12855_v17 = vld [vmem:[%s15733_s3 + $0xf8] sm:$0xff]  }
 0x130   :  { %v12838_v59 = vpop.f32.mrf.mxu1  ;;  %15971 = vst [vmem:[#allocation15_spill] sm:$0xff] %v12855_v17  ;;  %10548 = vmatprep.subr.bf16.mxu0 %v12855_v17 }
 0x131   :  { %v12840_v63 = vadd.f32 %v1511_v39, %v1059_v0  ;;  %v12842_v7 = vpop.f32.mrf.mxu0 }
 0x132   :  { %v12844_v48 = vpop.f32.mrf.mxu1 }
 0x133   :  { %15969 = vst [vmem:[#allocation9_spill] sm:$0xff] %v12840_v63  ;;  %v1527_v6 = vpop.f32.mrf.mxu0 }
 0x134   :  { %v12846_v51 = vpop.f32.mrf.mxu1 }
 0x135   :  { %v12848_v47 = vpop.f32.mrf.mxu0 }
 0x136   :  { %v1074_v54 = vpop.f32.mrf.mxu1 }
 0x137   :  { %v1075_v55 = vadd.f32 %v1074_v54, %v769_v25  ;;  %v12850_v2 = vpop.f32.mrf.mxu0 }
 0x138   :  { %15970 = vst [vmem:[#allocation19_spill] sm:$0xff] %v12850_v2  ;;  %v12857_v40 = vpop.f32.mrf.mxu1 }
 0x139   :  { %v12859_v21 = vadd.f32 %v1527_v6, %v1075_v55  ;;  %v12861_v39 = vpop.f32.mrf.mxu0 }
 0x13a   :  { %15973 = vst [vmem:[#allocation21_spill] sm:$0xff] %v12861_v39  ;;  %v12864_v8 = vpop.f32.mrf.mxu1  ;;  %v12895_v39 = vld [vmem:[#allocation2 + $0x40] sm:$0x8] }
 0x13b   :  { %15972 = vst [vmem:[#allocation20_spill] sm:$0xff] %v12859_v21  ;;  %v1543_v0 = vpop.f32.mrf.mxu0  ;;  %15984 = vst [vmem:[#allocation29_spill] sm:$0xff] %v12895_v39 }
 0x13d   :  { %v12866_v23 = vpop.f32.mrf.mxu1  ;;  %v12868_v25 = vpop.f32.mrf.mxu0 }
 0x13e   :  { %15974 = vst [vmem:[#allocation3_spill] sm:$0xff] %v12868_v25 }
 0x13f   :  { %v1090_v54 = vpop.f32.mrf.mxu1  ;;  %v12871_v4 = vpop.f32.mrf.mxu0 }
 0x140   :  { %v1091_v63 = vadd.f32 %v1090_v54, %v12719_v60  ;;  %15975 = vst [vmem:[#allocation6_spill] sm:$0xff] %v12871_v4  ;;  %v12886_v54 = vld [vmem:[#allocation2 + $0x4] sm:$0x8]  ;;  %v12888_v4 = vld [vmem:[#allocation2 + $0x18] sm:$0x8] }
 0x141   :  { %v12873_v58 = vpop.f32.mrf.mxu1  ;;  %15982 = vst [vmem:[#allocation28_spill] sm:$0xff] %v12886_v54 }
 0x142   :  { %15976 = vst [vmem:[#allocation22_spill] sm:$0xff] %v12873_v58  ;;  %v12875_v6 = vadd.f32 %v1543_v0, %v1091_v63 }
 0x143   :  { %v12877_v55 = vpop.f32.mrf.mxu0  ;;  %v12879_v21 = vpop.f32.mrf.mxu1 }
 0x144   :  { %15977 = vst [vmem:[#allocation25_spill] sm:$0xff] %v12875_v6  ;;  %15978 = vst [vmem:[#allocation23_spill] sm:$0xff] %v12877_v55  ;;  %v3310_v55 = vshrl.u32 %v12886_v54, 16  ;;  %v12920_v54 = vld [vmem:[#allocation2 + $0x54] sm:$0x8] }
 0x145   :  { %15979 = vst [vmem:[#allocation24_spill] sm:$0xff] %v12879_v21  ;;  %v1559_v17 = vpop.f32.mrf.mxu0  ;;  %v12902_v21 = vld [vmem:[#allocation2 + $0x2c] sm:$0x8] }
 0x146   :  { %v12881_v57 = vpop.f32.mrf.mxu1  ;;  %v12908_v58 = vrot.slane %v3310_v55, 11 }
 0x147   :  { %15980 = vst [vmem:[#allocation26_spill] sm:$0xff] %v12881_v57  ;;  %v10299_v56 = vpop.f32.mrf.mxu0  ;;  %v3332_v57 = vshrl.u32 %v12888_v4, 16 }
 0x148   :  { %v1106_v33 = vpop.f32.mrf.mxu1 }
 0x149   :  { %v1107_v25 = vadd.f32 %v1106_v33, %v12751_v14  ;;  %v12884_v31 = vpop.f32.mrf.mxu0  ;;  %v3376_v14 = vshrl.u32 %v12895_v39, 16 }
 0x14a   :  { %15981 = vst [vmem:[#allocation27_spill] sm:$0xff] %v12884_v31  ;;  %v10251_v60 = vpop.f32.mrf.mxu1 }
 0x14b   :  { %v12890_v63 = vadd.f32 %v1559_v17, %v1107_v25  ;;  %v1118_v0 = vadd.f32 %v10251_v60, %v12761_v34  ;;  %v3354_v60 = vshrl.u32 %v12902_v21, 16  ;;  %v12918_v34 = vrot.slane %v3376_v14, 11 }
 0x14c   :  { %v10302_v6 = vpop.f32.mrf.mxu0  ;;  %v12897_v2 = vpop.f32.mrf.mxu1  ;;  %v1051_v14 = vadd.f32 %v12818_v10, %v12741_v24  ;;  %v1046_v24 = vadd.f32 %v12830_v20, %v12763_v36 }
 0x14d   :  { %15983 = vst [vmem:[#allocation10_spill] sm:$0xff] %v12890_v63  ;;  %15985 = vst [vmem:[#allocation30_spill] sm:$0xff] %v12897_v2  ;;  %v12900_v33 = vadd.f32 %v10299_v56, %v1118_v0  ;;  %v12910_v2 = vrot.slane %v3332_v57, 11  ;;  %v12913_v0 = vld [vmem:[#allocation2 + $0x68] sm:$0x8]  ;;  %v1038_v57 = vadd.f32 %v12810_v5, %v12724_v32 }
 0x14e   :  { %v1575_v31 = vpop.f32.mrf.mxu0  ;;  %15987 = vst [vmem:[#allocation32_spill] sm:$0xff] %v12918_v34  ;;  %v12935_v34 = vrot.slane %v3354_v60, 11  ;;  %v12938_v32 = vld [vmem:[#allocation2 + $0x90] sm:$0x8]  ;;  %v12970_v20 = vadd.f32 %v12814_v46, %v1051_v14  ;;  %v12985_v46 = vadd.f32 %v12822_v28, %v1046_v24  ;;  %v13001_v24 = vld [vmem:[#allocation2 + $0xa4] sm:$0x8] }
 0x14f   :  { %15986 = vst [vmem:[#allocation31_spill] sm:$0xff] %v12900_v33  ;;  %v1035_v33 = vadd.f32 %v12803_v49, %v12707_v16  ;;  %v3398_v16 = vshrl.u32 %v12920_v54, 16  ;;  %v1030_v49 = vadd.f32 %v12816_v12, %v12731_v27  ;;  %v3464_v27 = vshrl.u32 %v12938_v32, 16  ;;  %15990 = vst [vmem:[#allocation35_spill] sm:$0xff] %v13001_v24 }
 0x150   :  { %v10254_v17 = vpop.f32.mrf.mxu1  ;;  %v10303_v61 = vpop.f32.mrf.mxu0 }
 0x151   :  { %v1131_v63 = vadd.f32 %v10254_v17, %v12769_v53  ;;  %v3420_v53 = vshrl.u32 %v12913_v0, 16  ;;  %v12947_v12 = vadd.f32 %v12799_v50, %v1035_v33  ;;  %v12967_v36 = vadd.f32 %v12808_v9, %v1030_v49  ;;  %v12982_v9 = vld [vmem:[#allocation2 + $0xb8] sm:$0x8] }
 0x152   :  { %v1122_v30 = vpop.f32.mrf.mxu1  ;;  %v12928_v56 = vpop.f32.mrf.mxu0  ;;  %v1067_v33 = vadd.f32 %v12832_v29, %v12767_v13  ;;  %15989 = vst [vmem:[#allocation34_spill] sm:$0xff] %v12982_v9  ;;  %v1070_v13 = vadd.f32 %v12838_v59, %v12773_v15  ;;  %v1062_v29 = vadd.f32 %v12844_v48, %v12783_v35  ;;  %v3508_v49 = vshrl.u32 %v12982_v9, 16 }
 0x153   :  { %v12925_v55 = vadd.f32 %v10302_v6, %v1131_v63  ;;  %v1123_v17 = vadd.f32 %v1122_v30, %v12771_v52  ;;  %v1054_v30 = vadd.f32 %v12824_v41, %v12756_v37  ;;  %v12954_v60 = vrot.slane %v3420_v53, 11  ;;  %v12956_v37 = vld [vmem:[#allocation2 + $0x7c] sm:$0x8] }
 0x154   :  { %v10255_v25 = vpop.f32.mrf.mxu1  ;;  %v3442_v50 = vshrl.u32 %v12956_v37, 16  ;;  %v13004_v15 = vadd.f32 %v12828_v3, %v1067_v33  ;;  %v1086_v35 = vadd.f32 %v12857_v40, %v12791_v11  ;;  %v13017_v33 = vld [vmem:[#allocation2 + $0xe0] sm:$0x8]  ;;  %v13020_v11 = vadd.f32 %v12834_v62, %v1070_v13  ;;  %v15995_v13 = vld [vmem:[#allocation12_spill] sm:$0xff] }
 0x155   :  { %v12942_v52 = vadd.f32 %v1575_v31, %v1123_v17  ;;  %v1134_v5 = vadd.f32 %v10255_v25, %v12781_v18  ;;  %v12959_v31 = vadd.f32 %v12805_v44, %v1038_v57  ;;  %v12963_v25 = vrot.slane %v3398_v16, 11  ;;  %15991 = vst [vmem:[#allocation36_spill] sm:$0xff] %v13017_v33  ;;  %v16007_v16 = vld [vmem:[#allocation18_spill] sm:$0xff] }
 0x156   :  { %v10306_v6 = vpop.f32.mrf.mxu0  ;;  %v12951_v10 = vpop.f32.mrf.mxu1  ;;  %v12999_v28 = vrot.slane %v3442_v50, 11  ;;  %v13023_v40 = vadd.f32 %v12836_v19, %v1062_v29  ;;  %v13040_v19 = vadd.f32 %v12848_v47, %v1086_v35  ;;  %v15996_v29 = vld [vmem:[#allocation22_spill] sm:$0xff]  ;;  %v13058_v47 = vld [vmem:[%s15734_s2] ss:$0 sm:$0xff] }
 0x157   :  { %v12961_v18 = vadd.f32 %v10303_v61, %v1134_v5  ;;  %v12976_v61 = vadd.f32 %v12820_v42, %v1054_v30  ;;  %v12980_v5 = vrot.slane %v3464_v27, 11 }
 0x158   :  { %v1591_v41 = vpop.f32.mrf.mxu0 }
 0x159   :  { %15988 = vst [vmem:[#allocation33_spill] sm:$0xff] %v12980_v5 }
 0x15a   :  { %v10258_v53 = vpop.f32.mrf.mxu1  ;;  %v10307_v17 = vpop.f32.mrf.mxu0 }
 0x15b   :  { %v1147_v57 = vadd.f32 %v10258_v53, %v12789_v38  ;;  %v1083_v38 = vadd.f32 %v12846_v51, %v12787_v26  ;;  %v3486_v26 = vshrl.u32 %v13001_v24, 16  ;;  %v1099_v51 = vadd.f32 %v12866_v23, %v12709_v22  ;;  %v16019_v24 = vld [vmem:[#allocation27_spill] sm:$0xff] }
 0x15c   :  { %v1138_v42 = vpop.f32.mrf.mxu1  ;;  %v12997_v27 = vpop.f32.mrf.mxu0  ;;  %v3552_v22 = vshrl.u32 %v13017_v33, 16  ;;  %v16009_v33 = vld [vmem:[#allocation3_spill] sm:$0xff] }
 0x15d   :  { %v12994_v14 = vadd.f32 %v10306_v6, %v1147_v57  ;;  %v1139_v30 = vadd.f32 %v1138_v42, %v12793_v43  ;;  %v1078_v43 = vadd.f32 %v12864_v8, %v12795_v1  ;;  %v13027_v57 = vrot.slane %v3508_v49, 11  ;;  %v13029_v1 = vld [vmem:[#allocation2 + $0xcc] sm:$0x8]  ;;  %v15997_v49 = vld [vmem:[#allocation11_spill] sm:$0xff] }
 0x15e   :  { %v10259_v59 = vpop.f32.mrf.mxu1  ;;  %v10374_v3 = vpop.f32.mrf.mxu0  ;;  %15993 = vst [vmem:[#allocation38_spill] sm:$0xff] %v13029_v1  ;;  %v13033_v23 = vadd.f32 %v12842_v7, %v1083_v38  ;;  %v1102_v42 = vadd.f32 %v15996_v29, %v15995_v13  ;;  %v13046_v44 = vrot.slane %v3486_v26, 11  ;;  %v16000_v7 = vld [vmem:[#allocation19_spill] sm:$0xff]  ;;  %v16001_v38 = vld [vmem:[#allocation21_spill] sm:$0xff]  ;;  %v13061_v29 = vld [vmem:[#allocation2 + $0x108] sm:$0x8] }
 0x15f   :  { %v13014_v6 = vadd.f32 %v1591_v41, %v1139_v30  ;;  %v1150_v50 = vadd.f32 %v10259_v59, %v12797_v45  ;;  %15992 = vst [vmem:[#allocation37_spill] sm:$0xff] %v13027_v57  ;;  %v3530_v41 = vshrl.u32 %v13029_v1, 16  ;;  %v15998_v30 = vld [vmem:[#allocation24_spill] sm:$0xff]  ;;  %16002 = vst [vmem:[#allocation22_spill] sm:$0xff] %v13061_v29  ;;  %v16003_v26 = vld [vmem:[#allocation13_spill] sm:$0xff] }
 0x160   :  { %v13025_v53 = vpop.f32.mrf.mxu1  ;;  %v2673_v8 = vpop.f32.mrf.mxu0  ;;  %v1094_v59 = vadd.f32 %v15998_v30, %v15997_v49  ;;  %15999 = vst [vmem:[#allocation12_spill] sm:$0xff] %v13046_v44  ;;  %v16004_v49 = vld [vmem:[#allocation26_spill] sm:$0xff]  ;;  %v13076_v44 = vadd.f32 %v16009_v33, %v1102_v42  ;;  %v16015_v42 = vld [vmem:[#allocation23_spill] sm:$0xff] }
 0x161   :  { %v13035_v45 = vadd.f32 %v10307_v17, %v1150_v50  ;;  %v13049_v17 = vadd.f32 %v16000_v7, %v1078_v43  ;;  %v13052_v50 = vadd.f32 %v16001_v38, %v1099_v51  ;;  %v1115_v30 = vadd.f32 %v16004_v49, %v16003_v26  ;;  %v13068_v38 = vld [vmem:[#allocation2 + $0xf4] sm:$0x8]  ;;  %v16010_v26 = vld [vmem:[#allocation6_spill] sm:$0xff] }
 0x162   :  { %v10326_v48 = vpop.f32.mrf.mxu1  ;;  %v10375_v35 = vpop.f32.mrf.mxu0  ;;  %v13066_v51 = vrot.slane %v3552_v22, 11  ;;  %16006 = vst [vmem:[#allocation24_spill] sm:$0xff] %v13068_v38  ;;  %v13072_v57 = vrot.slane %v3530_v41, 11  ;;  %v3574_v13 = vshrl.u32 %v13068_v38, 16  ;;  %v13079_v49 = vadd.f32 %v16010_v26, %v1094_v59  ;;  %v16011_v22 = vld [vmem:[#allocation14_spill] sm:$0xff]  ;;  %v16016_v26 = vld [vmem:[#allocation4_spill] sm:$0xff] }
 0x163   :  { %15994 = vst [vmem:[#allocation39_spill] sm:$0xff] %v13035_v45  ;;  %v2317_v62 = vadd.f32 %v10326_v48, %v12947_v12  ;;  %v3596_v12 = vshrl.u32 %v13061_v29, 16  ;;  %v16012_v7 = vld [vmem:[#allocation30_spill] sm:$0xff]  ;;  %v13092_v59 = vadd.f32 %v16015_v42, %v1115_v30 }
 0x164   :  { %v2188_v43 = vpop.f32.mrf.mxu1  ;;  %16005 = vst [vmem:[#allocation11_spill] sm:$0xff] %v13066_v51  ;;  %v2676_v63 = vpop.f32.mrf.mxu0  ;;  %16008 = vst [vmem:[#allocation19_spill] sm:$0xff] %v13072_v57  ;;  %v1110_v51 = vadd.f32 %v16012_v7, %v16011_v22  ;;  %v13088_v57 = vld [vmem:[#allocation2 + $0x130] sm:$0x8]  ;;  %v1126_v7 = vadd.f32 %v12951_v10, %v16016_v26  ;;  %v4567_v10 = vld [vmem:[#allocation2 + $0x24] sm:$0x1] }
 0x165   :  { %v2802_v48 = vadd.f32 %v10374_v3, %v2317_v62  ;;  %v2315_v39 = vadd.f32 %v2188_v43, %v16007_v16  ;;  %v13084_v3 = vld [vmem:[#allocation2 + $0x11c] sm:$0x8]  ;;  %16014 = vst [vmem:[#allocation13_spill] sm:$0xff] %v13088_v57  ;;  %v13097_v29 = vrot.slane %v3596_v12, 11  ;;  %v3640_v9 = vshrl.u32 %v13088_v57, 16 }
 0x166   :  { %v10327_v1 = vpop.f32.mrf.mxu1  ;;  %16013 = vst [vmem:[#allocation21_spill] sm:$0xff] %v13084_v3  ;;  %v10378_v43 = vpop.f32.mrf.mxu0  ;;  %v3618_v33 = vshrl.u32 %v13084_v3, 16  ;;  %v13103_v5 = vadd.f32 %v16019_v24, %v1110_v51  ;;  %v13112_v24 = vadd.f32 %v12928_v56, %v1126_v7 }
 0x167   :  { %v2841_v16 = vadd.f32 %v13058_v47, %v2802_v48  ;;  %v2800_v62 = vadd.f32 %v2673_v8, %v2315_v39  ;;  %v2318_v41 = vadd.f32 %v10327_v1, %v12959_v31  ;;  %16017 = vst [vmem:[#allocation26_spill] sm:$0xff] %v13097_v29  ;;  %v13100_v8 = vrot.slane %v3574_v13, 11  ;;  %v4564_v13 = vld [vmem:[#allocation2 + $0x10] sm:$0x1]  ;;  %v4573_v29 = vld [vmem:[#allocation2 + $0x4c] sm:$0x1] }
 0x168   :  { %v2191_v22 = vpop.f32.mrf.mxu1  ;;  %v2689_v1 = vpop.f32.mrf.mxu0  ;;  %v13124_v45 = vrot.slane %v3640_v9, 11 }
 0x169   :  { %v2873_v48 = vmax.f32 %v2841_v16, 0.0  ;;  %v2803_v39 = vadd.f32 %v10375_v35, %v2318_v41  ;;  %v2316_v31 = vadd.f32 %v2191_v22, %v12967_v36  ;;  %16018 = vst [vmem:[#allocation18_spill] sm:$0xff] %v13100_v8  ;;  %v2839_v30 = vadd.f32 %v13058_v47, %v2800_v62 }
 0x16a   :  { %v10330_v42 = vpop.f32.mrf.mxu1  ;;  %v10379_v36 = vpop.f32.mrf.mxu0  ;;  %v13109_v41 = vrot.slane %v3618_v33, 11  ;;  %v4630_v22 = vshll.u32 %v4564_v13, 16  ;;  %v4654_v33 = vshll.u32 %v4567_v10, 16 }
 0x16b   :  { %v9646_v26 = vpack.c.bf16 %v2873_v48, %v2873_v48  ;;  %v2842_v35 = vadd.f32 %v13058_v47, %v2803_v39  ;;  %v2801_v16 = vadd.f32 %v2676_v63, %v2316_v31  ;;  %v2321_v51 = vadd.f32 %v10330_v42, %v12970_v20  ;;  %v16021_v39 = vld [vmem:[#allocation8_spill] sm:$0xff] }
 0x16c   :  { %16020 = vst [vmem:[#allocation3_spill] sm:$0xff] %v13109_v41  ;;  %v2204_v62 = vpop.f32.mrf.mxu1  ;;  %v2692_v31 = vpop.f32.mrf.mxu0  ;;  %v4570_v41 = vld [vmem:[#allocation2 + $0x38] sm:$0x1]  ;;  %v2871_v8 = vmax.f32 %v2839_v30, 0.0  ;;  %v4702_v20 = vshll.u32 %v4573_v29, 16  ;;  %v13122_v10 = vrot.slane %v4630_v22, 5 }
 0x16d   :  { %3033 = vst [vmem:[#allocation2 + $0x1c] sm:$0xf] %v9646_v26  ;;  %v2874_v12 = vmax.f32 %v2842_v35, 0.0  ;;  %v2840_v48 = vadd.f32 %v13058_v47, %v2801_v16  ;;  %v2319_v63 = vadd.f32 %v2204_v62, %v16021_v39  ;;  %v2806_v56 = vadd.f32 %v10378_v43, %v2321_v51  ;;  %v16022_v35 = vld [vmem:[#allocation7_spill] sm:$0xff] }
 0x16e   :  { %v10331_v7 = vpop.f32.mrf.mxu1  ;;  %v4678_v3 = vshll.u32 %v4570_v41, 16  ;;  %v10382_v26 = vpop.f32.mrf.mxu0  ;;  %v1142_v16 = vadd.f32 %v13025_v53, %v16022_v35 }
 0x16f   :  { %v9647_v42 = vpack.c.bf16 %v2874_v12, %v2874_v12  ;;  %v2872_v13 = vmax.f32 %v2840_v48, 0.0  ;;  %v2804_v38 = vadd.f32 %v2689_v1, %v2319_v63  ;;  %v2322_v57 = vadd.f32 %v10331_v7, %v12976_v61  ;;  %v4576_v61 = vld [vmem:[#allocation2 + $0x60] sm:$0x1] }
 0x170   :  { %v2845_v62 = vadd.f32 %v13058_v47, %v2806_v56  ;;  %v2207_v39 = vpop.f32.mrf.mxu1  ;;  %v2705_v12 = vpop.f32.mrf.mxu0  ;;  %v13128_v48 = vrot.slane %v4654_v33, 5  ;;  %v13130_v53 = vrot.slane %v4678_v3, 5  ;;  %v4726_v63 = vshll.u32 %v4576_v61, 16 }
 0x171   :  { %3034 = vst [vmem:[#allocation2 + $0x20] sm:$0xf] %v9647_v42  ;;  %v9711_v43 = vpack.c.bf16 %v2872_v13, %v2871_v8  ;;  %v2843_v29 = vadd.f32 %v13058_v47, %v2804_v38  ;;  %v2807_v30 = vadd.f32 %v10379_v36, %v2322_v57  ;;  %v2320_v1 = vadd.f32 %v2207_v39, %v12985_v46 }
 0x172   :  { %v2877_v41 = vmax.f32 %v2845_v62, 0.0  ;;  %v10334_v51 = vpop.f32.mrf.mxu1  ;;  %v10383_v56 = vpop.f32.mrf.mxu0  ;;  %v13134_v38 = vrot.slane %v4702_v20, 5  ;;  %v13137_v46 = vadd.f32 %v12997_v27, %v1142_v16  ;;  %v13141_v3 = vrot.slane %v4726_v63, 5  ;;  %v16025_v62 = vld [vmem:[#allocation9_spill] sm:$0xff] }
 0x173   :  { %9788 = vst [vmem:[#allocation2 + $0x8] sm:$0xff] %v9711_v43   ;;  %v2846_v9 = vadd.f32 %v13058_v47, %v2807_v30  ;;  %v2805_v22 = vadd.f32 %v2692_v31, %v2320_v1  ;;  %v2325_v8 = vadd.f32 %v10334_v51, %v13004_v15  ;;  %v2875_v36 = vmax.f32 %v2843_v29, 0.0 }
 0x174   :  { %16023 = vst [vmem:[#allocation6_spill] sm:$0xff] %v13134_v38  ;;  %v9650_v57 = vpack.c.bf16 %v2877_v41, %v2877_v41  ;;  %v2220_v7 = vpop.f32.mrf.mxu1  ;;  %v3067_v33 = vld [vmem:[#allocation2 + $0x1c] sm:$0xf]  ;;  %16024 = vst [vmem:[#allocation14_spill] sm:$0xff] %v13141_v3  ;;  %v2708_v39 = vpop.f32.mrf.mxu0  ;;  %v16026_v27 = vmov 0 }
 0x175   :  { %v13139_v42 = vld [vmem:[#allocation2 + $0x1c] sm:$0xf]  ;;  %v2878_v13 = vmax.f32 %v2846_v9, 0.0  ;;  %v2844_v35 = vadd.f32 %v13058_v47, %v2805_v22  ;;  %v2810_v31 = vadd.f32 %v10382_v26, %v2325_v8  ;;  %v2323_v15 = vadd.f32 %v2220_v7, %v16025_v62 }
 0x176   :  { %v16027_v27 = vsel %vm13147_vm14, 4294967295, %v16026_v27  ;;  %3037 = vst [vmem:[#allocation2 + $0x44] sm:$0xf] %v9650_v57  ;;  %v10335_v20 = vpop.f32.mrf.mxu1  ;;  %v3171_v16 = vrot.slane %v3067_v33, 7  ;;  %v3337_v43 = vshrl.u32 %v3067_v33, 16  ;;  %v3340_v29 = vshll.u32 %v3067_v33, 16  ;;  %v10386_v51 = vpop.f32.mrf.mxu0 }
 0x177   :  { %16028 = vst [vmem:[#allocation30_spill] sm:$0xff] %v16027_v27  ;;  %v9651_v1 = vpack.c.bf16 %v2878_v13, %v2878_v13  ;;  %v2876_v61 = vmax.f32 %v2844_v35, 0.0  ;;  %v2849_v26 = vadd.f32 %v13058_v47, %v2810_v31  ;;  %v2808_v41 = vadd.f32 %v2705_v12, %v2323_v15 }
 0x178   :  { %v2326_v63 = vadd.f32 %v10335_v20, %v13020_v11  ;;  %v2223_v9 = vpop.f32.mrf.mxu1  ;;  %v3068_v22 = vld [vmem:[#allocation2 + $0x20] sm:$0x7]  ;;  %v16029_v8 = vrot.slane %v12888_v4, 11  ;;  %v3173_v7 = vrot.slane %v3171_v16, 4  ;;  %v13160_v33 = vrot.slane %v3337_v43, 7  ;;  %v2721_v62 = vpop.f32.mrf.mxu0 }
 0x179   :  { %3038 = vst [vmem:[#allocation2 + $0x48] sm:$0xf] %v9651_v1  ;;  %v9716_v13 = vpack.c.bf16 %v2876_v61, %v2875_v36  ;;  %v2881_v35 = vmax.f32 %v2849_v26, 0.0  ;;  %v2847_v12 = vadd.f32 %v13058_v47, %v2808_v41  ;;  %v2324_v31 = vadd.f32 %v2223_v9, %v13023_v40 }
 0x17a   :  { %v13158_v57 = vsel %vm13147_vm14, %v16029_v8, %v3171_v16  ;;  %v2811_v11 = vadd.f32 %v10383_v56, %v2326_v63  ;;  %v10338_v15 = vpop.f32.mrf.mxu1  ;;  %v3064_v20 = vld [vmem:[#allocation2 + $0x8] sm:$0xf]  ;;  %v3065_v30 = vld [vmem:[#allocation2 + $0xc] sm:$0x7]  ;;  %v3174_v4 = vrot.slane %v3068_v22, 7  ;;  %v13165_v3 = vor.u32 %v3340_v29, %v13160_v33  ;;  %v10387_v26 = vpop.f32.mrf.mxu0 }
 0x17b   :  { %9789 = vst [vmem:[#allocation2 + $0x30] sm:$0xff] %v9716_v13   ;;  %v9654_v43 = vpack.c.bf16 %v2881_v35, %v2881_v35  ;;  %v2879_v1 = vmax.f32 %v2847_v12, 0.0  ;;  %v2809_v36 = vadd.f32 %v2708_v39, %v2324_v31  ;;  %v2329_v61 = vadd.f32 %v10338_v15, %v13033_v23  ;;  %v16030_v8 = vld [vmem:[#allocation20_spill] sm:$0xff] }
 0x17c   :  { %v2850_v40 = vadd.f32 %v13058_v47, %v2811_v11  ;;  %v2236_v41 = vpop.f32.mrf.mxu1  ;;  %v3164_v56 = vrot.slane %v3064_v20, 7  ;;  %v3167_v63 = vrot.slane %v3065_v30, 7  ;;  %v3175_v9 = vsel %vm13147_vm14, %v3173_v7, %v3174_v4  ;;  %v2724_v35 = vpop.f32.mrf.mxu0  ;;  %v16031_v31 = vld [vmem:[#allocation28_spill] sm:$0xff] }
 0x17d   :  { %3041 = vst [vmem:[#allocation2 + $0x6c] sm:$0xf] %v9654_v43  ;;  %v2848_v29 = vadd.f32 %v13058_v47, %v2809_v36  ;;  %v2814_v22 = vadd.f32 %v10386_v51, %v2329_v61  ;;  %v2327_v13 = vadd.f32 %v2236_v41, %v16030_v8  ;;  %v9219_v39 = vcombine.low %v13158_v57, %v3175_v9 }
 0x17e   :  { %v2882_v12 = vmax.f32 %v2850_v40, 0.0  ;;  %v10339_v23 = vpop.f32.mrf.mxu1  ;;  %v16032_v15 = vrot.slane %v16031_v31, 11  ;;  %v3166_v30 = vrot.slane %v3164_v56, 4  ;;  %v3315_v16 = vshrl.u32 %v3064_v20, 16  ;;  %v10390_v43 = vpop.f32.mrf.mxu0 }
 0x17f   :  { %v2880_v38 = vmax.f32 %v2848_v29, 0.0  ;;  %v2853_v7 = vadd.f32 %v13058_v47, %v2814_v22  ;;  %v2812_v4 = vadd.f32 %v2721_v62, %v2327_v13  ;;  %v2330_v51 = vadd.f32 %v10339_v23, %v13040_v19  ;;  %v10979_v23 = vld [vmem:[%s15733_s3 + $0xf0] sm:$0xff]  }
 0x180   :  { %v3165_v11 = vsel %vm13147_vm14, %v16032_v15, %v3164_v56  ;;  %v9655_v36 = vpack.c.bf16 %v2882_v12, %v2882_v12  ;;  %v2239_v61 = vpop.f32.mrf.mxu1  ;;  %v3168_v57 = vsel %vm13147_vm14, %v3166_v30, %v3167_v63  ;;  %v13183_v40 = vrot.slane %v3315_v16, 7  ;;  %v2737_v29 = vpop.f32.mrf.mxu0  ;;  %v3290_v15 = vld [vmem:[#allocation2 + $0xc] sm:$0xf] }
 0x181   :  { %v3318_v41 = vshll.u32 %v3064_v20, 16  ;;  %v9721_v9 = vpack.c.bf16 %v2880_v38, %v2879_v1  ;;  %v2885_v8 = vmax.f32 %v2853_v7, 0.0  ;;  %v2851_v56 = vadd.f32 %v13058_v47, %v2812_v4 }
 0x182   :  { %v2815_v31 = vadd.f32 %v10387_v26, %v2330_v51  ;;  %3042 = vst [vmem:[#allocation2 + $0x70] sm:$0xf] %v9655_v36  ;;  %v2328_v62 = vadd.f32 %v2239_v61, %v13049_v17  ;;  %v10342_v19 = vpop.f32.mrf.mxu1  ;;  %v9218_v22 = vcombine.low %v3165_v11, %v3168_v57  ;;  %v16033_v13 = vmov 0  ;;  %v3291_v17 = vld [vmem:[#allocation2 + $0x20] sm:$0xf]  ;;  %v10391_v12 = vpop.f32.mrf.mxu0 }
 0x183   :  { %v16034_v13 = vsel %vm13189_vm1, 4294967295, %v16033_v13  ;;  %v3320_v20 = vor.u32 %v3318_v41, %v13183_v40  ;;  %v3322_v38 = vrot.slane %v13183_v40, 4  ;;  %9790 = vst [vmem:[#allocation2 + $0x58] sm:$0xff] %v9721_v9   ;;  %v9658_v16 = vpack.c.bf16 %v2885_v8, %v2885_v8  ;;  %v13208_v41 = vld [vmem:[#allocation2 + $0x30] sm:$0xf] }
 0x184   :  { %16035 = vst [vmem:[#allocation23_spill] sm:$0xff] %v16034_v13  ;;  %v2883_v1 = vmax.f32 %v2851_v56, 0.0  ;;  %v2854_v26 = vadd.f32 %v13058_v47, %v2815_v31  ;;  %v2333_v63 = vadd.f32 %v10342_v19, %v13052_v50  ;;  %v2813_v11 = vadd.f32 %v2724_v35, %v2328_v62  ;;  %10468 = vmatprep.mubr.bf16.mxu0 %v9218_v22  ;;  %v2252_v30 = vpop.f32.mrf.mxu1  ;;  %v16036_v50 = vld [vmem:[#allocation25_spill] sm:$0xff]  ;;  %v2740_v35 = vpop.f32.mrf.mxu0 }
 0x185   :  { %v3321_v7 = vsel %vm13189_vm1, %v12908_v58, %v3320_v20  ;;  %v3324_v4 = vshrl.u32 %v3290_v15, 16  ;;  %v3327_v51 = vshll.u32 %v3290_v15, 16  ;;  %3045 = vst [vmem:[#allocation2 + $0x94] sm:$0xf] %v9658_v16  ;;  %10469 = vmatmul.mubr.bf16.vlgmr.msra.gmra.mxu0 %v9219_v39  ;;  %v2331_v57 = vadd.f32 %v2252_v30, %v16036_v50  ;;  %v16037_v15 = vld [vmem:[#allocation15_spill] sm:$0xff] }
 0x186   :  { %v2886_v36 = vmax.f32 %v2854_v26, 0.0  ;;  %v2818_v61 = vadd.f32 %v10390_v43, %v2333_v63  ;;  %v3343_v40 = vsel %vm13189_vm1, %v12910_v2, %v13165_v3  ;;  %v2852_v9 = vadd.f32 %v13058_v47, %v2813_v11  ;;  %v10343_v31 = vpop.f32.mrf.mxu1  ;;  %10549 = vmatpush3.bf16.msra.mxu0 %v16037_v15  ;;  %v10394_v22 = vpop.f32.mrf.mxu0  ;;  %v10980_v2 = vld [vmem:[%s15733_s3 + $0xe8] sm:$0xff]   ;;  %v3071_v50 = vld [vmem:[#allocation2 + $0x34] sm:$0x7] }
 0x187   :  { %v3326_v8 = vrot.slane %v3324_v4, 7  ;;  %v3346_v58 = vshrl.u32 %v3291_v17, 16  ;;  %v3349_v56 = vshll.u32 %v3291_v17, 16  ;;  %v2816_v62 = vadd.f32 %v2737_v29, %v2331_v57  ;;  %10550 = vmatprep.subr.bf16.mxu0 %v10979_v23 }
 0x188   :  { %v9659_v43 = vpack.c.bf16 %v2886_v36, %v2886_v36  ;;  %v2857_v39 = vadd.f32 %v13058_v47, %v2818_v61  ;;  %v2334_v19 = vadd.f32 %v10343_v31, %v13076_v44  ;;  %v2884_v3 = vmax.f32 %v2852_v9, 0.0  ;;  %v2255_v26 = vpop.f32.mrf.mxu1  ;;  %v13226_v9 = vld [vmem:[#allocation2 + $0x44] sm:$0xf] }
 0x189   :  { %v3329_v20 = vor.u32 %v3327_v51, %v3326_v8  ;;  %v3348_v16 = vrot.slane %v3346_v58, 7  ;;  %v3178_v63 = vrot.slane %v13208_v41, 7  ;;  %v2855_v11 = vadd.f32 %v13058_v47, %v2816_v62  ;;  %v2753_v8 = vpop.f32.mrf.mxu0 }
 0x18a   :  { %3046 = vst [vmem:[#allocation2 + $0x98] sm:$0xf] %v9659_v43  ;;  %v2889_v17 = vmax.f32 %v2857_v39, 0.0  ;;  %v2819_v30 = vadd.f32 %v10391_v12, %v2334_v19  ;;  %v2332_v29 = vadd.f32 %v2255_v26, %v13079_v49  ;;  %v9726_v44 = vpack.c.bf16 %v2884_v3, %v2883_v1  ;;  %v10346_v61 = vpop.f32.mrf.mxu1  ;;  %10551 = vmatpush3.bf16.msra.mxu0 %v10979_v23  ;;  %v3074_v1 = vld [vmem:[#allocation2 + $0x48] sm:$0x7] }
 0x18b   :  { %v3330_v4 = vsel %vm13189_vm1, %v3322_v38, %v3329_v20  ;;  %v3351_v36 = vor.u32 %v3349_v56, %v3348_v16  ;;  %v16038_v51 = vrot.slane %v12902_v21, 11  ;;  %v2887_v12 = vmax.f32 %v2855_v11, 0.0  ;;  %10552 = vmatprep.subr.bf16.mxu0 %v10980_v2  ;;  %v10982_v38 = vld [vmem:[%s15733_s3 + $0xe0] sm:$0xff]   ;;  %v10974_v20 = vld [vmem:[%s15733_s3 + $0xb0] sm:$0xff]   ;;  %v13245_v11 = vpop.f32.mrf.mxu0 }
 0x18c   :  { %v9662_v58 = vpack.c.bf16 %v2889_v17, %v2889_v17  ;;  %v9194_v31 = vcombine.low %v3321_v7, %v3330_v4  ;;  %v2858_v49 = vadd.f32 %v13058_v47, %v2819_v30  ;;  %9791 = vst [vmem:[#allocation2 + $0x80] sm:$0xff] %v9726_v44   ;;  %v16039_v21 = vrot.slane %v13160_v33, 4  ;;  %v2268_v39 = vpop.f32.mrf.mxu1 }
 0x18d   :  { %v3179_v57 = vsel %vm13147_vm14, %v16038_v51, %v3178_v63  ;;  %v2817_v15 = vadd.f32 %v2740_v35, %v2332_v29  ;;  %v2337_v23 = vadd.f32 %v10346_v61, %v13092_v59  ;;  %v3180_v43 = vrot.slane %v3178_v63, 4  ;;  %v16040_v35 = vld [vmem:[#allocation10_spill] sm:$0xff]  ;;  %v13243_v59 = vld [vmem:[#allocation2 + $0x34] sm:$0xf]  ;;  %v16043_v61 = vld [vmem:[#allocation16_spill] sm:$0xff] }
 0x18e   :  { %v3352_v56 = vsel %vm13189_vm1, %v16039_v21, %v3351_v36  ;;  %3049 = vst [vmem:[#allocation2 + $0xbc] sm:$0xf] %v9662_v58  ;;  %10420 = vmatprep.mubr.bf16.mxu1 %v9194_v31  ;;  %v2890_v62 = vmax.f32 %v2858_v49, 0.0  ;;  %v3181_v19 = vrot.slane %v3071_v50, 7  ;;  %v3185_v3 = vrot.slane %v13226_v9, 7  ;;  %v10347_v63 = vpop.f32.mrf.mxu1  ;;  %10553 = vmatpush3.bf16.msra.mxu0 %v10980_v2  ;;  %v16041_v29 = vld [vmem:[#allocation29_spill] sm:$0xff] }
 0x18f   :  { %v9195_v7 = vcombine.low %v3343_v40, %v3352_v56  ;;  %v2856_v33 = vadd.f32 %v13058_v47, %v2817_v15  ;;  %v2822_v16 = vadd.f32 %v10394_v22, %v2337_v23  ;;  %v3188_v26 = vrot.slane %v3074_v1, 7  ;;  %10554 = vmatprep.subr.bf16.mxu0 %v10982_v38  ;;  %v10983_v36 = vld [vmem:[%s15733_s3 + $0xd8] sm:$0xff]   ;;  %v13263_v15 = vld [vmem:[#allocation2 + $0x48] sm:$0xf] }
 0x190   :  { %v2335_v17 = vadd.f32 %v2268_v39, %v16040_v35  ;;  %v9663_v40 = vpack.c.bf16 %v2890_v62, %v2890_v62  ;;  %v3182_v30 = vsel %vm13147_vm14, %v3180_v43, %v3181_v19  ;;  %v16042_v44 = vrot.slane %v16041_v29, 11  ;;  %v2271_v31 = vpop.f32.mrf.mxu1  ;;  %v10975_v23 = vld [vmem:[%s15733_s3 + $0xa8] sm:$0xff]  }
 0x191   :  { %10421 = vmatmul.mubr.bf16.vlgmr.msra.gmra.mxu1 %v9195_v7  ;;  %v3187_v22 = vrot.slane %v3185_v3, 4  ;;  %v2888_v50 = vmax.f32 %v2856_v33, 0.0  ;;  %v2861_v2 = vadd.f32 %v13058_v47, %v2822_v16  ;;  %v9220_v51 = vcombine.low %v3179_v57, %v3182_v30  ;;  %v2756_v7 = vpop.f32.mrf.mxu0 }
 0x192   :  { %v3186_v4 = vsel %vm13147_vm14, %v16042_v44, %v3185_v3  ;;  %10501 = vmatpush3.bf16.msra.mxu1 %v16043_v61  ;;  %v2820_v58 = vadd.f32 %v2753_v8, %v2335_v17  ;;  %3050 = vst [vmem:[#allocation2 + $0xc0] sm:$0xf] %v9663_v40  ;;  %v3359_v1 = vshrl.u32 %v13208_v41, 16  ;;  %v3362_v21 = vshll.u32 %v13208_v41, 16  ;;  %v10350_v62 = vpop.f32.mrf.mxu1  ;;  %10555 = vmatpush3.bf16.msra.mxu0 %v10982_v38  ;;  %v10976_v44 = vld [vmem:[%s15733_s3 + $0xa0] sm:$0xff]  }
 0x193   :  { %v3189_v49 = vsel %vm13147_vm14, %v3187_v22, %v3188_v26  ;;  %v3368_v56 = vshrl.u32 %v13243_v59, 16  ;;  %10502 = vmatprep.subr.bf16.mxu1 %v10974_v20  ;;  %v9731_v57 = vpack.c.bf16 %v2888_v50, %v2887_v12  ;;  %v2893_v8 = vmax.f32 %v2861_v2, 0.0  ;;  %10472 = vmatprep.mubr.bf16.mxu0 %v9220_v51  ;;  %v10985_v12 = vld [vmem:[%s15733_s3 + $0xd0] sm:$0xff]   ;;  %v16044_v61 = vld [vmem:[#allocation31_spill] sm:$0xff]  ;;  %v10398_v2 = vpop.f32.mrf.mxu0  ;;  %v13285_v51 = vld [vmem:[#allocation2 + $0x58] sm:$0xf] }
 0x194   :  { %v9221_v43 = vcombine.low %v3186_v4, %v3189_v49  ;;  %v13269_v39 = vadd.f32 %v13058_v47, %v2820_v58  ;;  %v3361_v41 = vrot.slane %v3359_v1, 7  ;;  %v3371_v3 = vshll.u32 %v13243_v59, 16  ;;  %10556 = vmatprep.subr.bf16.mxu0 %v10983_v36  ;;  %v2284_v58 = vpop.f32.mrf.mxu1 }
 0x195   :  { %v3370_v19 = vrot.slane %v3368_v56, 7  ;;  %v3381_v33 = vshrl.u32 %v13226_v9, 16  ;;  %9792 = vst [vmem:[#allocation2 + $0xa8] sm:$0xff] %v9731_v57   ;;  %v9666_v16 = vpack.c.bf16 %v2893_v8, %v2893_v8  ;;  %v3384_v35 = vshll.u32 %v13226_v9, 16  ;;  %v13292_v57 = vld [vmem:[#allocation2 + $0x6c] sm:$0xf] }
 0x196   :  { %10473 = vmatmul.mubr.bf16.gmra.mxu0 %v9221_v43  ;;  %v2891_v26 = vmax.f32 %v13269_v39, 0.0  ;;  %v3390_v38 = vshrl.u32 %v13263_v15, 16  ;;  %10503 = vmatpush3.bf16.msra.mxu1 %v10974_v20  ;;  %v3364_v17 = vor.u32 %v3362_v21, %v3361_v41  ;;  %v3366_v40 = vrot.slane %v3361_v41, 4  ;;  %v3077_v20 = vld [vmem:[#allocation2 + $0x5c] sm:$0x7]  ;;  %v16045_v43 = vld [vmem:[#allocation32_spill] sm:$0xff] }
 0x197   :  { %v3373_v30 = vor.u32 %v3371_v3, %v3370_v19  ;;  %v3383_v29 = vrot.slane %v3381_v33, 7  ;;  %10504 = vmatprep.subr.bf16.mxu1 %v10975_v23  ;;  %3053 = vst [vmem:[#allocation2 + $0xe4] sm:$0xf] %v9666_v16  ;;  %v3393_v22 = vshll.u32 %v13263_v15, 16  ;;  %v2338_v50 = vadd.f32 %v10347_v63, %v16044_v61  ;;  %10557 = vmatpush3.bf16.msra.mxu0 %v10983_v36  ;;  %v10978_v33 = vld [vmem:[%s15733_s3 + $0x98] sm:$0xff]  }
 0x198   :  { %v3392_v4 = vrot.slane %v3390_v38, 7  ;;  %v2336_v9 = vadd.f32 %v2271_v31, %v13103_v5  ;;  %v3365_v49 = vsel %vm13189_vm1, %v12935_v34, %v3364_v17  ;;  %10558 = vmatprep.subr.bf16.mxu0 %v10985_v12  ;;  %v10986_v5 = vld [vmem:[%s15733_s3 + $0xc8] sm:$0xff]   ;;  %v2341_v41 = vadd.f32 %v10350_v62, %v12925_v55  ;;  %v3080_v16 = vld [vmem:[#allocation2 + $0x70] sm:$0x7]  ;;  %v2769_v55 = vpop.f32.mrf.mxu0  ;;  %v10351_v62 = vpop.f32.mrf.mxu1 }
 0x199   :  { %v3374_v1 = vsel %vm13189_vm1, %v3366_v40, %v3373_v30  ;;  %v3386_v21 = vor.u32 %v3384_v35, %v3383_v29  ;;  %v3388_v56 = vrot.slane %v3383_v29, 4  ;;  %v2823_v36 = vadd.f32 %v13245_v11, %v2338_v50 }
 0x19a   :  { %v9196_v63 = vcombine.low %v3365_v49, %v3374_v1  ;;  %v3395_v31 = vor.u32 %v3393_v22, %v3392_v4  ;;  %v2821_v8 = vadd.f32 %v2756_v7, %v2336_v9  ;;  %10505 = vmatpush3.bf16.msra.mxu1 %v10975_v23  ;;  %v3192_v19 = vrot.slane %v13285_v51, 7  ;;  %v10989_v4 = vld [vmem:[%s15733_s3 + $0xc0] sm:$0xff]   ;;  %v13326_v1 = vld [vmem:[#allocation2 + $0x5c] sm:$0xf] }
 0x19b   :  { %v3387_v34 = vsel %vm13189_vm1, %v16045_v43, %v3386_v21  ;;  %v3195_v3 = vrot.slane %v3077_v20, 7  ;;  %10506 = vmatprep.subr.bf16.mxu1 %v10976_v44  ;;  %v2862_v23 = vadd.f32 %v13058_v47, %v2823_v36  ;;  %v3199_v35 = vrot.slane %v13292_v57, 7  ;;  %10559 = vmatpush3.bf16.msra.mxu0 %v10985_v12  ;;  %v2287_v36 = vpop.f32.mrf.mxu1 }
 0x19c   :  { %10424 = vmatprep.mubr.bf16.mxu1 %v9196_v63  ;;  %v3396_v11 = vsel %vm13189_vm1, %v3388_v56, %v3395_v31  ;;  %v2860_v7 = vadd.f32 %v13058_v47, %v2821_v8  ;;  %v2826_v17 = vadd.f32 %v10398_v2, %v2341_v41  ;;  %v16046_v40 = vrot.slane %v12920_v54, 11  ;;  %10560 = vmatprep.subr.bf16.mxu0 %v10986_v5  ;;  %v10399_v31 = vpop.f32.mrf.mxu0 }
 0x19d   :  { %v9197_v38 = vcombine.low %v3387_v34, %v3396_v11  ;;  %v3194_v29 = vrot.slane %v3192_v19, 4  ;;  %v2894_v22 = vmax.f32 %v2862_v23, 0.0  ;;  %v16047_v50 = vrot.slane %v12913_v0, 11  ;;  %v10981_v0 = vld [vmem:[%s15733_s3 + $0x90] sm:$0xff]  }
 0x19e   :  { %v3193_v30 = vsel %vm13147_vm14, %v16046_v40, %v3192_v19  ;;  %v2892_v61 = vmax.f32 %v2860_v7, 0.0  ;;  %v3201_v9 = vrot.slane %v3199_v35, 4  ;;  %10507 = vmatpush3.bf16.msra.mxu1 %v10976_v44  ;;  %v2865_v54 = vadd.f32 %v13058_v47, %v2826_v17  ;;  %v13337_v34 = vld [vmem:[#allocation2 + $0x70] sm:$0xf]  ;;  %v10984_v7 = vld [vmem:[%s15733_s3 + $0x88] sm:$0xff]   ;;  %v10354_v17 = vpop.f32.mrf.mxu1 }
 0x19f   :  { %v3200_v12 = vsel %vm13147_vm14, %v16047_v50, %v3199_v35  ;;  %10425 = vmatmul.mubr.bf16.gmra.mxu1 %v9197_v38  ;;  %v3196_v2 = vsel %vm13147_vm14, %v3194_v29, %v3195_v3  ;;  %v3202_v20 = vrot.slane %v3080_v16, 7  ;;  %v2339_v49 = vadd.f32 %v2284_v58, %v12942_v52  ;;  %10508 = vmatprep.subr.bf16.mxu1 %v10978_v33 }
 0x1a0   :  { %v9667_v21 = vpack.c.bf16 %v2894_v22, %v2894_v22  ;;  %v9736_v44 = vpack.c.bf16 %v2892_v61, %v2891_v26  ;;  %v9222_v56 = vcombine.low %v3193_v30, %v3196_v2  ;;  %v3403_v63 = vshrl.u32 %v13285_v51, 16  ;;  %10561 = vmatpush3.bf16.msra.mxu0 %v10986_v5  ;;  %v13353_v61 = vld [vmem:[#allocation2 + $0x80] sm:$0xf] }
 0x1a1   :  { %v2897_v8 = vmax.f32 %v2865_v54, 0.0  ;;  %v3203_v52 = vsel %vm13147_vm14, %v3201_v9, %v3202_v20  ;;  %v2824_v58 = vadd.f32 %v2769_v55, %v2339_v49  ;;  %v3406_v43 = vshll.u32 %v13285_v51, 16  ;;  %10562 = vmatprep.subr.bf16.mxu0 %v10989_v4 }
 0x1a2   :  { %3054 = vst [vmem:[#allocation2 + $0xe8] sm:$0xf] %v9667_v21  ;;  %9793 = vst [vmem:[#allocation2 + $0xd0] sm:$0xff] %v9736_v44   ;;  %10476 = vmatprep.mubr.bf16.mxu0 %v9222_v56  ;;  %v9223_v39 = vcombine.low %v3200_v12, %v3203_v52  ;;  %v3405_v26 = vrot.slane %v3403_v63, 7  ;;  %v3412_v41 = vshrl.u32 %v13326_v1, 16  ;;  %v3415_v19 = vshll.u32 %v13326_v1, 16  ;;  %10509 = vmatpush3.bf16.msra.mxu1 %v10978_v33  ;;  %v2772_v33 = vpop.f32.mrf.mxu0  ;;  %v2300_v52 = vpop.f32.mrf.mxu1 }
 0x1a3   :  { %v9670_v5 = vpack.c.bf16 %v2897_v8, %v2897_v8  ;;  %v13342_v3 = vadd.f32 %v13058_v47, %v2824_v58  ;;  %v3425_v11 = vshrl.u32 %v13292_v57, 16  ;;  %v3428_v23 = vshll.u32 %v13292_v57, 16  ;;  %10510 = vmatprep.subr.bf16.mxu1 %v10981_v0  ;;  %v3083_v56 = vld [vmem:[#allocation2 + $0x84] sm:$0x7]  ;;  %v3086_v8 = vld [vmem:[#allocation2 + $0x98] sm:$0x7] }
 0x1a4   :  { %10477 = vmatmul.mubr.bf16.gmra.mxu0 %v9223_v39  ;;  %v3408_v16 = vor.u32 %v3406_v43, %v3405_v26  ;;  %v3410_v35 = vrot.slane %v3405_v26, 4  ;;  %v3414_v55 = vrot.slane %v3412_v41, 7  ;;  %v3434_v38 = vshrl.u32 %v13337_v34, 16  ;;  %v10402_v44 = vpop.f32.mrf.mxu0 }
 0x1a5   :  { %3057 = vst [vmem:[#allocation2 + $0x10c] sm:$0xf] %v9670_v5  ;;  %v2895_v40 = vmax.f32 %v13342_v3, 0.0  ;;  %v3427_v30 = vrot.slane %v3425_v11, 7  ;;  %v3437_v29 = vshll.u32 %v13337_v34, 16  ;;  %v2342_v22 = vadd.f32 %v10351_v62, %v12961_v18  ;;  %10563 = vmatpush3.bf16.msra.mxu0 %v10989_v4  ;;  %v10987_v18 = vld [vmem:[%s15733_s3 + $0x80] sm:$0xff]  }
 0x1a6   :  { %v3409_v50 = vsel %vm13189_vm1, %v12963_v25, %v3408_v16  ;;  %v3417_v12 = vor.u32 %v3415_v19, %v3414_v55  ;;  %v3436_v9 = vrot.slane %v3434_v38, 7  ;;  %v2340_v54 = vadd.f32 %v2287_v36, %v13112_v24  ;;  %10511 = vmatpush3.bf16.msra.mxu1 %v10981_v0  ;;  %v13370_v36 = vld [vmem:[#allocation2 + $0x94] sm:$0xf]  ;;  %v13383_v11 = vld [vmem:[%s15733_s3 + $0x138] sm:$0xff]  }
 0x1a7   :  { %v3430_v2 = vor.u32 %v3428_v23, %v3427_v30  ;;  %v3432_v20 = vrot.slane %v3427_v30, 4  ;;  %v2827_v49 = vadd.f32 %v10399_v31, %v2342_v22  ;;  %v2345_v21 = vadd.f32 %v10354_v17, %v12994_v14  ;;  %10512 = vmatprep.subr.bf16.mxu1 %v10984_v7 }
 0x1a8   :  { %v3418_v62 = vsel %vm13189_vm1, %v3410_v35, %v3417_v12  ;;  %v3439_v4 = vor.u32 %v3437_v29, %v3436_v9  ;;  %v2825_v25 = vadd.f32 %v2772_v33, %v2340_v54  ;;  %v3206_v24 = vrot.slane %v13353_v61, 7  ;;  %v13389_v33 = vld [vmem:[#allocation2 + $0x84] sm:$0xf]  ;;  %v2785_v9 = vpop.f32.mrf.mxu0 }
 0x1a9   :  { %v9198_v0 = vcombine.low %v3409_v50, %v3418_v62  ;;  %v3431_v63 = vsel %vm13189_vm1, %v12954_v60, %v3430_v2  ;;  %v2866_v14 = vadd.f32 %v13058_v47, %v2827_v49  ;;  %v2830_v31 = vadd.f32 %v10402_v44, %v2345_v21  ;;  %v13397_v21 = vld [vmem:[#allocation2 + $0x98] sm:$0xf] }
 0x1aa   :  { %v3440_v58 = vsel %vm13189_vm1, %v3432_v20, %v3439_v4  ;;  %v2864_v43 = vadd.f32 %v13058_v47, %v2825_v25  ;;  %v16048_v39 = vrot.slane %v12956_v37, 11  ;;  %v3208_v41 = vrot.slane %v3206_v24, 4  ;;  %10513 = vmatpush3.bf16.msra.mxu1 %v10984_v7 }
 0x1ab   :  { %10428 = vmatprep.mubr.bf16.mxu1 %v9198_v0  ;;  %v9199_v60 = vcombine.low %v3431_v63, %v3440_v58  ;;  %v2898_v19 = vmax.f32 %v2866_v14, 0.0  ;;  %v2869_v5 = vadd.f32 %v13058_v47, %v2830_v31  ;;  %v3209_v3 = vrot.slane %v3083_v56, 7  ;;  %10514 = vmatprep.subr.bf16.mxu1 %v10987_v18  ;;  %v3089_v58 = vld [vmem:[#allocation2 + $0xac] sm:$0x7] }
 0x1ac   :  { %v3207_v26 = vsel %vm13147_vm14, %v16048_v39, %v3206_v24  ;;  %v2896_v23 = vmax.f32 %v2864_v43, 0.0  ;;  %v3213_v37 = vrot.slane %v13370_v36, 7  ;;  %v3216_v16 = vrot.slane %v3086_v8, 7  ;;  %v13408_v24 = vld [vmem:[#allocation2 + $0xa8] sm:$0xf]  ;;  %v10403_v8 = vpop.f32.mrf.mxu0 }
 0x1ad   :  { %v2343_v35 = vadd.f32 %v2300_v52, %v13014_v6  ;;  %10429 = vmatmul.mubr.bf16.gmra.mxu1 %v9199_v60  ;;  %v9671_v7 = vpack.c.bf16 %v2898_v19, %v2898_v19  ;;  %v2901_v55 = vmax.f32 %v2869_v5, 0.0  ;;  %v3210_v38 = vsel %vm13147_vm14, %v3208_v41, %v3209_v3  ;;  %v10355_v6 = vpop.f32.mrf.mxu1  ;;  %v13418_v60 = vld [vmem:[#allocation2 + $0xbc] sm:$0xf] }
 0x1ae   :  { %v3447_v17 = vshrl.u32 %v13353_v61, 16  ;;  %v9741_v30 = vpack.c.bf16 %v2896_v23, %v2895_v40  ;;  %v9224_v29 = vcombine.low %v3207_v26, %v3210_v38  ;;  %v16049_v22 = vrot.slane %v12938_v32, 11  ;;  %10515 = vmatpush3.bf16.msra.mxu1 %v10987_v18  ;;  %v16050_v26 = vld [vmem:[#allocation39_spill] sm:$0xff] }
 0x1af   :  { %v3215_v12 = vrot.slane %v3213_v37, 4  ;;  %3058 = vst [vmem:[#allocation2 + $0x110] sm:$0xf] %v9671_v7  ;;  %v9674_v54 = vpack.c.bf16 %v2901_v55, %v2901_v55  ;;  %v2828_v2 = vadd.f32 %v2785_v9, %v2343_v35  ;;  %v3450_v49 = vshll.u32 %v13353_v61, 16  ;;  %10596 = vmatprep.subr.bf16.mxu1 %v13383_v11  ;;  %v2303_v52 = vpop.f32.mrf.mxu1 }
 0x1b0   :  { %v3214_v50 = vsel %vm13147_vm14, %v16049_v22, %v3213_v37  ;;  %v3449_v20 = vrot.slane %v3447_v17, 7  ;;  %9794 = vst [vmem:[#allocation2 + $0xf8] sm:$0xff] %v9741_v30   ;;  %10480 = vmatprep.mubr.bf16.mxu0 %v9224_v29  ;;  %v3456_v40 = vshrl.u32 %v13389_v33, 16  ;;  %v3459_v62 = vshll.u32 %v13389_v33, 16  ;;  %v2788_v30 = vpop.f32.mrf.mxu0  ;;  %v3092_v29 = vld [vmem:[#allocation2 + $0xc0] sm:$0x7] }
 0x1b1   :  { %v3217_v32 = vsel %vm13147_vm14, %v3215_v12, %v3216_v16  ;;  %v3469_v18 = vshrl.u32 %v13370_v36, 16  ;;  %3061 = vst [vmem:[#allocation2 + $0x134] sm:$0xf] %v9674_v54  ;;  %v13406_v25 = vadd.f32 %v13058_v47, %v2828_v2  ;;  %v3472_v14 = vshll.u32 %v13370_v36, 16 }
 0x1b2   :  { %v9225_v4 = vcombine.low %v3214_v50, %v3217_v32  ;;  %v3452_v44 = vor.u32 %v3450_v49, %v3449_v20  ;;  %v3454_v56 = vrot.slane %v3449_v20, 4  ;;  %v3458_v0 = vrot.slane %v3456_v40, 7  ;;  %v13435_v20 = vld [vmem:[#allocation2 + $0xac] sm:$0xf]  ;;  %v16054_v40 = vld [vmem:[#allocation34_spill] sm:$0xff] }
 0x1b3   :  { %v3471_v63 = vrot.slane %v3469_v18, 7  ;;  %v3478_v31 = vshrl.u32 %v13397_v21, 16  ;;  %v2899_v43 = vmax.f32 %v13406_v25, 0.0  ;;  %v3481_v39 = vshll.u32 %v13397_v21, 16 }
 0x1b4   :  { %10481 = vmatmul.mubr.bf16.gmra.mxu0 %v9225_v4  ;;  %v3453_v47 = vsel %vm13189_vm1, %v12999_v28, %v3452_v44  ;;  %v2346_v41 = vadd.f32 %v10355_v6, %v16050_v26  ;;  %v3461_v19 = vor.u32 %v3459_v62, %v3458_v0  ;;  %v2344_v16 = vadd.f32 %v2303_v52, %v13137_v46  ;;  %v16051_v28 = vld [vmem:[#allocation33_spill] sm:$0xff]  ;;  %v11088_v46 = vld [vmem:[%s15734_s2] ss:$0 sm:$0xff] }
 0x1b5   :  { %v3474_v5 = vor.u32 %v3472_v14, %v3471_v63  ;;  %v3476_v3 = vrot.slane %v3471_v63, 4  ;;  %v3480_v23 = vrot.slane %v3478_v31, 7  ;;  %v3220_v35 = vrot.slane %v13408_v24, 7  ;;  %v16052_v6 = vld [vmem:[#allocation35_spill] sm:$0xff] }
 0x1b6   :  { %v2831_v37 = vadd.f32 %v10403_v8, %v2346_v41  ;;  %v3223_v7 = vrot.slane %v3089_v58, 7  ;;  %v3462_v55 = vsel %vm13189_vm1, %v3454_v56, %v3461_v19  ;;  %v3227_v22 = vrot.slane %v13418_v60, 7  ;;  %v13448_v52 = vld [vmem:[#allocation2 + $0xc0] sm:$0xf]  ;;  %v13452_v41 = vld [vmem:[#allocation2 + $0xd0] sm:$0xf] }
 0x1b7   :  { %v3475_v38 = vsel %vm13189_vm1, %v16051_v28, %v3474_v5  ;;  %v3483_v17 = vor.u32 %v3481_v39, %v3480_v23  ;;  %v9200_v50 = vcombine.low %v3453_v47, %v3462_v55  ;;  %v2829_v9 = vadd.f32 %v2788_v30, %v2344_v16  ;;  %v13454_v19 = vld [vmem:[#allocation2 + $0xe4] sm:$0xf]  ;;  %v3095_v16 = vld [vmem:[#allocation2 + $0xd4] sm:$0x7] }
 0x1b8   :  { %v2870_v12 = vadd.f32 %v11088_v46, %v2831_v37  ;;  %v16053_v54 = vrot.slane %v16052_v6, 11  ;;  %v3222_v32 = vrot.slane %v3220_v35, 4  ;;  %v16055_v62 = vrot.slane %v16054_v40, 11 }
 0x1b9   :  { %v3484_v49 = vsel %vm13189_vm1, %v3476_v3, %v3483_v17  ;;  %v3229_v4 = vrot.slane %v3227_v22, 4  ;;  %10432 = vmatprep.mubr.bf16.mxu1 %v9200_v50  ;;  %v2868_v56 = vadd.f32 %v11088_v46, %v2829_v9  ;;  %v3230_v0 = vrot.slane %v3092_v29, 7  ;;  %v16056_v9 = vld [vmem:[#allocation12_spill] sm:$0xff] }
 0x1ba   :  { %v3221_v2 = vsel %vm13147_vm14, %v16053_v54, %v3220_v35  ;;  %v3228_v18 = vsel %vm13147_vm14, %v16055_v62, %v3227_v22  ;;  %v9201_v25 = vcombine.low %v3475_v38, %v3484_v49  ;;  %v2902_v44 = vmax.f32 %v2870_v12, 0.0  ;;  %v3098_v38 = vld [vmem:[#allocation2 + $0xe8] sm:$0x7] }
 0x1bb   :  { %v3224_v63 = vsel %vm13147_vm14, %v3222_v32, %v3223_v7  ;;  %v3491_v14 = vshrl.u32 %v13408_v24, 16  ;;  %v3494_v31 = vshll.u32 %v13408_v24, 16  ;;  %v3500_v8 = vshrl.u32 %v13435_v20, 16 }
 0x1bc   :  { %10433 = vmatmul.mubr.bf16.gmra.mxu1 %v9201_v25  ;;  %v9675_v58 = vpack.c.bf16 %v2902_v44, %v2902_v44  ;;  %v2900_v47 = vmax.f32 %v2868_v56, 0.0  ;;  %v9226_v39 = vcombine.low %v3221_v2, %v3224_v63  ;;  %v3231_v26 = vsel %vm13147_vm14, %v3229_v4, %v3230_v0  ;;  %v13468_v4 = vld [vmem:[#allocation2 + $0xd4] sm:$0xf]  ;;  %v16057_v25 = vld [vmem:[#allocation38_spill] sm:$0xff]  ;;  %v16059_v63 = vld [vmem:[#allocation36_spill] sm:$0xff] }
 0x1bd   :  { %v9227_v5 = vcombine.low %v3228_v18, %v3231_v26  ;;  %v3493_v3 = vrot.slane %v3491_v14, 7  ;;  %v3502_v23 = vrot.slane %v3500_v8, 7  ;;  %v3503_v37 = vshll.u32 %v13435_v20, 16 }
 0x1be   :  { %3062 = vst [vmem:[#allocation2 + $0x138] sm:$0xf] %v9675_v58  ;;  %v9746_v35 = vpack.c.bf16 %v2900_v47, %v2899_v43  ;;  %10484 = vmatprep.mubr.bf16.mxu0 %v9226_v39  ;;  %v3513_v7 = vshrl.u32 %v13418_v60, 16  ;;  %v3516_v55 = vshll.u32 %v13418_v60, 16  ;;  %v3522_v28 = vshrl.u32 %v13448_v52, 16  ;;  %v16061_v58 = vld [vmem:[#allocation37_spill] sm:$0xff] }
 0x1bf   :  { %10485 = vmatmul.mubr.bf16.gmra.mxu0 %v9227_v5  ;;  %v3496_v17 = vor.u32 %v3494_v31, %v3493_v3  ;;  %v3498_v30 = vrot.slane %v3493_v3, 4  ;;  %v3505_v29 = vor.u32 %v3503_v37, %v3502_v23  ;;  %v3525_v22 = vshll.u32 %v13448_v52, 16  ;;  %v13485_v3 = vld [vmem:[#allocation2 + $0xe8] sm:$0xf] }
 0x1c0   :  { %9795 = vst [vmem:[#allocation2 + $0x120] sm:$0xff] %v9746_v35   ;;  %v3515_v50 = vrot.slane %v3513_v7, 7  ;;  %v3524_v46 = vrot.slane %v3522_v28, 7  ;;  %v3234_v12 = vrot.slane %v13452_v41, 7  ;;  %v3237_v43 = vrot.slane %v3095_v16, 7 }
 0x1c1   :  { %v3497_v6 = vsel %vm13189_vm1, %v16056_v9, %v3496_v17  ;;  %v3506_v54 = vsel %vm13189_vm1, %v3498_v30, %v3505_v29  ;;  %v3241_v2 = vrot.slane %v13454_v19, 7  ;;  %v3244_v49 = vrot.slane %v3098_v38, 7  ;;  %v13492_v7 = vld [vmem:[#allocation2 + $0xf8] sm:$0xf]  ;;  %v3101_v30 = vld [vmem:[#allocation2 + $0xfc] sm:$0x7] }
 0x1c2   :  { %v9202_v32 = vcombine.low %v3497_v6, %v3506_v54  ;;  %v3518_v40 = vor.u32 %v3516_v55, %v3515_v50  ;;  %v3520_v62 = vrot.slane %v3515_v50, 4  ;;  %v3527_v18 = vor.u32 %v3525_v22, %v3524_v46 }
 0x1c3   :  { %v16058_v44 = vrot.slane %v16057_v25, 11  ;;  %v3236_v0 = vrot.slane %v3234_v12, 4  ;;  %v16060_v14 = vrot.slane %v16059_v63, 11  ;;  %v3243_v8 = vrot.slane %v3241_v2, 4  ;;  %v16063_v25 = vld [vmem:[#allocation24_spill] sm:$0xff] }
 0x1c4   :  { %10436 = vmatprep.mubr.bf16.mxu1 %v9202_v32  ;;  %v3519_v47 = vsel %vm13189_vm1, %v16061_v58, %v3518_v40  ;;  %v3528_v39 = vsel %vm13189_vm1, %v3520_v62, %v3527_v18  ;;  %v3535_v26 = vshrl.u32 %v13452_v41, 16  ;;  %v3538_v5 = vshll.u32 %v13452_v41, 16  ;;  %v16062_v62 = vld [vmem:[#allocation19_spill] sm:$0xff]  ;;  %v3104_v63 = vld [vmem:[#allocation2 + $0x110] sm:$0x7] }
 0x1c5   :  { %v3235_v56 = vsel %vm13147_vm14, %v16058_v44, %v3234_v12  ;;  %v3242_v31 = vsel %vm13147_vm14, %v16060_v14, %v3241_v2  ;;  %v9203_v23 = vcombine.low %v3519_v47, %v3528_v39  ;;  %v3238_v37 = vsel %vm13147_vm14, %v3236_v0, %v3237_v43  ;;  %v13498_v12 = vld [vmem:[#allocation2 + $0x10c] sm:$0xf]  ;;  %v13512_v39 = vld [vmem:[#allocation2 + $0xfc] sm:$0xf] }
 0x1c6   :  { %v3245_v16 = vsel %vm13147_vm14, %v3243_v8, %v3244_v49  ;;  %v3544_v35 = vshrl.u32 %v13468_v4, 16  ;;  %v9228_v55 = vcombine.low %v3235_v56, %v3238_v37  ;;  %v3537_v38 = vrot.slane %v3535_v26, 7 }
 0x1c7   :  { %v9229_v28 = vcombine.low %v3242_v31, %v3245_v16  ;;  %v3547_v17 = vshll.u32 %v13468_v4, 16  ;;  %10437 = vmatmul.mubr.bf16.gmra.mxu1 %v9203_v23  ;;  %v3557_v22 = vshrl.u32 %v13454_v19, 16  ;;  %v3560_v50 = vshll.u32 %v13454_v19, 16  ;;  %v16065_v23 = vld [vmem:[#allocation22_spill] sm:$0xff] }
 0x1c8   :  { %v3546_v29 = vrot.slane %v3544_v35, 7  ;;  %v3566_v46 = vshrl.u32 %v13485_v3, 16  ;;  %10488 = vmatprep.mubr.bf16.mxu0 %v9228_v55  ;;  %v3540_v43 = vor.u32 %v3538_v5, %v3537_v38  ;;  %v3542_v9 = vrot.slane %v3537_v38, 4  ;;  %v16067_v55 = vld [vmem:[#allocation11_spill] sm:$0xff] }
 0x1c9   :  { %v3569_v6 = vshll.u32 %v13485_v3, 16  ;;  %v3248_v54 = vrot.slane %v13492_v7, 7  ;;  %10489 = vmatmul.mubr.bf16.gmra.mxu0 %v9229_v28  ;;  %v3559_v49 = vrot.slane %v3557_v22, 7  ;;  %v3251_v40 = vrot.slane %v3101_v30, 7  ;;  %v13527_v22 = vld [vmem:[#allocation2 + $0x120] sm:$0xf] }
 0x1ca   :  { %v3549_v2 = vor.u32 %v3547_v17, %v3546_v29  ;;  %v3568_v32 = vrot.slane %v3566_v46, 7  ;;  %v3541_v18 = vsel %vm13189_vm1, %v16062_v62, %v3540_v43  ;;  %v16064_v44 = vrot.slane %v16063_v25, 11  ;;  %v13525_v29 = vld [vmem:[#allocation2 + $0x110] sm:$0xf] }
 0x1cb   :  { %v3250_v0 = vrot.slane %v3248_v54, 4  ;;  %v3255_v14 = vrot.slane %v13498_v12, 7  ;;  %v3562_v8 = vor.u32 %v3560_v50, %v3559_v49  ;;  %v3564_v58 = vrot.slane %v3559_v49, 4 }
 0x1cc   :  { %v3249_v56 = vsel %vm13147_vm14, %v16064_v44, %v3248_v54  ;;  %v3550_v31 = vsel %vm13189_vm1, %v3542_v9, %v3549_v2  ;;  %v3571_v47 = vor.u32 %v3569_v6, %v3568_v32  ;;  %v16066_v37 = vrot.slane %v16065_v23, 11  ;;  %v3107_v6 = vld [vmem:[#allocation2 + $0x124] sm:$0x7] }
 0x1cd   :  { %v9204_v26 = vcombine.low %v3541_v18, %v3550_v31  ;;  %v3252_v5 = vsel %vm13147_vm14, %v3250_v0, %v3251_v40  ;;  %v3257_v35 = vrot.slane %v3255_v14, 4  ;;  %v3563_v28 = vsel %vm13189_vm1, %v16067_v55, %v3562_v8 }
 0x1ce   :  { %v3256_v16 = vsel %vm13147_vm14, %v16066_v37, %v3255_v14  ;;  %v3572_v38 = vsel %vm13189_vm1, %v3564_v58, %v3571_v47  ;;  %v9230_v17 = vcombine.low %v3249_v56, %v3252_v5  ;;  %v3258_v30 = vrot.slane %v3104_v63, 7  ;;  %v13540_v14 = vld [vmem:[#allocation2 + $0x134] sm:$0xf] }
 0x1cf   :  { %10440 = vmatprep.mubr.bf16.mxu1 %v9204_v26  ;;  %v9205_v50 = vcombine.low %v3563_v28, %v3572_v38  ;;  %v3579_v46 = vshrl.u32 %v13492_v7, 16  ;;  %v3582_v43 = vshll.u32 %v13492_v7, 16  ;;  %v3588_v9 = vshrl.u32 %v13512_v39, 16  ;;  %v3110_v26 = vld [vmem:[#allocation2 + $0x138] sm:$0x7]  ;;  %v16068_v37 = vld [vmem:[#allocation21_spill] sm:$0xff] }
 0x1d0   :  { %10492 = vmatprep.mubr.bf16.mxu0 %v9230_v17  ;;  %v3259_v54 = vsel %vm13147_vm14, %v3257_v35, %v3258_v30  ;;  %v3591_v2 = vshll.u32 %v13512_v39, 16  ;;  %v3601_v49 = vshrl.u32 %v13498_v12, 16  ;;  %v3604_v32 = vshll.u32 %v13498_v12, 16  ;;  %v16070_v28 = vld [vmem:[#allocation18_spill] sm:$0xff] }
 0x1d1   :  { %10441 = vmatmul.mubr.bf16.gmra.mxu1 %v9205_v50  ;;  %v9231_v40 = vcombine.low %v3256_v16, %v3259_v54  ;;  %v3581_v62 = vrot.slane %v3579_v46, 7  ;;  %v3590_v18 = vrot.slane %v3588_v9, 7  ;;  %v3610_v25 = vshrl.u32 %v13525_v29, 16  ;;  %v13552_v46 = vld [vmem:[#allocation2 + $0x124] sm:$0xf]  ;;  %v16071_v9 = vld [vmem:[#allocation26_spill] sm:$0xff] }
 0x1d2   :  { %v3603_v44 = vrot.slane %v3601_v49, 7  ;;  %v3613_v56 = vshll.u32 %v13525_v29, 16  ;;  %v3262_v0 = vrot.slane %v13527_v22, 7  ;;  %v3265_v63 = vrot.slane %v3107_v6, 7  ;;  %v4562_v49 = vld [vmem:[#allocation2 + $0x8] sm:$0xf] }
 0x1d3   :  { %10493 = vmatmul.mubr.bf16.gmra.mxu0 %v9231_v40  ;;  %v3584_v31 = vor.u32 %v3582_v43, %v3581_v62  ;;  %v3586_v8 = vrot.slane %v3581_v62, 4  ;;  %v3593_v58 = vor.u32 %v3591_v2, %v3590_v18  ;;  %v3612_v47 = vrot.slane %v3610_v25, 7  ;;  %v16072_v62 = vld [vmem:[#allocation13_spill] sm:$0xff] }
 0x1d4   :  { %v3606_v5 = vor.u32 %v3604_v32, %v3603_v44  ;;  %v3608_v23 = vrot.slane %v3603_v44, 4  ;;  %v16069_v16 = vrot.slane %v16068_v37, 11  ;;  %v3264_v55 = vrot.slane %v3262_v0, 4 }
 0x1d5   :  { %v3585_v38 = vsel %vm13189_vm1, %v16070_v28, %v3584_v31  ;;  %v3594_v17 = vsel %vm13189_vm1, %v3586_v8, %v3593_v58  ;;  %v3615_v30 = vor.u32 %v3613_v56, %v3612_v47  ;;  %v3269_v50 = vrot.slane %v13540_v14, 7  ;;  %v13565_v56 = vld [vmem:[#allocation2 + $0xc] sm:$0xf] }
 0x1d6   :  { %v3263_v35 = vsel %vm13147_vm14, %v16069_v16, %v3262_v0  ;;  %v9206_v43 = vcombine.low %v3585_v38, %v3594_v17  ;;  %v3607_v6 = vsel %vm13189_vm1, %v16071_v9, %v3606_v5  ;;  %v3266_v54 = vsel %vm13147_vm14, %v3264_v55, %v3265_v63  ;;  %v13575_v17 = vld [vmem:[#allocation2 + $0x138] sm:$0xf] }
 0x1d7   :  { %v3272_v2 = vrot.slane %v3110_v26, 7  ;;  %v3616_v32 = vsel %vm13189_vm1, %v3608_v23, %v3615_v30  ;;  %v9232_v40 = vcombine.low %v3263_v35, %v3266_v54  ;;  %v16073_v18 = vrot.slane %v16072_v62, 11 }
 0x1d8   :  { %v3271_v44 = vrot.slane %v3269_v50, 4  ;;  %10444 = vmatprep.mubr.bf16.mxu1 %v9206_v43  ;;  %v9207_v0 = vcombine.low %v3607_v6, %v3616_v32  ;;  %v3623_v31 = vshrl.u32 %v13527_v22, 16  ;;  %v3626_v63 = vshll.u32 %v13527_v22, 16 }
 0x1d9   :  { %v3270_v25 = vsel %vm13147_vm14, %v16073_v18, %v3269_v50  ;;  %v3632_v8 = vshrl.u32 %v13552_v46, 16  ;;  %10496 = vmatprep.mubr.bf16.mxu0 %v9232_v40  ;;  %v3635_v47 = vshll.u32 %v13552_v46, 16  ;;  %v4611_v26 = vshrl.u32 %v4562_v49, 16  ;;  %v16074_v40 = vld [vmem:[#allocation3_spill] sm:$0xff] }
 0x1da   :  { %v3273_v58 = vsel %vm13147_vm14, %v3271_v44, %v3272_v2  ;;  %v4614_v5 = vshll.u32 %v4562_v49, 16  ;;  %10445 = vmatmul.mubr.bf16.gmra.mxu1 %v9207_v0  ;;  %v3625_v37 = vrot.slane %v3623_v31, 7  ;;  %v4620_v35 = vshll.u32 %v13565_v56, 16 }
 0x1db   :  { %v9233_v23 = vcombine.low %v3270_v25, %v3273_v58  ;;  %v3634_v16 = vrot.slane %v3632_v8, 7  ;;  %v4613_v55 = vrot.slane %v4611_v26, 4  ;;  %v4624_v38 = vshrl.u32 %v13565_v56, 16  ;;  %v13586_v58 = vld [vmem:[#allocation2 + $0x20] sm:$0xf] }
 0x1dc   :  { %v4616_v28 = vrot.slane %v4614_v5, 5  ;;  %v3645_v30 = vshrl.u32 %v13540_v14, 16  ;;  %v3628_v50 = vor.u32 %v3626_v63, %v3625_v37  ;;  %v3630_v43 = vrot.slane %v3625_v37, 4  ;;  %v11090_v37 = vld [vmem:[#allocation2 + $0xc] sm:$0xf] }
 0x1dd   :  { %10497 = vmatmul.mubr.bf16.gmra.mxu0 %v9233_v23  ;;  %v3637_v9 = vor.u32 %v3635_v47, %v3634_v16  ;;  %v4622_v6 = vrot.slane %v4620_v35, 5  ;;  %v4626_v2 = vrot.slane %v4624_v38, 4  ;;  %v3648_v32 = vshll.u32 %v13540_v14, 16  ;;  %v4568_v47 = vld [vmem:[#allocation2 + $0x30] sm:$0xf] }
 0x1de   :  { %v4617_v54 = vor.u32 %v4616_v28, %v4613_v55  ;;  %v3647_v49 = vrot.slane %v3645_v30, 7  ;;  %v3629_v62 = vsel %vm13189_vm1, %v16074_v40, %v3628_v50  ;;  %v3654_v25 = vshrl.u32 %v13575_v17, 16  ;;  %v11089_v23 = vld [vmem:[#allocation2 + $0x8] sm:$0xf]  ;;  %v13590_v28 = vld [vmem:[#allocation2 + $0x34] sm:$0xf] }
 0x1df   :  { %v3638_v18 = vsel %vm13189_vm1, %v3630_v43, %v3637_v9  ;;  %v3657_v44 = vshll.u32 %v13575_v17, 16  ;;  %v4627_v63 = vor.u32 %v4626_v2, %v4622_v6  ;;  %v9258_v16 = vcombine.low %v11089_v23, %v11090_v37  ;;  %v11091_v9 = vld [vmem:[#allocation2 + $0x1c] sm:$0xf]  ;;  %v13605_v37 = vld [vmem:[#allocation2 + $0x48] sm:$0xf] }
 0x1e0   :  { %v9208_v0 = vcombine.low %v3629_v62, %v3638_v18  ;;  %v4618_v31 = vrot.slane %v4617_v54, 4  ;;  %v3650_v8 = vor.u32 %v3648_v32, %v3647_v49  ;;  %v3652_v26 = vrot.slane %v3647_v49, 4 }
 0x1e1   :  { %v3656_v5 = vrot.slane %v3654_v25, 7  ;;  %v16075_v35 = vshrl.u32 %v13139_v42, 16  ;;  %v4628_v50 = vrot.slane %v4627_v63, 4  ;;  %v4638_v54 = vshll.u32 %v11091_v9, 16  ;;  %v11093_v9 = vld [vmem:[#allocation2 + $0x20] sm:$0xf] }
 0x1e2   :  { %10448 = vmatprep.mubr.bf16.mxu1 %v9208_v0  ;;  %v4623_v30 = vsel %vm11216_vm2, %v4618_v31, %v4622_v6  ;;  %v3651_v43 = vsel %vm13189_vm1, %v13124_v45, %v3650_v8  ;;  %v4644_v49 = vshll.u32 %v13586_v58, 16  ;;  %v4648_v32 = vshrl.u32 %v13586_v58, 16 }
 0x1e3   :  { %v4637_v55 = vrot.slane %v16075_v35, 4  ;;  %v3659_v2 = vor.u32 %v3657_v44, %v3656_v5  ;;  %v4659_v42 = vshrl.u32 %v4568_v47, 16  ;;  %v4633_v40 = vsel %vm11216_vm2, %v4628_v50, %v13122_v10  ;;  %v4571_v44 = vld [vmem:[#allocation2 + $0x44] sm:$0xf]  ;;  %v11092_v50 = vld [vmem:[#allocation2 + $0x1c] sm:$0xf] }
 0x1e4   :  { %v4640_v62 = vrot.slane %v4638_v54, 5  ;;  %v4662_v18 = vshll.u32 %v4568_v47, 16  ;;  %v4668_v6 = vshll.u32 %v13590_v28, 16  ;;  %v9298_v25 = vcombine.low %v4623_v30, %v4633_v40 }
 0x1e5   :  { %v3660_v45 = vsel %vm13189_vm1, %v3652_v26, %v3659_v2  ;;  %v4646_v0 = vrot.slane %v4644_v49, 5  ;;  %v4650_v31 = vrot.slane %v4648_v32, 4  ;;  %v4661_v5 = vrot.slane %v4659_v42, 4  ;;  %v11094_v2 = vld [vmem:[#allocation2 + $0x30] sm:$0xf] }
 0x1e6   :  { %v9209_v63 = vcombine.low %v3651_v43, %v3660_v45  ;;  %v4641_v8 = vor.u32 %v4640_v62, %v4637_v55  ;;  %v4664_v23 = vrot.slane %v4662_v18, 5  ;;  %10564 = vmatprep.mubr.bf16.mxu0 %v9298_v25  ;;  %v4670_v10 = vrot.slane %v4668_v6, 5  ;;  %v4574_v62 = vld [vmem:[#allocation2 + $0x58] sm:$0xf] }
 0x1e7   :  { %v4651_v35 = vor.u32 %v4650_v31, %v4646_v0  ;;  %v4672_v47 = vshrl.u32 %v13590_v28, 16  ;;  %v9259_v30 = vcombine.low %v11092_v50, %v11093_v9  ;;  %v9260_v49 = vcombine.low %v11094_v2, %v13243_v59  ;;  %v13613_v31 = vld [vmem:[#allocation2 + $0x5c] sm:$0xf] }
 0x1e8   :  { %10449 = vmatmul.mubr.bf16.gmra.mxu1 %v9209_v63  ;;  %v4642_v54 = vrot.slane %v4641_v8, 4  ;;  %v4665_v26 = vor.u32 %v4664_v23, %v4661_v5  ;;  %v4683_v43 = vshrl.u32 %v4571_v44, 16  ;;  %v4686_v42 = vshll.u32 %v4571_v44, 16 }
 0x1e9   :  { %10516 = vmatprep.mubr.bf16.mxu1 %v9258_v16  ;;  %v4652_v55 = vrot.slane %v4651_v35, 4  ;;  %v4674_v32 = vrot.slane %v4672_v47, 4  ;;  %v4692_v40 = vshll.u32 %v13605_v37, 16  ;;  %v4696_v45 = vshrl.u32 %v13605_v37, 16 }
 0x1ea   :  { %v4647_v18 = vsel %vm11216_vm2, %v4642_v54, %v4646_v0  ;;  %v4666_v6 = vrot.slane %v4665_v26, 4  ;;  %v4685_v25 = vrot.slane %v4683_v43, 4  ;;  %v4688_v63 = vrot.slane %v4686_v42, 5 }
 0x1eb   :  { %v4657_v59 = vsel %vm11216_vm2, %v4652_v55, %v13128_v48  ;;  %v4675_v16 = vor.u32 %v4674_v32, %v4670_v10  ;;  %v4694_v8 = vrot.slane %v4692_v40, 5  ;;  %v4698_v23 = vrot.slane %v4696_v45, 4  ;;  %v11095_v48 = vld [vmem:[#allocation2 + $0x44] sm:$0xf]  ;;  %v10994_v55 = vld [vmem:[%s15733_s3 + $0x130] sm:$0xff]  }
 0x1ec   :  { %v9299_v44 = vcombine.low %v4647_v18, %v4657_v59  ;;  %v4671_v5 = vsel %vm11216_vm2, %v4666_v6, %v4670_v10  ;;  %v4707_v35 = vshrl.u32 %v4574_v62, 16  ;;  %v4689_v47 = vor.u32 %v4688_v63, %v4685_v25  ;;  %v4577_v10 = vld [vmem:[#allocation2 + $0x6c] sm:$0xf]  ;;  %v13629_v18 = vld [vmem:[#allocation2 + $0x70] sm:$0xf] }
 0x1ed   :  { %v4676_v0 = vrot.slane %v4675_v16, 4  ;;  %v4710_v50 = vshll.u32 %v4574_v62, 16  ;;  %v4716_v9 = vshll.u32 %v13613_v31, 16  ;;  %v4699_v54 = vor.u32 %v4698_v23, %v4694_v8  ;;  %v16077_v23 = vld [vmem:[#allocation6_spill] sm:$0xff] }
 0x1ee   :  { %10565 = vmatmul.mubr.bf16.vlgmr.msra.gmra.mxu0 %v9299_v44  ;;  %v4709_v26 = vrot.slane %v4707_v35, 4  ;;  %v4720_v2 = vshrl.u32 %v13613_v31, 16  ;;  %v9261_v43 = vcombine.low %v11095_v48, %v13263_v15  ;;  %v4690_v42 = vrot.slane %v4689_v47, 4 }
 0x1ef   :  { %v4681_v32 = vsel %vm11216_vm2, %v4676_v0, %v13130_v53  ;;  %v4712_v40 = vrot.slane %v4710_v50, 5  ;;  %v4718_v62 = vrot.slane %v4716_v9, 5  ;;  %v4700_v25 = vrot.slane %v4699_v54, 4  ;;  %v13636_v53 = vld [vmem:[#allocation2 + $0x74] sm:$0x1] }
 0x1f0   :  { %v9300_v6 = vcombine.low %v4671_v5, %v4681_v32  ;;  %10517 = vmatmul.mubr.bf16.vlgmr.msra.gmra.mxu1 %v9259_v30  ;;  %v4722_v45 = vrot.slane %v4720_v2, 4  ;;  %v9262_v15 = vcombine.low %v13285_v51, %v13326_v1  ;;  %v4695_v59 = vsel %vm11216_vm2, %v4690_v42, %v4694_v8  ;;  %v13646_v50 = vld [vmem:[#allocation2 + $0x84] sm:$0xf] }
 0x1f1   :  { %10520 = vmatprep.mubr.bf16.mxu1 %v9260_v49  ;;  %10597 = vmatpush3.bf16.msra.mxu1 %v13383_v11  ;;  %v4713_v16 = vor.u32 %v4712_v40, %v4709_v26  ;;  %v4731_v63 = vshrl.u32 %v4577_v10, 16  ;;  %v4734_v44 = vshll.u32 %v4577_v10, 16  ;;  %v4705_v30 = vsel %vm11216_vm2, %v4700_v25, %v16077_v23  ;;  %v4580_v11 = vld [vmem:[#allocation2 + $0x80] sm:$0xf]  ;;  %v10997_v49 = vld [vmem:[%s15733_s3 + $0x128] sm:$0xff]   ;;  %v16078_v40 = vld [vmem:[#allocation14_spill] sm:$0xff] }
 0x1f2   :  { %10568 = vmatprep.mubr.bf16.mxu0 %v9300_v6  ;;  %v4723_v5 = vor.u32 %v4722_v45, %v4718_v62  ;;  %10598 = vmatprep.subr.bf16.mxu1 %v10994_v55  ;;  %v4740_v51 = vshll.u32 %v13629_v18, 16  ;;  %v4744_v1 = vshrl.u32 %v13629_v18, 16  ;;  %v9301_v8 = vcombine.low %v4695_v59, %v4705_v30  ;;  %v13655_v23 = vld [vmem:[#allocation2 + $0x88] sm:$0x1]  ;;  %v11000_v30 = vld [vmem:[%s15733_s3 + $0x120] sm:$0xff]  }
 0x1f3   :  { %v4714_v35 = vrot.slane %v4713_v16, 4  ;;  %v4733_v0 = vrot.slane %v4731_v63, 4  ;;  %v4736_v47 = vrot.slane %v4734_v44, 5  ;;  %v4750_v2 = vshll.u32 %v13636_v53, 16  ;;  %v4583_v16 = vld [vmem:[#allocation2 + $0x94] sm:$0xf] }
 0x1f4   :  { %v4724_v9 = vrot.slane %v4723_v5, 4  ;;  %v4742_v54 = vrot.slane %v4740_v51, 5  ;;  %v4746_v26 = vrot.slane %v4744_v1, 4  ;;  %v4755_v32 = vshrl.u32 %v4580_v11, 16 }
 0x1f5   :  { %v4719_v48 = vsel %vm11216_vm2, %v4714_v35, %v4718_v62  ;;  %10599 = vmatpush3.bf16.msra.mxu1 %v10994_v55  ;;  %v4737_v10 = vor.u32 %v4736_v47, %v4733_v0  ;;  %v4758_v42 = vshll.u32 %v4580_v11, 16  ;;  %v4752_v45 = vrot.slane %v4750_v2, 5  ;;  %v13666_v47 = vld [vmem:[#allocation2 + $0x98] sm:$0xf] }
 0x1f6   :  { %10569 = vmatmul.mubr.bf16.gmra.mxu0 %v9301_v8  ;;  %v4729_v6 = vsel %vm11216_vm2, %v4724_v9, %v16078_v40  ;;  %v4747_v25 = vor.u32 %v4746_v26, %v4742_v54  ;;  %v4764_v59 = vshll.u32 %v13646_v50, 16  ;;  %10600 = vmatprep.subr.bf16.mxu1 %v10997_v49  ;;  %v4757_v62 = vrot.slane %v4755_v32, 4 }
 0x1f7   :  { %v9302_v63 = vcombine.low %v4719_v48, %v4729_v6  ;;  %v4738_v44 = vrot.slane %v4737_v10, 4  ;;  %v4760_v55 = vrot.slane %v4758_v42, 5  ;;  %v4768_v1 = vshrl.u32 %v13646_v50, 16 }
 0x1f8   :  { %10521 = vmatmul.mubr.bf16.gmra.mxu1 %v9261_v43  ;;  %v4748_v5 = vrot.slane %v4747_v25, 4  ;;  %v4766_v51 = vrot.slane %v4764_v59, 5  ;;  %v4774_v11 = vshll.u32 %v13655_v23, 16  ;;  %v9263_v0 = vcombine.low %v13292_v57, %v13337_v34  ;;  %v11003_v57 = vld [vmem:[%s15733_s3 + $0x118] sm:$0xff]  }
 0x1f9   :  { %10572 = vmatprep.mubr.bf16.mxu0 %v9302_v63  ;;  %10524 = vmatprep.mubr.bf16.mxu1 %v9262_v15  ;;  %v4743_v8 = vsel %vm11216_vm2, %v4738_v44, %v4742_v54  ;;  %v4761_v35 = vor.u32 %v4760_v55, %v4757_v62  ;;  %v4779_v9 = vshrl.u32 %v4583_v16, 16  ;;  %v4770_v26 = vrot.slane %v4768_v1, 4  ;;  %v4586_v15 = vld [vmem:[#allocation2 + $0xa8] sm:$0xf]  ;;  %v13672_v54 = vld [vmem:[#allocation2 + $0x9c] sm:$0x1] }
 0x1fa   :  { %v4753_v43 = vsel %vm11216_vm2, %v4748_v5, %v4752_v45  ;;  %v4776_v2 = vrot.slane %v4774_v11, 5  ;;  %v9264_v48 = vcombine.low %v13353_v61, %v13389_v33  ;;  %10601 = vmatpush3.bf16.msra.mxu1 %v10997_v49  ;;  %v4782_v40 = vshll.u32 %v4583_v16, 16  ;;  %v13680_v33 = vld [vmem:[#allocation2 + $0xac] sm:$0xf]  ;;  %v13684_v1 = vld [vmem:[#allocation2 + $0xb0] sm:$0x1] }
 0x1fb   :  { %v9303_v10 = vcombine.low %v4743_v8, %v4753_v43  ;;  %v4762_v32 = vrot.slane %v4761_v35, 4  ;;  %v4781_v42 = vrot.slane %v4779_v9, 4  ;;  %10602 = vmatprep.subr.bf16.mxu1 %v11000_v30  ;;  %v4771_v34 = vor.u32 %v4770_v26, %v4766_v51 }
 0x1fc   :  { %v4788_v6 = vshll.u32 %v13666_v47, 16  ;;  %v4792_v25 = vshrl.u32 %v13666_v47, 16  ;;  %v4798_v61 = vshll.u32 %v13672_v54, 16  ;;  %v4784_v45 = vrot.slane %v4782_v40, 5 }
 0x1fd   :  { %v4767_v49 = vsel %vm11216_vm2, %v4762_v32, %v4766_v51  ;;  %v4803_v59 = vshrl.u32 %v4586_v15, 16  ;;  %v4806_v16 = vshll.u32 %v4586_v15, 16  ;;  %v4772_v63 = vrot.slane %v4771_v34, 4  ;;  %v11006_v51 = vld [vmem:[%s15733_s3 + $0x110] sm:$0xff]   ;;  %v4589_v15 = vld [vmem:[#allocation2 + $0xbc] sm:$0xf] }
 0x1fe   :  { %10573 = vmatmul.mubr.bf16.gmra.mxu0 %v9303_v10  ;;  %v4790_v44 = vrot.slane %v4788_v6, 5  ;;  %v4794_v62 = vrot.slane %v4792_v25, 4  ;;  %v4800_v55 = vrot.slane %v4798_v61, 5  ;;  %10603 = vmatpush3.bf16.msra.mxu1 %v11000_v30  ;;  %v4785_v5 = vor.u32 %v4784_v45, %v4781_v42  ;;  %v13694_v34 = vld [vmem:[#allocation2 + $0xc0] sm:$0xf] }
 0x1ff   :  { %v4805_v11 = vrot.slane %v4803_v59, 4  ;;  %v4808_v8 = vrot.slane %v4806_v16, 5  ;;  %v4812_v35 = vshll.u32 %v13680_v33, 16  ;;  %10604 = vmatprep.subr.bf16.mxu1 %v11003_v57  ;;  %v4777_v9 = vsel %vm11216_vm2, %v4772_v63, %v4776_v2  ;;  %v11009_v59 = vld [vmem:[%s15733_s3 + $0x108] sm:$0xff]  }
 0x200   :  { %10525 = vmatmul.mubr.bf16.gmra.mxu1 %v9263_v0  ;;  %v4795_v43 = vor.u32 %v4794_v62, %v4790_v44  ;;  %v4816_v26 = vshrl.u32 %v13680_v33, 16  ;;  %v4822_v30 = vshll.u32 %v13684_v1, 16  ;;  %v9304_v10 = vcombine.low %v4767_v49, %v4777_v9  ;;  %v13708_v62 = vld [vmem:[#allocation2 + $0xd4] sm:$0xf] }
 0x201   :  { %10528 = vmatprep.mubr.bf16.mxu1 %v9264_v48  ;;  %v4786_v32 = vrot.slane %v4785_v5, 4  ;;  %v4809_v42 = vor.u32 %v4808_v8, %v4805_v11  ;;  %v4814_v40 = vrot.slane %v4812_v35, 5  ;;  %v9265_v2 = vcombine.low %v13370_v36, %v13397_v21 }
 0x202   :  { %v4796_v6 = vrot.slane %v4795_v43, 4  ;;  %v4818_v25 = vrot.slane %v4816_v26, 4  ;;  %v4824_v61 = vrot.slane %v4822_v30, 5  ;;  %10605 = vmatpush3.bf16.msra.mxu1 %v11003_v57  ;;  %10576 = vmatprep.mubr.bf16.mxu0 %v9304_v10  ;;  %v9266_v48 = vcombine.low %v13408_v24, %v13435_v20  ;;  %v4592_v57 = vld [vmem:[#allocation2 + $0xd0] sm:$0xf]  ;;  %v11012_v10 = vld [vmem:[%s15733_s3 + $0x100] sm:$0xff]  }
 0x203   :  { %v4791_v0 = vsel %vm11216_vm2, %v4786_v32, %v4790_v44  ;;  %v4810_v45 = vrot.slane %v4809_v42, 4  ;;  %v4827_v49 = vshrl.u32 %v4589_v15, 16  ;;  %10606 = vmatprep.subr.bf16.mxu1 %v11006_v51  ;;  %v4830_v36 = vshll.u32 %v4589_v15, 16  ;;  %v13712_v20 = vld [vmem:[#allocation2 + $0xc4] sm:$0x1] }
 0x204   :  { %v4801_v16 = vsel %vm11216_vm2, %v4796_v6, %v4800_v55  ;;  %v4819_v63 = vor.u32 %v4818_v25, %v4814_v40  ;;  %v4836_v21 = vshll.u32 %v13694_v34, 16  ;;  %v4840_v11 = vshrl.u32 %v13694_v34, 16 }
 0x205   :  { %v9305_v44 = vcombine.low %v4791_v0, %v4801_v16  ;;  %v4815_v24 = vsel %vm11216_vm2, %v4810_v45, %v4814_v40  ;;  %v4829_v5 = vrot.slane %v4827_v49, 4  ;;  %v4832_v35 = vrot.slane %v4830_v36, 5  ;;  %v13723_v0 = vld [vmem:[#allocation2 + $0xd8] sm:$0x1]  ;;  %v4595_v16 = vld [vmem:[#allocation2 + $0xe4] sm:$0xf] }
 0x206   :  { %v4820_v8 = vrot.slane %v4819_v63, 4  ;;  %v4838_v9 = vrot.slane %v4836_v21, 5  ;;  %v4846_v55 = vshll.u32 %v13712_v20, 16  ;;  %10607 = vmatpush3.bf16.msra.mxu1 %v11006_v51  ;;  %v4842_v43 = vrot.slane %v4840_v11, 4 }
 0x207   :  { %10577 = vmatmul.mubr.bf16.gmra.mxu0 %v9305_v44  ;;  %v4851_v26 = vshrl.u32 %v4592_v57, 16  ;;  %v4854_v30 = vshll.u32 %v4592_v57, 16  ;;  %v4860_v15 = vshll.u32 %v13708_v62, 16  ;;  %10608 = vmatprep.subr.bf16.mxu1 %v11009_v59  ;;  %v4833_v42 = vor.u32 %v4832_v35, %v4829_v5  ;;  %v13726_v44 = vld [vmem:[#allocation2 + $0xe8] sm:$0xf] }
 0x208   :  { %v4825_v32 = vsel %vm11216_vm2, %v4820_v8, %v4824_v61  ;;  %10529 = vmatmul.mubr.bf16.gmra.mxu1 %v9265_v2  ;;  %v4848_v40 = vrot.slane %v4846_v55, 5  ;;  %v4864_v6 = vshrl.u32 %v13708_v62, 16  ;;  %v4843_v25 = vor.u32 %v4842_v43, %v4838_v9  ;;  %v13734_v35 = vld [vmem:[#allocation2 + $0xec] sm:$0x1] }
 0x209   :  { %v9306_v51 = vcombine.low %v4815_v24, %v4825_v32  ;;  %10532 = vmatprep.mubr.bf16.mxu1 %v9266_v48  ;;  %v4853_v45 = vrot.slane %v4851_v26, 4  ;;  %v4856_v49 = vrot.slane %v4854_v30, 5  ;;  %v4834_v63 = vrot.slane %v4833_v42, 4  ;;  %v13740_v32 = vld [vmem:[#allocation2 + $0xfc] sm:$0xf] }
 0x20a   :  { %v4862_v36 = vrot.slane %v4860_v15, 5  ;;  %v4866_v21 = vrot.slane %v4864_v6, 4  ;;  %v4870_v57 = vshll.u32 %v13723_v0, 16  ;;  %10609 = vmatpush3.bf16.msra.mxu1 %v11009_v59  ;;  %v4844_v61 = vrot.slane %v4843_v25, 4 }
 0x20b   :  { %10580 = vmatprep.mubr.bf16.mxu0 %v9306_v51  ;;  %v4857_v2 = vor.u32 %v4856_v49, %v4853_v45  ;;  %v9267_v48 = vcombine.low %v13418_v60, %v13448_v52  ;;  %v9268_v24 = vcombine.low %v13452_v41, %v13468_v4  ;;  %10610 = vmatprep.subr.bf16.mxu1 %v11012_v10  ;;  %v4875_v55 = vshrl.u32 %v4595_v16, 16  ;;  %v4598_v60 = vld [vmem:[#allocation2 + $0xf8] sm:$0xf] }
 0x20c   :  { %v4839_v5 = vsel %vm11216_vm2, %v4834_v63, %v4838_v9  ;;  %v4867_v11 = vor.u32 %v4866_v21, %v4862_v36  ;;  %v4872_v8 = vrot.slane %v4870_v57, 5  ;;  %v4849_v59 = vsel %vm11216_vm2, %v4844_v61, %v4848_v40 }
 0x20d   :  { %v4858_v43 = vrot.slane %v4857_v2, 4  ;;  %v4878_v26 = vshll.u32 %v4595_v16, 16  ;;  %v4884_v30 = vshll.u32 %v13726_v44, 16  ;;  %v9307_v52 = vcombine.low %v4839_v5, %v4849_v59  ;;  %v13754_v59 = vld [vmem:[#allocation2 + $0x110] sm:$0xf] }
 0x20e   :  { %v4868_v15 = vrot.slane %v4867_v11, 4  ;;  %v4877_v41 = vrot.slane %v4875_v55, 4  ;;  %v4888_v4 = vshrl.u32 %v13726_v44, 16  ;;  %10611 = vmatpush3.bf16.msra.mxu1 %v11012_v10  ;;  %v4894_v40 = vshll.u32 %v13734_v35, 16  ;;  %v13747_v10 = vld [vmem:[#allocation2 + $0x100] sm:$0x1] }
 0x20f   :  { %v4863_v9 = vsel %vm11216_vm2, %v4858_v43, %v4862_v36  ;;  %v4880_v42 = vrot.slane %v4878_v26, 5  ;;  %v4886_v6 = vrot.slane %v4884_v30, 5  ;;  %10581 = vmatmul.mubr.bf16.gmra.mxu0 %v9307_v52  ;;  %v4899_v45 = vshrl.u32 %v4598_v60, 16  ;;  %v4601_v11 = vld [vmem:[#allocation2 + $0x10c] sm:$0xf] }
 0x210   :  { %v4873_v51 = vsel %vm11216_vm2, %v4868_v15, %v4872_v8  ;;  %10533 = vmatmul.mubr.bf16.gmra.mxu1 %v9267_v48  ;;  %v4890_v25 = vrot.slane %v4888_v4, 4  ;;  %v4902_v49 = vshll.u32 %v4598_v60, 16  ;;  %v4896_v21 = vrot.slane %v4894_v40, 5 }
 0x211   :  { %v9308_v16 = vcombine.low %v4863_v9, %v4873_v51  ;;  %10536 = vmatprep.mubr.bf16.mxu1 %v9268_v24  ;;  %v4881_v63 = vor.u32 %v4880_v42, %v4877_v41  ;;  %v4908_v36 = vshll.u32 %v13740_v32, 16  ;;  %v4901_v61 = vrot.slane %v4899_v45, 4  ;;  %v4604_v51 = vld [vmem:[#allocation2 + $0x120] sm:$0xf] }
 0x212   :  { %v4891_v57 = vor.u32 %v4890_v25, %v4886_v6  ;;  %v4904_v2 = vrot.slane %v4902_v49, 5  ;;  %v4912_v5 = vshrl.u32 %v13740_v32, 16  ;;  %v4918_v55 = vshll.u32 %v13747_v10, 16 }
 0x213   :  { %10584 = vmatprep.mubr.bf16.mxu0 %v9308_v16  ;;  %v4882_v8 = vrot.slane %v4881_v63, 4  ;;  %v4910_v48 = vrot.slane %v4908_v36, 5  ;;  %v9269_v24 = vcombine.low %v13454_v19, %v13485_v3  ;;  %v9270_v60 = vcombine.low %v13492_v7, %v13512_v39  ;;  %v13762_v19 = vld [vmem:[#allocation2 + $0x114] sm:$0x1]  ;;  %v13766_v39 = vld [vmem:[#allocation2 + $0x124] sm:$0xf] }
 0x214   :  { %v4892_v43 = vrot.slane %v4891_v57, 4  ;;  %v4905_v26 = vor.u32 %v4904_v2, %v4901_v61  ;;  %v4914_v30 = vrot.slane %v4912_v5, 4  ;;  %v4920_v15 = vrot.slane %v4918_v55, 5 }
 0x215   :  { %v4887_v52 = vsel %vm11216_vm2, %v4882_v8, %v4886_v6  ;;  %v4923_v41 = vshrl.u32 %v4601_v11, 16  ;;  %v4926_v4 = vshll.u32 %v4601_v11, 16  ;;  %v4932_v3 = vshll.u32 %v13754_v59, 16 }
 0x216   :  { %v4897_v9 = vsel %vm11216_vm2, %v4892_v43, %v4896_v21  ;;  %v4906_v42 = vrot.slane %v4905_v26, 4  ;;  %v4915_v40 = vor.u32 %v4914_v30, %v4910_v48  ;;  %v4936_v7 = vshrl.u32 %v13754_v59, 16  ;;  %v13775_v26 = vld [vmem:[#allocation2 + $0x128] sm:$0x1] }
 0x217   :  { %v9309_v25 = vcombine.low %v4887_v52, %v4897_v9  ;;  %v4925_v45 = vrot.slane %v4923_v41, 4  ;;  %v4928_v49 = vrot.slane %v4926_v4, 5  ;;  %v4934_v63 = vrot.slane %v4932_v3, 5  ;;  %v4607_v52 = vld [vmem:[#allocation2 + $0x134] sm:$0xf] }
 0x218   :  { %v4911_v6 = vsel %vm11216_vm2, %v4906_v42, %v4910_v48  ;;  %v4916_v16 = vrot.slane %v4915_v40, 4  ;;  %10537 = vmatmul.mubr.bf16.gmra.mxu1 %v9269_v24  ;;  %v4942_v21 = vshll.u32 %v13762_v19, 16  ;;  %v4938_v57 = vrot.slane %v4936_v7, 4  ;;  %v13778_v42 = vld [vmem:[#allocation2 + $0x138] sm:$0xf] }
 0x219   :  { %10585 = vmatmul.mubr.bf16.gmra.mxu0 %v9309_v25  ;;  %10540 = vmatprep.mubr.bf16.mxu1 %v9270_v60  ;;  %v4929_v36 = vor.u32 %v4928_v49, %v4925_v45  ;;  %v4947_v61 = vshrl.u32 %v4604_v51, 16  ;;  %v4950_v2 = vshll.u32 %v4604_v51, 16  ;;  %v4956_v8 = vshll.u32 %v13766_v39, 16 }
 0x21a   :  { %v4921_v5 = vsel %vm11216_vm2, %v4916_v16, %v4920_v15  ;;  %v4944_v11 = vrot.slane %v4942_v21, 5  ;;  %v4960_v55 = vshrl.u32 %v13766_v39, 16  ;;  %v4939_v24 = vor.u32 %v4938_v57, %v4934_v63 }
 0x21b   :  { %v9310_v48 = vcombine.low %v4911_v6, %v4921_v5  ;;  %v4930_v43 = vrot.slane %v4929_v36, 4  ;;  %v4949_v30 = vrot.slane %v4947_v61, 4  ;;  %v4952_v60 = vrot.slane %v4950_v2, 5 }
 0x21c   :  { %v4958_v41 = vrot.slane %v4956_v8, 5  ;;  %v4962_v4 = vrot.slane %v4960_v55, 4  ;;  %v4966_v9 = vshll.u32 %v13775_v26, 16  ;;  %v4940_v40 = vrot.slane %v4939_v24, 4  ;;  %v5316_v8 = vld [vmem:[#allocation2 + $0x8] sm:$0xe] }
 0x21d   :  { %10588 = vmatprep.mubr.bf16.mxu0 %v9310_v48  ;;  %v4935_v15 = vsel %vm11216_vm2, %v4930_v43, %v4934_v63  ;;  %v9271_v3 = vcombine.low %v13498_v12, %v13525_v29  ;;  %v9272_v51 = vcombine.low %v13527_v22, %v13552_v46  ;;  %v4953_v25 = vor.u32 %v4952_v60, %v4949_v30  ;;  %v13790_v12 = vld [vmem:[#allocation2 + $0x13c] sm:$0x1] }
 0x21e   :  { %v4963_v45 = vor.u32 %v4962_v4, %v4958_v41  ;;  %v4968_v49 = vrot.slane %v4966_v9, 5  ;;  %v4971_v7 = vshrl.u32 %v4607_v52, 16  ;;  %v4945_v6 = vsel %vm11216_vm2, %v4940_v40, %v4944_v11  ;;  %v11096_v4 = vld [vmem:[#allocation2 + $0x10] sm:$0x1] }
 0x21f   :  { %v4974_v16 = vshll.u32 %v4607_v52, 16  ;;  %v4980_v21 = vshll.u32 %v13778_v42, 16  ;;  %v4984_v36 = vshrl.u32 %v13778_v42, 16  ;;  %v9311_v63 = vcombine.low %v4935_v15, %v4945_v6  ;;  %v5318_v6 = vld [vmem:[#allocation2 + $0x30] sm:$0xe] }
 0x220   :  { %v4954_v57 = vrot.slane %v4953_v25, 4  ;;  %v4964_v61 = vrot.slane %v4963_v45, 4  ;;  %10541 = vmatmul.mubr.bf16.gmra.mxu1 %v9271_v3  ;;  %v4973_v29 = vrot.slane %v4971_v7, 4  ;;  %v4990_v5 = vshll.u32 %v13790_v12, 16  ;;  %v11097_v25 = vld [vmem:[#allocation2 + $0x24] sm:$0x1] }
 0x221   :  { %10544 = vmatprep.mubr.bf16.mxu1 %v9272_v51  ;;  %v4976_v22 = vrot.slane %v4974_v16, 5  ;;  %v4982_v46 = vrot.slane %v4980_v21, 5  ;;  %v4986_v2 = vrot.slane %v4984_v36, 4  ;;  %10589 = vmatmul.mubr.bf16.gmra.mxu0 %v9311_v63  ;;  %v9322_v52 = vrot.slane %v5316_v8, 9  ;;  %v11098_v63 = vld [vmem:[#allocation2 + $0x38] sm:$0x1] }
 0x222   :  { %v4959_v11 = vsel %vm11216_vm2, %v4954_v57, %v4958_v41  ;;  %v4969_v55 = vsel %vm11216_vm2, %v4964_v61, %v4968_v49  ;;  %v4992_v30 = vrot.slane %v4990_v5, 5  ;;  %v5382_v60 = vrot.slane %v13565_v56, 5 }
 0x223   :  { %v9312_v48 = vcombine.low %v4959_v11, %v4969_v55  ;;  %v4977_v43 = vor.u32 %v4976_v22, %v4973_v29  ;;  %v4987_v24 = vor.u32 %v4986_v2, %v4982_v46  ;;  %v5385_v9 = vrot.slane %v11096_v4, 5  ;;  %v5319_v4 = vld [vmem:[#allocation2 + $0x44] sm:$0xe] }
 0x224   :  { %v5389_v15 = vrot.slane %v13586_v58, 5  ;;  %v9273_v41 = vcombine.low %v13540_v14, %v13575_v17  ;;  %v5384_v51 = vrot.slane %v5382_v60, 4  ;;  %v5392_v45 = vrot.slane %v11097_v25, 5  ;;  %v5317_v17 = vld [vmem:[#allocation2 + $0x1c] sm:$0xe] }
 0x225   :  { %10592 = vmatprep.mubr.bf16.mxu0 %v9312_v48  ;;  %v4978_v40 = vrot.slane %v4977_v43, 4  ;;  %v4988_v3 = vrot.slane %v4987_v24, 4  ;;  %v5396_v16 = vrot.slane %v13590_v28, 5  ;;  %v5383_v36 = vsel %vm11686_vm5, %v9322_v52, %v5382_v60  ;;  %v5320_v60 = vld [vmem:[#allocation2 + $0x58] sm:$0xe] }
 0x226   :  { %v5391_v56 = vrot.slane %v5389_v15, 4  ;;  %v5386_v14 = vsel %vm11686_vm5, %v5384_v51, %v5385_v9  ;;  %v5399_v57 = vrot.slane %v11098_v63, 5  ;;  %v9324_v22 = vrot.slane %v5318_v6, 9  ;;  %v11100_v9 = vld [vmem:[#allocation2 + $0x60] sm:$0x1] }
 0x227   :  { %v4983_v49 = vsel %vm11216_vm2, %v4978_v40, %v4982_v46  ;;  %v4993_v7 = vsel %vm11216_vm2, %v4988_v3, %v4992_v30  ;;  %v9354_v61 = vcombine.low %v5383_v36, %v5386_v14  ;;  %v5398_v29 = vrot.slane %v5396_v16, 4  ;;  %v11099_v30 = vld [vmem:[#allocation2 + $0x4c] sm:$0x1]  ;;  %v5321_v36 = vld [vmem:[#allocation2 + $0x6c] sm:$0xe] }
 0x228   :  { %v9313_v58 = vcombine.low %v4983_v49, %v4993_v7  ;;  %10545 = vmatmul.mubr.bf16.gmra.mxu1 %v9273_v41  ;;  %v9323_v46 = vrot.slane %v5317_v17, 9  ;;  %v5393_v28 = vsel %vm11686_vm5, %v5391_v56, %v5392_v45  ;;  %v5403_v2 = vrot.slane %v13605_v37, 5 }
 0x229   :  { %10612 = vmatprep.mubr.bf16.mxu1 %v9354_v61  ;;  %v5400_v5 = vsel %vm11686_vm5, %v5398_v29, %v5399_v57  ;;  %v5410_v8 = vrot.slane %v13613_v31, 5  ;;  %v5397_v48 = vsel %vm11686_vm5, %v9324_v22, %v5396_v16  ;;  %v5406_v52 = vrot.slane %v11099_v30, 5 }
 0x22a   :  { %10593 = vmatmul.mubr.bf16.gmra.mxu0 %v9313_v58  ;;  %v5390_v11 = vsel %vm11686_vm5, %v9323_v46, %v5389_v15  ;;  %v9356_v43 = vcombine.low %v5397_v48, %v5400_v5  ;;  %v5405_v24 = vrot.slane %v5403_v2, 4  ;;  %v5413_v40 = vrot.slane %v11100_v9, 5  ;;  %v5322_v58 = vld [vmem:[#allocation2 + $0x80] sm:$0xe]  ;;  %v5324_v5 = vld [vmem:[#allocation2 + $0xa8] sm:$0xe] }
 0x22b   :  { %v9355_v55 = vcombine.low %v5390_v11, %v5393_v28  ;;  %v5412_v37 = vrot.slane %v5410_v8, 4  ;;  %v9326_v3 = vrot.slane %v5320_v60, 9  ;;  %v9325_v31 = vrot.slane %v5319_v4, 9  ;;  %v5326_v9 = vld [vmem:[#allocation2 + $0xd0] sm:$0xe] }
 0x22c   :  { %v5407_v15 = vsel %vm11686_vm5, %v5405_v24, %v5406_v52  ;;  %v5417_v41 = vrot.slane %v13629_v18, 5  ;;  %v5424_v25 = vrot.slane %v13646_v50, 5  ;;  %v5420_v16 = vrot.slane %v13636_v53, 5 }
 0x22d   :  { %v5414_v51 = vsel %vm11686_vm5, %v5412_v37, %v5413_v40  ;;  %v5404_v45 = vsel %vm11686_vm5, %v9325_v31, %v5403_v2  ;;  %v5411_v7 = vsel %vm11686_vm5, %v9326_v3, %v5410_v8  ;;  %v5427_v14 = vrot.slane %v13655_v23, 5  ;;  %v5323_v8 = vld [vmem:[#allocation2 + $0x94] sm:$0xe]  ;;  %v5325_v40 = vld [vmem:[#allocation2 + $0xbc] sm:$0xe] }
 0x22e   :  { %v9357_v49 = vcombine.low %v5404_v45, %v5407_v15  ;;  %v9358_v56 = vcombine.low %v5411_v7, %v5414_v51  ;;  %v5419_v6 = vrot.slane %v5417_v41, 4  ;;  %v5426_v18 = vrot.slane %v5424_v25, 4 }
 0x22f   :  { %v9328_v17 = vrot.slane %v5322_v58, 9  ;;  %v9327_v50 = vrot.slane %v5321_v36, 9  ;;  %v5431_v57 = vrot.slane %v13666_v47, 5  ;;  %v5438_v29 = vrot.slane %v13680_v33, 5  ;;  %v5329_v58 = vld [vmem:[#allocation2 + $0x10c] sm:$0xe] }
 0x230   :  { %10613 = vmatmul.mubr.bf16.vlgmr.msra.gmra.mxu1 %v9355_v55  ;;  %v5421_v63 = vsel %vm11686_vm5, %v5419_v6, %v5420_v16  ;;  %v5428_v61 = vsel %vm11686_vm5, %v5426_v18, %v5427_v14  ;;  %v5434_v2 = vrot.slane %v13672_v54, 5  ;;  %v5441_v11 = vrot.slane %v13684_v1, 5  ;;  %v5330_v36 = vld [vmem:[#allocation2 + $0x120] sm:$0xe] }
 0x231   :  { %10616 = vmatprep.mubr.bf16.mxu1 %v9356_v43  ;;  %v5418_v53 = vsel %vm11686_vm5, %v9327_v50, %v5417_v41  ;;  %v5425_v23 = vsel %vm11686_vm5, %v9328_v17, %v5424_v25  ;;  %v5433_v28 = vrot.slane %v5431_v57, 4  ;;  %v5440_v47 = vrot.slane %v5438_v29, 4  ;;  %v5331_v17 = vld [vmem:[#allocation2 + $0x134] sm:$0xe] }
 0x232   :  { %v9359_v22 = vcombine.low %v5418_v53, %v5421_v63  ;;  %v9360_v46 = vcombine.low %v5425_v23, %v5428_v61  ;;  %v9330_v55 = vrot.slane %v5324_v5, 9  ;;  %v9329_v33 = vrot.slane %v5323_v8, 9 }
 0x233   :  { %v5435_v48 = vsel %vm11686_vm5, %v5433_v28, %v5434_v2  ;;  %v5445_v43 = vrot.slane %v13694_v34, 5  ;;  %v5442_v24 = vsel %vm11686_vm5, %v5440_v47, %v5441_v11  ;;  %v5452_v30 = vrot.slane %v13708_v62, 5 }
 0x234   :  { %v5432_v54 = vsel %vm11686_vm5, %v9329_v33, %v5431_v57  ;;  %v5439_v1 = vsel %vm11686_vm5, %v9330_v55, %v5438_v29  ;;  %v5448_v37 = vrot.slane %v13712_v20, 5  ;;  %v5455_v3 = vrot.slane %v13723_v0, 5  ;;  %v5328_v0 = vld [vmem:[#allocation2 + $0xf8] sm:$0xe] }
 0x235   :  { %v9361_v52 = vcombine.low %v5432_v54, %v5435_v48  ;;  %v9362_v60 = vcombine.low %v5439_v1, %v5442_v24  ;;  %v5447_v4 = vrot.slane %v5445_v43, 4  ;;  %v5454_v34 = vrot.slane %v5452_v30, 4 }
 0x236   :  { %v9332_v31 = vrot.slane %v5326_v9, 9  ;;  %v9331_v15 = vrot.slane %v5325_v40, 9  ;;  %v5459_v51 = vrot.slane %v13726_v44, 5  ;;  %v5466_v20 = vrot.slane %v13740_v32, 5 }
 0x237   :  { %v5449_v41 = vsel %vm11686_vm5, %v5447_v4, %v5448_v37  ;;  %v5456_v25 = vsel %vm11686_vm5, %v5454_v34, %v5455_v3  ;;  %v5473_v7 = vrot.slane %v13754_v59, 5  ;;  %v5480_v44 = vrot.slane %v13766_v39, 5 }
 0x238   :  { %10617 = vmatmul.mubr.bf16.gmra.mxu1 %v9357_v49  ;;  %v5446_v45 = vsel %vm11686_vm5, %v9331_v15, %v5445_v43  ;;  %v5327_v49 = vld [vmem:[#allocation2 + $0xe4] sm:$0xe]  ;;  %v5453_v16 = vsel %vm11686_vm5, %v9332_v31, %v5452_v30  ;;  %v5461_v14 = vrot.slane %v5459_v51, 4  ;;  %v5462_v32 = vrot.slane %v13734_v35, 5 }
 0x239   :  { %10620 = vmatprep.mubr.bf16.mxu1 %v9358_v56  ;;  %v9363_v6 = vcombine.low %v5446_v45, %v5449_v41  ;;  %v9364_v18 = vcombine.low %v5453_v16, %v5456_v25  ;;  %v9333_v50 = vrot.slane %v5327_v49, 9  ;;  %v9334_v63 = vrot.slane %v5328_v0, 9 }
 0x23a   :  { %v5468_v57 = vrot.slane %v5466_v20, 4  ;;  %v5469_v59 = vrot.slane %v13747_v10, 5  ;;  %v9335_v61 = vrot.slane %v5329_v58, 9  ;;  %v5475_v29 = vrot.slane %v5473_v7, 4  ;;  %v11013_v10 = vld [vmem:[%s15735_s5 + $0x78] sm:$0xff]  }
 0x23b   :  { %v5476_v53 = vrot.slane %v13762_v19, 5  ;;  %v5482_v39 = vrot.slane %v5480_v44, 4  ;;  %v9337_v28 = vrot.slane %v5331_v17, 9  ;;  %v5487_v35 = vrot.slane %v13778_v42, 5  ;;  %10644 = vmatprep.subr.bf16.mxu0 %v11013_v10 }
 0x23c   :  { %v5463_v2 = vsel %vm11686_vm5, %v5461_v14, %v5462_v32  ;;  %v5490_v5 = vrot.slane %v13790_v12, 5  ;;  %v5470_v19 = vsel %vm11686_vm5, %v5468_v57, %v5469_v59  ;;  %v5467_v11 = vsel %vm11686_vm5, %v9334_v63, %v5466_v20  ;;  %10645 = vmatpush3.bf16.msra.mxu0 %v11013_v10  ;;  %v11018_v63 = vld [vmem:[%s15735_s5 + $0x58] sm:$0xff]   ;;  %v11019_v57 = vld [vmem:[%s15735_s5 + $0x30] sm:$0xff]  }
 0x23d   :  { %v9366_v55 = vcombine.low %v5467_v11, %v5470_v19  ;;  %v5477_v24 = vsel %vm11686_vm5, %v5475_v29, %v5476_v53  ;;  %v5489_v30 = vrot.slane %v5487_v35, 4  ;;  %v5488_v25 = vsel %vm11686_vm5, %v9337_v28, %v5487_v35  ;;  %v11021_v35 = vld [vmem:[%s15735_s5 + $0x50] sm:$0xff]   ;;  %v11023_v11 = vld [vmem:[%s15735_s5 + $0x18] sm:$0xff]  }
 0x23f   :  { %v5491_v31 = vsel %vm11686_vm5, %v5489_v30, %v5490_v5 }
 0x240   :  { %10621 = vmatmul.mubr.bf16.gmra.mxu1 %v9359_v22  ;;  %v9336_v22 = vrot.slane %v5330_v36, 9  ;;  %v9369_v45 = vcombine.low %v5488_v25, %v5491_v31  ;;  %v11017_v36 = vld [vmem:[%s15735_s5 + $0x38] sm:$0xff]  }
 0x241   :  { %10624 = vmatprep.mubr.bf16.mxu1 %v9360_v46  ;;  %v5483_v46 = vrot.slane %v13775_v26, 5  ;;  %v5460_v26 = vsel %vm11686_vm5, %v9333_v50, %v5459_v51  ;;  %v11015_v51 = vld [vmem:[%s15735_s5 + $0x68] sm:$0xff]   ;;  %10692 = vmatprep.subr.bf16.mxu1 %v11017_v36 }
 0x242   :  { %v9365_v42 = vcombine.low %v5460_v26, %v5463_v2  ;;  %v5481_v37 = vsel %vm11686_vm5, %v9336_v22, %v5480_v44  ;;  %10693 = vmatpush3.bf16.msra.mxu1 %v11017_v36  ;;  %v11020_v22 = vld [vmem:[%s15735_s5 + $0x28] sm:$0xff]   ;;  %v11022_v2 = vld [vmem:[%s15735_s5 + $0x20] sm:$0xff]  }
 0x243   :  { %v5484_v1 = vsel %vm11686_vm5, %v5482_v39, %v5483_v46  ;;  %10694 = vmatprep.subr.bf16.mxu1 %v11019_v57 }
 0x244   :  { %v9368_v40 = vcombine.low %v5481_v37, %v5484_v1 }
 0x245   :  { %v13856_v62 = vpop.f32.mrf.mxu0 }
 0x246   :  { %10695 = vmatpush3.bf16.msra.mxu1 %v11019_v57  ;;  %v14029_v57 = vld [vmem:[%s15735_s5 + $0xb8] sm:$0xff]  }
 0x247   :  { %v4097_v56 = vpop.f32.mrf.mxu0  ;;  %10696 = vmatprep.subr.bf16.mxu1 %v11020_v22  ;;  %16080 = vst [vmem:[#allocation4_spill] sm:$0xff] %v14029_v57 }
 0x248   :  { %10625 = vmatmul.mubr.bf16.gmra.mxu1 %v9361_v52  ;;  %v11014_v52 = vld [vmem:[%s15735_s5 + $0x70] sm:$0xff]  }
 0x249   :  { %10628 = vmatprep.mubr.bf16.mxu1 %v9362_v60  ;;  %v13873_v23 = vpop.f32.mrf.mxu0  ;;  %v5474_v60 = vsel %vm11686_vm5, %v9335_v61, %v5473_v7  ;;  %10646 = vmatprep.subr.bf16.mxu0 %v11014_v52 }
 0x24a   :  { %v9367_v4 = vcombine.low %v5474_v60, %v5477_v24  ;;  %10647 = vmatpush3.bf16.msra.mxu0 %v11014_v52  ;;  %10697 = vmatpush3.bf16.msra.mxu1 %v11020_v22  ;;  %v11025_v24 = vld [vmem:[%s15735_s5 + $0x10] sm:$0xff]  }
 0x24b   :  { %v13889_v47 = vpop.f32.mrf.mxu0  ;;  %10648 = vmatprep.subr.bf16.mxu0 %v11015_v51  ;;  %10698 = vmatprep.subr.bf16.mxu1 %v11022_v2 }
 0x24e   :  { %10649 = vmatpush3.bf16.msra.mxu0 %v11015_v51  ;;  %10699 = vmatpush3.bf16.msra.mxu1 %v11022_v2  ;;  %v11028_v51 = vld [vmem:[%s15735_s5] sm:$0xff]  }
 0x24f   :  { %10700 = vmatprep.subr.bf16.mxu1 %v11023_v11 }
 0x250   :  { %10629 = vmatmul.mubr.bf16.gmra.mxu1 %v9363_v6  ;;  %v11016_v6 = vld [vmem:[%s15735_s5 + $0x60] sm:$0xff]  }
 0x251   :  { %10632 = vmatprep.mubr.bf16.mxu1 %v9364_v18  ;;  %v13885_v8 = vpop.f32.mrf.mxu1  ;;  %10650 = vmatprep.subr.bf16.mxu0 %v11016_v6 }
 0x252   :  { %10651 = vmatpush3.bf16.msra.mxu0 %v11016_v6  ;;  %10701 = vmatpush3.bf16.msra.mxu1 %v11023_v11 }
 0x253   :  { %v3824_v12 = vpop.f32.mrf.mxu1  ;;  %10652 = vmatprep.subr.bf16.mxu0 %v11018_v63  ;;  %10702 = vmatprep.subr.bf16.mxu1 %v11025_v24 }
 0x254   :  { %v13893_v33 = vadd.f32 %v4097_v56, %v3824_v12 }
 0x255   :  { %v13897_v43 = vpop.f32.mrf.mxu1 }
 0x256   :  { %v13895_v48 = vpop.f32.mrf.mxu0  ;;  %10653 = vmatpush3.bf16.msra.mxu0 %v11018_v63  ;;  %10703 = vmatpush3.bf16.msra.mxu1 %v11025_v24 }
 0x257   :  { %v13910_v9 = vpop.f32.mrf.mxu1  ;;  %10654 = vmatprep.subr.bf16.mxu0 %v11021_v35 }
 0x258   :  { %10633 = vmatmul.mubr.bf16.gmra.mxu1 %v9365_v42  ;;  %v4113_v54 = vpop.f32.mrf.mxu0 }
 0x259   :  { %10636 = vmatprep.mubr.bf16.mxu1 %v9366_v55  ;;  %v11024_v55 = vld [vmem:[%s15735_s5 + $0x48] sm:$0xff]  }
 0x25a   :  { %v13912_v34 = vpop.f32.mrf.mxu0  ;;  %10655 = vmatpush3.bf16.msra.mxu0 %v11021_v35 }
 0x25b   :  { %10656 = vmatprep.subr.bf16.mxu0 %v11024_v55 }
 0x25c   :  { %v13918_v15 = vpop.f32.mrf.mxu0 }
 0x25e   :  { %10657 = vmatpush3.bf16.msra.mxu0 %v11024_v55 }
 0x25f   :  { %v13914_v3 = vpop.f32.mrf.mxu1 }
 0x260   :  { %10637 = vmatmul.mubr.bf16.gmra.mxu1 %v9367_v4 }
 0x261   :  { %10640 = vmatprep.mubr.bf16.mxu1 %v9368_v40  ;;  %v3840_v41 = vpop.f32.mrf.mxu1  ;;  %v11026_v40 = vld [vmem:[%s15735_s5 + $0x8] sm:$0xff]  }
 0x262   :  { %v13925_v20 = vadd.f32 %v4113_v54, %v3840_v41  ;;  %10704 = vmatprep.subr.bf16.mxu1 %v11026_v40  ;;  %v11027_v41 = vld [vmem:[%s15735_s5 + $0x40] sm:$0xff]  }
 0x263   :  { %v13929_v0 = vpop.f32.mrf.mxu1  ;;  %10705 = vmatpush3.bf16.msra.mxu1 %v11026_v40  ;;  %10658 = vmatprep.subr.bf16.mxu0 %v11027_v41 }
 0x264   :  { %v13927_v49 = vpop.f32.mrf.mxu0  ;;  %10706 = vmatprep.subr.bf16.mxu1 %v11028_v51  ;;  %10659 = vmatpush3.bf16.msra.mxu0 %v11027_v41 }
 0x265   :  { %v13931_v56 = vpop.f32.mrf.mxu1  ;;  %10740 = vmatprep.subr.bf16.mxu0 %v14029_v57 }
 0x266   :  { %v4129_v7 = vpop.f32.mrf.mxu0 }
 0x267   :  { %10707 = vmatpush3.bf16.msra.mxu1 %v11028_v51 }
 0x268   :  { %10641 = vmatmul.mubr.bf16.gmra.mxu1 %v9369_v45  ;;  %v13936_v16 = vpop.f32.mrf.mxu0 }
 0x26a   :  { %v13943_v18 = vpop.f32.mrf.mxu0 }
 0x26d   :  { %v13938_v58 = vpop.f32.mrf.mxu1 }
 0x26f   :  { %v3856_v44 = vpop.f32.mrf.mxu1 }
 0x270   :  { %v13945_v14 = vadd.f32 %v4129_v7, %v3856_v44 }
 0x271   :  { %v13947_v32 = vpop.f32.mrf.mxu1 }
 0x273   :  { %v13957_v59 = vpop.f32.mrf.mxu1 }
 0x274   :  { %v13949_v17 = vpop.f32.mrf.mxu0 }
 0x276   :  { %v4145_v50 = vpop.f32.mrf.mxu0 }
 0x278   :  { %v13959_v61 = vpop.f32.mrf.mxu0 }
 0x27a   :  { %v13961_v29 = vpop.f32.mrf.mxu0 }
 0x27c   :  { %v13963_v53 = vpop.f32.mrf.mxu1 }
 0x27e   :  { %v3872_v39 = vpop.f32.mrf.mxu1 }
 0x27f   :  { %v13968_v46 = vadd.f32 %v4145_v50, %v3872_v39  ;;  %v13970_v28 = vpop.f32.mrf.mxu0 }
 0x280   :  { %v13978_v5 = vpop.f32.mrf.mxu1 }
 0x281   :  { %v4161_v10 = vpop.f32.mrf.mxu0 }
 0x282   :  { %v13980_v19 = vpop.f32.mrf.mxu1 }
 0x283   :  { %v13982_v26 = vpop.f32.mrf.mxu0 }
 0x285   :  { %v13984_v42 = vpop.f32.mrf.mxu0 }
 0x287   :  { %v13989_v12 = vpop.f32.mrf.mxu1 }
 0x289   :  { %v3888_v30 = vpop.f32.mrf.mxu1  ;;  %v13997_v54 = vpop.f32.mrf.mxu0 }
 0x28a   :  { %v13999_v52 = vadd.f32 %v4161_v10, %v3888_v30 }
 0x28b   :  { %v14001_v1 = vpop.f32.mrf.mxu1  ;;  %v4177_v60 = vpop.f32.mrf.mxu0 }
 0x28d   :  { %v14003_v4 = vpop.f32.mrf.mxu1  ;;  %v14005_v37 = vpop.f32.mrf.mxu0 }
 0x28f   :  { %v14010_v31 = vpop.f32.mrf.mxu0 }
 0x291   :  { %v14018_v25 = vpop.f32.mrf.mxu1 }
 0x293   :  { %v3904_v45 = vpop.f32.mrf.mxu1  ;;  %v10494_v7 = vpop.f32.mrf.mxu0 }
 0x294   :  { %v14020_v6 = vadd.f32 %v4177_v60, %v3904_v45 }
 0x295   :  { %v14022_v36 = vpop.f32.mrf.mxu1  ;;  %v4193_v44 = vpop.f32.mrf.mxu0 }
 0x297   :  { %v14024_v50 = vpop.f32.mrf.mxu1  ;;  %v10495_v63 = vpop.f32.mrf.mxu0 }
 0x299   :  { %v14031_v22 = vpop.f32.mrf.mxu0 }
 0x29a   :  { %v10446_v39 = vpop.f32.mrf.mxu1 }
 0x29b   :  { %v14034_v35 = vadd.f32 %v10494_v7, %v10446_v39 }
 0x29c   :  { %v3920_v2 = vpop.f32.mrf.mxu1 }
 0x29d   :  { %v14036_v10 = vadd.f32 %v4193_v44, %v3920_v2  ;;  %v10498_v11 = vpop.f32.mrf.mxu0 }
 0x29e   :  { %v10447_v55 = vpop.f32.mrf.mxu1 }
 0x29f   :  { %v14038_v24 = vadd.f32 %v10495_v63, %v10447_v55  ;;  %v4209_v30 = vpop.f32.mrf.mxu0 }
 0x2a0   :  { %v14040_v60 = vpop.f32.mrf.mxu1 }
 0x2a1   :  { %16081 = vst [vmem:[#allocation27_spill] sm:$0xff] %v14038_v24  ;;  %v10499_v40 = vpop.f32.mrf.mxu0 }
 0x2a3   :  { %v14044_v21 = vpop.f32.mrf.mxu0 }
 0x2a8   :  { %v10450_v41 = vpop.f32.mrf.mxu1 }
 0x2a9   :  { %v14042_v51 = vadd.f32 %v10498_v11, %v10450_v41 }
 0x2aa   :  { %v3936_v45 = vpop.f32.mrf.mxu1 }
 0x2ab   :  { %16082 = vst [vmem:[#allocation8_spill] sm:$0xff] %v14042_v51  ;;  %v14046_v38 = vadd.f32 %v4209_v30, %v3936_v45 }
 0x2ac   :  { %v10451_v7 = vpop.f32.mrf.mxu1 }
 0x2ad   :  { %16083 = vst [vmem:[#allocation7_spill] sm:$0xff] %v14046_v38  ;;  %v14048_v39 = vadd.f32 %v10499_v40, %v10451_v7 }
 0x2ae   :  { %v14050_v44 = vpop.f32.mrf.mxu1  ;;  %v14052_v2 = vpop.f32.mrf.mxu0 }
 0x2af   :  { %16084 = vst [vmem:[#allocation9_spill] sm:$0xff] %v14048_v39 }
 0x2b0   :  { %v14054_v63 = vpop.f32.mrf.mxu1  ;;  %v14056_v55 = vpop.f32.mrf.mxu0 }
 0x2b1   :  { %16085 = vst [vmem:[#allocation20_spill] sm:$0xff] %v14056_v55 }
 0x2b2   :  { %v4403_v57 = vpop.f32.mrf.mxu1  ;;  %v14058_v13 = vpop.f32.mrf.mxu0 }
 0x2b3   :  { %16086 = vst [vmem:[#allocation28_spill] sm:$0xff] %v14058_v13  ;;  %v14061_v11 = vadd.f32 %v4403_v57, %v13893_v33 }
 0x2b4   :  { %v14063_v41 = vpop.f32.mrf.mxu1  ;;  %v14065_v30 = vpop.f32.mrf.mxu0 }
 0x2b5   :  { %16087 = vst [vmem:[#allocation25_spill] sm:$0xff] %v14065_v30 }
 0x2b6   :  { %v14067_v40 = vpop.f32.mrf.mxu1  ;;  %v14069_v45 = vpop.f32.mrf.mxu0 }
 0x2b7   :  { %16088 = vst [vmem:[#allocation15_spill] sm:$0xff] %v14069_v45 }
 0x2b8   :  { %v14071_v7 = vpop.f32.mrf.mxu1  ;;  %v14073_v27 = vpop.f32.mrf.mxu0 }
 0x2b9   :  { %16089 = vst [vmem:[#allocation10_spill] sm:$0xff] %v14073_v27 }
 0x2ba   :  { %v4419_v39 = vpop.f32.mrf.mxu1  ;;  %v14075_v38 = vpop.f32.mrf.mxu0 }
 0x2bb   :  { %16090 = vst [vmem:[#allocation29_spill] sm:$0xff] %v14075_v38  ;;  %v14078_v51 = vadd.f32 %v4419_v39, %v13925_v20 }
 0x2bc   :  { %v14080_v33 = vpop.f32.mrf.mxu1  ;;  %v14082_v57 = vpop.f32.mrf.mxu0 }
 0x2bd   :  { %16091 = vst [vmem:[#allocation16_spill] sm:$0xff] %v14078_v51  ;;  %16092 = vst [vmem:[#allocation31_spill] sm:$0xff] %v14082_v57  ;;  %v14104_v57 = vld [vmem:[%s15735_s5 + $0xf8] sm:$0xff]  }
 0x2be   :  { %v14084_v13 = vpop.f32.mrf.mxu1  ;;  %v14086_v30 = vpop.f32.mrf.mxu0  ;;  %16100 = vst [vmem:[#allocation36_spill] sm:$0xff] %v14104_v57  ;;  %10788 = vmatprep.subr.bf16.mxu1 %v14104_v57 }
 0x2bf   :  { %16093 = vst [vmem:[#allocation32_spill] sm:$0xff] %v14086_v30 }
 0x2c0   :  { %v14088_v24 = vpop.f32.mrf.mxu1  ;;  %v14090_v45 = vpop.f32.mrf.mxu0 }
 0x2c1   :  { %16094 = vst [vmem:[#allocation39_spill] sm:$0xff] %v14088_v24  ;;  %16095 = vst [vmem:[#allocation33_spill] sm:$0xff] %v14090_v45 }
 0x2c2   :  { %v4435_v55 = vpop.f32.mrf.mxu1  ;;  %v14092_v27 = vpop.f32.mrf.mxu0 }
 0x2c3   :  { %16096 = vst [vmem:[#allocation35_spill] sm:$0xff] %v14092_v27  ;;  %v14095_v38 = vadd.f32 %v4435_v55, %v13945_v14 }
 0x2c4   :  { %v14097_v20 = vpop.f32.mrf.mxu1  ;;  %v14099_v39 = vpop.f32.mrf.mxu0 }
 0x2c5   :  { %16097 = vst [vmem:[#allocation34_spill] sm:$0xff] %v14095_v38  ;;  %16098 = vst [vmem:[#allocation12_spill] sm:$0xff] %v14097_v20 }
 0x2c6   :  { %16099 = vst [vmem:[#allocation38_spill] sm:$0xff] %v14099_v39  ;;  %v14106_v30 = vpop.f32.mrf.mxu1 }
 0x2c7   :  { %16101 = vst [vmem:[#allocation37_spill] sm:$0xff] %v14106_v30  ;;  %v14109_v45 = vpop.f32.mrf.mxu0 }
 0x2c8   :  { %16102 = vst [vmem:[#allocation19_spill] sm:$0xff] %v14109_v45  ;;  %v14111_v51 = vpop.f32.mrf.mxu1 }
 0x2c9   :  { %16103 = vst [vmem:[#allocation24_spill] sm:$0xff] %v14111_v51  ;;  %v14113_v27 = vpop.f32.mrf.mxu0 }
 0x2ca   :  { %16104 = vst [vmem:[#allocation22_spill] sm:$0xff] %v14113_v27  ;;  %v4451_v14 = vpop.f32.mrf.mxu1 }
 0x2cb   :  { %v14116_v55 = vadd.f32 %v4451_v14, %v13968_v46  ;;  %v14118_v39 = vpop.f32.mrf.mxu0 }
 0x2cc   :  { %16106 = vst [vmem:[#allocation21_spill] sm:$0xff] %v14118_v39  ;;  %v14120_v38 = vpop.f32.mrf.mxu1 }
 0x2cd   :  { %16105 = vst [vmem:[#allocation11_spill] sm:$0xff] %v14116_v55  ;;  %v14122_v20 = vpop.f32.mrf.mxu0 }
 0x2ce   :  { %16107 = vst [vmem:[#allocation18_spill] sm:$0xff] %v14122_v20  ;;  %v14124_v24 = vpop.f32.mrf.mxu1  ;;  %v4106_v20 = vadd.f32 %v13856_v62, %v13885_v8  ;;  %v14159_v62 = vadd.f32 %v13927_v49, %v13938_v58  ;;  %v14186_v49 = vadd.f32 %v13961_v29, %v13980_v19  ;;  %v14194_v58 = vld [vmem:[#allocation2 + $0x2c] sm:$0x8] }
 0x2cf   :  { %v14126_v30 = vpop.f32.mrf.mxu0 }
 0x2d0   :  { %16108 = vst [vmem:[#allocation26_spill] sm:$0xff] %v14126_v30  ;;  %v14128_v57 = vpop.f32.mrf.mxu1  ;;  %v4109_v30 = vadd.f32 %v13873_v23, %v13897_v43  ;;  %v14163_v23 = vld [vmem:[#allocation2 + $0x4] sm:$0x8]  ;;  %v14175_v43 = vadd.f32 %v13949_v17, %v13963_v53  ;;  %v14204_v17 = vadd.f32 %v13982_v26, %v14001_v1  ;;  %v14212_v53 = vadd.f32 %v13984_v42, %v14003_v4  ;;  %v14223_v26 = vld [vmem:[#allocation2 + $0x54] sm:$0x8] }
 0x2d1   :  { %16109 = vst [vmem:[#allocation13_spill] sm:$0xff] %v14128_v57  ;;  %v14130_v45 = vpop.f32.mrf.mxu0  ;;  %16113 = vst [vmem:[#allocation40_spill] sm:$0xff] %v14223_v26 }
 0x2d2   :  { %16110 = vst [vmem:[#allocation3_spill] sm:$0xff] %v14130_v45  ;;  %v4467_v51 = vpop.f32.mrf.mxu1  ;;  %v4101_v45 = vadd.f32 %v13889_v47, %v13910_v9  ;;  %v14167_v47 = vadd.f32 %v13936_v16, %v13947_v32  ;;  %v14200_v32 = vadd.f32 %v13970_v28, %v13989_v12  ;;  %v14220_v28 = vadd.f32 %v14005_v37, %v14022_v36  ;;  %v16126_v36 = vld [vmem:[#allocation28_spill] sm:$0xff] }
 0x2d3   :  { %v14133_v27 = vadd.f32 %v4467_v51, %v13999_v52  ;;  %v14135_v46 = vpop.f32.mrf.mxu0  ;;  %v4122_v52 = vadd.f32 %v13895_v48, %v13914_v3  ;;  %v4125_v51 = vadd.f32 %v13912_v34, %v13929_v0  ;;  %v14171_v48 = vadd.f32 %v13943_v18, %v13957_v59  ;;  %v14177_v34 = vld [vmem:[#allocation2 + $0x18] sm:$0x8]  ;;  %v14196_v18 = vld [vmem:[#allocation2 + $0x40] sm:$0x8] }
 0x2d4   :  { %v14137_v14 = vpop.f32.mrf.mxu1  ;;  %v6286_v3 = vshrl.u32 %v14163_v23, 16  ;;  %v6308_v16 = vshrl.u32 %v14177_v34, 16  ;;  %16112 = vst [vmem:[#allocation14_spill] sm:$0xff] %v14196_v18  ;;  %v6352_v29 = vshrl.u32 %v14196_v18, 16  ;;  %v14227_v12 = vadd.f32 %v14010_v31, %v14024_v50 }
 0x2d5   :  { %v14139_v39 = vpop.f32.mrf.mxu0  ;;  %v14246_v50 = vadd.f32 %v14031_v22, %v14040_v60  ;;  %v14261_v22 = vadd.f32 %v14044_v21, %v14050_v44  ;;  %v4531_v60 = vadd.f32 %v14067_v40, %v4101_v45  ;;  %v14277_v21 = vld [vmem:[#allocation2 + $0x90] sm:$0x8] }
 0x2d6   :  { %16111 = vst [vmem:[#allocation6_spill] sm:$0xff] %v14139_v39  ;;  %v14141_v55 = vpop.f32.mrf.mxu1  ;;  %v4117_v39 = vadd.f32 %v13918_v15, %v13931_v56  ;;  %v14182_v15 = vadd.f32 %v13959_v61, %v13978_v5  ;;  %v6330_v61 = vshrl.u32 %v14194_v58, 16  ;;  %v14216_v5 = vadd.f32 %v13997_v54, %v14018_v25  ;;  %v14234_v54 = vld [vmem:[#allocation2 + $0x68] sm:$0x8]  ;;  %16122 = vst [vmem:[#allocation49_spill] sm:$0xff] %v14277_v21 }
 0x2d7   :  { %v14232_v4 = vrot.slane %v6286_v3, 11  ;;  %16115 = vst [vmem:[#allocation42_spill] sm:$0xff] %v14234_v54  ;;  %v6374_v25 = vshrl.u32 %v14223_v26, 16  ;;  %v6396_v31 = vshrl.u32 %v14234_v54, 16  ;;  %v4532_v3 = vadd.f32 %v14054_v63, %v4106_v20 }
 0x2d8   :  { %v14149_v57 = vpop.f32.mrf.mxu1  ;;  %v14249_v42 = vrot.slane %v6330_v61, 11  ;;  %v4536_v63 = vadd.f32 %v14071_v7, %v4122_v52  ;;  %v4535_v40 = vadd.f32 %v14084_v13, %v4117_v39  ;;  %v16123_v52 = vld [vmem:[#allocation20_spill] sm:$0xff]  ;;  %v14298_v39 = vld [vmem:[#allocation2 + $0xa4] sm:$0x8]  ;;  %v16132_v13 = vld [vmem:[#allocation10_spill] sm:$0xff] }
 0x2d9   :  { %v14161_v8 = vpop.f32.mrf.mxu0  ;;  %16114 = vst [vmem:[#allocation41_spill] sm:$0xff] %v14232_v4  ;;  %v14251_v4 = vrot.slane %v6352_v29, 11  ;;  %v14265_v61 = vrot.slane %v6374_v25, 11  ;;  %v14267_v29 = vld [vmem:[#allocation2 + $0x7c] sm:$0x8]  ;;  %v14282_v7 = vadd.f32 %v14052_v2, %v4532_v3  ;;  %16127 = vst [vmem:[#allocation20_spill] sm:$0xff] %v14298_v39 }
 0x2da   :  { %v4483_v9 = vpop.f32.mrf.mxu1  ;;  %16117 = vst [vmem:[#allocation44_spill] sm:$0xff] %v14249_v42  ;;  %16120 = vst [vmem:[#allocation47_spill] sm:$0xff] %v14267_v29  ;;  %v6418_v44 = vshrl.u32 %v14267_v29, 16  ;;  %v16128_v3 = vld [vmem:[#allocation25_spill] sm:$0xff] }
 0x2db   :  { %v14188_v0 = vpop.f32.mrf.mxu0  ;;  %v14191_v56 = vadd.f32 %v4483_v9, %v14020_v6  ;;  %v14239_v6 = vrot.slane %v6308_v16, 11  ;;  %16118 = vst [vmem:[#allocation45_spill] sm:$0xff] %v14251_v4  ;;  %v4533_v16 = vadd.f32 %v14063_v41, %v4109_v30  ;;  %16119 = vst [vmem:[#allocation46_spill] sm:$0xff] %v14265_v61  ;;  %v16133_v61 = vld [vmem:[#allocation29_spill] sm:$0xff] }
 0x2dc   :  { %v14206_v59 = vpop.f32.mrf.mxu1 }
 0x2dd   :  { %v14237_v37 = vpop.f32.mrf.mxu0  ;;  %16116 = vst [vmem:[#allocation43_spill] sm:$0xff] %v14239_v6  ;;  %v14295_v9 = vadd.f32 %v16126_v36, %v4533_v16 }
 0x2de   :  { %v14229_v1 = vpop.f32.mrf.mxu1 }
 0x2df   :  { %v14270_v41 = vpop.f32.mrf.mxu0 }
 0x2e0   :  { %v10542_v19 = vpop.f32.mrf.mxu1 }
 0x2e1   :  { %v14255_v6 = vadd.f32 %v10542_v19, %v14034_v35  ;;  %v4537_v35 = vadd.f32 %v14080_v33, %v4125_v51  ;;  %v14275_v19 = vrot.slane %v6396_v31, 11  ;;  %v14286_v33 = vadd.f32 %v16123_v52, %v14061_v11  ;;  %v16125_v31 = vld [vmem:[#allocation27_spill] sm:$0xff]  ;;  %v14312_v16 = vpop.f32.mrf.mxu0 }
 0x2e2   :  { %v4499_v20 = vpop.f32.mrf.mxu1  ;;  %v6440_v51 = vshrl.u32 %v14277_v21, 16  ;;  %v14303_v11 = vadd.f32 %v16128_v3, %v4531_v60  ;;  %v16129_v52 = vld [vmem:[#allocation15_spill] sm:$0xff]  ;;  %v14321_v60 = vrot.slane %v6418_v44, 11  ;;  %v16136_v3 = vld [vmem:[#allocation37_spill] sm:$0xff] }
 0x2e3   :  { %v14273_v30 = vadd.f32 %v4499_v20, %v14036_v10  ;;  %16121 = vst [vmem:[#allocation48_spill] sm:$0xff] %v14275_v19  ;;  %v16124_v10 = vld [vmem:[#allocation39_spill] sm:$0xff]  ;;  %v14306_v19 = vadd.f32 %v16129_v52, %v4536_v63  ;;  %v14319_v54 = vadd.f32 %v16133_v61, %v4537_v35  ;;  %v14323_v63 = vld [vmem:[#allocation2 + $0xb8] sm:$0x8]  ;;  %v4539_v52 = vadd.f32 %v16136_v3, %v14171_v48  ;;  %v16141_v61 = vld [vmem:[#allocation32_spill] sm:$0xff] }
 0x2e4   :  { %v10543_v45 = vpop.f32.mrf.mxu1  ;;  %v4540_v25 = vadd.f32 %v16124_v10, %v14159_v62  ;;  %v16130_v10 = vld [vmem:[#allocation12_spill] sm:$0xff]  ;;  %16134 = vst [vmem:[#allocation39_spill] sm:$0xff] %v14321_v60  ;;  %16135 = vst [vmem:[#allocation27_spill] sm:$0xff] %v14323_v63  ;;  %v14332_v4 = vrot.slane %v6440_v51, 11  ;;  %v6484_v60 = vshrl.u32 %v14323_v63, 16  ;;  %v4545_v48 = vadd.f32 %v14120_v38, %v14182_v15  ;;  %v16143_v3 = vld [vmem:[#allocation33_spill] sm:$0xff] }
 0x2e5   :  { %v14292_v20 = vadd.f32 %v10543_v45, %v16125_v31  ;;  %v6462_v45 = vshrl.u32 %v14298_v39, 16  ;;  %v4541_v36 = vadd.f32 %v16130_v10, %v14167_v47  ;;  %v16131_v31 = vld [vmem:[#allocation16_spill] sm:$0xff]  ;;  %v16138_v10 = vld [vmem:[#allocation31_spill] sm:$0xff] }
 0x2e6   :  { %v14300_v2 = vpop.f32.mrf.mxu1  ;;  %v14316_v29 = vadd.f32 %v16132_v13, %v16131_v31  ;;  %v16137_v62 = vld [vmem:[#allocation24_spill] sm:$0xff]  ;;  %v14330_v26 = vadd.f32 %v16138_v10, %v4535_v40  ;;  %16139 = vst [vmem:[#allocation28_spill] sm:$0xff] %v14332_v4  ;;  %v14338_v35 = vadd.f32 %v16141_v61, %v4540_v25  ;;  %v4543_v25 = vadd.f32 %v14124_v24, %v14186_v49  ;;  %v16146_v61 = vld [vmem:[#allocation7_spill] sm:$0xff] }
 0x2e7   :  { %v4544_v21 = vadd.f32 %v16137_v62, %v14175_v43  ;;  %v16140_v13 = vld [vmem:[#allocation8_spill] sm:$0xff]  ;;  %v16142_v62 = vld [vmem:[#allocation34_spill] sm:$0xff]  ;;  %v14349_v10 = vrot.slane %v6462_v45, 11  ;;  %v16147_v38 = vld [vmem:[#allocation35_spill] sm:$0xff]  ;;  %v14382_v18 = vrot.slane %v6484_v60, 11  ;;  %v4547_v60 = vadd.f32 %v14141_v55, %v14212_v53 }
 0x2e8   :  { %v10546_v47 = vpop.f32.mrf.mxu1  ;;  %v14346_v40 = vadd.f32 %v16143_v3, %v16142_v62  ;;  %v14361_v15 = vadd.f32 %v16147_v38, %v4541_v36  ;;  %v14363_v39 = vld [vmem:[#allocation2 + $0xe0] sm:$0x8]  ;;  %v16149_v45 = vld [vmem:[#allocation13_spill] sm:$0xff]  ;;  %v16154_v38 = vld [vmem:[#allocation22_spill] sm:$0xff] }
 0x2e9   :  { %v14335_v31 = vadd.f32 %v10546_v47, %v16140_v13  ;;  %16144 = vst [vmem:[#allocation25_spill] sm:$0xff] %v14349_v10  ;;  %v14351_v47 = vld [vmem:[#allocation2 + $0xcc] sm:$0x8]  ;;  %v14355_v13 = vpop.f32.mrf.mxu0  ;;  %16148 = vst [vmem:[#allocation12_spill] sm:$0xff] %v14363_v39  ;;  %v4548_v3 = vadd.f32 %v16149_v45, %v14200_v32  ;;  %v16150_v10 = vld [vmem:[#allocation38_spill] sm:$0xff] }
 0x2ea   :  { %v4515_v43 = vpop.f32.mrf.mxu1  ;;  %16145 = vst [vmem:[#allocation15_spill] sm:$0xff] %v14351_v47  ;;  %v6506_v62 = vshrl.u32 %v14351_v47, 16  ;;  %v14369_v63 = vadd.f32 %v16150_v10, %v4539_v52  ;;  %v16151_v24 = vld [vmem:[#allocation19_spill] sm:$0xff]  ;;  %16155 = vst [vmem:[#allocation16_spill] sm:$0xff] %v14382_v18  ;;  %v14385_v45 = vld [vmem:[#allocation2 + $0xf4] sm:$0x8]  ;;  %v4549_v52 = vadd.f32 %v14137_v14, %v14204_v17 }
 0x2eb   :  { %v14358_v44 = vadd.f32 %v4515_v43, %v16146_v61  ;;  %v14372_v49 = vadd.f32 %v16151_v24, %v4544_v21  ;;  %v6528_v43 = vshrl.u32 %v14363_v39, 16  ;;  %v16152_v61 = vld [vmem:[#allocation9_spill] sm:$0xff]  ;;  %v16153_v36 = vld [vmem:[#allocation11_spill] sm:$0xff]  ;;  %v10591_v32 = vpop.f32.mrf.mxu0  ;;  %v16158_v18 = vld [vmem:[#allocation18_spill] sm:$0xff] }
 0x2ec   :  { %v10547_v51 = vpop.f32.mrf.mxu1  ;;  %v14380_v42 = vadd.f32 %v16154_v38, %v16153_v36  ;;  %v16156_v10 = vld [vmem:[#allocation21_spill] sm:$0xff]  ;;  %v6550_v36 = vshrl.u32 %v14385_v45, 16  ;;  %v4552_v38 = vadd.f32 %v14149_v57, %v14216_v5  ;;  %v14403_v14 = vadd.f32 %v16158_v18, %v4543_v25  ;;  %v16161_v55 = vld [vmem:[#allocation3_spill] sm:$0xff]  ;;  %v14427_v47 = vld [vmem:[#allocation2 + $0x11c] sm:$0x8] }
 0x2ed   :  { %v14376_v4 = vadd.f32 %v10547_v51, %v16152_v61  ;;  %v14392_v24 = vadd.f32 %v16156_v10, %v4545_v48  ;;  %v14395_v61 = vld [vmem:[#allocation2 + $0x108] sm:$0x8]  ;;  %v14405_v17 = vrot.slane %v6506_v62, 11  ;;  %v14410_v10 = vld [vmem:[%s15736_s4] ss:$0 sm:$0xff]  ;;  %v16160_v51 = vld [vmem:[#allocation26_spill] sm:$0xff]  ;;  %v14417_v53 = vadd.f32 %v16161_v55, %v14133_v27 }
 0x2ee   :  { %v14389_v21 = vpop.f32.mrf.mxu1  ;;  %16157 = vst [vmem:[#allocation10_spill] sm:$0xff] %v14395_v61  ;;  %v14413_v39 = vadd.f32 %v16160_v51, %v4548_v3  ;;  %v14419_v57 = vrot.slane %v6528_v43, 11  ;;  %v6572_v18 = vshrl.u32 %v14395_v61, 16  ;;  %v4553_v5 = vadd.f32 %v14206_v59, %v14220_v28  ;;  %v14436_v55 = vld [vmem:[#allocation2 + $0x130] sm:$0x8]  ;;  %v5256_v28 = vpop.f32.mrf.mxu0 }
 0x2ef   :  { %16159 = vst [vmem:[#allocation29_spill] sm:$0xff] %v14405_v17  ;;  %v4551_v3 = vadd.f32 %v14229_v1, %v14227_v12  ;;  %v14432_v43 = vadd.f32 %v14135_v46, %v4549_v52  ;;  %v14434_v51 = vrot.slane %v6550_v36, 11  ;;  %v6594_v59 = vshrl.u32 %v14427_v47, 16  ;;  %v16163_v17 = vld [vmem:[#allocation6_spill] sm:$0xff]  ;;  %v7540_v1 = vld [vmem:[#allocation2 + $0x10] sm:$0x1] }
 0x2f0   :  { %v10614_v48 = vpop.f32.mrf.mxu1  ;;  %v14442_v62 = vadd.f32 %v16163_v17, %v4547_v60  ;;  %v14445_v12 = vadd.f32 %v14161_v8, %v4552_v38  ;;  %v14449_v52 = vadd.f32 %v14188_v0, %v14191_v56  ;;  %v14451_v36 = vrot.slane %v6572_v18, 11  ;;  %v10594_v18 = vpop.f32.mrf.mxu0 }
 0x2f1   :  { %v5784_v25 = vadd.f32 %v10614_v48, %v14282_v7  ;;  %16162 = vst [vmem:[#allocation37_spill] sm:$0xff] %v14434_v51  ;;  %v7606_v61 = vshll.u32 %v7540_v1, 16  ;;  %v14456_v60 = vadd.f32 %v14237_v37, %v4553_v5  ;;  %v14465_v0 = vadd.f32 %v14312_v16, %v14255_v6  ;;  %v7546_v1 = vld [vmem:[#allocation2 + $0x38] sm:$0x1] }
 0x2f2   :  { %v5655_v27 = vpop.f32.mrf.mxu1  ;;  %v14467_v56 = vrot.slane %v6594_v59, 11  ;;  %v14473_v5 = vadd.f32 %v14355_v13, %v14273_v30  ;;  %v6616_v16 = vshrl.u32 %v14436_v55, 16  ;;  %v7543_v59 = vld [vmem:[#allocation2 + $0x24] sm:$0x1] }
 0x2f3   :  { %v5823_v7 = vadd.f32 %v14410_v10, %v5784_v25  ;;  %v5782_v48 = vadd.f32 %v5655_v27, %v14286_v33  ;;  %v14461_v27 = vadd.f32 %v14270_v41, %v4551_v3  ;;  %v4555_v41 = vadd.f32 %v14300_v2, %v14246_v50 }
 0x2f4   :  { %v10615_v46 = vpop.f32.mrf.mxu1  ;;  %16164 = vst [vmem:[#allocation24_spill] sm:$0xff] %v14467_v56  ;;  %v14480_v6 = vrot.slane %v7606_v61, 5  ;;  %v7630_v13 = vshll.u32 %v7543_v59, 16  ;;  %v5269_v61 = vpop.f32.mrf.mxu0 }
 0x2f5   :  { %v5855_v25 = vmax.f32 %v5823_v7, 0.0  ;;  %v5785_v33 = vadd.f32 %v10615_v46, %v14295_v9  ;;  %v5821_v38 = vadd.f32 %v14410_v10, %v5782_v48  ;;  %v14478_v48 = vadd.f32 %v10591_v32, %v14292_v20 }
 0x2f6   :  { %v5658_v17 = vpop.f32.mrf.mxu1  ;;  %16165 = vst [vmem:[#allocation31_spill] sm:$0xff] %v14480_v6 }
 0x2f7   :  { %v9678_v7 = vpack.c.bf16 %v5855_v25, %v5855_v25  ;;  %v5824_v9 = vadd.f32 %v14410_v10, %v5785_v33  ;;  %v5783_v37 = vadd.f32 %v5658_v17, %v14303_v11  ;;  %v7549_v25 = vld [vmem:[#allocation2 + $0x4c] sm:$0x1]  ;;  %v7552_v33 = vld [vmem:[#allocation2 + $0x60] sm:$0x1]  ;;  %v5853_v50 = vmax.f32 %v5821_v38, 0.0 }
 0x2f8   :  { %v10618_v3 = vpop.f32.mrf.mxu1  ;;  %v7654_v17 = vshll.u32 %v7546_v1, 16  ;;  %v7678_v20 = vshll.u32 %v7549_v25, 16  ;;  %v7702_v32 = vshll.u32 %v7552_v33, 16  ;;  %v14499_v25 = vrot.slane %v7630_v13, 5 }
 0x2f9   :  { %6015 = vst [vmem:[#allocation2 + $0x1c] sm:$0xf] %v9678_v7  ;;  %v5856_v46 = vmax.f32 %v5824_v9, 0.0  ;;  %v5822_v11 = vadd.f32 %v14410_v10, %v5783_v37  ;;  %v5788_v30 = vadd.f32 %v10618_v3, %v14306_v19  ;;  %v7555_v9 = vld [vmem:[#allocation2 + $0x74] sm:$0x1]  ;;  %v14487_v37 = vadd.f32 %v5256_v28, %v4555_v41 }
 0x2fa   :  { %v5671_v2 = vpop.f32.mrf.mxu1  ;;  %v14490_v19 = vadd.f32 %v10594_v18, %v14335_v31  ;;  %v14492_v3 = vrot.slane %v6616_v16, 11  ;;  %v7726_v38 = vshll.u32 %v7555_v9, 16  ;;  %v14501_v28 = vrot.slane %v7654_v17, 5  ;;  %v10595_v18 = vpop.f32.mrf.mxu0 }
 0x2fb   :  { %v9679_v8 = vpack.c.bf16 %v5856_v46, %v5856_v46  ;;  %v5854_v51 = vmax.f32 %v5822_v11, 0.0  ;;  %v5827_v6 = vadd.f32 %v14410_v10, %v5788_v30  ;;  %v5786_v7 = vadd.f32 %v5671_v2, %v14316_v29 }
 0x2fc   :  { %v10619_v56 = vpop.f32.mrf.mxu1  ;;  %v14497_v29 = vadd.f32 %v5269_v61, %v14358_v44  ;;  %v14503_v31 = vrot.slane %v7678_v20, 5  ;;  %v14514_v13 = vadd.f32 %v10595_v18, %v14376_v4 }
 0x2fd   :  { %6016 = vst [vmem:[#allocation2 + $0x20] sm:$0xf] %v9679_v8  ;;  %v9751_v59 = vpack.c.bf16 %v5854_v51, %v5853_v50  ;;  %v5859_v1 = vmax.f32 %v5827_v6, 0.0  ;;  %v5825_v46 = vadd.f32 %v14410_v10, %v5786_v7  ;;  %v5789_v11 = vadd.f32 %v10619_v56, %v14319_v54  ;;  %v5272_v7 = vpop.f32.mrf.mxu0 }
 0x2fe   :  { %v5674_v30 = vpop.f32.mrf.mxu1  ;;  %v14507_v6 = vrot.slane %v7702_v32, 5  ;;  %v4559_v54 = vadd.f32 %v14389_v21, %v14261_v22  ;;  %v14518_v50 = vrot.slane %v7726_v38, 5 }
 0x2ff   :  { %9796 = vst [vmem:[#allocation2 + $0x8] sm:$0xff] %v9751_v59   ;;  %v9682_v41 = vpack.c.bf16 %v5859_v1, %v5859_v1  ;;  %v5828_v51 = vadd.f32 %v14410_v10, %v5789_v11  ;;  %v5787_v8 = vadd.f32 %v5674_v30, %v14330_v26  ;;  %v5857_v44 = vmax.f32 %v5825_v46, 0.0 }
 0x300   :  { %16166 = vst [vmem:[#allocation8_spill] sm:$0xff] %v14507_v6  ;;  %v10622_v56 = vpop.f32.mrf.mxu1  ;;  %v14511_v16 = vld [vmem:[#allocation2 + $0x1c] sm:$0xf]  ;;  %16167 = vst [vmem:[#allocation32_spill] sm:$0xff] %v14518_v50  ;;  %v16168_v11 = vrot.slane %v14177_v34, 11 }
 0x301   :  { %v14516_v33 = vld [vmem:[#allocation2 + $0x1c] sm:$0xf]  ;;  %6019 = vst [vmem:[#allocation2 + $0x44] sm:$0xf] %v9682_v41  ;;  %v5860_v2 = vmax.f32 %v5828_v51, 0.0  ;;  %v5826_v26 = vadd.f32 %v14410_v10, %v5787_v8  ;;  %v5792_v17 = vadd.f32 %v10622_v56, %v14338_v35  ;;  %v6150_v20 = vrot.slane %v14511_v16, 7 }
 0x302   :  { %v5687_v22 = vpop.f32.mrf.mxu1  ;;  %v6313_v21 = vshrl.u32 %v14511_v16, 16  ;;  %v6316_v32 = vshll.u32 %v14511_v16, 16  ;;  %v14539_v56 = vadd.f32 %v5272_v7, %v4559_v54 }
 0x303   :  { %v9683_v9 = vpack.c.bf16 %v5860_v2, %v5860_v2  ;;  %v5858_v38 = vmax.f32 %v5826_v26, 0.0  ;;  %v5831_v59 = vadd.f32 %v14410_v10, %v5792_v17  ;;  %v5790_v1 = vadd.f32 %v5687_v22, %v14346_v40 }
 0x304   :  { %v10623_v46 = vpop.f32.mrf.mxu1  ;;  %v6050_v35 = vld [vmem:[#allocation2 + $0x20] sm:$0x7]  ;;  %v14533_v18 = vsel %vm13147_vm14, %v16168_v11, %v6150_v20  ;;  %v6152_v41 = vrot.slane %v6150_v20, 4  ;;  %v14537_v8 = vrot.slane %v6313_v21, 7 }
 0x305   :  { %v14535_v51 = vld [vmem:[#allocation2 + $0x20] sm:$0xf]  ;;  %6020 = vst [vmem:[#allocation2 + $0x48] sm:$0xf] %v9683_v9  ;;  %v9756_v2 = vpack.c.bf16 %v5858_v38, %v5857_v44  ;;  %v5863_v26 = vmax.f32 %v5831_v59, 0.0  ;;  %v5829_v40 = vadd.f32 %v14410_v10, %v5790_v1  ;;  %v5793_v17 = vadd.f32 %v10623_v46, %v14361_v15 }
 0x306   :  { %v5690_v22 = vpop.f32.mrf.mxu1  ;;  %v6046_v34 = vld [vmem:[#allocation2 + $0x8] sm:$0xf]  ;;  %v6047_v61 = vld [vmem:[#allocation2 + $0xc] sm:$0x7]  ;;  %v6153_v4 = vrot.slane %v6050_v35, 7  ;;  %v14544_v11 = vor.u32 %v6316_v32, %v14537_v8 }
 0x307   :  { %9797 = vst [vmem:[#allocation2 + $0x30] sm:$0xff] %v9756_v2   ;;  %v9686_v21 = vpack.c.bf16 %v5863_v26, %v5863_v26  ;;  %v5861_v44 = vmax.f32 %v5829_v40, 0.0  ;;  %v5832_v7 = vadd.f32 %v14410_v10, %v5793_v17  ;;  %v5791_v9 = vadd.f32 %v5690_v22, %v14369_v63  ;;  %v6269_v26 = vld [vmem:[#allocation2 + $0xc] sm:$0xf] }
 0x308   :  { %v10626_v15 = vpop.f32.mrf.mxu1  ;;  %v6143_v38 = vrot.slane %v6046_v34, 7  ;;  %v6146_v59 = vrot.slane %v6047_v61, 7  ;;  %v6154_v1 = vsel %vm13147_vm14, %v6152_v41, %v6153_v4  ;;  %v6291_v32 = vshrl.u32 %v6046_v34, 16 }
 0x309   :  { %6023 = vst [vmem:[#allocation2 + $0x6c] sm:$0xf] %v9686_v21  ;;  %v5864_v46 = vmax.f32 %v5832_v7, 0.0  ;;  %v5830_v35 = vadd.f32 %v14410_v10, %v5791_v9  ;;  %v5796_v54 = vadd.f32 %v10626_v15, %v14372_v49  ;;  %v9484_v2 = vcombine.low %v14533_v18, %v6154_v1 }
 0x30a   :  { %v5703_v40 = vpop.f32.mrf.mxu1  ;;  %v16170_v17 = vrot.slane %v14163_v23, 11  ;;  %v6145_v61 = vrot.slane %v6143_v38, 4  ;;  %v6293_v22 = vrot.slane %v6291_v32, 7  ;;  %v6294_v20 = vshll.u32 %v6046_v34, 16 }
 0x30b   :  { %v9687_v4 = vpack.c.bf16 %v5864_v46, %v5864_v46  ;;  %v5862_v41 = vmax.f32 %v5830_v35, 0.0  ;;  %v5835_v21 = vadd.f32 %v14410_v10, %v5796_v54  ;;  %v5794_v7 = vadd.f32 %v5703_v40, %v14380_v42  ;;  %v16171_v35 = vld [vmem:[#allocation41_spill] sm:$0xff] }
 0x30c   :  { %v6144_v63 = vsel %vm13147_vm14, %v16170_v17, %v6143_v38  ;;  %v10627_v9 = vpop.f32.mrf.mxu1  ;;  %v6147_v49 = vsel %vm13147_vm14, %v6145_v61, %v6146_v59  ;;  %v6296_v18 = vor.u32 %v6294_v20, %v6293_v22  ;;  %v6298_v15 = vrot.slane %v6293_v22, 4 }
 0x30d   :  { %v6300_v1 = vshrl.u32 %v6269_v26, 16  ;;  %6024 = vst [vmem:[#allocation2 + $0x70] sm:$0xf] %v9687_v4  ;;  %v9761_v23 = vpack.c.bf16 %v5862_v41, %v5861_v44  ;;  %v5867_v50 = vmax.f32 %v5835_v21, 0.0  ;;  %v5833_v38 = vadd.f32 %v14410_v10, %v5794_v7  ;;  %v14573_v4 = vld [vmem:[#allocation2 + $0x44] sm:$0xf] }
 0x30e   :  { %v5797_v34 = vadd.f32 %v10627_v9, %v14392_v24  ;;  %v5706_v32 = vpop.f32.mrf.mxu1  ;;  %v9483_v46 = vcombine.low %v6144_v63, %v6147_v49  ;;  %v6297_v42 = vsel %vm13189_vm1, %v16171_v35, %v6296_v18  ;;  %v6303_v17 = vshll.u32 %v6269_v26, 16  ;;  %v14569_v6 = vld [vmem:[#allocation2 + $0x30] sm:$0xf]  ;;  %v6053_v22 = vld [vmem:[#allocation2 + $0x34] sm:$0x7]  ;;  %v16173_v26 = vld [vmem:[#allocation43_spill] sm:$0xff] }
 0x30f   :  { %v6302_v40 = vrot.slane %v6300_v1, 7  ;;  %9798 = vst [vmem:[#allocation2 + $0x58] sm:$0xff] %v9761_v23   ;;  %v9690_v20 = vpack.c.bf16 %v5867_v50, %v5867_v50  ;;  %v5865_v59 = vmax.f32 %v5833_v38, 0.0  ;;  %v5795_v61 = vadd.f32 %v5706_v32, %v14403_v14  ;;  %v11035_v24 = vld [vmem:[%s15735_s5 + $0xf0] sm:$0xff]   ;;  %v16174_v32 = vld [vmem:[#allocation36_spill] sm:$0xff] }
 0x310   :  { %v5836_v44 = vadd.f32 %v14410_v10, %v5797_v34  ;;  %10708 = vmatprep.mubr.bf16.mxu1 %v9483_v46  ;;  %v10630_v63 = vpop.f32.mrf.mxu1  ;;  %v6319_v50 = vsel %vm13189_vm1, %v16173_v26, %v14544_v11  ;;  %v6322_v21 = vshrl.u32 %v14535_v51, 16  ;;  %v6325_v7 = vshll.u32 %v14535_v51, 16  ;;  %v6056_v26 = vld [vmem:[#allocation2 + $0x48] sm:$0x7]  ;;  %v11103_v54 = vld [vmem:[#allocation2 + $0x30] sm:$0xf] }
 0x311   :  { %v6305_v41 = vor.u32 %v6303_v17, %v6302_v40  ;;  %6027 = vst [vmem:[#allocation2 + $0x94] sm:$0xf] %v9690_v20  ;;  %v5834_v9 = vadd.f32 %v14410_v10, %v5795_v61  ;;  %10709 = vmatmul.mubr.bf16.vlgmr.msra.gmra.mxu1 %v9484_v2  ;;  %v5800_v49 = vadd.f32 %v10630_v63, %v14413_v39  ;;  %v6157_v18 = vrot.slane %v14569_v6, 7  ;;  %v11036_v39 = vld [vmem:[%s15735_s5 + $0xe8] sm:$0xff]  }
 0x312   :  { %v5868_v14 = vmax.f32 %v5836_v44, 0.0  ;;  %v6324_v23 = vrot.slane %v6322_v21, 7  ;;  %v5719_v38 = vpop.f32.mrf.mxu1  ;;  %v6160_v34 = vrot.slane %v6053_v22, 7  ;;  %v6164_v11 = vrot.slane %v14573_v4, 7  ;;  %10789 = vmatpush3.bf16.msra.mxu1 %v16174_v32  ;;  %v16176_v21 = vld [vmem:[#allocation14_spill] sm:$0xff] }
 0x313   :  { %v6306_v1 = vsel %vm13189_vm1, %v6298_v15, %v6305_v41  ;;  %v5866_v35 = vmax.f32 %v5834_v9, 0.0  ;;  %v5839_v40 = vadd.f32 %v14410_v10, %v5800_v49  ;;  %10790 = vmatprep.subr.bf16.mxu1 %v11035_v24  ;;  %v5798_v15 = vadd.f32 %v5719_v38, %v14417_v53  ;;  %v14614_v32 = vld [vmem:[#allocation2 + $0x34] sm:$0xf] }
 0x314   :  { %v9691_v46 = vpack.c.bf16 %v5868_v14, %v5868_v14  ;;  %v9459_v17 = vcombine.low %v6297_v42, %v6306_v1  ;;  %v6327_v2 = vor.u32 %v6325_v7, %v6324_v23  ;;  %v10631_v20 = vpop.f32.mrf.mxu1  ;;  %v16175_v44 = vrot.slane %v14194_v58, 11 }
 0x315   :  { %v6159_v22 = vrot.slane %v6157_v18, 4  ;;  %v9766_v63 = vpack.c.bf16 %v5866_v35, %v5865_v59  ;;  %v5871_v41 = vmax.f32 %v5839_v40, 0.0  ;;  %v5801_v42 = vadd.f32 %v10631_v20, %v14432_v43 }
 0x316   :  { %v6158_v61 = vsel %vm13147_vm14, %v16175_v44, %v6157_v18  ;;  %6028 = vst [vmem:[#allocation2 + $0x98] sm:$0xf] %v9691_v46  ;;  %10660 = vmatprep.mubr.bf16.mxu0 %v9459_v17  ;;  %v16177_v14 = vrot.slane %v16176_v21, 11  ;;  %v16178_v53 = vrot.slane %v14537_v8, 4  ;;  %v5837_v9 = vadd.f32 %v14410_v10, %v5798_v15  ;;  %v5722_v49 = vpop.f32.mrf.mxu1  ;;  %10791 = vmatpush3.bf16.msra.mxu1 %v11035_v24  ;;  %v11030_v8 = vld [vmem:[%s15735_s5 + $0xb0] sm:$0xff]   ;;  %v16179_v15 = vld [vmem:[#allocation4_spill] sm:$0xff] }
 0x317   :  { %v6161_v59 = vsel %vm13147_vm14, %v6159_v22, %v6160_v34  ;;  %v6166_v18 = vrot.slane %v6164_v11, 4  ;;  %9799 = vst [vmem:[#allocation2 + $0x80] sm:$0xff] %v9766_v63   ;;  %v9694_v43 = vpack.c.bf16 %v5871_v41, %v5871_v41  ;;  %v5840_v23 = vadd.f32 %v14410_v10, %v5801_v42  ;;  %10792 = vmatprep.subr.bf16.mxu1 %v11036_v39  ;;  %v14631_v63 = vld [vmem:[#allocation2 + $0x48] sm:$0xf] }
 0x318   :  { %v6165_v7 = vsel %vm13147_vm14, %v16177_v14, %v6164_v11  ;;  %v6328_v58 = vsel %vm13189_vm1, %v16178_v53, %v6327_v2  ;;  %v5799_v38 = vadd.f32 %v5722_v49, %v14442_v62  ;;  %v5869_v46 = vmax.f32 %v5837_v9, 0.0  ;;  %v10634_v34 = vpop.f32.mrf.mxu1 }
 0x319   :  { %v9460_v1 = vcombine.low %v6319_v50, %v6328_v58  ;;  %v9485_v35 = vcombine.low %v6158_v61, %v6161_v59  ;;  %v6167_v40 = vrot.slane %v6056_v26, 7  ;;  %v6335_v24 = vshrl.u32 %v14569_v6, 16  ;;  %v11038_v50 = vld [vmem:[%s15735_s5 + $0xe0] sm:$0xff]   ;;  %6031 = vst [vmem:[#allocation2 + $0xbc] sm:$0xf] %v9694_v43  ;;  %v11039_v59 = vld [vmem:[%s15735_s5 + $0xd8] sm:$0xff]  }
 0x31a   :  { %v5872_v62 = vmax.f32 %v5840_v23, 0.0  ;;  %v5838_v11 = vadd.f32 %v14410_v10, %v5799_v38  ;;  %v5804_v17 = vadd.f32 %v10634_v34, %v14445_v12  ;;  %v6338_v2 = vshll.u32 %v14569_v6, 16  ;;  %v5735_v41 = vpop.f32.mrf.mxu1  ;;  %v11031_v6 = vld [vmem:[%s15735_s5 + $0xa8] sm:$0xff]   ;;  %10793 = vmatpush3.bf16.msra.mxu1 %v11036_v39 }
 0x31b   :  { %10661 = vmatmul.mubr.bf16.vlgmr.msra.gmra.mxu0 %v9460_v1  ;;  %10712 = vmatprep.mubr.bf16.mxu1 %v9485_v35  ;;  %v6168_v20 = vsel %vm13147_vm14, %v6166_v18, %v6167_v40  ;;  %v6337_v44 = vrot.slane %v6335_v24, 7  ;;  %v6344_v61 = vshrl.u32 %v14614_v32, 16  ;;  %v6347_v22 = vshll.u32 %v14614_v32, 16  ;;  %v16180_v39 = vld [vmem:[#allocation44_spill] sm:$0xff] }
 0x31c   :  { %10741 = vmatpush3.bf16.msra.mxu0 %v16179_v15  ;;  %v9695_v42 = vpack.c.bf16 %v5872_v62, %v5872_v62  ;;  %v5870_v26 = vmax.f32 %v5838_v11, 0.0  ;;  %v9486_v21 = vcombine.low %v6165_v7, %v6168_v20  ;;  %v5843_v12 = vadd.f32 %v14410_v10, %v5804_v17  ;;  %v10635_v49 = vpop.f32.mrf.mxu1  ;;  %10794 = vmatprep.subr.bf16.mxu1 %v11038_v50  ;;  %v6059_v17 = vld [vmem:[#allocation2 + $0x5c] sm:$0x7] }
 0x31d   :  { %10742 = vmatprep.subr.bf16.mxu0 %v11030_v8  ;;  %v6340_v14 = vor.u32 %v6338_v2, %v6337_v44  ;;  %v6342_v53 = vrot.slane %v6337_v44, 4  ;;  %v6346_v58 = vrot.slane %v6344_v61, 7  ;;  %v6357_v9 = vshrl.u32 %v14573_v4, 16  ;;  %v11032_v2 = vld [vmem:[%s15735_s5 + $0xa0] sm:$0xff]   ;;  %v14657_v61 = vld [vmem:[#allocation2 + $0x6c] sm:$0xf] }
 0x31e   :  { %6032 = vst [vmem:[#allocation2 + $0xc0] sm:$0xf] %v9695_v42  ;;  %v9771_v7 = vpack.c.bf16 %v5870_v26, %v5869_v46  ;;  %10713 = vmatmul.mubr.bf16.gmra.mxu1 %v9486_v21  ;;  %v5875_v18 = vmax.f32 %v5843_v12, 0.0  ;;  %v6360_v43 = vshll.u32 %v14573_v4, 16  ;;  %v6366_v1 = vshrl.u32 %v14631_v63, 16  ;;  %v5738_v34 = vpop.f32.mrf.mxu1  ;;  %v16181_v26 = vld [vmem:[#allocation45_spill] sm:$0xff] }
 0x31f   :  { %v6341_v23 = vsel %vm13189_vm1, %v16180_v39, %v6340_v14  ;;  %v6349_v38 = vor.u32 %v6347_v22, %v6346_v58  ;;  %v6359_v35 = vrot.slane %v6357_v9, 7  ;;  %v6369_v40 = vshll.u32 %v14631_v63, 16  ;;  %v14649_v4 = vld [vmem:[#allocation2 + $0x58] sm:$0xf]  ;;  %10795 = vmatpush3.bf16.msra.mxu1 %v11038_v50  ;;  %v11041_v50 = vld [vmem:[%s15735_s5 + $0xd0] sm:$0xff]   ;;  %v16182_v39 = vld [vmem:[#allocation40_spill] sm:$0xff] }
 0x320   :  { %10743 = vmatpush3.bf16.msra.mxu0 %v11030_v8  ;;  %9800 = vst [vmem:[#allocation2 + $0xa8] sm:$0xff] %v9771_v7   ;;  %v9698_v24 = vpack.c.bf16 %v5875_v18, %v5875_v18  ;;  %v6368_v62 = vrot.slane %v6366_v1, 7  ;;  %v5802_v46 = vadd.f32 %v5735_v41, %v14449_v52  ;;  %v5805_v11 = vadd.f32 %v10635_v49, %v14456_v60  ;;  %v10638_v52 = vpop.f32.mrf.mxu1 }
 0x321   :  { %10744 = vmatprep.subr.bf16.mxu0 %v11031_v6  ;;  %v6350_v8 = vsel %vm13189_vm1, %v6342_v53, %v6349_v38  ;;  %v6362_v15 = vor.u32 %v6360_v43, %v6359_v35  ;;  %v6364_v20 = vrot.slane %v6359_v35, 4  ;;  %v5803_v44 = vadd.f32 %v5738_v34, %v14461_v27  ;;  %10796 = vmatprep.subr.bf16.mxu1 %v11039_v59  ;;  %v6062_v53 = vld [vmem:[#allocation2 + $0x70] sm:$0x7]  ;;  %v11034_v34 = vld [vmem:[%s15735_s5 + $0x98] sm:$0xff]  }
 0x322   :  { %6035 = vst [vmem:[#allocation2 + $0xe4] sm:$0xf] %v9698_v24  ;;  %v9461_v60 = vcombine.low %v6341_v23, %v6350_v8  ;;  %v6371_v22 = vor.u32 %v6369_v40, %v6368_v62  ;;  %v5841_v41 = vadd.f32 %v14410_v10, %v5802_v46  ;;  %v5844_v42 = vadd.f32 %v14410_v10, %v5805_v11  ;;  %v5751_v58 = vpop.f32.mrf.mxu1  ;;  %v14676_v40 = vld [vmem:[#allocation2 + $0x5c] sm:$0xf] }
 0x323   :  { %v6363_v21 = vsel %vm13189_vm1, %v16181_v26, %v6362_v15  ;;  %v5842_v27 = vadd.f32 %v14410_v10, %v5803_v44  ;;  %v6171_v12 = vrot.slane %v14649_v4, 7  ;;  %v6174_v14 = vrot.slane %v6059_v17, 7  ;;  %10797 = vmatpush3.bf16.msra.mxu1 %v11039_v59  ;;  %v16184_v62 = vld [vmem:[#allocation42_spill] sm:$0xff]  ;;  %v11042_v15 = vld [vmem:[%s15735_s5 + $0xc8] sm:$0xff]  }
 0x324   :  { %10745 = vmatpush3.bf16.msra.mxu0 %v11031_v6  ;;  %10664 = vmatprep.mubr.bf16.mxu0 %v9461_v60  ;;  %v6372_v9 = vsel %vm13189_vm1, %v6364_v20, %v6371_v22  ;;  %v5873_v49 = vmax.f32 %v5841_v41, 0.0  ;;  %v5876_v7 = vmax.f32 %v5844_v42, 0.0  ;;  %v6178_v18 = vrot.slane %v14657_v61, 7  ;;  %v10639_v6 = vpop.f32.mrf.mxu1  ;;  %v14692_v22 = vld [vmem:[#allocation2 + $0x70] sm:$0xf] }
 0x325   :  { %10746 = vmatprep.subr.bf16.mxu0 %v11032_v2  ;;  %v9462_v43 = vcombine.low %v6363_v21, %v6372_v9  ;;  %v5874_v1 = vmax.f32 %v5842_v27, 0.0  ;;  %v16183_v23 = vrot.slane %v16182_v39, 11  ;;  %v6173_v35 = vrot.slane %v6171_v12, 4  ;;  %10798 = vmatprep.subr.bf16.mxu1 %v11041_v50 }
 0x326   :  { %v9699_v24 = vpack.c.bf16 %v5876_v7, %v5876_v7  ;;  %v16185_v46 = vrot.slane %v16184_v62, 11  ;;  %v6180_v17 = vrot.slane %v6178_v18, 4  ;;  %v6181_v8 = vrot.slane %v6062_v53, 7  ;;  %v5754_v27 = vpop.f32.mrf.mxu1  ;;  %v11037_v53 = vld [vmem:[%s15735_s5 + $0x90] sm:$0xff]  }
 0x327   :  { %v6172_v38 = vsel %vm13147_vm14, %v16183_v23, %v6171_v12  ;;  %10665 = vmatmul.mubr.bf16.gmra.mxu0 %v9462_v43  ;;  %v9776_v20 = vpack.c.bf16 %v5874_v1, %v5873_v49  ;;  %v6175_v44 = vsel %vm13147_vm14, %v6173_v35, %v6174_v14  ;;  %v5808_v59 = vadd.f32 %v10638_v52, %v14465_v0  ;;  %v11045_v23 = vld [vmem:[%s15735_s5 + $0xc0] sm:$0xff]  }
 0x328   :  { %v6179_v11 = vsel %vm13147_vm14, %v16185_v46, %v6178_v18  ;;  %v6379_v60 = vshrl.u32 %v14649_v4, 16  ;;  %6036 = vst [vmem:[#allocation2 + $0xe8] sm:$0xf] %v9699_v24  ;;  %v9487_v41 = vcombine.low %v6172_v38, %v6175_v44  ;;  %v6182_v42 = vsel %vm13147_vm14, %v6180_v17, %v6181_v8  ;;  %10747 = vmatpush3.bf16.msra.mxu0 %v11032_v2  ;;  %v10642_v62 = vpop.f32.mrf.mxu1  ;;  %v14716_v44 = vld [vmem:[#allocation2 + $0x80] sm:$0xf] }
 0x329   :  { %v6382_v26 = vshll.u32 %v14649_v4, 16  ;;  %v6388_v21 = vshrl.u32 %v14676_v40, 16  ;;  %9801 = vst [vmem:[#allocation2 + $0xd0] sm:$0xff] %v9776_v20   ;;  %v9488_v12 = vcombine.low %v6179_v11, %v6182_v42  ;;  %v5847_v14 = vadd.f32 %v14410_v10, %v5808_v59  ;;  %10748 = vmatprep.subr.bf16.mxu0 %v11034_v34  ;;  %10799 = vmatpush3.bf16.msra.mxu1 %v11041_v50  ;;  %v16186_v11 = vld [vmem:[#allocation46_spill] sm:$0xff]  ;;  %v6065_v59 = vld [vmem:[#allocation2 + $0x84] sm:$0x7] }
 0x32a   :  { %v6381_v0 = vrot.slane %v6379_v60, 7  ;;  %v6391_v52 = vshll.u32 %v14676_v40, 16  ;;  %10716 = vmatprep.mubr.bf16.mxu1 %v9487_v41  ;;  %v6401_v49 = vshrl.u32 %v14657_v61, 16  ;;  %v6404_v7 = vshll.u32 %v14657_v61, 16  ;;  %10800 = vmatprep.subr.bf16.mxu1 %v11042_v15  ;;  %v11040_v60 = vld [vmem:[%s15735_s5 + $0x88] sm:$0xff]  }
 0x32b   :  { %v6390_v9 = vrot.slane %v6388_v21, 7  ;;  %v6410_v2 = vshrl.u32 %v14692_v22, 16  ;;  %10717 = vmatmul.mubr.bf16.gmra.mxu1 %v9488_v12  ;;  %v5879_v18 = vmax.f32 %v5847_v14, 0.0  ;;  %v6413_v39 = vshll.u32 %v14692_v22, 16  ;;  %v6068_v21 = vld [vmem:[#allocation2 + $0x98] sm:$0x7] }
 0x32c   :  { %v6384_v43 = vor.u32 %v6382_v26, %v6381_v0  ;;  %v6386_v1 = vrot.slane %v6381_v0, 4  ;;  %v6403_v38 = vrot.slane %v6401_v49, 7  ;;  %v5806_v24 = vadd.f32 %v5751_v58, %v14473_v5  ;;  %10749 = vmatpush3.bf16.msra.mxu0 %v11034_v34  ;;  %v14726_v26 = vld [vmem:[#allocation2 + $0x94] sm:$0xf] }
 0x32d   :  { %v6393_v50 = vor.u32 %v6391_v52, %v6390_v9  ;;  %v6412_v35 = vrot.slane %v6410_v2, 7  ;;  %v9702_v46 = vpack.c.bf16 %v5879_v18, %v5879_v18  ;;  %v5809_v8 = vadd.f32 %v10639_v6, %v14478_v48  ;;  %10750 = vmatprep.subr.bf16.mxu0 %v11037_v53  ;;  %10801 = vmatpush3.bf16.msra.mxu1 %v11042_v15  ;;  %v5767_v52 = vpop.f32.mrf.mxu1  ;;  %v11043_v18 = vld [vmem:[%s15735_s5 + $0x80] sm:$0xff]  }
 0x32e   :  { %v6385_v17 = vsel %vm13189_vm1, %v16186_v11, %v6384_v43  ;;  %v5807_v20 = vadd.f32 %v5754_v27, %v14487_v37  ;;  %v6406_v58 = vor.u32 %v6404_v7, %v6403_v38  ;;  %v6408_v34 = vrot.slane %v6403_v38, 4  ;;  %10802 = vmatprep.subr.bf16.mxu1 %v11045_v23  ;;  %v16187_v27 = vld [vmem:[#allocation48_spill] sm:$0xff]  ;;  %v16188_v43 = vld [vmem:[#allocation47_spill] sm:$0xff] }
 0x32f   :  { %v6394_v5 = vsel %vm13189_vm1, %v6386_v1, %v6393_v50  ;;  %v6415_v41 = vor.u32 %v6413_v39, %v6412_v35  ;;  %6039 = vst [vmem:[#allocation2 + $0x10c] sm:$0xf] %v9702_v46  ;;  %v5845_v48 = vadd.f32 %v14410_v10, %v5806_v24  ;;  %v5848_v37 = vadd.f32 %v14410_v10, %v5809_v8 }
 0x330   :  { %v9463_v42 = vcombine.low %v6385_v17, %v6394_v5  ;;  %v5846_v6 = vadd.f32 %v14410_v10, %v5807_v20  ;;  %v6407_v12 = vsel %vm13189_vm1, %v16187_v27, %v6406_v58  ;;  %v6185_v15 = vrot.slane %v14716_v44, 7  ;;  %10751 = vmatpush3.bf16.msra.mxu0 %v11037_v53  ;;  %v14742_v53 = vld [vmem:[#allocation2 + $0x84] sm:$0xf]  ;;  %v16190_v20 = vld [vmem:[#allocation49_spill] sm:$0xff]  ;;  %v14765_v27 = vld [vmem:[%s15735_s5 + $0x138] sm:$0xff]  }
 0x331   :  { %v6416_v14 = vsel %vm13189_vm1, %v6408_v34, %v6415_v41  ;;  %v6188_v0 = vrot.slane %v6065_v59, 7  ;;  %v5877_v49 = vmax.f32 %v5845_v48, 0.0  ;;  %v5880_v7 = vmax.f32 %v5848_v37, 0.0  ;;  %10752 = vmatprep.subr.bf16.mxu0 %v11040_v60  ;;  %10803 = vmatpush3.bf16.msra.mxu1 %v11045_v23  ;;  %v10643_v41 = vpop.f32.mrf.mxu1  ;;  %v14755_v48 = vld [vmem:[#allocation2 + $0x98] sm:$0xf] }
 0x332   :  { %10668 = vmatprep.mubr.bf16.mxu0 %v9463_v42  ;;  %v9464_v9 = vcombine.low %v6407_v12, %v6416_v14  ;;  %v5878_v2 = vmax.f32 %v5846_v6, 0.0  ;;  %v16189_v1 = vrot.slane %v16188_v43, 11  ;;  %v6187_v50 = vrot.slane %v6185_v15, 4 }
 0x333   :  { %v6192_v38 = vrot.slane %v14726_v26, 7  ;;  %v6195_v35 = vrot.slane %v6068_v21, 7  ;;  %v9703_v24 = vpack.c.bf16 %v5880_v7, %v5880_v7  ;;  %v5812_v11 = vadd.f32 %v10642_v62, %v14490_v19  ;;  %v5770_v43 = vpop.f32.mrf.mxu1 }
 0x334   :  { %v6186_v39 = vsel %vm13147_vm14, %v16189_v1, %v6185_v15  ;;  %10669 = vmatmul.mubr.bf16.gmra.mxu0 %v9464_v9  ;;  %v9781_v46 = vpack.c.bf16 %v5878_v2, %v5877_v49  ;;  %v6423_v17 = vshrl.u32 %v14716_v44, 16  ;;  %v6189_v8 = vsel %vm13147_vm14, %v6187_v50, %v6188_v0  ;;  %v14769_v1 = vld [vmem:[#allocation2 + $0xa8] sm:$0xf]  ;;  %v16192_v50 = vld [vmem:[#allocation39_spill] sm:$0xff] }
 0x335   :  { %v16191_v59 = vrot.slane %v16190_v20, 11  ;;  %v6194_v58 = vrot.slane %v6192_v38, 4  ;;  %v6426_v34 = vshll.u32 %v14716_v44, 16  ;;  %10753 = vmatpush3.bf16.msra.mxu0 %v11040_v60  ;;  %6040 = vst [vmem:[#allocation2 + $0x110] sm:$0xf] %v9703_v24  ;;  %v9489_v23 = vcombine.low %v6186_v39, %v6189_v8 }
 0x336   :  { %9802 = vst [vmem:[#allocation2 + $0xf8] sm:$0xff] %v9781_v46   ;;  %v5851_v19 = vadd.f32 %v14410_v10, %v5812_v11  ;;  %v6425_v62 = vrot.slane %v6423_v17, 7  ;;  %v6432_v42 = vshrl.u32 %v14742_v53, 16  ;;  %10754 = vmatprep.subr.bf16.mxu0 %v11043_v18  ;;  %v6435_v6 = vshll.u32 %v14742_v53, 16  ;;  %v6071_v46 = vld [vmem:[#allocation2 + $0xac] sm:$0x7] }
 0x337   :  { %v6193_v5 = vsel %vm13147_vm14, %v16191_v59, %v6192_v38  ;;  %v6196_v37 = vsel %vm13147_vm14, %v6194_v58, %v6195_v35  ;;  %v6445_v21 = vshrl.u32 %v14726_v26, 16  ;;  %v6448_v60 = vshll.u32 %v14726_v26, 16  ;;  %10720 = vmatprep.mubr.bf16.mxu1 %v9489_v23 }
 0x338   :  { %v9490_v12 = vcombine.low %v6193_v5, %v6196_v37  ;;  %v5883_v14 = vmax.f32 %v5851_v19, 0.0  ;;  %v6428_v15 = vor.u32 %v6426_v34, %v6425_v62  ;;  %v6430_v0 = vrot.slane %v6425_v62, 4  ;;  %v14781_v34 = vld [vmem:[#allocation2 + $0xbc] sm:$0xf]  ;;  %v6074_v19 = vld [vmem:[#allocation2 + $0xc0] sm:$0x7] }
 0x339   :  { %v6434_v9 = vrot.slane %v6432_v42, 7  ;;  %v6447_v49 = vrot.slane %v6445_v21, 7  ;;  %v6454_v7 = vshrl.u32 %v14755_v48, 16  ;;  %v6457_v2 = vshll.u32 %v14755_v48, 16  ;;  %10755 = vmatpush3.bf16.msra.mxu0 %v11043_v18  ;;  %v16194_v21 = vld [vmem:[#allocation20_spill] sm:$0xff] }
 0x33a   :  { %10721 = vmatmul.mubr.bf16.gmra.mxu1 %v9490_v12  ;;  %v9706_v39 = vpack.c.bf16 %v5883_v14, %v5883_v14  ;;  %v6429_v38 = vsel %vm13189_vm1, %v16192_v50, %v6428_v15  ;;  %v5810_v35 = vadd.f32 %v5767_v52, %v14497_v29  ;;  %v5813_v24 = vadd.f32 %v10643_v41, %v14514_v13  ;;  %v16193_v13 = vld [vmem:[#allocation28_spill] sm:$0xff] }
 0x33b   :  { %v6437_v11 = vor.u32 %v6435_v6, %v6434_v9  ;;  %v6450_v17 = vor.u32 %v6448_v60, %v6447_v49  ;;  %v6452_v8 = vrot.slane %v6447_v49, 4  ;;  %v6456_v20 = vrot.slane %v6454_v7, 7  ;;  %10836 = vmatprep.subr.bf16.mxu0 %v14765_v27 }
 0x33c   :  { %6043 = vst [vmem:[#allocation2 + $0x134] sm:$0xf] %v9706_v39  ;;  %v5849_v18 = vadd.f32 %v14410_v10, %v5810_v35  ;;  %v5852_v59 = vadd.f32 %v14410_v10, %v5813_v24  ;;  %v5811_v5 = vadd.f32 %v5770_v43, %v14539_v56  ;;  %v6199_v58 = vrot.slane %v14769_v1, 7  ;;  %v16196_v43 = vld [vmem:[#allocation27_spill] sm:$0xff] }
 0x33d   :  { %v6438_v29 = vsel %vm13189_vm1, %v6430_v0, %v6437_v11  ;;  %v6451_v52 = vsel %vm13189_vm1, %v16193_v13, %v6450_v17  ;;  %v6459_v41 = vor.u32 %v6457_v2, %v6456_v20  ;;  %v6202_v23 = vrot.slane %v6071_v46, 7  ;;  %v14796_v0 = vld [vmem:[#allocation2 + $0xac] sm:$0xf]  ;;  %v14805_v24 = vld [vmem:[#allocation2 + $0xc0] sm:$0xf] }
 0x33e   :  { %v9465_v62 = vcombine.low %v6429_v38, %v6438_v29  ;;  %v5881_v42 = vmax.f32 %v5849_v18, 0.0  ;;  %v5884_v37 = vmax.f32 %v5852_v59, 0.0  ;;  %v5850_v6 = vadd.f32 %v14410_v10, %v5811_v5  ;;  %v14809_v20 = vld [vmem:[#allocation2 + $0xd0] sm:$0xf]  ;;  %v6077_v29 = vld [vmem:[#allocation2 + $0xd4] sm:$0x7] }
 0x33f   :  { %v6460_v56 = vsel %vm13189_vm1, %v6452_v8, %v6459_v41  ;;  %v16195_v60 = vrot.slane %v16194_v21, 11  ;;  %v6201_v14 = vrot.slane %v6199_v58, 4  ;;  %v6206_v15 = vrot.slane %v14781_v34, 7 }
 0x340   :  { %10672 = vmatprep.mubr.bf16.mxu0 %v9465_v62  ;;  %v9466_v9 = vcombine.low %v6451_v52, %v6460_v56  ;;  %v9707_v49 = vpack.c.bf16 %v5884_v37, %v5884_v37  ;;  %v5882_v7 = vmax.f32 %v5850_v6, 0.0  ;;  %v6209_v2 = vrot.slane %v6074_v19, 7  ;;  %v14817_v19 = vld [vmem:[#allocation2 + $0xe4] sm:$0xf] }
 0x341   :  { %v6200_v12 = vsel %vm13147_vm14, %v16195_v60, %v6199_v58  ;;  %v6203_v10 = vsel %vm13147_vm14, %v6201_v14, %v6202_v23  ;;  %v16197_v39 = vrot.slane %v16196_v43, 11  ;;  %v6208_v38 = vrot.slane %v6206_v15, 4  ;;  %v16198_v14 = vld [vmem:[#allocation25_spill] sm:$0xff] }
 0x342   :  { %v6467_v35 = vshrl.u32 %v14769_v1, 16  ;;  %10673 = vmatmul.mubr.bf16.gmra.mxu0 %v9466_v9  ;;  %6044 = vst [vmem:[#allocation2 + $0x138] sm:$0xf] %v9707_v49  ;;  %v9786_v46 = vpack.c.bf16 %v5882_v7, %v5881_v42  ;;  %v9491_v11 = vcombine.low %v6200_v12, %v6203_v10  ;;  %v6470_v17 = vshll.u32 %v14769_v1, 16  ;;  %v6080_v7 = vld [vmem:[#allocation2 + $0xe8] sm:$0x7] }
 0x343   :  { %v6207_v50 = vsel %vm13147_vm14, %v16197_v39, %v6206_v15  ;;  %v6476_v8 = vshrl.u32 %v14796_v0, 16  ;;  %v6210_v18 = vsel %vm13147_vm14, %v6208_v38, %v6209_v2  ;;  %v6479_v5 = vshll.u32 %v14796_v0, 16  ;;  %v16199_v39 = vld [vmem:[#allocation15_spill] sm:$0xff] }
 0x344   :  { %v6469_v59 = vrot.slane %v6467_v35, 7  ;;  %v6489_v58 = vshrl.u32 %v14781_v34, 16  ;;  %9803 = vst [vmem:[#allocation2 + $0x120] sm:$0xff] %v9786_v46   ;;  %10724 = vmatprep.mubr.bf16.mxu1 %v9491_v11  ;;  %v9492_v13 = vcombine.low %v6207_v50, %v6210_v18  ;;  %v6492_v41 = vshll.u32 %v14781_v34, 16  ;;  %v14831_v46 = vld [vmem:[#allocation2 + $0xd4] sm:$0xf] }
 0x345   :  { %v6478_v52 = vrot.slane %v6476_v8, 7  ;;  %v6498_v23 = vshrl.u32 %v14805_v24, 16  ;;  %v6501_v6 = vshll.u32 %v14805_v24, 16  ;;  %v6213_v60 = vrot.slane %v14809_v20, 7  ;;  %v16202_v18 = vld [vmem:[#allocation12_spill] sm:$0xff] }
 0x346   :  { %v6472_v62 = vor.u32 %v6470_v17, %v6469_v59  ;;  %v6474_v42 = vrot.slane %v6469_v59, 4  ;;  %v6491_v37 = vrot.slane %v6489_v58, 7  ;;  %10725 = vmatmul.mubr.bf16.gmra.mxu1 %v9492_v13  ;;  %v6216_v12 = vrot.slane %v6077_v29, 7  ;;  %v16201_v17 = vld [vmem:[#allocation16_spill] sm:$0xff] }
 0x347   :  { %v6481_v56 = vor.u32 %v6479_v5, %v6478_v52  ;;  %v6500_v21 = vrot.slane %v6498_v23, 7  ;;  %v6220_v2 = vrot.slane %v14817_v19, 7  ;;  %v16200_v50 = vrot.slane %v16199_v39, 11  ;;  %v14845_v23 = vld [vmem:[#allocation2 + $0xe8] sm:$0xf] }
 0x348   :  { %v6473_v15 = vsel %vm13189_vm1, %v16198_v14, %v6472_v62  ;;  %v6494_v9 = vor.u32 %v6492_v41, %v6491_v37  ;;  %v6496_v49 = vrot.slane %v6491_v37, 4  ;;  %v6215_v35 = vrot.slane %v6213_v60, 4 }
 0x349   :  { %v6482_v10 = vsel %vm13189_vm1, %v6474_v42, %v6481_v56  ;;  %v6503_v43 = vor.u32 %v6501_v6, %v6500_v21  ;;  %v6214_v38 = vsel %vm13147_vm14, %v16200_v50, %v6213_v60  ;;  %v16203_v59 = vrot.slane %v16202_v18, 11  ;;  %v14849_v56 = vld [vmem:[#allocation2 + $0xf8] sm:$0xf]  ;;  %v16204_v18 = vld [vmem:[#allocation29_spill] sm:$0xff] }
 0x34a   :  { %v9467_v11 = vcombine.low %v6473_v15, %v6482_v10  ;;  %v6495_v8 = vsel %vm13189_vm1, %v16201_v17, %v6494_v9  ;;  %v6222_v58 = vrot.slane %v6220_v2, 4  ;;  %v6217_v13 = vsel %vm13147_vm14, %v6215_v35, %v6216_v12  ;;  %v6083_v15 = vld [vmem:[#allocation2 + $0xfc] sm:$0x7]  ;;  %v14857_v10 = vld [vmem:[#allocation2 + $0x10c] sm:$0xf] }
 0x34b   :  { %v6221_v5 = vsel %vm13147_vm14, %v16203_v59, %v6220_v2  ;;  %v6504_v29 = vsel %vm13189_vm1, %v6496_v49, %v6503_v43  ;;  %v6223_v52 = vrot.slane %v6080_v7, 7  ;;  %v6511_v41 = vshrl.u32 %v14809_v20, 16 }
 0x34c   :  { %10676 = vmatprep.mubr.bf16.mxu0 %v9467_v11  ;;  %v9468_v62 = vcombine.low %v6495_v8, %v6504_v29  ;;  %v9493_v42 = vcombine.low %v6214_v38, %v6217_v13  ;;  %v6514_v37 = vshll.u32 %v14809_v20, 16  ;;  %v6520_v6 = vshrl.u32 %v14831_v46, 16  ;;  %v6086_v29 = vld [vmem:[#allocation2 + $0x110] sm:$0x7] }
 0x34d   :  { %v6224_v21 = vsel %vm13147_vm14, %v6222_v58, %v6223_v52  ;;  %v6513_v60 = vrot.slane %v6511_v41, 7  ;;  %v6523_v12 = vshll.u32 %v14831_v46, 16  ;;  %v6533_v14 = vshrl.u32 %v14817_v19, 16 }
 0x34e   :  { %10677 = vmatmul.mubr.bf16.gmra.mxu0 %v9468_v62  ;;  %10728 = vmatprep.mubr.bf16.mxu1 %v9493_v42  ;;  %v9494_v9 = vcombine.low %v6221_v5, %v6224_v21  ;;  %v6522_v49 = vrot.slane %v6520_v6, 7  ;;  %v6536_v7 = vshll.u32 %v14817_v19, 16  ;;  %v6542_v2 = vshrl.u32 %v14845_v23, 16  ;;  %v14871_v6 = vld [vmem:[#allocation2 + $0xfc] sm:$0xf] }
 0x34f   :  { %v6516_v43 = vor.u32 %v6514_v37, %v6513_v60  ;;  %v6518_v39 = vrot.slane %v6513_v60, 4  ;;  %v6535_v50 = vrot.slane %v6533_v14, 7  ;;  %v6545_v38 = vshll.u32 %v14845_v23, 16 }
 0x350   :  { %10729 = vmatmul.mubr.bf16.gmra.mxu1 %v9494_v9  ;;  %v6525_v35 = vor.u32 %v6523_v12, %v6522_v49  ;;  %v6544_v11 = vrot.slane %v6542_v2, 7  ;;  %v6227_v17 = vrot.slane %v14849_v56, 7  ;;  %v6230_v8 = vrot.slane %v6083_v15, 7  ;;  %v16206_v12 = vld [vmem:[#allocation10_spill] sm:$0xff] }
 0x351   :  { %v6517_v59 = vsel %vm13189_vm1, %v16204_v18, %v6516_v43  ;;  %v6538_v5 = vor.u32 %v6536_v7, %v6535_v50  ;;  %v6540_v58 = vrot.slane %v6535_v50, 4  ;;  %v6234_v13 = vrot.slane %v14857_v10, 7  ;;  %v14885_v43 = vld [vmem:[#allocation2 + $0x110] sm:$0xf] }
 0x352   :  { %v6526_v52 = vsel %vm13189_vm1, %v6518_v39, %v6525_v35  ;;  %v6547_v41 = vor.u32 %v6545_v38, %v6544_v11  ;;  %v16205_v62 = vrot.slane %v14385_v45, 11  ;;  %v6229_v37 = vrot.slane %v6227_v17, 4  ;;  %v14889_v35 = vld [vmem:[#allocation2 + $0x120] sm:$0xf] }
 0x353   :  { %v9469_v21 = vcombine.low %v6517_v59, %v6526_v52  ;;  %v6539_v60 = vsel %vm13189_vm1, %v14419_v57, %v6538_v5  ;;  %v16207_v14 = vrot.slane %v16206_v12, 11  ;;  %v6236_v9 = vrot.slane %v6234_v13, 4  ;;  %v6089_v59 = vld [vmem:[#allocation2 + $0x124] sm:$0x7]  ;;  %v14897_v52 = vld [vmem:[#allocation2 + $0x134] sm:$0xf] }
 0x354   :  { %v6228_v42 = vsel %vm13147_vm14, %v16205_v62, %v6227_v17  ;;  %v6548_v45 = vsel %vm13189_vm1, %v6540_v58, %v6547_v41  ;;  %v6231_v49 = vsel %vm13147_vm14, %v6229_v37, %v6230_v8  ;;  %v6237_v7 = vrot.slane %v6086_v29, 7 }
 0x355   :  { %v6235_v15 = vsel %vm13147_vm14, %v16207_v14, %v6234_v13  ;;  %v6555_v2 = vshrl.u32 %v14849_v56, 16  ;;  %10680 = vmatprep.mubr.bf16.mxu0 %v9469_v21  ;;  %v9470_v39 = vcombine.low %v6539_v60, %v6548_v45  ;;  %v9495_v57 = vcombine.low %v6228_v42, %v6231_v49 }
 0x356   :  { %v6558_v50 = vshll.u32 %v14849_v56, 16  ;;  %v6564_v38 = vshrl.u32 %v14871_v6, 16  ;;  %v6238_v11 = vsel %vm13147_vm14, %v6236_v9, %v6237_v7  ;;  %v6567_v8 = vshll.u32 %v14871_v6, 16  ;;  %v16208_v9 = vld [vmem:[#allocation37_spill] sm:$0xff]  ;;  %v6092_v7 = vld [vmem:[#allocation2 + $0x138] sm:$0x7] }
 0x357   :  { %v6557_v17 = vrot.slane %v6555_v2, 7  ;;  %v6577_v18 = vshrl.u32 %v14857_v10, 16  ;;  %10681 = vmatmul.mubr.bf16.gmra.mxu0 %v9470_v39  ;;  %10732 = vmatprep.mubr.bf16.mxu1 %v9495_v57  ;;  %v9496_v5 = vcombine.low %v6235_v15, %v6238_v11  ;;  %v6580_v29 = vshll.u32 %v14857_v10, 16 }
 0x358   :  { %v6566_v58 = vrot.slane %v6564_v38, 7  ;;  %v6586_v13 = vshrl.u32 %v14885_v43, 16  ;;  %v6589_v37 = vshll.u32 %v14885_v43, 16  ;;  %v6241_v12 = vrot.slane %v14889_v35, 7 }
 0x359   :  { %v6560_v41 = vor.u32 %v6558_v50, %v6557_v17  ;;  %v6562_v62 = vrot.slane %v6557_v17, 4  ;;  %v6579_v42 = vrot.slane %v6577_v18, 7  ;;  %10733 = vmatmul.mubr.bf16.gmra.mxu1 %v9496_v5  ;;  %v6244_v14 = vrot.slane %v6089_v59, 7  ;;  %v14911_v17 = vld [vmem:[#allocation2 + $0x124] sm:$0xf] }
 0x35a   :  { %v6569_v21 = vor.u32 %v6567_v8, %v6566_v58  ;;  %v6588_v60 = vrot.slane %v6586_v13, 7  ;;  %v6248_v2 = vrot.slane %v14897_v52, 7  ;;  %v16209_v50 = vrot.slane %v14427_v47, 11 }
 0x35b   :  { %v6561_v15 = vsel %vm13189_vm1, %v16208_v9, %v6560_v41  ;;  %v6582_v45 = vor.u32 %v6580_v29, %v6579_v42  ;;  %v6584_v49 = vrot.slane %v6579_v42, 4  ;;  %v6243_v11 = vrot.slane %v6241_v12, 4  ;;  %v7538_v29 = vld [vmem:[#allocation2 + $0x8] sm:$0xf]  ;;  %v14925_v42 = vld [vmem:[#allocation2 + $0xc] sm:$0xf] }
 0x35c   :  { %v6570_v39 = vsel %vm13189_vm1, %v6562_v62, %v6569_v21  ;;  %v6591_v57 = vor.u32 %v6589_v37, %v6588_v60  ;;  %v6242_v38 = vsel %vm13147_vm14, %v16209_v50, %v6241_v12  ;;  %v16210_v59 = vrot.slane %v14436_v55, 11 }
 0x35d   :  { %v9471_v8 = vcombine.low %v6561_v15, %v6570_v39  ;;  %v6583_v18 = vsel %vm13189_vm1, %v14451_v36, %v6582_v45  ;;  %v6250_v58 = vrot.slane %v6248_v2, 4  ;;  %v6245_v13 = vsel %vm13147_vm14, %v6243_v11, %v6244_v14 }
 0x35e   :  { %v6249_v5 = vsel %vm13147_vm14, %v16210_v59, %v6248_v2  ;;  %v6592_v47 = vsel %vm13189_vm1, %v6584_v49, %v6591_v57  ;;  %v6251_v41 = vrot.slane %v6092_v7, 7  ;;  %v6599_v62 = vshrl.u32 %v14889_v35, 16  ;;  %v14933_v2 = vld [vmem:[#allocation2 + $0x138] sm:$0xf]  ;;  %v16211_v59 = vld [vmem:[#allocation24_spill] sm:$0xff] }
 0x35f   :  { %10684 = vmatprep.mubr.bf16.mxu0 %v9471_v8  ;;  %v9472_v36 = vcombine.low %v6583_v18, %v6592_v47  ;;  %v9497_v37 = vcombine.low %v6242_v38, %v6245_v13  ;;  %v6602_v55 = vshll.u32 %v14889_v35, 16  ;;  %v6608_v21 = vshrl.u32 %v14911_v17, 16 }
 0x360   :  { %v6252_v60 = vsel %vm13147_vm14, %v6250_v58, %v6251_v41  ;;  %v6601_v12 = vrot.slane %v6599_v62, 7  ;;  %v6611_v9 = vshll.u32 %v14911_v17, 16  ;;  %v7587_v15 = vshrl.u32 %v7538_v29, 16 }
 0x361   :  { %10685 = vmatmul.mubr.bf16.gmra.mxu0 %v9472_v36  ;;  %10736 = vmatprep.mubr.bf16.mxu1 %v9497_v37  ;;  %v9498_v14 = vcombine.low %v6249_v5, %v6252_v60  ;;  %v6610_v45 = vrot.slane %v6608_v21, 7  ;;  %v7590_v49 = vshll.u32 %v7538_v29, 16  ;;  %v7596_v7 = vshll.u32 %v14925_v42, 16  ;;  %v14945_v37 = vld [vmem:[#allocation2 + $0x20] sm:$0xf] }
 0x362   :  { %v6604_v39 = vor.u32 %v6602_v55, %v6601_v12  ;;  %v6606_v57 = vrot.slane %v6601_v12, 4  ;;  %v7589_v50 = vrot.slane %v7587_v15, 4  ;;  %v7600_v38 = vshrl.u32 %v14925_v42, 16  ;;  %v11101_v12 = vld [vmem:[#allocation2 + $0x8] sm:$0xf] }
 0x363   :  { %10737 = vmatmul.mubr.bf16.gmra.mxu1 %v9498_v14  ;;  %v6613_v30 = vor.u32 %v6611_v9, %v6610_v45  ;;  %v7592_v11 = vrot.slane %v7590_v49, 5  ;;  %v7598_v8 = vrot.slane %v7596_v7, 5  ;;  %v6621_v18 = vshrl.u32 %v14897_v52, 16  ;;  %v11102_v9 = vld [vmem:[#allocation2 + $0xc] sm:$0xf] }
 0x364   :  { %v6605_v5 = vsel %vm13189_vm1, %v16211_v59, %v6604_v39  ;;  %v7602_v58 = vrot.slane %v7600_v38, 4  ;;  %v6624_v29 = vshll.u32 %v14897_v52, 16  ;;  %v6630_v47 = vshrl.u32 %v14933_v2, 16  ;;  %v7544_v14 = vld [vmem:[#allocation2 + $0x30] sm:$0xf] }
 0x365   :  { %v6614_v13 = vsel %vm13189_vm1, %v6606_v57, %v6613_v30  ;;  %v7593_v41 = vor.u32 %v7592_v11, %v7589_v50  ;;  %v6623_v62 = vrot.slane %v6621_v18, 7  ;;  %v6633_v36 = vshll.u32 %v14933_v2, 16 }
 0x366   :  { %v9473_v55 = vcombine.low %v6605_v5, %v6614_v13  ;;  %v7603_v21 = vor.u32 %v7602_v58, %v7598_v8  ;;  %v6632_v60 = vrot.slane %v6630_v47, 7  ;;  %v9523_v15 = vcombine.low %v11101_v12, %v11102_v9  ;;  %v14958_v47 = vld [vmem:[#allocation2 + $0x34] sm:$0xf] }
 0x367   :  { %v7594_v45 = vrot.slane %v7593_v41, 4  ;;  %v6626_v49 = vor.u32 %v6624_v29, %v6623_v62  ;;  %v6628_v7 = vrot.slane %v6623_v62, 4  ;;  %v16212_v39 = vshrl.u32 %v14516_v33, 16  ;;  %v16215_v41 = vld [vmem:[#allocation31_spill] sm:$0xff] }
 0x368   :  { %10688 = vmatprep.mubr.bf16.mxu0 %v9473_v55  ;;  %v7604_v57 = vrot.slane %v7603_v21, 4  ;;  %v6635_v50 = vor.u32 %v6633_v36, %v6632_v60  ;;  %v16213_v30 = vshll.u32 %v14516_v33, 16  ;;  %v7620_v18 = vshll.u32 %v14945_v37, 16  ;;  %v7547_v21 = vld [vmem:[#allocation2 + $0x44] sm:$0xf] }
 0x369   :  { %v7613_v38 = vrot.slane %v16212_v39, 4  ;;  %v7599_v5 = vsel %vm11216_vm2, %v7594_v45, %v7598_v8  ;;  %v6627_v58 = vsel %vm13189_vm1, %v14492_v3, %v6626_v49  ;;  %v7624_v29 = vshrl.u32 %v14945_v37, 16 }
 0x36a   :  { %v7616_v11 = vrot.slane %v16213_v30, 5  ;;  %v7635_v13 = vshrl.u32 %v7544_v14, 16  ;;  %v7609_v62 = vsel %vm11216_vm2, %v7604_v57, %v16215_v41  ;;  %v6636_v33 = vsel %vm13189_vm1, %v6628_v7, %v6635_v50  ;;  %v14967_v30 = vld [vmem:[#allocation2 + $0x48] sm:$0xf] }
 0x36b   :  { %v7622_v55 = vrot.slane %v7620_v18, 5  ;;  %v9563_v8 = vcombine.low %v7599_v5, %v7609_v62  ;;  %v9474_v60 = vcombine.low %v6627_v58, %v6636_v33  ;;  %v7626_v12 = vrot.slane %v7624_v29, 4 }
 0x36c   :  { %v7617_v36 = vor.u32 %v7616_v11, %v7613_v38  ;;  %v7637_v9 = vrot.slane %v7635_v13, 4  ;;  %v7638_v45 = vshll.u32 %v7544_v14, 16  ;;  %v7644_v49 = vshll.u32 %v14958_v47, 16  ;;  %v7550_v11 = vld [vmem:[#allocation2 + $0x58] sm:$0xf] }
 0x36d   :  { %v7648_v39 = vshrl.u32 %v14958_v47, 16  ;;  %10804 = vmatprep.mubr.bf16.mxu1 %v9563_v8  ;;  %10689 = vmatmul.mubr.bf16.gmra.mxu0 %v9474_v60  ;;  %v7627_v57 = vor.u32 %v7626_v12, %v7622_v55  ;;  %v9525_v7 = vcombine.low %v11103_v54, %v14614_v32  ;;  %v7659_v38 = vshrl.u32 %v7547_v21, 16  ;;  %v14974_v32 = vld [vmem:[#allocation2 + $0x5c] sm:$0xf] }
 0x36e   :  { %v7618_v3 = vrot.slane %v7617_v36, 4  ;;  %v7662_v50 = vshll.u32 %v7547_v21, 16  ;;  %10756 = vmatprep.mubr.bf16.mxu0 %v9523_v15  ;;  %v7640_v14 = vrot.slane %v7638_v45, 5  ;;  %v7646_v5 = vrot.slane %v7644_v49, 5 }
 0x36f   :  { %v7650_v58 = vrot.slane %v7648_v39, 4  ;;  %v7628_v29 = vrot.slane %v7627_v57, 4  ;;  %v7661_v13 = vrot.slane %v7659_v38, 4  ;;  %v7668_v62 = vshll.u32 %v14967_v30, 16 }
 0x370   :  { %v7623_v18 = vsel %vm11216_vm2, %v7618_v3, %v7622_v55  ;;  %v7664_v41 = vrot.slane %v7662_v50, 5  ;;  %v7641_v33 = vor.u32 %v7640_v14, %v7637_v9  ;;  %v7672_v8 = vshrl.u32 %v14967_v30, 16  ;;  %v11050_v50 = vld [vmem:[%s15735_s5 + $0x130] sm:$0xff]  }
 0x371   :  { %v7651_v36 = vor.u32 %v7650_v58, %v7646_v5  ;;  %v7683_v21 = vshrl.u32 %v7550_v11, 16  ;;  %v7633_v15 = vsel %vm11216_vm2, %v7628_v29, %v14499_v25  ;;  %v7670_v60 = vrot.slane %v7668_v62, 5  ;;  %v7553_v58 = vld [vmem:[#allocation2 + $0x6c] sm:$0xf]  ;;  %v14989_v29 = vld [vmem:[#allocation2 + $0x70] sm:$0xf] }
 0x372   :  { %v7665_v55 = vor.u32 %v7664_v41, %v7661_v13  ;;  %v7686_v12 = vshll.u32 %v7550_v11, 16  ;;  %v9564_v3 = vcombine.low %v7623_v18, %v7633_v15  ;;  %v7642_v45 = vrot.slane %v7641_v33, 4 }
 0x373   :  { %v7652_v49 = vrot.slane %v7651_v36, 4  ;;  %v7674_v39 = vrot.slane %v7672_v8, 4  ;;  %v7685_v54 = vrot.slane %v7683_v21, 4  ;;  %v7692_v38 = vshll.u32 %v14974_v32, 16  ;;  %v7556_v36 = vld [vmem:[#allocation2 + $0x80] sm:$0xf] }
 0x374   :  { %v7666_v57 = vrot.slane %v7665_v55, 4  ;;  %v7688_v9 = vrot.slane %v7686_v12, 5  ;;  %10805 = vmatmul.mubr.bf16.vlgmr.msra.gmra.mxu1 %v9564_v3  ;;  %v7647_v25 = vsel %vm11216_vm2, %v7642_v45, %v7646_v5  ;;  %v7696_v14 = vshrl.u32 %v14974_v32, 16  ;;  %v11104_v21 = vld [vmem:[#allocation2 + $0x44] sm:$0xf] }
 0x375   :  { %v7657_v11 = vsel %vm11216_vm2, %v7652_v49, %v14501_v28  ;;  %v7675_v18 = vor.u32 %v7674_v39, %v7670_v60  ;;  %v16216_v41 = vcombine.low %v14511_v16, %v14535_v51  ;;  %v7694_v5 = vrot.slane %v7692_v38, 5  ;;  %v15008_v45 = vld [vmem:[#allocation2 + $0x84] sm:$0xf] }
 0x376   :  { %v9565_v13 = vcombine.low %v7647_v25, %v7657_v11  ;;  %v7671_v62 = vsel %vm11216_vm2, %v7666_v57, %v7670_v60  ;;  %v7689_v33 = vor.u32 %v7688_v9, %v7685_v54  ;;  %v7698_v8 = vrot.slane %v7696_v14, 4 }
 0x377   :  { %10757 = vmatmul.mubr.bf16.vlgmr.msra.gmra.mxu0 %v16216_v41  ;;  %v7676_v28 = vrot.slane %v7675_v18, 4  ;;  %v9526_v15 = vcombine.low %v11104_v21, %v14631_v63  ;;  %v9527_v55 = vcombine.low %v14649_v4, %v14676_v40  ;;  %v7707_v51 = vshrl.u32 %v7553_v58, 16  ;;  %v15012_v18 = vld [vmem:[#allocation2 + $0x88] sm:$0x1] }
 0x378   :  { %10760 = vmatprep.mubr.bf16.mxu0 %v9525_v7  ;;  %10837 = vmatpush3.bf16.msra.mxu0 %v14765_v27  ;;  %v7690_v16 = vrot.slane %v7689_v33, 4  ;;  %v7710_v12 = vshll.u32 %v7553_v58, 16  ;;  %v7716_v60 = vshll.u32 %v14989_v29, 16  ;;  %v11053_v7 = vld [vmem:[%s15735_s5 + $0x128] sm:$0xff]   ;;  %v7699_v3 = vor.u32 %v7698_v8, %v7694_v5 }
 0x379   :  { %10808 = vmatprep.mubr.bf16.mxu1 %v9565_v13  ;;  %10838 = vmatprep.subr.bf16.mxu0 %v11050_v50  ;;  %v7681_v27 = vsel %vm11216_vm2, %v7676_v28, %v14503_v31  ;;  %v7720_v63 = vshrl.u32 %v14989_v29, 16  ;;  %v7731_v4 = vshrl.u32 %v7556_v36, 16  ;;  %v7709_v39 = vrot.slane %v7707_v51, 4  ;;  %v11056_v13 = vld [vmem:[%s15735_s5 + $0x120] sm:$0xff]   ;;  %v16217_v41 = vld [vmem:[#allocation8_spill] sm:$0xff] }
 0x37a   :  { %v9566_v40 = vcombine.low %v7671_v62, %v7681_v27  ;;  %v7695_v49 = vsel %vm11216_vm2, %v7690_v16, %v7694_v5  ;;  %v7712_v57 = vrot.slane %v7710_v12, 5  ;;  %v7700_v54 = vrot.slane %v7699_v3, 4  ;;  %v15025_v51 = vld [vmem:[#allocation2 + $0x98] sm:$0xf] }
 0x37b   :  { %v7718_v9 = vrot.slane %v7716_v60, 5  ;;  %v7722_v38 = vrot.slane %v7720_v63, 4  ;;  %v7733_v25 = vrot.slane %v7731_v4, 4  ;;  %v7734_v31 = vshll.u32 %v7556_v36, 16  ;;  %v7559_v36 = vld [vmem:[#allocation2 + $0x94] sm:$0xf] }
 0x37c   :  { %10839 = vmatpush3.bf16.msra.mxu0 %v11050_v50  ;;  %v7713_v11 = vor.u32 %v7712_v57, %v7709_v39  ;;  %v7740_v14 = vshll.u32 %v15008_v45, 16  ;;  %v7744_v58 = vshrl.u32 %v15008_v45, 16  ;;  %10809 = vmatmul.mubr.bf16.gmra.mxu1 %v9566_v40  ;;  %v7705_v50 = vsel %vm11216_vm2, %v7700_v54, %v16217_v41  ;;  %v11059_v4 = vld [vmem:[%s15735_s5 + $0x118] sm:$0xff]  }
 0x37d   :  { %10840 = vmatprep.subr.bf16.mxu0 %v11053_v7  ;;  %v7723_v62 = vor.u32 %v7722_v38, %v7718_v9  ;;  %v7750_v33 = vshll.u32 %v15012_v18, 16  ;;  %v9528_v5 = vcombine.low %v14657_v61, %v14692_v22  ;;  %v9567_v28 = vcombine.low %v7695_v49, %v7705_v50  ;;  %v15037_v39 = vld [vmem:[#allocation2 + $0x9c] sm:$0x1] }
 0x37e   :  { %v7714_v8 = vrot.slane %v7713_v11, 4  ;;  %v7736_v21 = vrot.slane %v7734_v31, 5  ;;  %v7742_v16 = vrot.slane %v7740_v14, 5  ;;  %v7746_v60 = vrot.slane %v7744_v58, 4 }
 0x37f   :  { %10761 = vmatmul.mubr.bf16.gmra.mxu0 %v9526_v15  ;;  %v7724_v12 = vrot.slane %v7723_v62, 4  ;;  %v7752_v27 = vrot.slane %v7750_v33, 5  ;;  %v9529_v3 = vcombine.low %v14716_v44, %v14742_v53  ;;  %10812 = vmatprep.mubr.bf16.mxu1 %v9567_v28  ;;  %v7755_v63 = vshrl.u32 %v7559_v36, 16 }
 0x380   :  { %10764 = vmatprep.mubr.bf16.mxu0 %v9527_v55  ;;  %10841 = vmatpush3.bf16.msra.mxu0 %v11053_v7  ;;  %v7719_v61 = vsel %vm11216_vm2, %v7714_v8, %v7718_v9  ;;  %v7737_v22 = vor.u32 %v7736_v21, %v7733_v25  ;;  %v7758_v15 = vshll.u32 %v7559_v36, 16  ;;  %v16218_v55 = vld [vmem:[#allocation32_spill] sm:$0xff]  ;;  %v7747_v49 = vor.u32 %v7746_v60, %v7742_v16  ;;  %v15048_v21 = vld [vmem:[#allocation2 + $0xb0] sm:$0x1] }
 0x381   :  { %10842 = vmatprep.subr.bf16.mxu0 %v11056_v13  ;;  %v7729_v40 = vsel %vm11216_vm2, %v7724_v12, %v16218_v55  ;;  %v7764_v44 = vshll.u32 %v15025_v51, 16  ;;  %v7768_v53 = vshrl.u32 %v15025_v51, 16  ;;  %v7562_v7 = vld [vmem:[#allocation2 + $0xa8] sm:$0xf]  ;;  %v7757_v9 = vrot.slane %v7755_v63, 4 }
 0x382   :  { %v9568_v57 = vcombine.low %v7719_v61, %v7729_v40  ;;  %v7738_v54 = vrot.slane %v7737_v22, 4  ;;  %v7760_v38 = vrot.slane %v7758_v15, 5  ;;  %v15041_v25 = vld [vmem:[#allocation2 + $0xac] sm:$0xf]  ;;  %v7748_v11 = vrot.slane %v7747_v49, 4 }
 0x383   :  { %v7766_v31 = vrot.slane %v7764_v44, 5  ;;  %v7770_v14 = vrot.slane %v7768_v53, 4  ;;  %v7774_v58 = vshll.u32 %v15037_v39, 16  ;;  %v7779_v62 = vshrl.u32 %v7562_v7, 16  ;;  %v7565_v63 = vld [vmem:[#allocation2 + $0xbc] sm:$0xf] }
 0x384   :  { %10843 = vmatpush3.bf16.msra.mxu0 %v11056_v13  ;;  %v7743_v41 = vsel %vm11216_vm2, %v7738_v54, %v7742_v16  ;;  %v7761_v50 = vor.u32 %v7760_v38, %v7757_v9  ;;  %v7782_v33 = vshll.u32 %v7562_v7, 16  ;;  %10813 = vmatmul.mubr.bf16.gmra.mxu1 %v9568_v57  ;;  %v7753_v36 = vsel %vm11216_vm2, %v7748_v11, %v7752_v27  ;;  %v11062_v13 = vld [vmem:[%s15735_s5 + $0x110] sm:$0xff]   ;;  %v15056_v49 = vld [vmem:[#allocation2 + $0xc0] sm:$0xf]  ;;  %v11065_v7 = vld [vmem:[%s15735_s5 + $0x108] sm:$0xff]  }
 0x385   :  { %10844 = vmatprep.subr.bf16.mxu0 %v11059_v4  ;;  %v7771_v28 = vor.u32 %v7770_v14, %v7766_v31  ;;  %v7776_v8 = vrot.slane %v7774_v58, 5  ;;  %v7788_v12 = vshll.u32 %v15041_v25, 16  ;;  %v9569_v60 = vcombine.low %v7743_v41, %v7753_v36  ;;  %v7568_v38 = vld [vmem:[#allocation2 + $0xd0] sm:$0xf]  ;;  %v15069_v14 = vld [vmem:[#allocation2 + $0xc4] sm:$0x1] }
 0x386   :  { %v7762_v16 = vrot.slane %v7761_v50, 4  ;;  %v7781_v61 = vrot.slane %v7779_v62, 4  ;;  %v7784_v22 = vrot.slane %v7782_v33, 5  ;;  %v7792_v27 = vshrl.u32 %v15041_v25, 16  ;;  %v15074_v50 = vld [vmem:[#allocation2 + $0xd4] sm:$0xf] }
 0x387   :  { %10765 = vmatmul.mubr.bf16.gmra.mxu0 %v9528_v5  ;;  %v7772_v15 = vrot.slane %v7771_v28, 4  ;;  %v7790_v55 = vrot.slane %v7788_v12, 5  ;;  %v7798_v40 = vshll.u32 %v15048_v21, 16  ;;  %10816 = vmatprep.mubr.bf16.mxu1 %v9569_v60  ;;  %v9530_v5 = vcombine.low %v14726_v26, %v14755_v48 }
 0x388   :  { %10768 = vmatprep.mubr.bf16.mxu0 %v9529_v3  ;;  %10845 = vmatpush3.bf16.msra.mxu0 %v11059_v4  ;;  %v7767_v44 = vsel %vm11216_vm2, %v7762_v16, %v7766_v31  ;;  %v7785_v53 = vor.u32 %v7784_v22, %v7781_v61  ;;  %v9531_v3 = vcombine.low %v14769_v1, %v14796_v0  ;;  %v7794_v54 = vrot.slane %v7792_v27, 4 }
 0x389   :  { %v7777_v57 = vsel %vm11216_vm2, %v7772_v15, %v7776_v8  ;;  %v7800_v4 = vrot.slane %v7798_v40, 5  ;;  %v7803_v9 = vshrl.u32 %v7565_v63, 16  ;;  %10846 = vmatprep.subr.bf16.mxu0 %v11062_v13  ;;  %v7806_v26 = vshll.u32 %v7565_v63, 16  ;;  %v11068_v8 = vld [vmem:[%s15735_s5 + $0x100] sm:$0xff]   ;;  %v15081_v63 = vld [vmem:[#allocation2 + $0xd8] sm:$0x1] }
 0x38a   :  { %v9570_v11 = vcombine.low %v7767_v44, %v7777_v57  ;;  %v7786_v31 = vrot.slane %v7785_v53, 4  ;;  %v7812_v48 = vshll.u32 %v15056_v49, 16  ;;  %v7795_v1 = vor.u32 %v7794_v54, %v7790_v55  ;;  %v7571_v57 = vld [vmem:[#allocation2 + $0xe4] sm:$0xf] }
 0x38b   :  { %v7805_v0 = vrot.slane %v7803_v9, 4  ;;  %v7816_v58 = vshrl.u32 %v15056_v49, 16  ;;  %v7822_v41 = vshll.u32 %v15069_v14, 16  ;;  %v7808_v33 = vrot.slane %v7806_v26, 5 }
 0x38c   :  { %10847 = vmatpush3.bf16.msra.mxu0 %v11062_v13  ;;  %v7791_v62 = vsel %vm11216_vm2, %v7786_v31, %v7790_v55  ;;  %v7814_v36 = vrot.slane %v7812_v48, 5  ;;  %v7827_v28 = vshrl.u32 %v7568_v38, 16  ;;  %10817 = vmatmul.mubr.bf16.gmra.mxu1 %v9570_v11  ;;  %v7796_v12 = vrot.slane %v7795_v1, 4  ;;  %v15088_v11 = vld [vmem:[#allocation2 + $0xe8] sm:$0xf] }
 0x38d   :  { %10848 = vmatprep.subr.bf16.mxu0 %v11065_v7  ;;  %v7818_v60 = vrot.slane %v7816_v58, 4  ;;  %v7824_v16 = vrot.slane %v7822_v41, 5  ;;  %v7830_v61 = vshll.u32 %v7568_v38, 16  ;;  %v7809_v22 = vor.u32 %v7808_v33, %v7805_v0  ;;  %v15096_v0 = vld [vmem:[#allocation2 + $0xec] sm:$0x1] }
 0x38e   :  { %v7829_v13 = vrot.slane %v7827_v28, 4  ;;  %v7836_v15 = vshll.u32 %v15074_v50, 16  ;;  %v7840_v55 = vshrl.u32 %v15074_v50, 16  ;;  %v7801_v27 = vsel %vm11216_vm2, %v7796_v12, %v7800_v4  ;;  %v7574_v12 = vld [vmem:[#allocation2 + $0xf8] sm:$0xf] }
 0x38f   :  { %10769 = vmatmul.mubr.bf16.gmra.mxu0 %v9530_v5  ;;  %v7819_v40 = vor.u32 %v7818_v60, %v7814_v36  ;;  %v7832_v44 = vrot.slane %v7830_v61, 5  ;;  %v7846_v53 = vshll.u32 %v15081_v63, 16  ;;  %v9571_v54 = vcombine.low %v7791_v62, %v7801_v27  ;;  %v15102_v61 = vld [vmem:[#allocation2 + $0xfc] sm:$0xf] }
 0x390   :  { %10772 = vmatprep.mubr.bf16.mxu0 %v9531_v3  ;;  %10849 = vmatpush3.bf16.msra.mxu0 %v11065_v7  ;;  %v7810_v5 = vrot.slane %v7809_v22, 4  ;;  %v7838_v9 = vrot.slane %v7836_v15, 5  ;;  %v7842_v38 = vrot.slane %v7840_v55, 4  ;;  %v9532_v4 = vcombine.low %v14781_v34, %v14805_v24 }
 0x391   :  { %10850 = vmatprep.subr.bf16.mxu0 %v11068_v8  ;;  %v7820_v31 = vrot.slane %v7819_v40, 4  ;;  %v7833_v26 = vor.u32 %v7832_v44, %v7829_v13  ;;  %v7848_v48 = vrot.slane %v7846_v53, 5  ;;  %10820 = vmatprep.mubr.bf16.mxu1 %v9571_v54  ;;  %v9533_v7 = vcombine.low %v14809_v20, %v14831_v46  ;;  %v15109_v53 = vld [vmem:[#allocation2 + $0x100] sm:$0x1] }
 0x392   :  { %v7815_v3 = vsel %vm11216_vm2, %v7810_v5, %v7814_v36  ;;  %v7843_v1 = vor.u32 %v7842_v38, %v7838_v9  ;;  %v7851_v58 = vshrl.u32 %v7571_v57, 16  ;;  %v7854_v33 = vshll.u32 %v7571_v57, 16 }
 0x393   :  { %v7825_v41 = vsel %vm11216_vm2, %v7820_v31, %v7824_v16  ;;  %v7834_v62 = vrot.slane %v7833_v26, 4  ;;  %v7860_v28 = vshll.u32 %v15088_v11, 16  ;;  %v7864_v36 = vshrl.u32 %v15088_v11, 16  ;;  %v7577_v31 = vld [vmem:[#allocation2 + $0x10c] sm:$0xf] }
 0x394   :  { %10851 = vmatpush3.bf16.msra.mxu0 %v11068_v8  ;;  %v9572_v34 = vcombine.low %v7815_v3, %v7825_v41  ;;  %v7844_v24 = vrot.slane %v7843_v1, 4  ;;  %v7853_v60 = vrot.slane %v7851_v58, 4  ;;  %v7856_v46 = vrot.slane %v7854_v33, 5  ;;  %v15116_v1 = vld [vmem:[#allocation2 + $0x110] sm:$0xf] }
 0x395   :  { %v7839_v20 = vsel %vm11216_vm2, %v7834_v62, %v7838_v9  ;;  %v7862_v22 = vrot.slane %v7860_v28, 5  ;;  %v7870_v16 = vshll.u32 %v15096_v0, 16  ;;  %v7866_v8 = vrot.slane %v7864_v36, 4 }
 0x396   :  { %10821 = vmatmul.mubr.bf16.gmra.mxu1 %v9572_v34  ;;  %v7849_v13 = vsel %vm11216_vm2, %v7844_v24, %v7848_v48  ;;  %v7875_v15 = vshrl.u32 %v7574_v12, 16  ;;  %v7878_v55 = vshll.u32 %v7574_v12, 16  ;;  %v7857_v40 = vor.u32 %v7856_v46, %v7853_v60 }
 0x397   :  { %10773 = vmatmul.mubr.bf16.gmra.mxu0 %v9532_v4  ;;  %v9573_v27 = vcombine.low %v7839_v20, %v7849_v13  ;;  %v7872_v44 = vrot.slane %v7870_v16, 5  ;;  %v7884_v57 = vshll.u32 %v15102_v61, 16  ;;  %v7867_v54 = vor.u32 %v7866_v8, %v7862_v22  ;;  %v7580_v20 = vld [vmem:[#allocation2 + $0x120] sm:$0xf] }
 0x398   :  { %10776 = vmatprep.mubr.bf16.mxu0 %v9533_v7  ;;  %v7877_v5 = vrot.slane %v7875_v15, 4  ;;  %v7880_v9 = vrot.slane %v7878_v55, 5  ;;  %v7888_v38 = vshrl.u32 %v15102_v61, 16  ;;  %v7858_v26 = vrot.slane %v7857_v40, 4 }
 0x399   :  { %10824 = vmatprep.mubr.bf16.mxu1 %v9573_v27  ;;  %v7886_v48 = vrot.slane %v7884_v57, 5  ;;  %v7894_v4 = vshll.u32 %v15109_v53, 16  ;;  %v9534_v3 = vcombine.low %v14817_v19, %v14845_v23  ;;  %v7868_v7 = vrot.slane %v7867_v54, 4  ;;  %v15124_v19 = vld [vmem:[#allocation2 + $0x114] sm:$0x1] }
 0x39a   :  { %v7881_v58 = vor.u32 %v7880_v9, %v7877_v5  ;;  %v7890_v41 = vrot.slane %v7888_v38, 4  ;;  %v9535_v62 = vcombine.low %v14849_v56, %v14871_v6  ;;  %v7863_v33 = vsel %vm11216_vm2, %v7858_v26, %v7862_v22  ;;  %v15128_v6 = vld [vmem:[#allocation2 + $0x124] sm:$0xf] }
 0x39b   :  { %v7896_v28 = vrot.slane %v7894_v4, 5  ;;  %v7899_v12 = vshrl.u32 %v7577_v31, 16  ;;  %v7902_v34 = vshll.u32 %v7577_v31, 16  ;;  %v7873_v24 = vsel %vm11216_vm2, %v7868_v7, %v7872_v44  ;;  %v15137_v4 = vld [vmem:[#allocation2 + $0x128] sm:$0x1] }
 0x39c   :  { %v7882_v60 = vrot.slane %v7881_v58, 4  ;;  %v7891_v36 = vor.u32 %v7890_v41, %v7886_v48  ;;  %v7908_v23 = vshll.u32 %v15116_v1, 16  ;;  %v9574_v46 = vcombine.low %v7863_v33, %v7873_v24  ;;  %v7583_v7 = vld [vmem:[#allocation2 + $0x134] sm:$0xf] }
 0x39d   :  { %v7901_v16 = vrot.slane %v7899_v12, 4  ;;  %v7904_v13 = vrot.slane %v7902_v34, 5  ;;  %v7912_v56 = vshrl.u32 %v15116_v1, 16  ;;  %v7918_v55 = vshll.u32 %v15124_v19, 16  ;;  %v15140_v12 = vld [vmem:[#allocation2 + $0x138] sm:$0xf] }
 0x39e   :  { %v7887_v22 = vsel %vm11216_vm2, %v7882_v60, %v7886_v48  ;;  %v7892_v8 = vrot.slane %v7891_v36, 4  ;;  %v7910_v15 = vrot.slane %v7908_v23, 5  ;;  %10825 = vmatmul.mubr.bf16.gmra.mxu1 %v9574_v46  ;;  %v7923_v44 = vshrl.u32 %v7580_v20, 16 }
 0x39f   :  { %10777 = vmatmul.mubr.bf16.gmra.mxu0 %v9534_v3  ;;  %v7905_v27 = vor.u32 %v7904_v13, %v7901_v16  ;;  %v7914_v40 = vrot.slane %v7912_v56, 4  ;;  %v7926_v57 = vshll.u32 %v7580_v20, 16  ;;  %v7920_v5 = vrot.slane %v7918_v55, 5 }
 0x3a0   :  { %10780 = vmatprep.mubr.bf16.mxu0 %v9535_v62  ;;  %v7897_v54 = vsel %vm11216_vm2, %v7892_v8, %v7896_v28  ;;  %v7932_v9 = vshll.u32 %v15128_v6, 16  ;;  %v7936_v38 = vshrl.u32 %v15128_v6, 16  ;;  %v7925_v3 = vrot.slane %v7923_v44, 4  ;;  %v8292_v44 = vld [vmem:[#allocation2 + $0x8] sm:$0xe] }
 0x3a1   :  { %v9575_v31 = vcombine.low %v7887_v22, %v7897_v54  ;;  %v7906_v26 = vrot.slane %v7905_v27, 4  ;;  %v7915_v48 = vor.u32 %v7914_v40, %v7910_v15  ;;  %v7928_v58 = vrot.slane %v7926_v57, 5 }
 0x3a2   :  { %v7934_v41 = vrot.slane %v7932_v9, 5  ;;  %v7938_v62 = vrot.slane %v7936_v38, 4  ;;  %v7942_v33 = vshll.u32 %v15137_v4, 16  ;;  %v9536_v24 = vcombine.low %v14857_v10, %v14885_v43  ;;  %v15152_v10 = vld [vmem:[#allocation2 + $0x13c] sm:$0x1] }
 0x3a3   :  { %10828 = vmatprep.mubr.bf16.mxu1 %v9575_v31  ;;  %v7911_v28 = vsel %vm11216_vm2, %v7906_v26, %v7910_v15  ;;  %v7916_v34 = vrot.slane %v7915_v48, 4  ;;  %v9537_v60 = vcombine.low %v14889_v35, %v14911_v17  ;;  %v7929_v36 = vor.u32 %v7928_v58, %v7925_v3  ;;  %v11105_v3 = vld [vmem:[#allocation2 + $0x10] sm:$0x1] }
 0x3a4   :  { %v7939_v23 = vor.u32 %v7938_v62, %v7934_v41  ;;  %v7944_v20 = vrot.slane %v7942_v33, 5  ;;  %v7947_v46 = vshrl.u32 %v7583_v7, 16  ;;  %v7950_v13 = vshll.u32 %v7583_v7, 16 }
 0x3a5   :  { %v7921_v16 = vsel %vm11216_vm2, %v7916_v34, %v7920_v5  ;;  %v7956_v56 = vshll.u32 %v15140_v12, 16  ;;  %v7960_v22 = vshrl.u32 %v15140_v12, 16  ;;  %v7930_v15 = vrot.slane %v7929_v36, 4  ;;  %v8294_v36 = vld [vmem:[#allocation2 + $0x30] sm:$0xe] }
 0x3a6   :  { %v9576_v8 = vcombine.low %v7911_v28, %v7921_v16  ;;  %v7940_v55 = vrot.slane %v7939_v23, 4  ;;  %v7949_v43 = vrot.slane %v7947_v46, 4  ;;  %v7952_v35 = vrot.slane %v7950_v13, 5 }
 0x3a7   :  { %10781 = vmatmul.mubr.bf16.gmra.mxu0 %v9536_v24  ;;  %v7958_v17 = vrot.slane %v7956_v56, 5  ;;  %v7962_v27 = vrot.slane %v7960_v22, 4  ;;  %v7966_v40 = vshll.u32 %v15152_v10, 16  ;;  %v7935_v57 = vsel %vm11216_vm2, %v7930_v15, %v7934_v41  ;;  %v11106_v24 = vld [vmem:[#allocation2 + $0x24] sm:$0x1] }
 0x3a8   :  { %10784 = vmatprep.mubr.bf16.mxu0 %v9537_v60  ;;  %10829 = vmatmul.mubr.bf16.gmra.mxu1 %v9576_v8  ;;  %v7945_v54 = vsel %vm11216_vm2, %v7940_v55, %v7944_v20  ;;  %v7953_v9 = vor.u32 %v7952_v35, %v7949_v43  ;;  %v9587_v26 = vrot.slane %v8292_v44, 9  ;;  %v8358_v48 = vrot.slane %v14925_v42, 5  ;;  %v8293_v20 = vld [vmem:[#allocation2 + $0x1c] sm:$0xe]  ;;  %v8295_v55 = vld [vmem:[#allocation2 + $0x44] sm:$0xe] }
 0x3a9   :  { %v9577_v5 = vcombine.low %v7935_v57, %v7945_v54  ;;  %v7963_v38 = vor.u32 %v7962_v27, %v7958_v17  ;;  %v7968_v31 = vrot.slane %v7966_v40, 5  ;;  %v8361_v7 = vrot.slane %v11105_v3, 5  ;;  %v8298_v27 = vld [vmem:[#allocation2 + $0x80] sm:$0xe] }
 0x3aa   :  { %v8365_v58 = vrot.slane %v14945_v37, 5  ;;  %v7954_v62 = vrot.slane %v7953_v9, 4  ;;  %v9538_v41 = vcombine.low %v14897_v52, %v14933_v2  ;;  %v8360_v28 = vrot.slane %v8358_v48, 4  ;;  %v11107_v2 = vld [vmem:[#allocation2 + $0x38] sm:$0x1] }
 0x3ab   :  { %10832 = vmatprep.mubr.bf16.mxu1 %v9577_v5  ;;  %v7964_v33 = vrot.slane %v7963_v38, 4  ;;  %v8368_v60 = vrot.slane %v11106_v24, 5  ;;  %v8372_v37 = vrot.slane %v14958_v47, 5  ;;  %v8359_v13 = vsel %vm11686_vm5, %v9587_v26, %v8358_v48  ;;  %v8296_v47 = vld [vmem:[#allocation2 + $0x58] sm:$0xe] }
 0x3ac   :  { %v8367_v34 = vrot.slane %v8365_v58, 4  ;;  %v7959_v23 = vsel %vm11216_vm2, %v7954_v62, %v7958_v17  ;;  %v8362_v52 = vsel %vm11686_vm5, %v8360_v28, %v8361_v7  ;;  %v8375_v56 = vrot.slane %v11107_v2, 5  ;;  %v11109_v62 = vld [vmem:[#allocation2 + $0x60] sm:$0x1] }
 0x3ad   :  { %v7969_v42 = vsel %vm11216_vm2, %v7964_v33, %v7968_v31  ;;  %v9619_v22 = vcombine.low %v8359_v13, %v8362_v52  ;;  %v9589_v8 = vrot.slane %v8294_v36, 9  ;;  %v8374_v15 = vrot.slane %v8372_v37, 4  ;;  %v11108_v31 = vld [vmem:[#allocation2 + $0x4c] sm:$0x1]  ;;  %v8301_v36 = vld [vmem:[#allocation2 + $0xbc] sm:$0xe] }
 0x3ae   :  { %v9578_v46 = vcombine.low %v7959_v23, %v7969_v42  ;;  %v9588_v59 = vrot.slane %v8293_v20, 9  ;;  %v8369_v43 = vsel %vm11686_vm5, %v8367_v34, %v8368_v60  ;;  %v8379_v35 = vrot.slane %v14967_v30, 5 }
 0x3af   :  { %10785 = vmatmul.mubr.bf16.gmra.mxu0 %v9538_v41  ;;  %v8386_v17 = vrot.slane %v14974_v32, 5  ;;  %v8376_v44 = vsel %vm11686_vm5, %v8374_v15, %v8375_v56  ;;  %v9590_v57 = vrot.slane %v8295_v55, 9  ;;  %v8373_v5 = vsel %vm11686_vm5, %v9589_v8, %v8372_v37  ;;  %v8299_v41 = vld [vmem:[#allocation2 + $0x94] sm:$0xe] }
 0x3b0   :  { %10833 = vmatmul.mubr.bf16.gmra.mxu1 %v9578_v46  ;;  %10852 = vmatprep.mubr.bf16.mxu0 %v9619_v22  ;;  %v8366_v40 = vsel %vm11686_vm5, %v9588_v59, %v8365_v58  ;;  %v9591_v9 = vrot.slane %v8296_v47, 9  ;;  %v8393_v38 = vrot.slane %v14989_v29, 5  ;;  %v8382_v26 = vrot.slane %v11108_v31, 5  ;;  %v8302_v46 = vld [vmem:[#allocation2 + $0xd0] sm:$0xe] }
 0x3b1   :  { %v9620_v54 = vcombine.low %v8366_v40, %v8369_v43  ;;  %v9593_v30 = vrot.slane %v8298_v27, 9  ;;  %v8400_v32 = vrot.slane %v15008_v45, 5  ;;  %v8403_v48 = vrot.slane %v15012_v18, 5  ;;  %v8297_v40 = vld [vmem:[#allocation2 + $0x6c] sm:$0xe] }
 0x3b2   :  { %v9621_v3 = vcombine.low %v8373_v5, %v8376_v44  ;;  %v8381_v7 = vrot.slane %v8379_v35, 4  ;;  %v8388_v58 = vrot.slane %v8386_v17, 4  ;;  %v8389_v33 = vrot.slane %v11109_v62, 5  ;;  %v11110_v44 = vld [vmem:[#allocation2 + $0x74] sm:$0x1] }
 0x3b3   :  { %v8380_v28 = vsel %vm11686_vm5, %v9590_v57, %v8379_v35  ;;  %v8402_v34 = vrot.slane %v8400_v32, 4  ;;  %v8387_v24 = vsel %vm11686_vm5, %v9591_v9, %v8386_v17  ;;  %v8395_v45 = vrot.slane %v8393_v38, 4  ;;  %v8303_v5 = vld [vmem:[#allocation2 + $0xe4] sm:$0xe]  ;;  %v8305_v9 = vld [vmem:[#allocation2 + $0x10c] sm:$0xe] }
 0x3b4   :  { %v8407_v18 = vrot.slane %v15025_v51, 5  ;;  %v8410_v60 = vrot.slane %v15037_v39, 5  ;;  %v8401_v23 = vsel %vm11686_vm5, %v9593_v30, %v8400_v32  ;;  %v9594_v20 = vrot.slane %v8299_v41, 9 }
 0x3b5   :  { %v8404_v42 = vsel %vm11686_vm5, %v8402_v34, %v8403_v48  ;;  %v8421_v37 = vrot.slane %v15056_v49, 5  ;;  %v8383_v13 = vsel %vm11686_vm5, %v8381_v7, %v8382_v26  ;;  %v8390_v52 = vsel %vm11686_vm5, %v8388_v58, %v8389_v33 }
 0x3b6   :  { %v9625_v51 = vcombine.low %v8401_v23, %v8404_v42  ;;  %v8409_v2 = vrot.slane %v8407_v18, 4  ;;  %v8408_v39 = vsel %vm11686_vm5, %v9594_v20, %v8407_v18  ;;  %v9596_v56 = vrot.slane %v8301_v36, 9  ;;  %v8307_v18 = vld [vmem:[#allocation2 + $0x134] sm:$0xe] }
 0x3b7   :  { %10853 = vmatmul.mubr.bf16.vlgmr.msra.gmra.mxu0 %v9620_v54  ;;  %v8423_v22 = vrot.slane %v8421_v37, 4  ;;  %v8424_v8 = vrot.slane %v15069_v14, 5  ;;  %v9597_v49 = vrot.slane %v8302_v46, 9  ;;  %v8428_v55 = vrot.slane %v15074_v50, 5 }
 0x3b8   :  { %10856 = vmatprep.mubr.bf16.mxu0 %v9621_v3  ;;  %v8411_v15 = vsel %vm11686_vm5, %v8409_v2, %v8410_v60  ;;  %v8431_v59 = vrot.slane %v15081_v63, 5  ;;  %v9622_v43 = vcombine.low %v8380_v28, %v8383_v13  ;;  %v8422_v35 = vsel %vm11686_vm5, %v9596_v56, %v8421_v37  ;;  %v8300_v60 = vld [vmem:[#allocation2 + $0xa8] sm:$0xe] }
 0x3b9   :  { %v9626_v47 = vcombine.low %v8408_v39, %v8411_v15  ;;  %v8425_v17 = vsel %vm11686_vm5, %v8423_v22, %v8424_v8  ;;  %v9623_v27 = vcombine.low %v8387_v24, %v8390_v52  ;;  %v8396_v14 = vrot.slane %v11110_v44, 5 }
 0x3ba   :  { %v9628_v57 = vcombine.low %v8422_v35, %v8425_v17  ;;  %v8430_v54 = vrot.slane %v8428_v55, 4  ;;  %v8435_v50 = vrot.slane %v15088_v11, 5  ;;  %v8438_v63 = vrot.slane %v15096_v0, 5 }
 0x3bb   :  { %v8429_v31 = vsel %vm11686_vm5, %v9597_v49, %v8428_v55  ;;  %v8449_v30 = vrot.slane %v15116_v1, 5  ;;  %v9592_v32 = vrot.slane %v8297_v40, 9  ;;  %v9598_v3 = vrot.slane %v8303_v5, 9 }
 0x3bc   :  { %v8432_v26 = vsel %vm11686_vm5, %v8430_v54, %v8431_v59  ;;  %v8437_v7 = vrot.slane %v8435_v50, 4  ;;  %v8397_v58 = vsel %vm11686_vm5, %v8395_v45, %v8396_v14  ;;  %v9600_v11 = vrot.slane %v8305_v9, 9 }
 0x3bd   :  { %v9629_v48 = vcombine.low %v8429_v31, %v8432_v26  ;;  %v8451_v62 = vrot.slane %v8449_v30, 4  ;;  %v8452_v0 = vrot.slane %v15124_v19, 5  ;;  %v8414_v33 = vrot.slane %v15041_v25, 5 }
 0x3be   :  { %v8436_v41 = vsel %vm11686_vm5, %v9598_v3, %v8435_v50  ;;  %v8439_v28 = vsel %vm11686_vm5, %v8437_v7, %v8438_v63  ;;  %v8394_v1 = vsel %vm11686_vm5, %v9592_v32, %v8393_v38  ;;  %v8450_v24 = vsel %vm11686_vm5, %v9600_v11, %v8449_v30 }
 0x3bf   :  { %10857 = vmatmul.mubr.bf16.gmra.mxu0 %v9622_v43  ;;  %v9630_v34 = vcombine.low %v8436_v41, %v8439_v28  ;;  %v8453_v19 = vsel %vm11686_vm5, %v8451_v62, %v8452_v0  ;;  %v9624_v45 = vcombine.low %v8394_v1, %v8397_v58  ;;  %v8463_v36 = vrot.slane %v15140_v12, 5 }
 0x3c0   :  { %10860 = vmatprep.mubr.bf16.mxu0 %v9623_v27  ;;  %v9632_v25 = vcombine.low %v8450_v24, %v8453_v19  ;;  %v8466_v23 = vrot.slane %v15152_v10, 5  ;;  %v8416_v29 = vrot.slane %v8414_v33, 4  ;;  %v8417_v42 = vrot.slane %v15048_v21, 5 }
 0x3c1   :  { %v9602_v38 = vrot.slane %v8307_v18, 9  ;;  %v8465_v20 = vrot.slane %v8463_v36, 4  ;;  %v9595_v37 = vrot.slane %v8300_v60, 9  ;;  %v8442_v21 = vrot.slane %v15102_v61, 5 }
 0x3c2   :  { %v8418_v52 = vsel %vm11686_vm5, %v8416_v29, %v8417_v42  ;;  %v8445_v56 = vrot.slane %v15109_v53, 5  ;;  %v8456_v55 = vrot.slane %v15128_v6, 5  ;;  %v8459_v35 = vrot.slane %v15137_v4, 5 }
 0x3c3   :  { %v8464_v46 = vsel %vm11686_vm5, %v9602_v38, %v8463_v36  ;;  %v8467_v13 = vsel %vm11686_vm5, %v8465_v20, %v8466_v23  ;;  %v8415_v10 = vsel %vm11686_vm5, %v9595_v37, %v8414_v33  ;;  %v8444_v39 = vrot.slane %v8442_v21, 4 }
 0x3c4   :  { %v9634_v12 = vcombine.low %v8464_v46, %v8467_v13  ;;  %v9627_v2 = vcombine.low %v8415_v10, %v8418_v52  ;;  %v8458_v53 = vrot.slane %v8456_v55, 4 }
 0x3c5   :  { %v8446_v49 = vsel %vm11686_vm5, %v8444_v39, %v8445_v56 }
 0x3c6   :  { %v8460_v6 = vsel %vm11686_vm5, %v8458_v53, %v8459_v35 }
 0x3c7   :  { %10861 = vmatmul.mubr.bf16.gmra.mxu0 %v9624_v45 }
 0x3c8   :  { %10864 = vmatprep.mubr.bf16.mxu0 %v9625_v51  ;;  %v8304_v51 = vld [vmem:[#allocation2 + $0xf8] sm:$0xe] }
 0x3c9   :  { %v9599_v8 = vrot.slane %v8304_v51, 9 }
 0x3cb   :  { %v8443_v61 = vsel %vm11686_vm5, %v9599_v8, %v8442_v21 }
 0x3cc   :  { %v9631_v43 = vcombine.low %v8443_v61, %v8446_v49 }
 0x3cf   :  { %10865 = vmatmul.mubr.bf16.gmra.mxu0 %v9626_v47  ;;  %v8306_v47 = vld [vmem:[#allocation2 + $0x120] sm:$0xe] }
 0x3d0   :  { %10868 = vmatprep.mubr.bf16.mxu0 %v9627_v2  ;;  %v9601_v40 = vrot.slane %v8306_v47, 9 }
 0x3d1   :  { %v15249_v22 = vpop.f32.mrf.mxu1 }
 0x3d2   :  { %v8457_v54 = vsel %vm11686_vm5, %v9601_v40, %v8456_v55 }
 0x3d3   :  { %v15251_v15 = vpop.f32.mrf.mxu1  ;;  %v9633_v4 = vcombine.low %v8457_v54, %v8460_v6 }
 0x3d5   :  { %v15256_v59 = vpop.f32.mrf.mxu1 }
 0x3d7   :  { %10869 = vmatmul.mubr.bf16.gmra.mxu0 %v9628_v57  ;;  %v15263_v27 = vpop.f32.mrf.mxu1 }
 0x3d8   :  { %10872 = vmatprep.mubr.bf16.mxu0 %v9629_v48 }
 0x3db   :  { %v15261_v17 = vpop.f32.mrf.mxu0 }
 0x3dd   :  { %v15265_v44 = vpop.f32.mrf.mxu0 }
 0x3de   :  { %v15269_v14 = vpop.f32.mrf.mxu1 }
 0x3df   :  { %10873 = vmatmul.mubr.bf16.gmra.mxu0 %v9630_v34  ;;  %v15271_v57 = vpop.f32.mrf.mxu0 }
 0x3e0   :  { %10876 = vmatprep.mubr.bf16.mxu0 %v9631_v43  ;;  %v15275_v5 = vpop.f32.mrf.mxu1 }
 0x3e1   :  { %v15277_v50 = vpop.f32.mrf.mxu0 }
 0x3e2   :  { %v15279_v63 = vpop.f32.mrf.mxu1 }
 0x3e4   :  { %v15283_v31 = vpop.f32.mrf.mxu1 }
 0x3e7   :  { %10877 = vmatmul.mubr.bf16.gmra.mxu0 %v9632_v25  ;;  %v15281_v9 = vpop.f32.mrf.mxu0 }
 0x3e8   :  { %10880 = vmatprep.mubr.bf16.mxu0 %v9633_v4 }
 0x3e9   :  { %v15285_v26 = vpop.f32.mrf.mxu0 }
 0x3eb   :  { %v15287_v30 = vpop.f32.mrf.mxu0  ;;  %v15289_v16 = vpop.f32.mrf.mxu1 }
 0x3ed   :  { %v15291_v32 = vpop.f32.mrf.mxu1  ;;  %v15293_v48 = vpop.f32.mrf.mxu0 }
 0x3ef   :  { %10881 = vmatmul.mubr.bf16.gmra.mxu0 %v9634_v12  ;;  %v15295_v3 = vpop.f32.mrf.mxu1 }
 0x3f1   :  { %v15301_v11 = vpop.f32.mrf.mxu1 }
 0x3f4   :  { %v15297_v7 = vpop.f32.mrf.mxu0 }
 0x3f6   :  { %v15299_v58 = vpop.f32.mrf.mxu0 }
 0x3f8   :  { %v15303_v62 = vpop.f32.mrf.mxu0 }
 0x3fa   :  { %v15305_v0 = vpop.f32.mrf.mxu1  ;;  %v15309_v41 = vpop.f32.mrf.mxu0 }
 0x3fc   :  { %v15307_v33 = vpop.f32.mrf.mxu1 }
 0x3fe   :  { %v15311_v28 = vpop.f32.mrf.mxu1 }
 0x3ff   :  { %16220 = vst [vmem:[#allocation34_spill] sm:$0xff] %v15311_v28 }
 0x400   :  { %v15315_v34 = vpop.f32.mrf.mxu1 }
 0x401   :  { %16221 = vst [vmem:[#allocation33_spill] sm:$0xff] %v15315_v34 }
 0x402   :  { %v15313_v1 = vpop.f32.mrf.mxu0 }
 0x404   :  { %v15317_v24 = vpop.f32.mrf.mxu0 }
 0x406   :  { %v15319_v19 = vpop.f32.mrf.mxu0  ;;  %v15321_v45 = vpop.f32.mrf.mxu1 }
 0x407   :  { %16222 = vst [vmem:[#allocation7_spill] sm:$0xff] %v15321_v45 }
 0x408   :  { %v15323_v25 = vpop.f32.mrf.mxu1  ;;  %v15325_v18 = vpop.f32.mrf.mxu0 }
 0x409   :  { %16223 = vst [vmem:[#allocation35_spill] sm:$0xff] %v15323_v25  ;;  %16224 = vst [vmem:[#allocation13_spill] sm:$0xff] %v15325_v18 }
 0x40a   :  { %v15327_v60 = vpop.f32.mrf.mxu1 }
 0x40b   :  { %16225 = vst [vmem:[#allocation38_spill] sm:$0xff] %v15327_v60 }
 0x40c   :  { %v15329_v36 = vpop.f32.mrf.mxu1 }
 0x40d   :  { %16226 = vst [vmem:[#allocation19_spill] sm:$0xff] %v15329_v36 }
 0x40e   :  { %v15331_v23 = vpop.f32.mrf.mxu0 }
 0x40f   :  { %16227 = vst [vmem:[#allocation9_spill] sm:$0xff] %v15331_v23 }
 0x410   :  { %v15333_v29 = vpop.f32.mrf.mxu0  ;;  %v15335_v42 = vpop.f32.mrf.mxu1 }
 0x411   :  { %16228 = vst [vmem:[#allocation11_spill] sm:$0xff] %v15333_v29  ;;  %16229 = vst [vmem:[#allocation22_spill] sm:$0xff] %v15335_v42 }
 0x412   :  { %v15337_v38 = vpop.f32.mrf.mxu0  ;;  %v15339_v20 = vpop.f32.mrf.mxu1 }
 0x413   :  { %16230 = vst [vmem:[#allocation21_spill] sm:$0xff] %v15337_v38  ;;  %16231 = vst [vmem:[#allocation18_spill] sm:$0xff] %v15339_v20 }
 0x414   :  { %v15341_v37 = vpop.f32.mrf.mxu0  ;;  %v15343_v46 = vpop.f32.mrf.mxu1 }
 0x415   :  { %16232 = vst [vmem:[#allocation26_spill] sm:$0xff] %v15341_v37  ;;  %16233 = vst [vmem:[#allocation3_spill] sm:$0xff] %v15343_v46 }
 0x416   :  { %v15345_v13 = vpop.f32.mrf.mxu1 }
 0x417   :  { %16234 = vst [vmem:[#allocation6_spill] sm:$0xff] %v15345_v13  ;;  %v15347_v52 = vpop.f32.mrf.mxu0 }
 0x418   :  { %16235 = vst [vmem:[#allocation30_spill] sm:$0xff] %v15347_v52 }
 0x419   :  { %v15349_v12 = vpop.f32.mrf.mxu0  ;;  %v15351_v10 = vpop.f32.mrf.mxu1 }
 0x41a   :  { %16236 = vst [vmem:[#allocation41_spill] sm:$0xff] %v15349_v12  ;;  %16237 = vst [vmem:[#allocation23_spill] sm:$0xff] %v15351_v10 }
 0x41b   :  { %v15353_v2 = vpop.f32.mrf.mxu0  ;;  %v15355_v21 = vpop.f32.mrf.mxu1 }
 0x41c   :  { %16238 = vst [vmem:[#allocation43_spill] sm:$0xff] %v15353_v2  ;;  %16239 = vst [vmem:[#allocation36_spill] sm:$0xff] %v15355_v21 }
 0x41d   :  { %v15357_v51 = vpop.f32.mrf.mxu0  ;;  %v15359_v39 = vpop.f32.mrf.mxu1 }
 0x41e   :  { %16240 = vst [vmem:[#allocation14_spill] sm:$0xff] %v15357_v51  ;;  %16241 = vst [vmem:[#allocation4_spill] sm:$0xff] %v15359_v39 }
 0x41f   :  { %v15363_v8 = vpop.f32.mrf.mxu1 }
 0x420   :  { %16243 = vst [vmem:[#allocation45_spill] sm:$0xff] %v15363_v8 }
 0x421   :  { %v15361_v56 = vpop.f32.mrf.mxu0 }
 0x422   :  { %16242 = vst [vmem:[#allocation44_spill] sm:$0xff] %v15361_v56 }
 0x423   :  { %v15365_v49 = vpop.f32.mrf.mxu0  ;;  %v15369_v61 = vpop.f32.mrf.mxu1 }
 0x424   :  { %16244 = vst [vmem:[#allocation40_spill] sm:$0xff] %v15365_v49  ;;  %16246 = vst [vmem:[#allocation46_spill] sm:$0xff] %v15369_v61 }
 0x425   :  { %v15367_v55 = vpop.f32.mrf.mxu0  ;;  %v15373_v47 = vpop.f32.mrf.mxu1 }
 0x426   :  { %16245 = vst [vmem:[#allocation42_spill] sm:$0xff] %v15367_v55  ;;  %16248 = vst [vmem:[#allocation47_spill] sm:$0xff] %v15373_v47 }
 0x427   :  { %v15371_v43 = vpop.f32.mrf.mxu0  ;;  %v15377_v35 = vpop.f32.mrf.mxu1 }
 0x428   :  { %16247 = vst [vmem:[#allocation48_spill] sm:$0xff] %v15371_v43  ;;  %16250 = vst [vmem:[#allocation39_spill] sm:$0xff] %v15377_v35 }
 0x429   :  { %v15383_v54 = vpop.f32.mrf.mxu1 }
 0x42a   :  { %16253 = vst [vmem:[#allocation27_spill] sm:$0xff] %v15383_v54 }
 0x42d   :  { %v15375_v53 = vpop.f32.mrf.mxu0 }
 0x42e   :  { %16249 = vst [vmem:[#allocation49_spill] sm:$0xff] %v15375_v53 }
 0x42f   :  { %v15379_v40 = vpop.f32.mrf.mxu0 }
 0x430   :  { %16251 = vst [vmem:[#allocation28_spill] sm:$0xff] %v15379_v40 }
 0x431   :  { %v15381_v6 = vpop.f32.mrf.mxu0 }
 0x432   :  { %16252 = vst [vmem:[#allocation20_spill] sm:$0xff] %v15381_v6 }
 0x433   :  { %v15385_v4 = vpop.f32.mrf.mxu0 }
 0x434   :  { %16254 = vst [vmem:[#allocation25_spill] sm:$0xff] %v15385_v4  ;;  %v10806_v8 = vpop.f32.mrf.mxu1 }
 0x436   :  { %v8133_v61 = vpop.f32.mrf.mxu1 }
 0x437   :  { %v10758_v39 = vpop.f32.mrf.mxu0 }
 0x438   :  { %v15387_v49 = vpop.f32.mrf.mxu1 }
 0x439   :  { %v7379_v55 = vpop.f32.mrf.mxu0 }
 0x43a   :  { %v15391_v35 = vpop.f32.mrf.mxu1 }
 0x43b   :  { %v10759_v21 = vpop.f32.mrf.mxu0 }
 0x43c   :  { %v15397_v54 = vpop.f32.mrf.mxu1 }
 0x43d   :  { %v7382_v43 = vpop.f32.mrf.mxu0 }
 0x43e   :  { %v15403_v56 = vpop.f32.mrf.mxu1 }
 0x43f   :  { %v10762_v47 = vpop.f32.mrf.mxu0 }
 0x440   :  { %v15409_v46 = vpop.f32.mrf.mxu1 }
 0x441   :  { %v15389_v53 = vpop.f32.mrf.mxu0 }
 0x442   :  { %v15415_v12 = vpop.f32.mrf.mxu1 }
 0x443   :  { %v15393_v40 = vpop.f32.mrf.mxu0 }
 0x444   :  { %v15421_v36 = vpop.f32.mrf.mxu1 }
 0x445   :  { %v15395_v6 = vpop.f32.mrf.mxu0 }
 0x446   :  { %v15427_v38 = vpop.f32.mrf.mxu1 }
 0x447   :  { %v15399_v4 = vpop.f32.mrf.mxu0 }
 0x448   :  { %v15433_v45 = vpop.f32.mrf.mxu1 }
 0x449   :  { %v15401_v10 = vpop.f32.mrf.mxu0 }
 0x44b   :  { %v15405_v13 = vpop.f32.mrf.mxu0 }
 0x44d   :  { %v15407_v51 = vpop.f32.mrf.mxu0 }
 0x44f   :  { %v15411_v2 = vpop.f32.mrf.mxu0 }
 0x451   :  { %v15413_v20 = vpop.f32.mrf.mxu0 }
 0x452   :  { %16255 = vst [vmem:[#allocation15_spill] sm:$0xff] %v15413_v20 }
 0x453   :  { %v15417_v42 = vpop.f32.mrf.mxu0 }
 0x454   :  { %16256 = vst [vmem:[#allocation16_spill] sm:$0xff] %v15417_v42  ;;  %v15439_v42 = vpop.f32.mrf.mxu1 }
 0x455   :  { %v15419_v52 = vpop.f32.mrf.mxu0 }
 0x456   :  { %16257 = vst [vmem:[#allocation12_spill] sm:$0xff] %v15419_v52 }
 0x457   :  { %v15423_v37 = vpop.f32.mrf.mxu0 }
 0x458   :  { %16258 = vst [vmem:[#allocation29_spill] sm:$0xff] %v15423_v37  ;;  %v15445_v37 = vpop.f32.mrf.mxu1 }
 0x459   :  { %v15425_v60 = vpop.f32.mrf.mxu0  ;;  %16266 = vst [vmem:[#allocation17_spill] sm:$0xff] %v15445_v37 }
 0x45a   :  { %16259 = vst [vmem:[#allocation10_spill] sm:$0xff] %v15425_v60 }
 0x45b   :  { %v15429_v25 = vpop.f32.mrf.mxu0 }
 0x45c   :  { %16260 = vst [vmem:[#allocation37_spill] sm:$0xff] %v15429_v25  ;;  %v15451_v25 = vpop.f32.mrf.mxu1 }
 0x45d   :  { %v15431_v29 = vpop.f32.mrf.mxu0  ;;  %16269 = vst [vmem:[#allocation52_spill] sm:$0xff] %v15451_v25 }
 0x45e   :  { %16261 = vst [vmem:[#allocation24_spill] sm:$0xff] %v15431_v29 }
 0x45f   :  { %v15435_v23 = vpop.f32.mrf.mxu0 }
 0x460   :  { %16262 = vst [vmem:[#allocation5_spill] sm:$0xff] %v15435_v23  ;;  %v15457_v23 = vpop.f32.mrf.mxu1 }
 0x461   :  { %v15437_v34 = vpop.f32.mrf.mxu0  ;;  %16272 = vst [vmem:[#allocation55_spill] sm:$0xff] %v15457_v23 }
 0x462   :  { %16263 = vst [vmem:[#allocation31_spill] sm:$0xff] %v15437_v34 }
 0x463   :  { %v15441_v52 = vpop.f32.mrf.mxu0 }
 0x464   :  { %16264 = vst [vmem:[#allocation8_spill] sm:$0xff] %v15441_v52  ;;  %v7082_v52 = vadd.f32 %v15249_v22, %v15261_v17 }
 0x465   :  { %v15443_v18 = vpop.f32.mrf.mxu0 }
 0x466   :  { %16265 = vst [vmem:[#allocation32_spill] sm:$0xff] %v15443_v18  ;;  %v7508_v37 = vadd.f32 %v10758_v39, %v7082_v52  ;;  %v15484_v52 = vld [vmem:[%s15737_s6] ss:$0 sm:$0xff]  ;;  %v7090_v39 = vadd.f32 %v15275_v5, %v15285_v26  ;;  %v7093_v26 = vadd.f32 %v15283_v31, %v15293_v48 }
 0x467   :  { %v15447_v60 = vpop.f32.mrf.mxu0 }
 0x468   :  { %16267 = vst [vmem:[#allocation50_spill] sm:$0xff] %v15447_v60  ;;  %v7074_v60 = vadd.f32 %v15251_v15, %v15265_v44  ;;  %v8262_v17 = vadd.f32 %v10806_v8, %v7508_v37  ;;  %v7511_v48 = vadd.f32 %v15395_v6, %v7093_v26  ;;  %v16275_v26 = vld [vmem:[#allocation34_spill] sm:$0xff] }
 0x469   :  { %v15449_v20 = vpop.f32.mrf.mxu0 }
 0x46a   :  { %16268 = vst [vmem:[#allocation51_spill] sm:$0xff] %v15449_v20  ;;  %v15467_v20 = vpop.f32.mrf.mxu1 }
 0x46b   :  { %v15453_v29 = vpop.f32.mrf.mxu0 }
 0x46c   :  { %16270 = vst [vmem:[#allocation53_spill] sm:$0xff] %v15453_v29  ;;  %v7506_v29 = vadd.f32 %v7379_v55, %v7074_v60  ;;  %v15479_v15 = vpop.f32.mrf.mxu1 }
 0x46d   :  { %v15455_v28 = vpop.f32.mrf.mxu0 }
 0x46e   :  { %16271 = vst [vmem:[#allocation54_spill] sm:$0xff] %v15455_v28  ;;  %v7085_v28 = vadd.f32 %v15256_v59, %v15271_v57  ;;  %v8260_v60 = vadd.f32 %v8133_v61, %v7506_v29  ;;  %v15493_v8 = vpop.f32.mrf.mxu1 }
 0x46f   :  { %v15459_v34 = vpop.f32.mrf.mxu0 }
 0x470   :  { %16273 = vst [vmem:[#allocation56_spill] sm:$0xff] %v15459_v34  ;;  %v7077_v34 = vadd.f32 %v15263_v27, %v15277_v50  ;;  %v7509_v22 = vadd.f32 %v10759_v21, %v7085_v28  ;;  %v7510_v21 = vadd.f32 %v15389_v53, %v7090_v39  ;;  %v7114_v53 = vadd.f32 %v15289_v16, %v15297_v7 }
 0x471   :  { %v15463_v18 = vpop.f32.mrf.mxu0 }
 0x472   :  { %16274 = vst [vmem:[#allocation57_spill] sm:$0xff] %v15463_v18  ;;  %v7098_v18 = vadd.f32 %v15269_v14, %v15281_v9  ;;  %v7507_v59 = vadd.f32 %v7382_v43, %v7077_v34  ;;  %v8263_v14 = vadd.f32 %v15387_v49, %v7509_v22  ;;  %v7101_v9 = vadd.f32 %v15279_v63, %v15287_v30 }
 0x473   :  { %v15469_v25 = vpop.f32.mrf.mxu0  ;;  %v8264_v31 = vadd.f32 %v15403_v56, %v7510_v21  ;;  %v7516_v16 = vadd.f32 %v15399_v4, %v7114_v53  ;;  %v7130_v21 = vadd.f32 %v15305_v0, %v15313_v1  ;;  %v16277_v53 = vld [vmem:[#allocation13_spill] sm:$0xff] }
 0x474   :  { %v7512_v27 = vadd.f32 %v10762_v47, %v7098_v18  ;;  %v8261_v5 = vadd.f32 %v15391_v35, %v7507_v59  ;;  %v7513_v43 = vadd.f32 %v15393_v40, %v7101_v9  ;;  %v15507_v35 = vpop.f32.mrf.mxu1 }
 0x475   :  { %v15473_v23 = vpop.f32.mrf.mxu0  ;;  %v7520_v0 = vadd.f32 %v15411_v2, %v7130_v21 }
 0x476   :  { %v8266_v49 = vadd.f32 %v15397_v54, %v7512_v27  ;;  %v15526_v27 = vpop.f32.mrf.mxu1 }
 0x477   :  { %v10854_v44 = vpop.f32.mrf.mxu0 }
 0x478   :  { %v8760_v57 = vadd.f32 %v10854_v44, %v8262_v17  ;;  %v7106_v44 = vadd.f32 %v15291_v32, %v15299_v58 }
 0x479   :  { %v8631_v50 = vpop.f32.mrf.mxu0 }
 0x47a   :  { %v8799_v28 = vadd.f32 %v15484_v52, %v8760_v57  ;;  %v8758_v37 = vadd.f32 %v8631_v50, %v8260_v60  ;;  %v8267_v57 = vadd.f32 %v15409_v46, %v7513_v43  ;;  %v7117_v60 = vadd.f32 %v15295_v3, %v15303_v62 }
 0x47b   :  { %v10855_v34 = vpop.f32.mrf.mxu0  ;;  %v7514_v39 = vadd.f32 %v15401_v10, %v7106_v44  ;;  %v7109_v46 = vadd.f32 %v15301_v11, %v15309_v41  ;;  %v8270_v3 = vadd.f32 %v15421_v36, %v7516_v16 }
 0x47c   :  { %v8831_v55 = vmax.f32 %v8799_v28, 0.0  ;;  %v8797_v29 = vadd.f32 %v15484_v52, %v8758_v37  ;;  %v8761_v61 = vadd.f32 %v10855_v34, %v8263_v14  ;;  %v8265_v28 = vadd.f32 %v15415_v12, %v7511_v48  ;;  %v15543_v12 = vpop.f32.mrf.mxu1 }
 0x47d   :  { %v8634_v18 = vpop.f32.mrf.mxu0  ;;  %v7517_v62 = vadd.f32 %v15405_v13, %v7117_v60  ;;  %v8268_v11 = vadd.f32 %v15427_v38, %v7514_v39  ;;  %v7515_v41 = vadd.f32 %v15407_v51, %v7109_v46  ;;  %v16284_v39 = vld [vmem:[#allocation12_spill] sm:$0xff]  ;;  %v16286_v46 = vld [vmem:[#allocation35_spill] sm:$0xff] }
 0x47e   :  { %8863 = vst [vmem:[%s15738_s7 + $0x10] sm:$0xff] %v8831_v55  ;;  %v8829_v63 = vmax.f32 %v8797_v29, 0.0  ;;  %v8800_v30 = vadd.f32 %v15484_v52, %v8761_v61  ;;  %v8759_v47 = vadd.f32 %v8634_v18, %v8261_v5  ;;  %v7122_v29 = vadd.f32 %v15307_v33, %v15317_v24 }
 0x47f   :  { %v10858_v22 = vpop.f32.mrf.mxu0  ;;  %v8271_v5 = vadd.f32 %v15433_v45, %v7517_v62  ;;  %v7133_v18 = vadd.f32 %v16275_v26, %v15319_v19  ;;  %v16278_v45 = vld [vmem:[#allocation33_spill] sm:$0xff]  ;;  %v16292_v26 = vld [vmem:[#allocation26_spill] sm:$0xff] }
 0x480   :  { %8861 = vst [vmem:[%s15738_s7] sm:$0xff] %v8829_v63  ;;  %v8832_v40 = vmax.f32 %v8800_v30, 0.0  ;;  %v8798_v54 = vadd.f32 %v15484_v52, %v8759_v47  ;;  %v8764_v17 = vadd.f32 %v10858_v22, %v8266_v49  ;;  %v16276_v49 = vld [vmem:[#allocation15_spill] sm:$0xff]  ;;  %v15562_v63 = vpop.f32.mrf.mxu1  ;;  %v8269_v47 = vadd.f32 %v15439_v42, %v7515_v41  ;;  %v16279_v19 = vld [vmem:[#allocation17_spill] sm:$0xff] }
 0x481   :  { %v8647_v7 = vpop.f32.mrf.mxu0  ;;  %v7518_v43 = vadd.f32 %v16276_v49, %v7122_v29  ;;  %v7125_v22 = vadd.f32 %v16278_v45, %v16277_v53  ;;  %v8274_v48 = vadd.f32 %v16279_v19, %v7520_v0  ;;  %v16289_v41 = vld [vmem:[#allocation21_spill] sm:$0xff]  ;;  %v16295_v45 = vld [vmem:[#allocation30_spill] sm:$0xff] }
 0x482   :  { %8864 = vst [vmem:[%s15738_s7 + $0x18] sm:$0xff] %v8832_v40  ;;  %v8830_v56 = vmax.f32 %v8798_v54, 0.0  ;;  %v8803_v6 = vadd.f32 %v15484_v52, %v8764_v17  ;;  %v8762_v59 = vadd.f32 %v8647_v7, %v8264_v31  ;;  %v16280_v40 = vld [vmem:[#allocation16_spill] sm:$0xff]  ;;  %v16281_v7 = vld [vmem:[#allocation9_spill] sm:$0xff]  ;;  %v15579_v42 = vpop.f32.mrf.mxu1 }
 0x483   :  { %v10859_v32 = vpop.f32.mrf.mxu0  ;;  %v7521_v54 = vadd.f32 %v16280_v40, %v7133_v18  ;;  %v16293_v18 = vld [vmem:[#allocation19_spill] sm:$0xff]  ;;  %v16297_v40 = vld [vmem:[#allocation24_spill] sm:$0xff] }
 0x484   :  { %8862 = vst [vmem:[%s15738_s7 + $0x8] sm:$0xff] %v8830_v56  ;;  %v8835_v58 = vmax.f32 %v8803_v6, 0.0  ;;  %v8801_v4 = vadd.f32 %v15484_v52, %v8762_v59  ;;  %v8765_v50 = vadd.f32 %v10859_v32, %v8267_v57  ;;  %v16282_v56 = vld [vmem:[#allocation7_spill] sm:$0xff]  ;;  %v16283_v57 = vld [vmem:[#allocation52_spill] sm:$0xff]  ;;  %v7519_v32 = vadd.f32 %v16284_v39, %v7125_v22  ;;  %v15598_v0 = vpop.f32.mrf.mxu1  ;;  %v16296_v22 = vld [vmem:[#allocation22_spill] sm:$0xff] }
 0x485   :  { %v8650_v37 = vpop.f32.mrf.mxu0  ;;  %v7146_v6 = vadd.f32 %v16282_v56, %v16281_v7  ;;  %v8272_v60 = vadd.f32 %v16283_v57, %v7518_v43  ;;  %v7141_v49 = vadd.f32 %v16293_v18, %v16292_v26  ;;  %v16299_v7 = vld [vmem:[#allocation18_spill] sm:$0xff]  ;;  %v16309_v18 = vld [vmem:[#allocation32_spill] sm:$0xff] }
 0x486   :  { %8867 = vst [vmem:[%s15738_s7 + $0x30] sm:$0xff] %v8835_v58  ;;  %v8833_v10 = vmax.f32 %v8801_v4, 0.0  ;;  %v8804_v14 = vadd.f32 %v15484_v52, %v8765_v50  ;;  %v8763_v9 = vadd.f32 %v8650_v37, %v8265_v28  ;;  %v16285_v28 = vld [vmem:[#allocation11_spill] sm:$0xff] }
 0x487   :  { %v10862_v34 = vpop.f32.mrf.mxu0  ;;  %v7138_v37 = vadd.f32 %v16286_v46, %v16285_v28  ;;  %v16303_v28 = vld [vmem:[#allocation31_spill] sm:$0xff] }
 0x488   :  { %8865 = vst [vmem:[%s15738_s7 + $0x20] sm:$0xff] %v8833_v10  ;;  %v8836_v36 = vmax.f32 %v8804_v14, 0.0  ;;  %v8802_v13 = vadd.f32 %v15484_v52, %v8763_v9  ;;  %v8768_v55 = vadd.f32 %v10862_v34, %v8270_v3  ;;  %v16287_v3 = vld [vmem:[#allocation29_spill] sm:$0xff]  ;;  %v16288_v34 = vld [vmem:[#allocation55_spill] sm:$0xff] }
 0x489   :  { %v8663_v1 = vpop.f32.mrf.mxu0  ;;  %v7524_v62 = vadd.f32 %v16287_v3, %v7146_v6  ;;  %v16300_v6 = vld [vmem:[#allocation5_spill] sm:$0xff] }
 0x48a   :  { %8868 = vst [vmem:[%s15738_s7 + $0x38] sm:$0xff] %v8836_v36  ;;  %v8834_v38 = vmax.f32 %v8802_v13, 0.0  ;;  %v8807_v51 = vadd.f32 %v15484_v52, %v8768_v55  ;;  %v8766_v61 = vadd.f32 %v8663_v1, %v8268_v11  ;;  %v8275_v11 = vadd.f32 %v16288_v34, %v7521_v54  ;;  %v16290_v36 = vld [vmem:[#allocation38_spill] sm:$0xff] }
 0x48b   :  { %v10863_v33 = vpop.f32.mrf.mxu0  ;;  %v7149_v13 = vadd.f32 %v16290_v36, %v16289_v41  ;;  %v16291_v55 = vld [vmem:[#allocation10_spill] sm:$0xff]  ;;  %v7523_v54 = vadd.f32 %v16297_v40, %v7141_v49  ;;  %v16306_v36 = vld [vmem:[#allocation8_spill] sm:$0xff] }
 0x48c   :  { %8866 = vst [vmem:[%s15738_s7 + $0x28] sm:$0xff] %v8834_v38  ;;  %v8839_v24 = vmax.f32 %v8807_v51, 0.0  ;;  %v8805_v2 = vadd.f32 %v15484_v52, %v8766_v61  ;;  %v8769_v30 = vadd.f32 %v10863_v33, %v8271_v5  ;;  %v7522_v29 = vadd.f32 %v16291_v55, %v7138_v37  ;;  %v16305_v34 = vld [vmem:[#allocation6_spill] sm:$0xff]  ;;  %v16314_v40 = vld [vmem:[#allocation4_spill] sm:$0xff] }
 0x48d   :  { %v8666_v31 = vpop.f32.mrf.mxu0  ;;  %v8273_v5 = vadd.f32 %v15467_v20, %v7519_v32  ;;  %v8278_v33 = vadd.f32 %v15479_v15, %v7524_v62  ;;  %v10830_v20 = vpop.f32.mrf.mxu1 }
 0x48e   :  { %8871 = vst [vmem:[%s15738_s7 + $0x50] sm:$0xff] %v8839_v24  ;;  %v8837_v17 = vmax.f32 %v8805_v2, 0.0  ;;  %v8808_v44 = vadd.f32 %v15484_v52, %v8769_v30  ;;  %v8767_v16 = vadd.f32 %v8666_v31, %v8269_v47  ;;  %v16294_v24 = vld [vmem:[#allocation37_spill] sm:$0xff]  ;;  %v7162_v31 = vadd.f32 %v16296_v22, %v16295_v45 }
 0x48f   :  { %v10866_v59 = vpop.f32.mrf.mxu0  ;;  %v7525_v2 = vadd.f32 %v16294_v24, %v7149_v13  ;;  %v8229_v37 = vpop.f32.mrf.mxu1  ;;  %v16310_v24 = vld [vmem:[#allocation40_spill] sm:$0xff] }
 0x490   :  { %8869 = vst [vmem:[%s15738_s7 + $0x40] sm:$0xff] %v8837_v17  ;;  %v8840_v58 = vmax.f32 %v8808_v44, 0.0  ;;  %v8806_v4 = vadd.f32 %v15484_v52, %v8767_v16  ;;  %v8772_v50 = vadd.f32 %v10866_v59, %v8274_v48  ;;  %v8276_v48 = vadd.f32 %v15493_v8, %v7522_v29  ;;  %v16298_v16 = vld [vmem:[#allocation41_spill] sm:$0xff] }
 0x491   :  { %v8679_v10 = vpop.f32.mrf.mxu0  ;;  %v7154_v56 = vadd.f32 %v16299_v7, %v16298_v16  ;;  %v7528_v59 = vadd.f32 %v16300_v6, %v7162_v31  ;;  %v8279_v32 = vadd.f32 %v15507_v35, %v7525_v2  ;;  %v16311_v2 = vld [vmem:[#allocation36_spill] sm:$0xff] }
 0x492   :  { %8872 = vst [vmem:[%s15738_s7 + $0x58] sm:$0xff] %v8840_v58  ;;  %v8838_v14 = vmax.f32 %v8806_v4, 0.0  ;;  %v8811_v9 = vadd.f32 %v15484_v52, %v8772_v50  ;;  %v8770_v21 = vadd.f32 %v8679_v10, %v8272_v60  ;;  %v16301_v58 = vld [vmem:[#allocation43_spill] sm:$0xff] }
 0x493   :  { %v10867_v1 = vpop.f32.mrf.mxu0  ;;  %v16302_v4 = vld [vmem:[#allocation3_spill] sm:$0xff]  ;;  %v7526_v46 = vadd.f32 %v16303_v28, %v7154_v56  ;;  %v8282_v41 = vadd.f32 %v15543_v12, %v7528_v59 }
 0x494   :  { %8870 = vst [vmem:[%s15738_s7 + $0x48] sm:$0xff] %v8838_v14  ;;  %v8843_v38 = vmax.f32 %v8811_v9, 0.0  ;;  %v8809_v51 = vadd.f32 %v15484_v52, %v8770_v21  ;;  %v8773_v61 = vadd.f32 %v10867_v1, %v8275_v11  ;;  %v7165_v50 = vadd.f32 %v16302_v4, %v16301_v58  ;;  %v16304_v21 = vld [vmem:[#allocation14_spill] sm:$0xff] }
 0x495   :  { %v8682_v43 = vpop.f32.mrf.mxu0  ;;  %v8277_v9 = vadd.f32 %v15526_v27, %v7523_v54  ;;  %v7157_v35 = vadd.f32 %v16305_v34, %v16304_v21  ;;  %v10831_v27 = vpop.f32.mrf.mxu1  ;;  %v8280_v26 = vadd.f32 %v15562_v63, %v7526_v46  ;;  %v16319_v46 = vld [vmem:[#allocation49_spill] sm:$0xff] }
 0x496   :  { %8875 = vst [vmem:[%s15738_s7 + $0x70] sm:$0xff] %v8843_v38  ;;  %v8841_v30 = vmax.f32 %v8809_v51, 0.0  ;;  %v8812_v47 = vadd.f32 %v15484_v52, %v8773_v61  ;;  %v8771_v53 = vadd.f32 %v8682_v43, %v8273_v5  ;;  %v7529_v13 = vadd.f32 %v16306_v36, %v7165_v50  ;;  %v16307_v38 = vld [vmem:[#allocation44_spill] sm:$0xff]  ;;  %v16308_v51 = vld [vmem:[#allocation23_spill] sm:$0xff] }
 0x497   :  { %v10870_v19 = vpop.f32.mrf.mxu0  ;;  %v7178_v61 = vadd.f32 %v16308_v51, %v16307_v38  ;;  %v7527_v49 = vadd.f32 %v16309_v18, %v7157_v35 }
 0x498   :  { %8873 = vst [vmem:[%s15738_s7 + $0x60] sm:$0xff] %v8841_v30  ;;  %v8844_v15 = vmax.f32 %v8812_v47, 0.0  ;;  %v8810_v17 = vadd.f32 %v15484_v52, %v8771_v53  ;;  %v8776_v44 = vadd.f32 %v10870_v19, %v8278_v33  ;;  %v7170_v30 = vadd.f32 %v16311_v2, %v16310_v24  ;;  %v16312_v47 = vld [vmem:[#allocation50_spill] sm:$0xff] }
 0x499   :  { %v8695_v57 = vpop.f32.mrf.mxu0  ;;  %v7532_v53 = vadd.f32 %v16312_v47, %v7178_v61  ;;  %v8283_v19 = vadd.f32 %v15579_v42, %v7529_v13  ;;  %v8281_v59 = vadd.f32 %v15598_v0, %v7527_v49  ;;  %v16324_v13 = vld [vmem:[#allocation56_spill] sm:$0xff]  ;;  %v16327_v49 = vld [vmem:[#allocation57_spill] sm:$0xff] }
 0x49a   :  { %8876 = vst [vmem:[%s15738_s7 + $0x78] sm:$0xff] %v8844_v15  ;;  %v8842_v8 = vmax.f32 %v8810_v17, 0.0  ;;  %v8815_v60 = vadd.f32 %v15484_v52, %v8776_v44  ;;  %v8774_v39 = vadd.f32 %v8695_v57, %v8276_v48  ;;  %v16313_v48 = vld [vmem:[#allocation42_spill] sm:$0xff]  ;;  %v16315_v15 = vld [vmem:[#allocation51_spill] sm:$0xff]  ;;  %v8232_v44 = vpop.f32.mrf.mxu1  ;;  %v16316_v57 = vld [vmem:[#allocation48_spill] sm:$0xff] }
 0x49b   :  { %v10871_v3 = vpop.f32.mrf.mxu0  ;;  %v7181_v54 = vadd.f32 %v16314_v40, %v16313_v48  ;;  %v7530_v17 = vadd.f32 %v16315_v15, %v7170_v30  ;;  %v16325_v61 = vld [vmem:[#allocation20_spill] sm:$0xff]  ;;  %v16328_v47 = vld [vmem:[#allocation25_spill] sm:$0xff] }
 0x49c   :  { %8874 = vst [vmem:[%s15738_s7 + $0x68] sm:$0xff] %v8842_v8  ;;  %v8847_v62 = vmax.f32 %v8815_v60, 0.0  ;;  %v8813_v10 = vadd.f32 %v15484_v52, %v8774_v39  ;;  %v8777_v14 = vadd.f32 %v10871_v3, %v8279_v32  ;;  %v16317_v8 = vld [vmem:[#allocation45_spill] sm:$0xff]  ;;  %v8286_v39 = vadd.f32 %v10830_v20, %v7532_v53  ;;  %v16320_v3 = vld [vmem:[#allocation46_spill] sm:$0xff]  ;;  %v16329_v53 = vld [vmem:[#allocation27_spill] sm:$0xff] }
 0x49d   :  { %v8698_v11 = vpop.f32.mrf.mxu0  ;;  %v7173_v42 = vadd.f32 %v16317_v8, %v16316_v57  ;;  %v16318_v32 = vld [vmem:[#allocation53_spill] sm:$0xff] }
 0x49e   :  { %8879 = vst [vmem:[%s15738_s7 + $0x90] sm:$0xff] %v8847_v62  ;;  %v8845_v55 = vmax.f32 %v8813_v10, 0.0  ;;  %v8816_v29 = vadd.f32 %v15484_v52, %v8777_v14  ;;  %v8775_v1 = vadd.f32 %v8698_v11, %v8277_v9  ;;  %v7533_v58 = vadd.f32 %v16318_v32, %v7181_v54  ;;  %v10834_v10 = vpop.f32.mrf.mxu1  ;;  %v16321_v9 = vld [vmem:[#allocation54_spill] sm:$0xff]  ;;  %v16322_v11 = vld [vmem:[#allocation28_spill] sm:$0xff] }
 0x49f   :  { %v10874_v5 = vpop.f32.mrf.mxu0  ;;  %v7194_v62 = vadd.f32 %v16320_v3, %v16319_v46  ;;  %v8284_v14 = vadd.f32 %v8229_v37, %v7530_v17  ;;  %v7531_v21 = vadd.f32 %v16321_v9, %v7173_v42 }
 0x4a0   :  { %8877 = vst [vmem:[%s15738_s7 + $0x80] sm:$0xff] %v8845_v55  ;;  %v8848_v12 = vmax.f32 %v8816_v29, 0.0  ;;  %v8814_v43 = vadd.f32 %v15484_v52, %v8775_v1  ;;  %v8780_v33 = vadd.f32 %v10874_v5, %v8282_v41  ;;  %v16323_v41 = vld [vmem:[#allocation47_spill] sm:$0xff]  ;;  %v8287_v51 = vadd.f32 %v10831_v27, %v7533_v58  ;;  %v8245_v18 = vpop.f32.mrf.mxu1 }
 0x4a1   :  { %v8711_v45 = vpop.f32.mrf.mxu0  ;;  %v7186_v36 = vadd.f32 %v16323_v41, %v16322_v11  ;;  %v7536_v55 = vadd.f32 %v16324_v13, %v7194_v62  ;;  %v16326_v5 = vld [vmem:[#allocation39_spill] sm:$0xff]  ;;  %v8285_v30 = vadd.f32 %v8232_v44, %v7531_v21 }
 0x4a2   :  { %8880 = vst [vmem:[%s15738_s7 + $0x98] sm:$0xff] %v8848_v12  ;;  %v8846_v63 = vmax.f32 %v8814_v43, 0.0  ;;  %v8819_v22 = vadd.f32 %v15484_v52, %v8780_v33  ;;  %v8778_v31 = vadd.f32 %v8711_v45, %v8280_v26  ;;  %v7197_v26 = vadd.f32 %v16326_v5, %v16325_v61  ;;  %v10835_v40 = vpop.f32.mrf.mxu1 }
 0x4a3   :  { %v10875_v16 = vpop.f32.mrf.mxu0  ;;  %v7534_v12 = vadd.f32 %v16327_v49, %v7186_v36  ;;  %v7189_v45 = vadd.f32 %v16329_v53, %v16328_v47 }
 0x4a4   :  { %8878 = vst [vmem:[%s15738_s7 + $0x88] sm:$0xff] %v8846_v63  ;;  %v8851_v7 = vmax.f32 %v8819_v22, 0.0  ;;  %v8817_v56 = vadd.f32 %v15484_v52, %v8778_v31  ;;  %v8781_v6 = vadd.f32 %v10875_v16, %v8283_v19  ;;  %v8290_v63 = vadd.f32 %v10834_v10, %v7536_v55  ;;  %v8248_v8 = vpop.f32.mrf.mxu1 }
 0x4a5   :  { %v8714_v60 = vpop.f32.mrf.mxu0  ;;  %v7537_v22 = vadd.f32 %v15469_v25, %v7197_v26  ;;  %v8288_v15 = vadd.f32 %v8245_v18, %v7534_v12  ;;  %v7535_v17 = vadd.f32 %v15473_v23, %v7189_v45 }
 0x4a6   :  { %8883 = vst [vmem:[%s15738_s7 + $0xb0] sm:$0xff] %v8851_v7  ;;  %v8849_v4 = vmax.f32 %v8817_v56, 0.0  ;;  %v8820_v50 = vadd.f32 %v15484_v52, %v8781_v6  ;;  %v8779_v28 = vadd.f32 %v8714_v60, %v8281_v59 }
 0x4a7   :  { %v10878_v0 = vpop.f32.mrf.mxu0  ;;  %v8291_v57 = vadd.f32 %v10835_v40, %v7537_v22  ;;  %v8289_v32 = vadd.f32 %v8248_v8, %v7535_v17 }
 0x4a8   :  { %8881 = vst [vmem:[%s15738_s7 + $0xa0] sm:$0xff] %v8849_v4  ;;  %v8852_v20 = vmax.f32 %v8820_v50, 0.0  ;;  %v8818_v34 = vadd.f32 %v15484_v52, %v8779_v28  ;;  %v8784_v35 = vadd.f32 %v10878_v0, %v8286_v39 }
 0x4a9   :  { %v8727_v29 = vpop.f32.mrf.mxu0 }
 0x4aa   :  { %8884 = vst [vmem:[%s15738_s7 + $0xb8] sm:$0xff] %v8852_v20  ;;  %v8850_v37 = vmax.f32 %v8818_v34, 0.0  ;;  %v8823_v1 = vadd.f32 %v15484_v52, %v8784_v35  ;;  %v8782_v38 = vadd.f32 %v8727_v29, %v8284_v14 }
 0x4ab   :  { %v10879_v43 = vpop.f32.mrf.mxu0 }
 0x4ac   :  { %8882 = vst [vmem:[%s15738_s7 + $0xa8] sm:$0xff] %v8850_v37  ;;  %v8855_v33 = vmax.f32 %v8823_v1, 0.0  ;;  %v8821_v24 = vadd.f32 %v15484_v52, %v8782_v38  ;;  %v8785_v2 = vadd.f32 %v10879_v43, %v8287_v51 }
 0x4ad   :  { %v8730_v27 = vpop.f32.mrf.mxu0 }
 0x4ae   :  { %8887 = vst [vmem:[%s15738_s7 + $0xd0] sm:$0xff] %v8855_v33  ;;  %v8853_v31 = vmax.f32 %v8821_v24, 0.0  ;;  %v8824_v19 = vadd.f32 %v15484_v52, %v8785_v2  ;;  %v8783_v48 = vadd.f32 %v8730_v27, %v8285_v30 }
 0x4af   :  { %v10882_v54 = vpop.f32.mrf.mxu0 }
 0x4b0   :  { %8885 = vst [vmem:[%s15738_s7 + $0xc0] sm:$0xff] %v8853_v31  ;;  %v8856_v44 = vmax.f32 %v8824_v19, 0.0  ;;  %v8822_v25 = vadd.f32 %v15484_v52, %v8783_v48  ;;  %v8788_v16 = vadd.f32 %v10882_v54, %v8290_v63 }
 0x4b1   :  { %v8743_v7 = vpop.f32.mrf.mxu0 }
 0x4b2   :  { %8888 = vst [vmem:[%s15738_s7 + $0xd8] sm:$0xff] %v8856_v44  ;;  %v8854_v56 = vmax.f32 %v8822_v25, 0.0  ;;  %v8827_v6 = vadd.f32 %v15484_v52, %v8788_v16  ;;  %v8786_v59 = vadd.f32 %v8743_v7, %v8288_v15 }
 0x4b3   :  { %v10883_v23 = vpop.f32.mrf.mxu0 }
 0x4b4   :  { %8886 = vst [vmem:[%s15738_s7 + $0xc8] sm:$0xff] %v8854_v56  ;;  %v8859_v42 = vmax.f32 %v8827_v6, 0.0  ;;  %v8825_v60 = vadd.f32 %v15484_v52, %v8786_v59  ;;  %v8789_v39 = vadd.f32 %v10883_v23, %v8291_v57 }
 0x4b5   :  { %v8746_v58 = vpop.f32.mrf.mxu0 }
 0x4b6   :  { %8891 = vst [vmem:[%s15738_s7 + $0xf0] sm:$0xff] %v8859_v42  ;;  %v8857_v4 = vmax.f32 %v8825_v60, 0.0  ;;  %v8828_v50 = vadd.f32 %v15484_v52, %v8789_v39  ;;  %v8787_v28 = vadd.f32 %v8746_v58, %v8289_v32 }
 0x4b8   :  { %8889 = vst [vmem:[%s15738_s7 + $0xe0] sm:$0xff] %v8857_v4  ;;  %v8860_v46 = vmax.f32 %v8828_v50, 0.0  ;;  %v8826_v3 = vadd.f32 %v15484_v52, %v8787_v28 }
 0x4ba   :  { %8892 = vst [vmem:[%s15738_s7 + $0xf8] sm:$0xff] %v8860_v46  ;;  %v8858_v62 = vmax.f32 %v8826_v3, 0.0 }
 0x4bc   :  { %8890 = vst [vmem:[%s15738_s7 + $0xe8] sm:$0xff] %v8858_v62 }

// kernel: tempcnn_forward.3
= control target key start
LH: loop header
LB: loop body
LE: loop exit
PB: predicated region body
PF: predicated region fallthrough
CT: control target
= control target key end

     0   :  { %vm5672_vm0 = vmmov 0   ;;  %s7395_s1 = inlined_call_operand.vmem [shape: bf16[1024,768], index: 1, kind: input, shape index: {}]   ;;  %s7396_s0 = inlined_call_operand.vmem [shape: bf16[16,1024], index: 0, kind: input, shape index: {}]   ;;  %s7397_s3 = inlined_call_operand.vmem [shape: bf16[768,128], index: 3, kind: input, shape index: {}]   ;;  %s7398_s2 = inlined_call_operand.vmem [shape: f32[1,768], index: 2, kind: input, shape index: {}]   ;;  %s7399_s5 = inlined_call_operand.vmem [shape: bf16[1024,128], index: 5, kind: input, shape index: {}]   ;;  %s7400_s7 = inlined_call_operand.vmem [shape: bf16[128,128], index: 7, kind: input, shape index: {}]   ;;  %s7401_s4 = inlined_call_operand.vmem [shape: f32[1,128], index: 4, kind: input, shape index: {}]   ;;  %s7402_s9 = inlined_call_operand.vmem [shape: f32[16,128], index: 9, kind: output, shape index: {0}]   ;;  %s7403_s6 = inlined_call_operand.vmem [shape: f32[1,128], index: 6, kind: input, shape index: {}]   ;;  %s7404_s8 = inlined_call_operand.vmem [shape: f32[1,128], index: 8, kind: input, shape index: {}]   ;;  %s7405_s10 = inlined_call_operand.vmem [shape: f32[16,128], index: 10, kind: output, shape index: {1}]  }
   0x1   :  { %v4975_v0 = vld [vmem:[%s7395_s1 + $0x154] ss:$24 sps:$4 sm:$0xff]   ;;  %v4979_v2 = vld [vmem:[%s7395_s1 + $0x150] ss:$24 sps:$4 sm:$0xff]   ;;  %v4981_v4 = vld [vmem:[%s7395_s1 + $0x124] ss:$24 sps:$4 sm:$0xff]  }
   0x2   :  { %v4977_v1 = vld [vmem:[%s7395_s1 + $0x454] ss:$24 sps:$4 sm:$0xff]   ;;  %2419 = vmatprep.subr.bf16.mxu0 %v4975_v0  ;;  %v4980_v3 = vld [vmem:[%s7395_s1 + $0x450] ss:$24 sps:$4 sm:$0xff]   ;;  %v4983_v5 = vld [vmem:[%s7395_s1 + $0x424] ss:$24 sps:$4 sm:$0xff]  }
   0x3   :  { %2462 = vmatprep.subr.bf16.mxu1 %v4977_v1  ;;  %2420 = vmatpush1.bf16.msra.mxu0 %v4979_v2  ;;  %v4985_v6 = vld [vmem:[%s7395_s1 + $0x120] ss:$24 sps:$4 sm:$0xff]   ;;  %v4987_v8 = vld [vmem:[%s7395_s1 + $0xf4] ss:$24 sps:$4 sm:$0xff]   ;;  %v4991_v10 = vld [vmem:[%s7395_s1 + $0xf0] ss:$24 sps:$4 sm:$0xff]  }
   0x4   :  { %2463 = vmatpush1.bf16.msra.mxu1 %v4980_v3  ;;  %2421 = vmatprep.subr.bf16.mxu0 %v4981_v4  ;;  %v4986_v7 = vld [vmem:[%s7395_s1 + $0x420] ss:$24 sps:$4 sm:$0xff]   ;;  %v4989_v9 = vld [vmem:[%s7395_s1 + $0x3f4] ss:$24 sps:$4 sm:$0xff]   ;;  %v4992_v11 = vld [vmem:[%s7395_s1 + $0x3f0] ss:$24 sps:$4 sm:$0xff]  }
   0x5   :  { %2464 = vmatprep.subr.bf16.mxu1 %v4983_v5  ;;  %v4993_v12 = vld [vmem:[%s7395_s1 + $0xc4] ss:$24 sps:$4 sm:$0xff]   ;;  %v4997_v14 = vld [vmem:[%s7395_s1 + $0xc0] ss:$24 sps:$4 sm:$0xff]   ;;  %v4999_v16 = vld [vmem:[%s7395_s1 + $0x94] ss:$24 sps:$4 sm:$0xff]  }
   0x6   :  { %v4995_v13 = vld [vmem:[%s7395_s1 + $0x3c4] ss:$24 sps:$4 sm:$0xff]   ;;  %v4998_v15 = vld [vmem:[%s7395_s1 + $0x3c0] ss:$24 sps:$4 sm:$0xff]   ;;  %v5001_v17 = vld [vmem:[%s7395_s1 + $0x394] ss:$24 sps:$4 sm:$0xff]  }
   0x7   :  { %2422 = vmatpush1.bf16.msra.mxu0 %v4985_v6  ;;  %v5003_v18 = vld [vmem:[%s7395_s1 + $0x90] ss:$24 sps:$4 sm:$0xff]   ;;  %v5005_v20 = vld [vmem:[%s7395_s1 + $0x64] ss:$24 sps:$4 sm:$0xff]   ;;  %v5009_v22 = vld [vmem:[%s7395_s1 + $0x60] ss:$24 sps:$4 sm:$0xff]  }
   0x8   :  { %2465 = vmatpush1.bf16.msra.mxu1 %v4986_v7  ;;  %2423 = vmatprep.subr.bf16.mxu0 %v4987_v8  ;;  %v5004_v19 = vld [vmem:[%s7395_s1 + $0x390] ss:$24 sps:$4 sm:$0xff]   ;;  %v5007_v21 = vld [vmem:[%s7395_s1 + $0x364] ss:$24 sps:$4 sm:$0xff]   ;;  %v5010_v23 = vld [vmem:[%s7395_s1 + $0x360] ss:$24 sps:$4 sm:$0xff]  }
   0x9   :  { %2466 = vmatprep.subr.bf16.mxu1 %v4989_v9  ;;  %v5011_v24 = vld [vmem:[%s7395_s1 + $0x34] ss:$24 sps:$4 sm:$0xff]   ;;  %v5015_v26 = vld [vmem:[%s7395_s1 + $0x30] ss:$24 sps:$4 sm:$0xff]   ;;  %v5017_v28 = vld [vmem:[%s7395_s1 + $0x4] ss:$24 sps:$4 sm:$0xff]  }
   0xa   :  { %v5013_v25 = vld [vmem:[%s7395_s1 + $0x334] ss:$24 sps:$4 sm:$0xff]   ;;  %v5016_v27 = vld [vmem:[%s7395_s1 + $0x330] ss:$24 sps:$4 sm:$0xff]   ;;  %v5019_v29 = vld [vmem:[%s7395_s1 + $0x304] ss:$24 sps:$4 sm:$0xff]  }
   0xb   :  { %2424 = vmatpush1.bf16.msra.mxu0 %v4991_v10  ;;  %v5021_v30 = vld [vmem:[%s7395_s1] ss:$24 sps:$4 sm:$0xff]   ;;  %v5023_v32 = vld [vmem:[%s7395_s1 + $0x2d4] ss:$24 sps:$4 sm:$0xff]   ;;  %v5027_v34 = vld [vmem:[%s7395_s1 + $0x2d0] ss:$24 sps:$4 sm:$0xff]  }
   0xc   :  { %2467 = vmatpush1.bf16.msra.mxu1 %v4992_v11  ;;  %2425 = vmatprep.subr.bf16.mxu0 %v4993_v12  ;;  %v5022_v31 = vld [vmem:[%s7395_s1 + $0x300] ss:$24 sps:$4 sm:$0xff]   ;;  %v5025_v33 = vld [vmem:[%s7395_s1 + $0x5d4] ss:$24 sps:$4 sm:$0xff]   ;;  %v5028_v35 = vld [vmem:[%s7395_s1 + $0x5d0] ss:$24 sps:$4 sm:$0xff]  }
   0xd   :  { %2468 = vmatprep.subr.bf16.mxu1 %v4995_v13  ;;  %v5029_v36 = vld [vmem:[%s7395_s1 + $0x2a4] ss:$24 sps:$4 sm:$0xff]   ;;  %v5033_v38 = vld [vmem:[%s7395_s1 + $0x2a0] ss:$24 sps:$4 sm:$0xff]   ;;  %v5035_v40 = vld [vmem:[%s7395_s1 + $0x274] ss:$24 sps:$4 sm:$0xff]  }
   0xe   :  { %v5031_v37 = vld [vmem:[%s7395_s1 + $0x5a4] ss:$24 sps:$4 sm:$0xff]   ;;  %v5034_v39 = vld [vmem:[%s7395_s1 + $0x5a0] ss:$24 sps:$4 sm:$0xff]   ;;  %v5037_v41 = vld [vmem:[%s7395_s1 + $0x574] ss:$24 sps:$4 sm:$0xff]  }
   0xf   :  { %2426 = vmatpush1.bf16.msra.mxu0 %v4997_v14  ;;  %v5039_v42 = vld [vmem:[%s7395_s1 + $0x270] ss:$24 sps:$4 sm:$0xff]   ;;  %v5041_v44 = vld [vmem:[%s7395_s1 + $0x244] ss:$24 sps:$4 sm:$0xff]   ;;  %v5045_v46 = vld [vmem:[%s7395_s1 + $0x240] ss:$24 sps:$4 sm:$0xff]  }
  0x10   :  { %2469 = vmatpush1.bf16.msra.mxu1 %v4998_v15  ;;  %2427 = vmatprep.subr.bf16.mxu0 %v4999_v16  ;;  %v5040_v43 = vld [vmem:[%s7395_s1 + $0x570] ss:$24 sps:$4 sm:$0xff]   ;;  %v5043_v45 = vld [vmem:[%s7395_s1 + $0x544] ss:$24 sps:$4 sm:$0xff]   ;;  %v5046_v47 = vld [vmem:[%s7395_s1 + $0x540] ss:$24 sps:$4 sm:$0xff]  }
  0x11   :  { %2470 = vmatprep.subr.bf16.mxu1 %v5001_v17  ;;  %v35_v48 = vld [vmem:[%s7396_s0] sm:$0xff]  ;;  %v36_v50 = vld [vmem:[%s7396_s0 + $0x8] sm:$0xff] }
  0x12   :  { %v39_v49 = vld [vmem:[%s7396_s0 + $0x20] sm:$0xff]  ;;  %v40_v51 = vld [vmem:[%s7396_s0 + $0x28] sm:$0xff] }
  0x13   :  { %2428 = vmatpush1.bf16.msra.mxu0 %v5003_v18  ;;  %v5047_v52 = vld [vmem:[%s7395_s1 + $0x214] ss:$24 sps:$4 sm:$0xff]   ;;  %v5887_v53 = vcombine.high %v35_v48, %v39_v49  ;;  %v5889_v54 = vcombine.high %v36_v50, %v40_v51  ;;  %v5051_v56 = vld [vmem:[%s7395_s1 + $0x210] ss:$24 sps:$4 sm:$0xff]   ;;  %v5053_v58 = vld [vmem:[%s7395_s1 + $0x1e4] ss:$24 sps:$4 sm:$0xff]   ;;  %v5944_v8 = vcombine.low %v35_v48, %v39_v49  ;;  %v5946_v9 = vcombine.low %v36_v50, %v40_v51 }
  0x14   :  { %2471 = vmatpush1.bf16.msra.mxu1 %v5004_v19  ;;  %2429 = vmatprep.subr.bf16.mxu0 %v5005_v20  ;;  %v5049_v55 = vld [vmem:[%s7395_s1 + $0x514] ss:$24 sps:$4 sm:$0xff]   ;;  %v5052_v57 = vld [vmem:[%s7395_s1 + $0x510] ss:$24 sps:$4 sm:$0xff]   ;;  %v5055_v59 = vld [vmem:[%s7395_s1 + $0x4e4] ss:$24 sps:$4 sm:$0xff]  }
  0x15   :  { %2472 = vmatprep.subr.bf16.mxu1 %v5007_v21  ;;  %2451 = vmatprep.mubr.bf16.mxu0 %v5887_v53  ;;  %v5057_v60 = vld [vmem:[%s7395_s1 + $0x1e0] ss:$24 sps:$4 sm:$0xff]   ;;  %v5059_v62 = vld [vmem:[%s7395_s1 + $0x1b4] ss:$24 sps:$4 sm:$0xff]   ;;  %v5063_v0 = vld [vmem:[%s7395_s1 + $0x1b0] ss:$24 sps:$4 sm:$0xff]  }
  0x16   :  { %2494 = vmatprep.mubr.bf16.mxu1 %v5889_v54  ;;  %v5058_v61 = vld [vmem:[%s7395_s1 + $0x4e0] ss:$24 sps:$4 sm:$0xff]   ;;  %v5061_v63 = vld [vmem:[%s7395_s1 + $0x4b4] ss:$24 sps:$4 sm:$0xff]   ;;  %v5064_v1 = vld [vmem:[%s7395_s1 + $0x4b0] ss:$24 sps:$4 sm:$0xff]  }
  0x17   :  { %2430 = vmatpush1.bf16.msra.mxu0 %v5009_v22  ;;  %v5065_v2 = vld [vmem:[%s7395_s1 + $0x184] ss:$24 sps:$4 sm:$0xff]   ;;  %v5069_v4 = vld [vmem:[%s7395_s1 + $0x180] ss:$24 sps:$4 sm:$0xff]   ;;  %v5073_v6 = vld [vmem:[%s7395_s1 + $0x754] ss:$24 sps:$4 sm:$0xff]  }
  0x18   :  { %2473 = vmatpush1.bf16.msra.mxu1 %v5010_v23  ;;  %2431 = vmatprep.subr.bf16.mxu0 %v5011_v24  ;;  %v5067_v3 = vld [vmem:[%s7395_s1 + $0x484] ss:$24 sps:$4 sm:$0xff]   ;;  %v5070_v5 = vld [vmem:[%s7395_s1 + $0x480] ss:$24 sps:$4 sm:$0xff]   ;;  %v5076_v7 = vld [vmem:[%s7395_s1 + $0xa54] ss:$24 sps:$4 sm:$0xff]  }
  0x19   :  { %2474 = vmatprep.subr.bf16.mxu1 %v5013_v25  ;;  %v5071_v10 = vld [vmem:[%s7395_s1 + $0x750] ss:$24 sps:$4 sm:$0xff]   ;;  %v5079_v12 = vld [vmem:[%s7395_s1 + $0x724] ss:$24 sps:$4 sm:$0xff]   ;;  %v5077_v14 = vld [vmem:[%s7395_s1 + $0x720] ss:$24 sps:$4 sm:$0xff]  }
  0x1a   :  { %v5074_v11 = vld [vmem:[%s7395_s1 + $0xa50] ss:$24 sps:$4 sm:$0xff]   ;;  %v5082_v13 = vld [vmem:[%s7395_s1 + $0xa24] ss:$24 sps:$4 sm:$0xff]   ;;  %v5080_v15 = vld [vmem:[%s7395_s1 + $0xa20] ss:$24 sps:$4 sm:$0xff]  }
  0x1b   :  { %2432 = vmatpush1.bf16.msra.mxu0 %v5015_v26  ;;  %v5085_v16 = vld [vmem:[%s7395_s1 + $0x6f4] ss:$24 sps:$4 sm:$0xff]   ;;  %v5083_v18 = vld [vmem:[%s7395_s1 + $0x6f0] ss:$24 sps:$4 sm:$0xff]   ;;  %v5091_v20 = vld [vmem:[%s7395_s1 + $0x6c4] ss:$24 sps:$4 sm:$0xff]  }
  0x1c   :  { %2475 = vmatpush1.bf16.msra.mxu1 %v5016_v27  ;;  %2433 = vmatprep.subr.bf16.mxu0 %v5017_v28  ;;  %v5088_v17 = vld [vmem:[%s7395_s1 + $0x9f4] ss:$24 sps:$4 sm:$0xff]   ;;  %v5086_v19 = vld [vmem:[%s7395_s1 + $0x9f0] ss:$24 sps:$4 sm:$0xff]   ;;  %v5094_v21 = vld [vmem:[%s7395_s1 + $0x9c4] ss:$24 sps:$4 sm:$0xff]  }
  0x1d   :  { %2476 = vmatprep.subr.bf16.mxu1 %v5019_v29  ;;  %v5089_v22 = vld [vmem:[%s7395_s1 + $0x6c0] ss:$24 sps:$4 sm:$0xff]   ;;  %v5097_v24 = vld [vmem:[%s7395_s1 + $0x694] ss:$24 sps:$4 sm:$0xff]   ;;  %v5095_v26 = vld [vmem:[%s7395_s1 + $0x690] ss:$24 sps:$4 sm:$0xff]  }
  0x1e   :  { %v5092_v23 = vld [vmem:[%s7395_s1 + $0x9c0] ss:$24 sps:$4 sm:$0xff]   ;;  %v5100_v25 = vld [vmem:[%s7395_s1 + $0x994] ss:$24 sps:$4 sm:$0xff]   ;;  %v5098_v27 = vld [vmem:[%s7395_s1 + $0x990] ss:$24 sps:$4 sm:$0xff]  }
  0x1f   :  { %2434 = vmatpush1.bf16.msra.mxu0 %v5021_v30  ;;  %v5103_v28 = vld [vmem:[%s7395_s1 + $0x664] ss:$24 sps:$4 sm:$0xff]   ;;  %v5101_v30 = vld [vmem:[%s7395_s1 + $0x660] ss:$24 sps:$4 sm:$0xff]   ;;  %v5119_v48 = vld [vmem:[%s7395_s1 + $0x8d0] ss:$24 sps:$4 sm:$0xff]  }
  0x20   :  { %2477 = vmatpush1.bf16.msra.mxu1 %v5022_v31  ;;  %2435 = vmatprep.subr.bf16.mxu0 %v5023_v32  ;;  %v5106_v29 = vld [vmem:[%s7395_s1 + $0x964] ss:$24 sps:$4 sm:$0xff]   ;;  %v5104_v31 = vld [vmem:[%s7395_s1 + $0x960] ss:$24 sps:$4 sm:$0xff]   ;;  %v5109_v32 = vld [vmem:[%s7395_s1 + $0x634] ss:$24 sps:$4 sm:$0xff]  }
  0x21   :  { %2478 = vmatprep.subr.bf16.mxu1 %v5025_v33  ;;  %v5112_v33 = vld [vmem:[%s7395_s1 + $0x934] ss:$24 sps:$4 sm:$0xff]   ;;  %v5122_v49 = vld [vmem:[%s7395_s1 + $0xbd0] ss:$24 sps:$4 sm:$0xff]   ;;  %v5127_v50 = vld [vmem:[%s7395_s1 + $0x8a4] ss:$24 sps:$4 sm:$0xff]  }
  0x22   :  { %v5130_v51 = vld [vmem:[%s7395_s1 + $0xba4] ss:$24 sps:$4 sm:$0xff]  }
  0x23   :  { %2436 = vmatpush2.bf16.msra.mxu0 %v5027_v34  ;;  %v5107_v34 = vld [vmem:[%s7395_s1 + $0x630] ss:$24 sps:$4 sm:$0xff]  }
  0x24   :  { %2479 = vmatpush2.bf16.msra.mxu1 %v5028_v35  ;;  %2437 = vmatprep.subr.bf16.mxu0 %v5029_v36  ;;  %v5110_v35 = vld [vmem:[%s7395_s1 + $0x930] ss:$24 sps:$4 sm:$0xff]  }
  0x25   :  { %2480 = vmatprep.subr.bf16.mxu1 %v5031_v37  ;;  %v6031_v36 = vld [vmem:[%s7396_s0 + $0x10] sm:$0xff] }
  0x26   :  { %v6036_v37 = vld [vmem:[%s7396_s0 + $0x30] sm:$0xff] }
  0x27   :  { %2438 = vmatpush2.bf16.msra.mxu0 %v5033_v38  ;;  %v6041_v38 = vld [vmem:[%s7396_s0 + $0x18] sm:$0xff] }
  0x28   :  { %2481 = vmatpush2.bf16.msra.mxu1 %v5034_v39  ;;  %2439 = vmatprep.subr.bf16.mxu0 %v5035_v40  ;;  %v6046_v39 = vld [vmem:[%s7396_s0 + $0x38] sm:$0xff] }
  0x29   :  { %2482 = vmatprep.subr.bf16.mxu1 %v5037_v41  ;;  %v5115_v40 = vld [vmem:[%s7395_s1 + $0x604] ss:$24 sps:$4 sm:$0xff]   ;;  %v6053_v41 = vcombine.high %v6031_v36, %v6036_v37 }
  0x2b   :  { %2440 = vmatpush2.bf16.msra.mxu0 %v5039_v42  ;;  %v6057_v42 = vcombine.high %v6041_v38, %v6046_v39 }
  0x2c   :  { %2483 = vmatpush2.bf16.msra.mxu1 %v5040_v43  ;;  %2441 = vmatprep.subr.bf16.mxu0 %v5041_v44  ;;  %v5118_v43 = vld [vmem:[%s7395_s1 + $0x904] ss:$24 sps:$4 sm:$0xff]   ;;  %v5113_v44 = vld [vmem:[%s7395_s1 + $0x600] ss:$24 sps:$4 sm:$0xff]  }
  0x2d   :  { %2484 = vmatprep.subr.bf16.mxu1 %v5043_v45  ;;  %v5116_v45 = vld [vmem:[%s7395_s1 + $0x900] ss:$24 sps:$4 sm:$0xff]  }
  0x2f   :  { %2442 = vmatpush2.bf16.msra.mxu0 %v5045_v46  ;;  %v5121_v46 = vld [vmem:[%s7395_s1 + $0x8d4] ss:$24 sps:$4 sm:$0xff]  }
  0x30   :  { %2485 = vmatpush2.bf16.msra.mxu1 %v5046_v47  ;;  %2443 = vmatprep.subr.bf16.mxu0 %v5047_v52  ;;  %v5124_v47 = vld [vmem:[%s7395_s1 + $0xbd4] ss:$24 sps:$4 sm:$0xff]   ;;  %v5125_v52 = vld [vmem:[%s7395_s1 + $0x8a0] ss:$24 sps:$4 sm:$0xff]  }
  0x31   :  { %2486 = vmatprep.subr.bf16.mxu1 %v5049_v55  ;;  %v5128_v55 = vld [vmem:[%s7395_s1 + $0xba0] ss:$24 sps:$4 sm:$0xff]  }
  0x33   :  { %2444 = vmatpush2.bf16.msra.mxu0 %v5051_v56  ;;  %v5133_v56 = vld [vmem:[%s7395_s1 + $0x874] ss:$24 sps:$4 sm:$0xff]  }
  0x34   :  { %2487 = vmatpush2.bf16.msra.mxu1 %v5052_v57  ;;  %2445 = vmatprep.subr.bf16.mxu0 %v5053_v58  ;;  %v5136_v57 = vld [vmem:[%s7395_s1 + $0xb74] ss:$24 sps:$4 sm:$0xff]   ;;  %v5131_v58 = vld [vmem:[%s7395_s1 + $0x870] ss:$24 sps:$4 sm:$0xff]  }
  0x35   :  { %2488 = vmatprep.subr.bf16.mxu1 %v5055_v59  ;;  %v5134_v59 = vld [vmem:[%s7395_s1 + $0xb70] ss:$24 sps:$4 sm:$0xff]  }
  0x37   :  { %2446 = vmatpush2.bf16.msra.mxu0 %v5057_v60  ;;  %v5139_v60 = vld [vmem:[%s7395_s1 + $0x844] ss:$24 sps:$4 sm:$0xff]  }
  0x38   :  { %2489 = vmatpush2.bf16.msra.mxu1 %v5058_v61  ;;  %2447 = vmatprep.subr.bf16.mxu0 %v5059_v62  ;;  %v5142_v61 = vld [vmem:[%s7395_s1 + $0xb44] ss:$24 sps:$4 sm:$0xff]   ;;  %v5137_v62 = vld [vmem:[%s7395_s1 + $0x840] ss:$24 sps:$4 sm:$0xff]  }
  0x39   :  { %2490 = vmatprep.subr.bf16.mxu1 %v5061_v63  ;;  %v5140_v63 = vld [vmem:[%s7395_s1 + $0xb40] ss:$24 sps:$4 sm:$0xff]  }
  0x3b   :  { %2448 = vmatpush2.bf16.msra.mxu0 %v5063_v0  ;;  %v5145_v0 = vld [vmem:[%s7395_s1 + $0x814] ss:$24 sps:$4 sm:$0xff]  }
  0x3c   :  { %2491 = vmatpush2.bf16.msra.mxu1 %v5064_v1  ;;  %2449 = vmatprep.subr.bf16.mxu0 %v5065_v2  ;;  %v5148_v1 = vld [vmem:[%s7395_s1 + $0xb14] ss:$24 sps:$4 sm:$0xff]   ;;  %v5143_v2 = vld [vmem:[%s7395_s1 + $0x810] ss:$24 sps:$4 sm:$0xff]  }
  0x3d   :  { %2492 = vmatprep.subr.bf16.mxu1 %v5067_v3  ;;  %v5146_v3 = vld [vmem:[%s7395_s1 + $0xb10] ss:$24 sps:$4 sm:$0xff]  }
  0x3f   :  { %2450 = vmatpush2.bf16.msra.mxu0 %v5069_v4  ;;  %v5151_v4 = vld [vmem:[%s7395_s1 + $0x7e4] ss:$24 sps:$4 sm:$0xff]  }
  0x40   :  { %2493 = vmatpush2.bf16.msra.mxu1 %v5070_v5  ;;  %2505 = vmatprep.subr.bf16.mxu0 %v5073_v6  ;;  %v5154_v5 = vld [vmem:[%s7395_s1 + $0xae4] ss:$24 sps:$4 sm:$0xff]   ;;  %v5149_v6 = vld [vmem:[%s7395_s1 + $0x7e0] ss:$24 sps:$4 sm:$0xff]  }
  0x41   :  { %2548 = vmatprep.subr.bf16.mxu1 %v5076_v7  ;;  %v5152_v7 = vld [vmem:[%s7395_s1 + $0xae0] ss:$24 sps:$4 sm:$0xff]  }
  0x42   :  { %2452 = vmatmul.mubr.bf16.vlgmr.msra.gmra.mxu0 %v5944_v8 }
  0x43   :  { %2495 = vmatmul.mubr.bf16.vlgmr.msra.gmra.mxu1 %v5946_v9  ;;  %2506 = vmatpush1.bf16.msra.mxu0 %v5071_v10  ;;  %v5157_v10 = vld [vmem:[%s7395_s1 + $0x7b4] ss:$24 sps:$4 sm:$0xff]  }
  0x44   :  { %2549 = vmatpush1.bf16.msra.mxu1 %v5074_v11  ;;  %2507 = vmatprep.subr.bf16.mxu0 %v5079_v12  ;;  %v5160_v11 = vld [vmem:[%s7395_s1 + $0xab4] ss:$24 sps:$4 sm:$0xff]   ;;  %v5155_v12 = vld [vmem:[%s7395_s1 + $0x7b0] ss:$24 sps:$4 sm:$0xff]  }
  0x45   :  { %2550 = vmatprep.subr.bf16.mxu1 %v5082_v13  ;;  %2537 = vmatprep.mubr.bf16.mxu0 %v6053_v41  ;;  %v5158_v13 = vld [vmem:[%s7395_s1 + $0xab0] ss:$24 sps:$4 sm:$0xff]  }
  0x46   :  { %2580 = vmatprep.mubr.bf16.mxu1 %v6057_v42 }
  0x47   :  { %2508 = vmatpush1.bf16.msra.mxu0 %v5077_v14  ;;  %v5163_v14 = vld [vmem:[%s7395_s1 + $0x784] ss:$24 sps:$4 sm:$0xff]  }
  0x48   :  { %2551 = vmatpush1.bf16.msra.mxu1 %v5080_v15  ;;  %2509 = vmatprep.subr.bf16.mxu0 %v5085_v16  ;;  %v5166_v15 = vld [vmem:[%s7395_s1 + $0xa84] ss:$24 sps:$4 sm:$0xff]   ;;  %v5161_v16 = vld [vmem:[%s7395_s1 + $0x780] ss:$24 sps:$4 sm:$0xff]  }
  0x49   :  { %2552 = vmatprep.subr.bf16.mxu1 %v5088_v17  ;;  %v5164_v17 = vld [vmem:[%s7395_s1 + $0xa80] ss:$24 sps:$4 sm:$0xff]  }
  0x4b   :  { %2510 = vmatpush1.bf16.msra.mxu0 %v5083_v18  ;;  %v5169_v18 = vld [vmem:[%s7395_s1 + $0x15c] ss:$24 sps:$4 sm:$0xff]  }
  0x4c   :  { %2553 = vmatpush1.bf16.msra.mxu1 %v5086_v19  ;;  %2511 = vmatprep.subr.bf16.mxu0 %v5091_v20  ;;  %v5172_v19 = vld [vmem:[%s7395_s1 + $0x45c] ss:$24 sps:$4 sm:$0xff]   ;;  %v6174_v20 = vcombine.low %v6031_v36, %v6036_v37 }
  0x4d   :  { %2554 = vmatprep.subr.bf16.mxu1 %v5094_v21  ;;  %v6178_v21 = vcombine.low %v6041_v38, %v6046_v39  ;;  %v5193_v36 = vld [vmem:[%s7395_s1 + $0x9c] ss:$24 sps:$4 sm:$0xff]   ;;  %v5191_v38 = vld [vmem:[%s7395_s1 + $0x98] ss:$24 sps:$4 sm:$0xff]  }
  0x4e   :  { %v5196_v37 = vld [vmem:[%s7395_s1 + $0x39c] ss:$24 sps:$4 sm:$0xff]   ;;  %v5194_v39 = vld [vmem:[%s7395_s1 + $0x398] ss:$24 sps:$4 sm:$0xff]  }
  0x4f   :  { %2512 = vmatpush1.bf16.msra.mxu0 %v5089_v22  ;;  %v5167_v22 = vld [vmem:[%s7395_s1 + $0x158] ss:$24 sps:$4 sm:$0xff]  }
  0x50   :  { %2555 = vmatpush1.bf16.msra.mxu1 %v5092_v23  ;;  %2513 = vmatprep.subr.bf16.mxu0 %v5097_v24  ;;  %v5170_v23 = vld [vmem:[%s7395_s1 + $0x458] ss:$24 sps:$4 sm:$0xff]   ;;  %v5175_v24 = vld [vmem:[%s7395_s1 + $0x12c] ss:$24 sps:$4 sm:$0xff]  }
  0x51   :  { %2556 = vmatprep.subr.bf16.mxu1 %v5100_v25  ;;  %v5178_v25 = vld [vmem:[%s7395_s1 + $0x42c] ss:$24 sps:$4 sm:$0xff]  }
  0x53   :  { %2514 = vmatpush1.bf16.msra.mxu0 %v5095_v26  ;;  %v5173_v26 = vld [vmem:[%s7395_s1 + $0x128] ss:$24 sps:$4 sm:$0xff]  }
  0x54   :  { %2557 = vmatpush1.bf16.msra.mxu1 %v5098_v27  ;;  %2515 = vmatprep.subr.bf16.mxu0 %v5103_v28  ;;  %v5176_v27 = vld [vmem:[%s7395_s1 + $0x428] ss:$24 sps:$4 sm:$0xff]   ;;  %v5181_v28 = vld [vmem:[%s7395_s1 + $0xfc] ss:$24 sps:$4 sm:$0xff]  }
  0x55   :  { %2558 = vmatprep.subr.bf16.mxu1 %v5106_v29  ;;  %v5184_v29 = vld [vmem:[%s7395_s1 + $0x3fc] ss:$24 sps:$4 sm:$0xff]  }
  0x57   :  { %2516 = vmatpush1.bf16.msra.mxu0 %v5101_v30  ;;  %v5179_v30 = vld [vmem:[%s7395_s1 + $0xf8] ss:$24 sps:$4 sm:$0xff]  }
  0x58   :  { %2559 = vmatpush1.bf16.msra.mxu1 %v5104_v31  ;;  %2517 = vmatprep.subr.bf16.mxu0 %v5109_v32  ;;  %v5182_v31 = vld [vmem:[%s7395_s1 + $0x3f8] ss:$24 sps:$4 sm:$0xff]   ;;  %v5187_v32 = vld [vmem:[%s7395_s1 + $0xcc] ss:$24 sps:$4 sm:$0xff]  }
  0x59   :  { %2560 = vmatprep.subr.bf16.mxu1 %v5112_v33  ;;  %v5190_v33 = vld [vmem:[%s7395_s1 + $0x3cc] ss:$24 sps:$4 sm:$0xff]  }
  0x5b   :  { %2518 = vmatpush1.bf16.msra.mxu0 %v5107_v34  ;;  %v5185_v34 = vld [vmem:[%s7395_s1 + $0xc8] ss:$24 sps:$4 sm:$0xff]  }
  0x5c   :  { %2561 = vmatpush1.bf16.msra.mxu1 %v5110_v35  ;;  %2519 = vmatprep.subr.bf16.mxu0 %v5115_v40  ;;  %v5188_v35 = vld [vmem:[%s7395_s1 + $0x3c8] ss:$24 sps:$4 sm:$0xff]   ;;  %v5199_v40 = vld [vmem:[%s7395_s1 + $0x6c] ss:$24 sps:$4 sm:$0xff]  }
  0x5d   :  { %2562 = vmatprep.subr.bf16.mxu1 %v5118_v43  ;;  %v5202_v43 = vld [vmem:[%s7395_s1 + $0x36c] ss:$24 sps:$4 sm:$0xff]  }
  0x5f   :  { %2520 = vmatpush1.bf16.msra.mxu0 %v5113_v44  ;;  %v5197_v44 = vld [vmem:[%s7395_s1 + $0x68] ss:$24 sps:$4 sm:$0xff]  }
  0x60   :  { %2563 = vmatpush1.bf16.msra.mxu1 %v5116_v45  ;;  %2521 = vmatprep.subr.bf16.mxu0 %v5121_v46  ;;  %v5200_v45 = vld [vmem:[%s7395_s1 + $0x368] ss:$24 sps:$4 sm:$0xff]   ;;  %v5205_v46 = vld [vmem:[%s7395_s1 + $0x3c] ss:$24 sps:$4 sm:$0xff]  }
  0x61   :  { %2564 = vmatprep.subr.bf16.mxu1 %v5124_v47  ;;  %v5208_v47 = vld [vmem:[%s7395_s1 + $0x33c] ss:$24 sps:$4 sm:$0xff]  }
  0x63   :  { %2522 = vmatpush2.bf16.msra.mxu0 %v5119_v48  ;;  %v5203_v48 = vld [vmem:[%s7395_s1 + $0x38] ss:$24 sps:$4 sm:$0xff]  }
  0x64   :  { %2565 = vmatpush2.bf16.msra.mxu1 %v5122_v49  ;;  %2523 = vmatprep.subr.bf16.mxu0 %v5127_v50  ;;  %v5206_v49 = vld [vmem:[%s7395_s1 + $0x338] ss:$24 sps:$4 sm:$0xff]   ;;  %v5211_v50 = vld [vmem:[%s7395_s1 + $0xc] ss:$24 sps:$4 sm:$0xff]  }
  0x65   :  { %2566 = vmatprep.subr.bf16.mxu1 %v5130_v51  ;;  %v5214_v51 = vld [vmem:[%s7395_s1 + $0x30c] ss:$24 sps:$4 sm:$0xff]  }
  0x67   :  { %2524 = vmatpush2.bf16.msra.mxu0 %v5125_v52  ;;  %v5209_v52 = vld [vmem:[%s7395_s1 + $0x8] ss:$24 sps:$4 sm:$0xff]  }
  0x68   :  { %2567 = vmatpush2.bf16.msra.mxu1 %v5128_v55  ;;  %2525 = vmatprep.subr.bf16.mxu0 %v5133_v56  ;;  %v5212_v55 = vld [vmem:[%s7395_s1 + $0x308] ss:$24 sps:$4 sm:$0xff]   ;;  %v5217_v56 = vld [vmem:[%s7395_s1 + $0x2dc] ss:$24 sps:$4 sm:$0xff]  }
  0x69   :  { %2568 = vmatprep.subr.bf16.mxu1 %v5136_v57  ;;  %v5220_v57 = vld [vmem:[%s7395_s1 + $0x5dc] ss:$24 sps:$4 sm:$0xff]  }
  0x6b   :  { %2526 = vmatpush2.bf16.msra.mxu0 %v5131_v58  ;;  %v5215_v58 = vld [vmem:[%s7395_s1 + $0x2d8] ss:$24 sps:$4 sm:$0xff]  }
  0x6c   :  { %2569 = vmatpush2.bf16.msra.mxu1 %v5134_v59  ;;  %2527 = vmatprep.subr.bf16.mxu0 %v5139_v60  ;;  %v5218_v59 = vld [vmem:[%s7395_s1 + $0x5d8] ss:$24 sps:$4 sm:$0xff]   ;;  %v5223_v60 = vld [vmem:[%s7395_s1 + $0x2ac] ss:$24 sps:$4 sm:$0xff]  }
  0x6d   :  { %2570 = vmatprep.subr.bf16.mxu1 %v5142_v61  ;;  %v5226_v61 = vld [vmem:[%s7395_s1 + $0x5ac] ss:$24 sps:$4 sm:$0xff]  }
  0x6f   :  { %2528 = vmatpush2.bf16.msra.mxu0 %v5137_v62  ;;  %v5221_v62 = vld [vmem:[%s7395_s1 + $0x2a8] ss:$24 sps:$4 sm:$0xff]  }
  0x70   :  { %2571 = vmatpush2.bf16.msra.mxu1 %v5140_v63  ;;  %2529 = vmatprep.subr.bf16.mxu0 %v5145_v0  ;;  %v5224_v63 = vld [vmem:[%s7395_s1 + $0x5a8] ss:$24 sps:$4 sm:$0xff]   ;;  %v5229_v0 = vld [vmem:[%s7395_s1 + $0x27c] ss:$24 sps:$4 sm:$0xff]  }
  0x71   :  { %2572 = vmatprep.subr.bf16.mxu1 %v5148_v1  ;;  %v5232_v1 = vld [vmem:[%s7395_s1 + $0x57c] ss:$24 sps:$4 sm:$0xff]  }
  0x73   :  { %2530 = vmatpush2.bf16.msra.mxu0 %v5143_v2  ;;  %v5227_v2 = vld [vmem:[%s7395_s1 + $0x278] ss:$24 sps:$4 sm:$0xff]  }
  0x74   :  { %2573 = vmatpush2.bf16.msra.mxu1 %v5146_v3  ;;  %2531 = vmatprep.subr.bf16.mxu0 %v5151_v4  ;;  %v5230_v3 = vld [vmem:[%s7395_s1 + $0x578] ss:$24 sps:$4 sm:$0xff]   ;;  %v5235_v4 = vld [vmem:[%s7395_s1 + $0x24c] ss:$24 sps:$4 sm:$0xff]  }
  0x75   :  { %2574 = vmatprep.subr.bf16.mxu1 %v5154_v5  ;;  %v5238_v5 = vld [vmem:[%s7395_s1 + $0x54c] ss:$24 sps:$4 sm:$0xff]  }
  0x77   :  { %2532 = vmatpush2.bf16.msra.mxu0 %v5149_v6  ;;  %v5233_v6 = vld [vmem:[%s7395_s1 + $0x248] ss:$24 sps:$4 sm:$0xff]  }
  0x78   :  { %2575 = vmatpush2.bf16.msra.mxu1 %v5152_v7  ;;  %2533 = vmatprep.subr.bf16.mxu0 %v5157_v10  ;;  %v5236_v7 = vld [vmem:[%s7395_s1 + $0x548] ss:$24 sps:$4 sm:$0xff]   ;;  %v5241_v10 = vld [vmem:[%s7395_s1 + $0x21c] ss:$24 sps:$4 sm:$0xff]  }
  0x79   :  { %2576 = vmatprep.subr.bf16.mxu1 %v5160_v11  ;;  %v5244_v11 = vld [vmem:[%s7395_s1 + $0x51c] ss:$24 sps:$4 sm:$0xff]  }
  0x7b   :  { %2534 = vmatpush2.bf16.msra.mxu0 %v5155_v12  ;;  %v5239_v12 = vld [vmem:[%s7395_s1 + $0x218] ss:$24 sps:$4 sm:$0xff]  }
  0x7c   :  { %2577 = vmatpush2.bf16.msra.mxu1 %v5158_v13  ;;  %2535 = vmatprep.subr.bf16.mxu0 %v5163_v14  ;;  %v5242_v13 = vld [vmem:[%s7395_s1 + $0x518] ss:$24 sps:$4 sm:$0xff]   ;;  %v5247_v14 = vld [vmem:[%s7395_s1 + $0x1ec] ss:$24 sps:$4 sm:$0xff]  }
  0x7d   :  { %2578 = vmatprep.subr.bf16.mxu1 %v5166_v15  ;;  %v5250_v15 = vld [vmem:[%s7395_s1 + $0x4ec] ss:$24 sps:$4 sm:$0xff]  }
  0x7f   :  { %2536 = vmatpush2.bf16.msra.mxu0 %v5161_v16  ;;  %v5245_v16 = vld [vmem:[%s7395_s1 + $0x1e8] ss:$24 sps:$4 sm:$0xff]  }
  0x80   :  { %2579 = vmatpush2.bf16.msra.mxu1 %v5164_v17  ;;  %2591 = vmatprep.subr.bf16.mxu0 %v5169_v18  ;;  %v5248_v17 = vld [vmem:[%s7395_s1 + $0x4e8] ss:$24 sps:$4 sm:$0xff]   ;;  %v5253_v18 = vld [vmem:[%s7395_s1 + $0x1bc] ss:$24 sps:$4 sm:$0xff]  }
  0x81   :  { %2634 = vmatprep.subr.bf16.mxu1 %v5172_v19  ;;  %v5256_v19 = vld [vmem:[%s7395_s1 + $0x4bc] ss:$24 sps:$4 sm:$0xff]  }
  0x82   :  { %2538 = vmatmul.mubr.bf16.vlgmr.msra.gmra.mxu0 %v6174_v20 }
  0x83   :  { %2581 = vmatmul.mubr.bf16.vlgmr.msra.gmra.mxu1 %v6178_v21  ;;  %2592 = vmatpush1.bf16.msra.mxu0 %v5167_v22  ;;  %v5251_v22 = vld [vmem:[%s7395_s1 + $0x1b8] ss:$24 sps:$4 sm:$0xff]  }
  0x84   :  { %2635 = vmatpush1.bf16.msra.mxu1 %v5170_v23  ;;  %2593 = vmatprep.subr.bf16.mxu0 %v5175_v24  ;;  %v5254_v23 = vld [vmem:[%s7395_s1 + $0x4b8] ss:$24 sps:$4 sm:$0xff]   ;;  %v5259_v24 = vld [vmem:[%s7395_s1 + $0x18c] ss:$24 sps:$4 sm:$0xff]  }
  0x85   :  { %2636 = vmatprep.subr.bf16.mxu1 %v5178_v25  ;;  %2623 = vmatprep.mubr.bf16.mxu0 %v5887_v53  ;;  %v5262_v25 = vld [vmem:[%s7395_s1 + $0x48c] ss:$24 sps:$4 sm:$0xff]  }
  0x86   :  { %2666 = vmatprep.mubr.bf16.mxu1 %v5889_v54 }
  0x87   :  { %2594 = vmatpush1.bf16.msra.mxu0 %v5173_v26  ;;  %v5257_v26 = vld [vmem:[%s7395_s1 + $0x188] ss:$24 sps:$4 sm:$0xff]  }
  0x88   :  { %2637 = vmatpush1.bf16.msra.mxu1 %v5176_v27  ;;  %2595 = vmatprep.subr.bf16.mxu0 %v5181_v28  ;;  %v5260_v27 = vld [vmem:[%s7395_s1 + $0x488] ss:$24 sps:$4 sm:$0xff]   ;;  %v5265_v28 = vld [vmem:[%s7395_s1 + $0x75c] ss:$24 sps:$4 sm:$0xff]  }
  0x89   :  { %2638 = vmatprep.subr.bf16.mxu1 %v5184_v29  ;;  %v5268_v29 = vld [vmem:[%s7395_s1 + $0xa5c] ss:$24 sps:$4 sm:$0xff]  }
  0x8b   :  { %2596 = vmatpush1.bf16.msra.mxu0 %v5179_v30  ;;  %v5263_v30 = vld [vmem:[%s7395_s1 + $0x758] ss:$24 sps:$4 sm:$0xff]  }
  0x8c   :  { %2639 = vmatpush1.bf16.msra.mxu1 %v5182_v31  ;;  %2597 = vmatprep.subr.bf16.mxu0 %v5187_v32  ;;  %v5266_v31 = vld [vmem:[%s7395_s1 + $0xa58] ss:$24 sps:$4 sm:$0xff]   ;;  %v5271_v32 = vld [vmem:[%s7395_s1 + $0x72c] ss:$24 sps:$4 sm:$0xff]  }
  0x8d   :  { %2640 = vmatprep.subr.bf16.mxu1 %v5190_v33  ;;  %v5274_v33 = vld [vmem:[%s7395_s1 + $0xa2c] ss:$24 sps:$4 sm:$0xff]  }
  0x8f   :  { %2598 = vmatpush1.bf16.msra.mxu0 %v5185_v34  ;;  %v5269_v34 = vld [vmem:[%s7395_s1 + $0x728] ss:$24 sps:$4 sm:$0xff]  }
  0x90   :  { %2641 = vmatpush1.bf16.msra.mxu1 %v5188_v35  ;;  %2599 = vmatprep.subr.bf16.mxu0 %v5193_v36  ;;  %v5272_v35 = vld [vmem:[%s7395_s1 + $0xa28] ss:$24 sps:$4 sm:$0xff]   ;;  %v5277_v36 = vld [vmem:[%s7395_s1 + $0x6fc] ss:$24 sps:$4 sm:$0xff]  }
  0x91   :  { %2642 = vmatprep.subr.bf16.mxu1 %v5196_v37  ;;  %v5280_v37 = vld [vmem:[%s7395_s1 + $0x9fc] ss:$24 sps:$4 sm:$0xff]  }
  0x93   :  { %2600 = vmatpush1.bf16.msra.mxu0 %v5191_v38  ;;  %v5275_v38 = vld [vmem:[%s7395_s1 + $0x6f8] ss:$24 sps:$4 sm:$0xff]  }
  0x94   :  { %2643 = vmatpush1.bf16.msra.mxu1 %v5194_v39  ;;  %2601 = vmatprep.subr.bf16.mxu0 %v5199_v40  ;;  %v5278_v39 = vld [vmem:[%s7395_s1 + $0x9f8] ss:$24 sps:$4 sm:$0xff]   ;;  %v5283_v40 = vld [vmem:[%s7395_s1 + $0x6cc] ss:$24 sps:$4 sm:$0xff]  }
  0x95   :  { %2644 = vmatprep.subr.bf16.mxu1 %v5202_v43  ;;  %v5286_v43 = vld [vmem:[%s7395_s1 + $0x9cc] ss:$24 sps:$4 sm:$0xff]  }
  0x97   :  { %2602 = vmatpush1.bf16.msra.mxu0 %v5197_v44  ;;  %v5281_v44 = vld [vmem:[%s7395_s1 + $0x6c8] ss:$24 sps:$4 sm:$0xff]  }
  0x98   :  { %2645 = vmatpush1.bf16.msra.mxu1 %v5200_v45  ;;  %2603 = vmatprep.subr.bf16.mxu0 %v5205_v46  ;;  %v5284_v45 = vld [vmem:[%s7395_s1 + $0x9c8] ss:$24 sps:$4 sm:$0xff]   ;;  %v5289_v46 = vld [vmem:[%s7395_s1 + $0x69c] ss:$24 sps:$4 sm:$0xff]  }
  0x99   :  { %2646 = vmatprep.subr.bf16.mxu1 %v5208_v47  ;;  %v5292_v47 = vld [vmem:[%s7395_s1 + $0x99c] ss:$24 sps:$4 sm:$0xff]  }
  0x9b   :  { %2604 = vmatpush1.bf16.msra.mxu0 %v5203_v48  ;;  %v5287_v48 = vld [vmem:[%s7395_s1 + $0x698] ss:$24 sps:$4 sm:$0xff]  }
  0x9c   :  { %2647 = vmatpush1.bf16.msra.mxu1 %v5206_v49  ;;  %2605 = vmatprep.subr.bf16.mxu0 %v5211_v50  ;;  %v5290_v49 = vld [vmem:[%s7395_s1 + $0x998] ss:$24 sps:$4 sm:$0xff]   ;;  %v5295_v50 = vld [vmem:[%s7395_s1 + $0x66c] ss:$24 sps:$4 sm:$0xff]  }
  0x9d   :  { %2648 = vmatprep.subr.bf16.mxu1 %v5214_v51  ;;  %v5298_v51 = vld [vmem:[%s7395_s1 + $0x96c] ss:$24 sps:$4 sm:$0xff]  }
  0x9f   :  { %2606 = vmatpush1.bf16.msra.mxu0 %v5209_v52  ;;  %v5293_v52 = vld [vmem:[%s7395_s1 + $0x668] ss:$24 sps:$4 sm:$0xff]  }
  0xa0   :  { %2649 = vmatpush1.bf16.msra.mxu1 %v5212_v55  ;;  %2607 = vmatprep.subr.bf16.mxu0 %v5217_v56  ;;  %v5296_v55 = vld [vmem:[%s7395_s1 + $0x968] ss:$24 sps:$4 sm:$0xff]   ;;  %v5301_v56 = vld [vmem:[%s7395_s1 + $0x63c] ss:$24 sps:$4 sm:$0xff]  }
  0xa1   :  { %2650 = vmatprep.subr.bf16.mxu1 %v5220_v57  ;;  %v5304_v57 = vld [vmem:[%s7395_s1 + $0x93c] ss:$24 sps:$4 sm:$0xff]  }
  0xa3   :  { %2608 = vmatpush2.bf16.msra.mxu0 %v5215_v58  ;;  %v5299_v58 = vld [vmem:[%s7395_s1 + $0x638] ss:$24 sps:$4 sm:$0xff]  }
  0xa4   :  { %2651 = vmatpush2.bf16.msra.mxu1 %v5218_v59  ;;  %2609 = vmatprep.subr.bf16.mxu0 %v5223_v60  ;;  %v5302_v59 = vld [vmem:[%s7395_s1 + $0x938] ss:$24 sps:$4 sm:$0xff]   ;;  %v5307_v60 = vld [vmem:[%s7395_s1 + $0x60c] ss:$24 sps:$4 sm:$0xff]  }
  0xa5   :  { %2652 = vmatprep.subr.bf16.mxu1 %v5226_v61  ;;  %v5310_v61 = vld [vmem:[%s7395_s1 + $0x90c] ss:$24 sps:$4 sm:$0xff]  }
  0xa7   :  { %2610 = vmatpush2.bf16.msra.mxu0 %v5221_v62  ;;  %v5305_v62 = vld [vmem:[%s7395_s1 + $0x608] ss:$24 sps:$4 sm:$0xff]  }
  0xa8   :  { %2653 = vmatpush2.bf16.msra.mxu1 %v5224_v63  ;;  %2611 = vmatprep.subr.bf16.mxu0 %v5229_v0  ;;  %v5308_v63 = vld [vmem:[%s7395_s1 + $0x908] ss:$24 sps:$4 sm:$0xff]   ;;  %v5313_v0 = vld [vmem:[%s7395_s1 + $0x8dc] ss:$24 sps:$4 sm:$0xff]  }
  0xa9   :  { %2654 = vmatprep.subr.bf16.mxu1 %v5232_v1  ;;  %v5316_v1 = vld [vmem:[%s7395_s1 + $0xbdc] ss:$24 sps:$4 sm:$0xff]  }
  0xab   :  { %2612 = vmatpush2.bf16.msra.mxu0 %v5227_v2  ;;  %v5311_v2 = vld [vmem:[%s7395_s1 + $0x8d8] ss:$24 sps:$4 sm:$0xff]  }
  0xac   :  { %2655 = vmatpush2.bf16.msra.mxu1 %v5230_v3  ;;  %2613 = vmatprep.subr.bf16.mxu0 %v5235_v4  ;;  %v5314_v3 = vld [vmem:[%s7395_s1 + $0xbd8] ss:$24 sps:$4 sm:$0xff]   ;;  %v5319_v4 = vld [vmem:[%s7395_s1 + $0x8ac] ss:$24 sps:$4 sm:$0xff]  }
  0xad   :  { %2656 = vmatprep.subr.bf16.mxu1 %v5238_v5  ;;  %v5322_v5 = vld [vmem:[%s7395_s1 + $0xbac] ss:$24 sps:$4 sm:$0xff]  }
  0xaf   :  { %2614 = vmatpush2.bf16.msra.mxu0 %v5233_v6  ;;  %v5317_v6 = vld [vmem:[%s7395_s1 + $0x8a8] ss:$24 sps:$4 sm:$0xff]  }
  0xb0   :  { %2657 = vmatpush2.bf16.msra.mxu1 %v5236_v7  ;;  %2615 = vmatprep.subr.bf16.mxu0 %v5241_v10  ;;  %v5320_v7 = vld [vmem:[%s7395_s1 + $0xba8] ss:$24 sps:$4 sm:$0xff]   ;;  %v5325_v10 = vld [vmem:[%s7395_s1 + $0x87c] ss:$24 sps:$4 sm:$0xff]  }
  0xb1   :  { %2658 = vmatprep.subr.bf16.mxu1 %v5244_v11  ;;  %v5328_v11 = vld [vmem:[%s7395_s1 + $0xb7c] ss:$24 sps:$4 sm:$0xff]  }
  0xb3   :  { %2616 = vmatpush2.bf16.msra.mxu0 %v5239_v12  ;;  %v5323_v12 = vld [vmem:[%s7395_s1 + $0x878] ss:$24 sps:$4 sm:$0xff]  }
  0xb4   :  { %2659 = vmatpush2.bf16.msra.mxu1 %v5242_v13  ;;  %2617 = vmatprep.subr.bf16.mxu0 %v5247_v14  ;;  %v5326_v13 = vld [vmem:[%s7395_s1 + $0xb78] ss:$24 sps:$4 sm:$0xff]   ;;  %v5331_v14 = vld [vmem:[%s7395_s1 + $0x84c] ss:$24 sps:$4 sm:$0xff]  }
  0xb5   :  { %2660 = vmatprep.subr.bf16.mxu1 %v5250_v15  ;;  %v5334_v15 = vld [vmem:[%s7395_s1 + $0xb4c] ss:$24 sps:$4 sm:$0xff]  }
  0xb7   :  { %2618 = vmatpush2.bf16.msra.mxu0 %v5245_v16  ;;  %v5329_v16 = vld [vmem:[%s7395_s1 + $0x848] ss:$24 sps:$4 sm:$0xff]  }
  0xb8   :  { %2661 = vmatpush2.bf16.msra.mxu1 %v5248_v17  ;;  %2619 = vmatprep.subr.bf16.mxu0 %v5253_v18  ;;  %v5332_v17 = vld [vmem:[%s7395_s1 + $0xb48] ss:$24 sps:$4 sm:$0xff]   ;;  %v5337_v18 = vld [vmem:[%s7395_s1 + $0x81c] ss:$24 sps:$4 sm:$0xff]  }
  0xb9   :  { %2662 = vmatprep.subr.bf16.mxu1 %v5256_v19  ;;  %v5340_v19 = vld [vmem:[%s7395_s1 + $0xb1c] ss:$24 sps:$4 sm:$0xff]  }
  0xbb   :  { %2620 = vmatpush2.bf16.msra.mxu0 %v5251_v22  ;;  %v5335_v22 = vld [vmem:[%s7395_s1 + $0x818] ss:$24 sps:$4 sm:$0xff]  }
  0xbc   :  { %2663 = vmatpush2.bf16.msra.mxu1 %v5254_v23  ;;  %2621 = vmatprep.subr.bf16.mxu0 %v5259_v24  ;;  %v5338_v23 = vld [vmem:[%s7395_s1 + $0xb18] ss:$24 sps:$4 sm:$0xff]   ;;  %v5343_v24 = vld [vmem:[%s7395_s1 + $0x7ec] ss:$24 sps:$4 sm:$0xff]  }
  0xbd   :  { %2664 = vmatprep.subr.bf16.mxu1 %v5262_v25  ;;  %v5346_v25 = vld [vmem:[%s7395_s1 + $0xaec] ss:$24 sps:$4 sm:$0xff]  }
  0xbf   :  { %2622 = vmatpush2.bf16.msra.mxu0 %v5257_v26  ;;  %v5341_v26 = vld [vmem:[%s7395_s1 + $0x7e8] ss:$24 sps:$4 sm:$0xff]  }
  0xc0   :  { %2665 = vmatpush2.bf16.msra.mxu1 %v5260_v27  ;;  %2677 = vmatprep.subr.bf16.mxu0 %v5265_v28  ;;  %v5344_v27 = vld [vmem:[%s7395_s1 + $0xae8] ss:$24 sps:$4 sm:$0xff]   ;;  %v5349_v28 = vld [vmem:[%s7395_s1 + $0x7bc] ss:$24 sps:$4 sm:$0xff]  }
  0xc1   :  { %2720 = vmatprep.subr.bf16.mxu1 %v5268_v29  ;;  %v5352_v29 = vld [vmem:[%s7395_s1 + $0xabc] ss:$24 sps:$4 sm:$0xff]  }
  0xc2   :  { %2624 = vmatmul.mubr.bf16.vlgmr.msra.gmra.mxu0 %v5944_v8 }
  0xc3   :  { %2667 = vmatmul.mubr.bf16.vlgmr.msra.gmra.mxu1 %v5946_v9  ;;  %2678 = vmatpush1.bf16.msra.mxu0 %v5263_v30  ;;  %v5347_v30 = vld [vmem:[%s7395_s1 + $0x7b8] ss:$24 sps:$4 sm:$0xff]  }
  0xc4   :  { %2721 = vmatpush1.bf16.msra.mxu1 %v5266_v31  ;;  %2679 = vmatprep.subr.bf16.mxu0 %v5271_v32  ;;  %v5350_v31 = vld [vmem:[%s7395_s1 + $0xab8] ss:$24 sps:$4 sm:$0xff]   ;;  %v5355_v32 = vld [vmem:[%s7395_s1 + $0x78c] ss:$24 sps:$4 sm:$0xff]  }
  0xc5   :  { %2722 = vmatprep.subr.bf16.mxu1 %v5274_v33  ;;  %2709 = vmatprep.mubr.bf16.mxu0 %v6053_v41  ;;  %v5358_v33 = vld [vmem:[%s7395_s1 + $0xa8c] ss:$24 sps:$4 sm:$0xff]  }
  0xc6   :  { %2752 = vmatprep.mubr.bf16.mxu1 %v6057_v42 }
  0xc7   :  { %2680 = vmatpush1.bf16.msra.mxu0 %v5269_v34  ;;  %v5353_v34 = vld [vmem:[%s7395_s1 + $0x788] ss:$24 sps:$4 sm:$0xff]  }
  0xc8   :  { %2723 = vmatpush1.bf16.msra.mxu1 %v5272_v35  ;;  %2681 = vmatprep.subr.bf16.mxu0 %v5277_v36  ;;  %v5356_v35 = vld [vmem:[%s7395_s1 + $0xa88] ss:$24 sps:$4 sm:$0xff]   ;;  %v5361_v36 = vld [vmem:[%s7395_s1 + $0x164] ss:$24 sps:$4 sm:$0xff]  }
  0xc9   :  { %2724 = vmatprep.subr.bf16.mxu1 %v5280_v37  ;;  %v5364_v37 = vld [vmem:[%s7395_s1 + $0x464] ss:$24 sps:$4 sm:$0xff]  }
  0xcb   :  { %2682 = vmatpush1.bf16.msra.mxu0 %v5275_v38  ;;  %v5359_v38 = vld [vmem:[%s7395_s1 + $0x160] ss:$24 sps:$4 sm:$0xff]  }
  0xcc   :  { %2725 = vmatpush1.bf16.msra.mxu1 %v5278_v39  ;;  %2683 = vmatprep.subr.bf16.mxu0 %v5283_v40  ;;  %v5362_v39 = vld [vmem:[%s7395_s1 + $0x460] ss:$24 sps:$4 sm:$0xff]   ;;  %v5367_v40 = vld [vmem:[%s7395_s1 + $0x134] ss:$24 sps:$4 sm:$0xff]  }
  0xcd   :  { %2726 = vmatprep.subr.bf16.mxu1 %v5286_v43  ;;  %v5370_v43 = vld [vmem:[%s7395_s1 + $0x434] ss:$24 sps:$4 sm:$0xff]  }
  0xcf   :  { %2684 = vmatpush1.bf16.msra.mxu0 %v5281_v44  ;;  %v5365_v44 = vld [vmem:[%s7395_s1 + $0x130] ss:$24 sps:$4 sm:$0xff]  }
  0xd0   :  { %2727 = vmatpush1.bf16.msra.mxu1 %v5284_v45  ;;  %2685 = vmatprep.subr.bf16.mxu0 %v5289_v46  ;;  %v5368_v45 = vld [vmem:[%s7395_s1 + $0x430] ss:$24 sps:$4 sm:$0xff]   ;;  %v5373_v46 = vld [vmem:[%s7395_s1 + $0x104] ss:$24 sps:$4 sm:$0xff]  }
  0xd1   :  { %2728 = vmatprep.subr.bf16.mxu1 %v5292_v47  ;;  %v5376_v47 = vld [vmem:[%s7395_s1 + $0x404] ss:$24 sps:$4 sm:$0xff]  }
  0xd3   :  { %2686 = vmatpush1.bf16.msra.mxu0 %v5287_v48  ;;  %v5371_v48 = vld [vmem:[%s7395_s1 + $0x100] ss:$24 sps:$4 sm:$0xff]  }
  0xd4   :  { %2729 = vmatpush1.bf16.msra.mxu1 %v5290_v49  ;;  %2687 = vmatprep.subr.bf16.mxu0 %v5295_v50  ;;  %v5374_v49 = vld [vmem:[%s7395_s1 + $0x400] ss:$24 sps:$4 sm:$0xff]   ;;  %v5379_v50 = vld [vmem:[%s7395_s1 + $0xd4] ss:$24 sps:$4 sm:$0xff]  }
  0xd5   :  { %2730 = vmatprep.subr.bf16.mxu1 %v5298_v51  ;;  %v5382_v51 = vld [vmem:[%s7395_s1 + $0x3d4] ss:$24 sps:$4 sm:$0xff]  }
  0xd7   :  { %2688 = vmatpush1.bf16.msra.mxu0 %v5293_v52  ;;  %v5377_v52 = vld [vmem:[%s7395_s1 + $0xd0] ss:$24 sps:$4 sm:$0xff]  }
  0xd8   :  { %2731 = vmatpush1.bf16.msra.mxu1 %v5296_v55  ;;  %2689 = vmatprep.subr.bf16.mxu0 %v5301_v56  ;;  %v5380_v55 = vld [vmem:[%s7395_s1 + $0x3d0] ss:$24 sps:$4 sm:$0xff]   ;;  %v5385_v56 = vld [vmem:[%s7395_s1 + $0xa4] ss:$24 sps:$4 sm:$0xff]  }
  0xd9   :  { %2732 = vmatprep.subr.bf16.mxu1 %v5304_v57  ;;  %v5388_v57 = vld [vmem:[%s7395_s1 + $0x3a4] ss:$24 sps:$4 sm:$0xff]  }
  0xdb   :  { %2690 = vmatpush1.bf16.msra.mxu0 %v5299_v58  ;;  %v5383_v58 = vld [vmem:[%s7395_s1 + $0xa0] ss:$24 sps:$4 sm:$0xff]  }
  0xdc   :  { %2733 = vmatpush1.bf16.msra.mxu1 %v5302_v59  ;;  %2691 = vmatprep.subr.bf16.mxu0 %v5307_v60  ;;  %v5386_v59 = vld [vmem:[%s7395_s1 + $0x3a0] ss:$24 sps:$4 sm:$0xff]   ;;  %v5391_v60 = vld [vmem:[%s7395_s1 + $0x74] ss:$24 sps:$4 sm:$0xff]  }
  0xdd   :  { %2734 = vmatprep.subr.bf16.mxu1 %v5310_v61  ;;  %v5394_v61 = vld [vmem:[%s7395_s1 + $0x374] ss:$24 sps:$4 sm:$0xff]  }
  0xdf   :  { %2692 = vmatpush1.bf16.msra.mxu0 %v5305_v62  ;;  %v5389_v62 = vld [vmem:[%s7395_s1 + $0x70] ss:$24 sps:$4 sm:$0xff]  }
  0xe0   :  { %2735 = vmatpush1.bf16.msra.mxu1 %v5308_v63  ;;  %2693 = vmatprep.subr.bf16.mxu0 %v5313_v0  ;;  %v5392_v63 = vld [vmem:[%s7395_s1 + $0x370] ss:$24 sps:$4 sm:$0xff]   ;;  %v5397_v0 = vld [vmem:[%s7395_s1 + $0x44] ss:$24 sps:$4 sm:$0xff]  }
  0xe1   :  { %2736 = vmatprep.subr.bf16.mxu1 %v5316_v1  ;;  %v5400_v1 = vld [vmem:[%s7395_s1 + $0x344] ss:$24 sps:$4 sm:$0xff]  }
  0xe3   :  { %2694 = vmatpush2.bf16.msra.mxu0 %v5311_v2  ;;  %v5395_v2 = vld [vmem:[%s7395_s1 + $0x40] ss:$24 sps:$4 sm:$0xff]  }
  0xe4   :  { %2737 = vmatpush2.bf16.msra.mxu1 %v5314_v3  ;;  %2695 = vmatprep.subr.bf16.mxu0 %v5319_v4  ;;  %v5398_v3 = vld [vmem:[%s7395_s1 + $0x340] ss:$24 sps:$4 sm:$0xff]   ;;  %v5403_v4 = vld [vmem:[%s7395_s1 + $0x14] ss:$24 sps:$4 sm:$0xff]  }
  0xe5   :  { %2738 = vmatprep.subr.bf16.mxu1 %v5322_v5  ;;  %v5406_v5 = vld [vmem:[%s7395_s1 + $0x314] ss:$24 sps:$4 sm:$0xff]  }
  0xe7   :  { %2696 = vmatpush2.bf16.msra.mxu0 %v5317_v6  ;;  %v5401_v6 = vld [vmem:[%s7395_s1 + $0x10] ss:$24 sps:$4 sm:$0xff]  }
  0xe8   :  { %2739 = vmatpush2.bf16.msra.mxu1 %v5320_v7  ;;  %2697 = vmatprep.subr.bf16.mxu0 %v5325_v10  ;;  %v5404_v7 = vld [vmem:[%s7395_s1 + $0x310] ss:$24 sps:$4 sm:$0xff]   ;;  %v5409_v10 = vld [vmem:[%s7395_s1 + $0x2e4] ss:$24 sps:$4 sm:$0xff]  }
  0xe9   :  { %2740 = vmatprep.subr.bf16.mxu1 %v5328_v11  ;;  %v5412_v11 = vld [vmem:[%s7395_s1 + $0x5e4] ss:$24 sps:$4 sm:$0xff]  }
  0xeb   :  { %2698 = vmatpush2.bf16.msra.mxu0 %v5323_v12  ;;  %v5407_v12 = vld [vmem:[%s7395_s1 + $0x2e0] ss:$24 sps:$4 sm:$0xff]  }
  0xec   :  { %2741 = vmatpush2.bf16.msra.mxu1 %v5326_v13  ;;  %2699 = vmatprep.subr.bf16.mxu0 %v5331_v14  ;;  %v5410_v13 = vld [vmem:[%s7395_s1 + $0x5e0] ss:$24 sps:$4 sm:$0xff]   ;;  %v5415_v14 = vld [vmem:[%s7395_s1 + $0x2b4] ss:$24 sps:$4 sm:$0xff]  }
  0xed   :  { %2742 = vmatprep.subr.bf16.mxu1 %v5334_v15  ;;  %v5418_v15 = vld [vmem:[%s7395_s1 + $0x5b4] ss:$24 sps:$4 sm:$0xff]  }
  0xef   :  { %2700 = vmatpush2.bf16.msra.mxu0 %v5329_v16  ;;  %v5413_v16 = vld [vmem:[%s7395_s1 + $0x2b0] ss:$24 sps:$4 sm:$0xff]  }
  0xf0   :  { %2743 = vmatpush2.bf16.msra.mxu1 %v5332_v17  ;;  %2701 = vmatprep.subr.bf16.mxu0 %v5337_v18  ;;  %v5416_v17 = vld [vmem:[%s7395_s1 + $0x5b0] ss:$24 sps:$4 sm:$0xff]   ;;  %v5421_v18 = vld [vmem:[%s7395_s1 + $0x284] ss:$24 sps:$4 sm:$0xff]  }
  0xf1   :  { %2744 = vmatprep.subr.bf16.mxu1 %v5340_v19  ;;  %v5424_v19 = vld [vmem:[%s7395_s1 + $0x584] ss:$24 sps:$4 sm:$0xff]  }
  0xf3   :  { %2702 = vmatpush2.bf16.msra.mxu0 %v5335_v22  ;;  %v5419_v22 = vld [vmem:[%s7395_s1 + $0x280] ss:$24 sps:$4 sm:$0xff]  }
  0xf4   :  { %2745 = vmatpush2.bf16.msra.mxu1 %v5338_v23  ;;  %2703 = vmatprep.subr.bf16.mxu0 %v5343_v24  ;;  %v5422_v23 = vld [vmem:[%s7395_s1 + $0x580] ss:$24 sps:$4 sm:$0xff]   ;;  %v5427_v24 = vld [vmem:[%s7395_s1 + $0x254] ss:$24 sps:$4 sm:$0xff]  }
  0xf5   :  { %2746 = vmatprep.subr.bf16.mxu1 %v5346_v25  ;;  %v5430_v25 = vld [vmem:[%s7395_s1 + $0x554] ss:$24 sps:$4 sm:$0xff]  }
  0xf7   :  { %2704 = vmatpush2.bf16.msra.mxu0 %v5341_v26  ;;  %v5425_v26 = vld [vmem:[%s7395_s1 + $0x250] ss:$24 sps:$4 sm:$0xff]  }
  0xf8   :  { %2747 = vmatpush2.bf16.msra.mxu1 %v5344_v27  ;;  %2705 = vmatprep.subr.bf16.mxu0 %v5349_v28  ;;  %v5428_v27 = vld [vmem:[%s7395_s1 + $0x550] ss:$24 sps:$4 sm:$0xff]   ;;  %v5433_v28 = vld [vmem:[%s7395_s1 + $0x224] ss:$24 sps:$4 sm:$0xff]  }
  0xf9   :  { %2748 = vmatprep.subr.bf16.mxu1 %v5352_v29  ;;  %v5436_v29 = vld [vmem:[%s7395_s1 + $0x524] ss:$24 sps:$4 sm:$0xff]  }
  0xfb   :  { %2706 = vmatpush2.bf16.msra.mxu0 %v5347_v30  ;;  %v5431_v30 = vld [vmem:[%s7395_s1 + $0x220] ss:$24 sps:$4 sm:$0xff]  }
  0xfc   :  { %2749 = vmatpush2.bf16.msra.mxu1 %v5350_v31  ;;  %2707 = vmatprep.subr.bf16.mxu0 %v5355_v32  ;;  %v5434_v31 = vld [vmem:[%s7395_s1 + $0x520] ss:$24 sps:$4 sm:$0xff]   ;;  %v5439_v32 = vld [vmem:[%s7395_s1 + $0x1f4] ss:$24 sps:$4 sm:$0xff]  }
  0xfd   :  { %2750 = vmatprep.subr.bf16.mxu1 %v5358_v33  ;;  %v5442_v33 = vld [vmem:[%s7395_s1 + $0x4f4] ss:$24 sps:$4 sm:$0xff]  }
  0xff   :  { %2708 = vmatpush2.bf16.msra.mxu0 %v5353_v34  ;;  %v5437_v34 = vld [vmem:[%s7395_s1 + $0x1f0] ss:$24 sps:$4 sm:$0xff]  }
 0x100   :  { %2751 = vmatpush2.bf16.msra.mxu1 %v5356_v35  ;;  %2763 = vmatprep.subr.bf16.mxu0 %v5361_v36  ;;  %v5440_v35 = vld [vmem:[%s7395_s1 + $0x4f0] ss:$24 sps:$4 sm:$0xff]   ;;  %v5445_v36 = vld [vmem:[%s7395_s1 + $0x1c4] ss:$24 sps:$4 sm:$0xff]  }
 0x101   :  { %2806 = vmatprep.subr.bf16.mxu1 %v5364_v37  ;;  %v5448_v37 = vld [vmem:[%s7395_s1 + $0x4c4] ss:$24 sps:$4 sm:$0xff]  }
 0x102   :  { %2710 = vmatmul.mubr.bf16.vlgmr.msra.gmra.mxu0 %v6174_v20 }
 0x103   :  { %2753 = vmatmul.mubr.bf16.vlgmr.msra.gmra.mxu1 %v6178_v21  ;;  %2764 = vmatpush1.bf16.msra.mxu0 %v5359_v38  ;;  %v5443_v38 = vld [vmem:[%s7395_s1 + $0x1c0] ss:$24 sps:$4 sm:$0xff]  }
 0x104   :  { %2807 = vmatpush1.bf16.msra.mxu1 %v5362_v39  ;;  %2765 = vmatprep.subr.bf16.mxu0 %v5367_v40  ;;  %v5446_v39 = vld [vmem:[%s7395_s1 + $0x4c0] ss:$24 sps:$4 sm:$0xff]   ;;  %v5451_v40 = vld [vmem:[%s7395_s1 + $0x194] ss:$24 sps:$4 sm:$0xff]  }
 0x105   :  { %2808 = vmatprep.subr.bf16.mxu1 %v5370_v43  ;;  %2795 = vmatprep.mubr.bf16.mxu0 %v5887_v53  ;;  %v5454_v43 = vld [vmem:[%s7395_s1 + $0x494] ss:$24 sps:$4 sm:$0xff]  }
 0x106   :  { %2838 = vmatprep.mubr.bf16.mxu1 %v5889_v54 }
 0x107   :  { %2766 = vmatpush1.bf16.msra.mxu0 %v5365_v44  ;;  %v5449_v44 = vld [vmem:[%s7395_s1 + $0x190] ss:$24 sps:$4 sm:$0xff]  }
 0x108   :  { %2809 = vmatpush1.bf16.msra.mxu1 %v5368_v45  ;;  %2767 = vmatprep.subr.bf16.mxu0 %v5373_v46  ;;  %v5452_v45 = vld [vmem:[%s7395_s1 + $0x490] ss:$24 sps:$4 sm:$0xff]   ;;  %v5457_v46 = vld [vmem:[%s7395_s1 + $0x764] ss:$24 sps:$4 sm:$0xff]  }
 0x109   :  { %2810 = vmatprep.subr.bf16.mxu1 %v5376_v47  ;;  %v5460_v47 = vld [vmem:[%s7395_s1 + $0xa64] ss:$24 sps:$4 sm:$0xff]  }
 0x10b   :  { %2768 = vmatpush1.bf16.msra.mxu0 %v5371_v48  ;;  %v5455_v48 = vld [vmem:[%s7395_s1 + $0x760] ss:$24 sps:$4 sm:$0xff]  }
 0x10c   :  { %2811 = vmatpush1.bf16.msra.mxu1 %v5374_v49  ;;  %2769 = vmatprep.subr.bf16.mxu0 %v5379_v50  ;;  %v5458_v49 = vld [vmem:[%s7395_s1 + $0xa60] ss:$24 sps:$4 sm:$0xff]   ;;  %v5463_v50 = vld [vmem:[%s7395_s1 + $0x734] ss:$24 sps:$4 sm:$0xff]  }
 0x10d   :  { %2812 = vmatprep.subr.bf16.mxu1 %v5382_v51  ;;  %v5466_v51 = vld [vmem:[%s7395_s1 + $0xa34] ss:$24 sps:$4 sm:$0xff]  }
 0x10f   :  { %2770 = vmatpush1.bf16.msra.mxu0 %v5377_v52  ;;  %v5461_v52 = vld [vmem:[%s7395_s1 + $0x730] ss:$24 sps:$4 sm:$0xff]  }
 0x110   :  { %2813 = vmatpush1.bf16.msra.mxu1 %v5380_v55  ;;  %2771 = vmatprep.subr.bf16.mxu0 %v5385_v56  ;;  %v5464_v55 = vld [vmem:[%s7395_s1 + $0xa30] ss:$24 sps:$4 sm:$0xff]   ;;  %v5469_v56 = vld [vmem:[%s7395_s1 + $0x704] ss:$24 sps:$4 sm:$0xff]  }
 0x111   :  { %2814 = vmatprep.subr.bf16.mxu1 %v5388_v57  ;;  %v5472_v57 = vld [vmem:[%s7395_s1 + $0xa04] ss:$24 sps:$4 sm:$0xff]  }
 0x113   :  { %2772 = vmatpush1.bf16.msra.mxu0 %v5383_v58  ;;  %v5467_v58 = vld [vmem:[%s7395_s1 + $0x700] ss:$24 sps:$4 sm:$0xff]  }
 0x114   :  { %2815 = vmatpush1.bf16.msra.mxu1 %v5386_v59  ;;  %2773 = vmatprep.subr.bf16.mxu0 %v5391_v60  ;;  %v5470_v59 = vld [vmem:[%s7395_s1 + $0xa00] ss:$24 sps:$4 sm:$0xff]   ;;  %v5475_v60 = vld [vmem:[%s7395_s1 + $0x6d4] ss:$24 sps:$4 sm:$0xff]  }
 0x115   :  { %2816 = vmatprep.subr.bf16.mxu1 %v5394_v61  ;;  %v5478_v61 = vld [vmem:[%s7395_s1 + $0x9d4] ss:$24 sps:$4 sm:$0xff]  }
 0x117   :  { %2774 = vmatpush1.bf16.msra.mxu0 %v5389_v62  ;;  %v5473_v62 = vld [vmem:[%s7395_s1 + $0x6d0] ss:$24 sps:$4 sm:$0xff]  }
 0x118   :  { %2817 = vmatpush1.bf16.msra.mxu1 %v5392_v63  ;;  %2775 = vmatprep.subr.bf16.mxu0 %v5397_v0  ;;  %v5476_v63 = vld [vmem:[%s7395_s1 + $0x9d0] ss:$24 sps:$4 sm:$0xff]   ;;  %v5481_v0 = vld [vmem:[%s7395_s1 + $0x6a4] ss:$24 sps:$4 sm:$0xff]  }
 0x119   :  { %2818 = vmatprep.subr.bf16.mxu1 %v5400_v1  ;;  %v5484_v1 = vld [vmem:[%s7395_s1 + $0x9a4] ss:$24 sps:$4 sm:$0xff]  }
 0x11b   :  { %2776 = vmatpush1.bf16.msra.mxu0 %v5395_v2  ;;  %v5479_v2 = vld [vmem:[%s7395_s1 + $0x6a0] ss:$24 sps:$4 sm:$0xff]  }
 0x11c   :  { %2819 = vmatpush1.bf16.msra.mxu1 %v5398_v3  ;;  %2777 = vmatprep.subr.bf16.mxu0 %v5403_v4  ;;  %v5482_v3 = vld [vmem:[%s7395_s1 + $0x9a0] ss:$24 sps:$4 sm:$0xff]   ;;  %v5487_v4 = vld [vmem:[%s7395_s1 + $0x674] ss:$24 sps:$4 sm:$0xff]  }
 0x11d   :  { %2820 = vmatprep.subr.bf16.mxu1 %v5406_v5  ;;  %v5490_v5 = vld [vmem:[%s7395_s1 + $0x974] ss:$24 sps:$4 sm:$0xff]  }
 0x11f   :  { %2778 = vmatpush1.bf16.msra.mxu0 %v5401_v6  ;;  %v5485_v6 = vld [vmem:[%s7395_s1 + $0x670] ss:$24 sps:$4 sm:$0xff]  }
 0x120   :  { %2821 = vmatpush1.bf16.msra.mxu1 %v5404_v7  ;;  %2779 = vmatprep.subr.bf16.mxu0 %v5409_v10  ;;  %v5488_v7 = vld [vmem:[%s7395_s1 + $0x970] ss:$24 sps:$4 sm:$0xff]   ;;  %v5493_v10 = vld [vmem:[%s7395_s1 + $0x644] ss:$24 sps:$4 sm:$0xff]  }
 0x121   :  { %2822 = vmatprep.subr.bf16.mxu1 %v5412_v11  ;;  %v5496_v11 = vld [vmem:[%s7395_s1 + $0x944] ss:$24 sps:$4 sm:$0xff]  }
 0x123   :  { %2780 = vmatpush2.bf16.msra.mxu0 %v5407_v12  ;;  %v5491_v12 = vld [vmem:[%s7395_s1 + $0x640] ss:$24 sps:$4 sm:$0xff]  }
 0x124   :  { %2823 = vmatpush2.bf16.msra.mxu1 %v5410_v13  ;;  %2781 = vmatprep.subr.bf16.mxu0 %v5415_v14  ;;  %v5494_v13 = vld [vmem:[%s7395_s1 + $0x940] ss:$24 sps:$4 sm:$0xff]   ;;  %v6850_v14 = vpop.f32.mrf.mxu0 }
 0x125   :  { %2824 = vmatprep.subr.bf16.mxu1 %v5418_v15  ;;  %v5499_v15 = vld [vmem:[%s7395_s1 + $0x614] ss:$24 sps:$4 sm:$0xff]  }
 0x127   :  { %2782 = vmatpush2.bf16.msra.mxu0 %v5413_v16  ;;  %v5502_v16 = vld [vmem:[%s7395_s1 + $0x914] ss:$24 sps:$4 sm:$0xff]  }
 0x128   :  { %2825 = vmatpush2.bf16.msra.mxu1 %v5416_v17  ;;  %2783 = vmatprep.subr.bf16.mxu0 %v5421_v18  ;;  %v5497_v17 = vld [vmem:[%s7395_s1 + $0x610] ss:$24 sps:$4 sm:$0xff]  }
 0x129   :  { %2826 = vmatprep.subr.bf16.mxu1 %v5424_v19  ;;  %v5500_v18 = vld [vmem:[%s7395_s1 + $0x910] ss:$24 sps:$4 sm:$0xff]   ;;  %v6864_v19 = vpop.f32.mrf.mxu0 }
 0x12b   :  { %2784 = vmatpush2.bf16.msra.mxu0 %v5419_v22  ;;  %v5505_v22 = vld [vmem:[%s7395_s1 + $0x8e4] ss:$24 sps:$4 sm:$0xff]  }
 0x12c   :  { %2827 = vmatpush2.bf16.msra.mxu1 %v5422_v23  ;;  %2785 = vmatprep.subr.bf16.mxu0 %v5427_v24  ;;  %v5508_v23 = vld [vmem:[%s7395_s1 + $0xbe4] ss:$24 sps:$4 sm:$0xff]   ;;  %v6872_v24 = vpop.f32.mrf.mxu1 }
 0x12d   :  { %2828 = vmatprep.subr.bf16.mxu1 %v5430_v25  ;;  %v5503_v25 = vld [vmem:[%s7395_s1 + $0x8e0] ss:$24 sps:$4 sm:$0xff]  }
 0x12f   :  { %2786 = vmatpush2.bf16.msra.mxu0 %v5425_v26  ;;  %v5506_v26 = vld [vmem:[%s7395_s1 + $0xbe0] ss:$24 sps:$4 sm:$0xff]  }
 0x130   :  { %2829 = vmatpush2.bf16.msra.mxu1 %v5428_v27  ;;  %2787 = vmatprep.subr.bf16.mxu0 %v5433_v28  ;;  %v6880_v27 = vpop.f32.mrf.mxu0  ;;  %v5511_v28 = vld [vmem:[%s7395_s1 + $0x8b4] ss:$24 sps:$4 sm:$0xff]  }
 0x131   :  { %2830 = vmatprep.subr.bf16.mxu1 %v5436_v29  ;;  %v5514_v29 = vld [vmem:[%s7395_s1 + $0xbb4] ss:$24 sps:$4 sm:$0xff]  }
 0x133   :  { %2788 = vmatpush2.bf16.msra.mxu0 %v5431_v30  ;;  %v429_v30 = vlaneseq }
 0x134   :  { %2831 = vmatpush2.bf16.msra.mxu1 %v5434_v31  ;;  %2789 = vmatprep.subr.bf16.mxu0 %v5439_v32  ;;  %v2498_v31 = vpop.f32.mrf.mxu1  ;;  %v5509_v32 = vld [vmem:[%s7395_s1 + $0x8b0] ss:$24 sps:$4 sm:$0xff]  }
 0x135   :  { %2832 = vmatprep.subr.bf16.mxu1 %v5442_v33  ;;  %v5512_v33 = vld [vmem:[%s7395_s1 + $0xbb0] ss:$24 sps:$4 sm:$0xff]  }
 0x137   :  { %2790 = vmatpush2.bf16.msra.mxu0 %v5437_v34  ;;  %v2459_v34 = vpop.f32.mrf.mxu0 }
 0x138   :  { %2833 = vmatpush2.bf16.msra.mxu1 %v5440_v35  ;;  %2791 = vmatprep.subr.bf16.mxu0 %v5445_v36  ;;  %v5517_v35 = vld [vmem:[%s7395_s1 + $0x884] ss:$24 sps:$4 sm:$0xff]  }
 0x139   :  { %2834 = vmatprep.subr.bf16.mxu1 %v5448_v37  ;;  %v5520_v36 = vld [vmem:[%s7395_s1 + $0xb84] ss:$24 sps:$4 sm:$0xff]   ;;  %v6900_v37 = vshrl.u32 %v429_v30, 7 }
 0x13b   :  { %2792 = vmatpush2.bf16.msra.mxu0 %v5443_v38  ;;  %v6902_v38 = vpop.f32.mrf.mxu1 }
 0x13c   :  { %2835 = vmatpush2.bf16.msra.mxu1 %v5446_v39  ;;  %2793 = vmatprep.subr.bf16.mxu0 %v5451_v40  ;;  %v5515_v40 = vld [vmem:[%s7395_s1 + $0x880] ss:$24 sps:$4 sm:$0xff]  }
 0x13d   :  { %2836 = vmatprep.subr.bf16.mxu1 %v5454_v43  ;;  %v5518_v43 = vld [vmem:[%s7395_s1 + $0xb80] ss:$24 sps:$4 sm:$0xff]  }
 0x13f   :  { %2794 = vmatpush2.bf16.msra.mxu0 %v5449_v44  ;;  %v5523_v44 = vld [vmem:[%s7395_s1 + $0x854] ss:$24 sps:$4 sm:$0xff]  }
 0x140   :  { %2837 = vmatpush2.bf16.msra.mxu1 %v5452_v45  ;;  %2849 = vmatprep.subr.bf16.mxu0 %v5457_v46  ;;  %v5526_v45 = vld [vmem:[%s7395_s1 + $0xb54] ss:$24 sps:$4 sm:$0xff]   ;;  %v435_v46 = vsub.s32 1, %v6900_v37 }
 0x141   :  { %2892 = vmatprep.subr.bf16.mxu1 %v5460_v47  ;;  %v6922_v47 = vld [vmem:[%s7398_s2] sm:$0x3f] }
 0x142   :  { %2796 = vmatmul.mubr.bf16.vlgmr.msra.gmra.mxu0 %v5944_v8  ;;  %v6904_v39 = vpop.f32.mrf.mxu0 }
 0x143   :  { %2839 = vmatmul.mubr.bf16.vlgmr.msra.gmra.mxu1 %v5946_v9  ;;  %2850 = vmatpush1.bf16.msra.mxu0 %v5455_v48  ;;  %v2502_v48 = vpop.f32.mrf.mxu1 }
 0x144   :  { %2893 = vmatpush1.bf16.msra.mxu1 %v5458_v49  ;;  %2851 = vmatprep.subr.bf16.mxu0 %v5463_v50  ;;  %v2541_v49 = vpop.f32.mrf.mxu0  ;;  %v5521_v50 = vld [vmem:[%s7395_s1 + $0x850] ss:$24 sps:$4 sm:$0xff]  }
 0x145   :  { %2894 = vmatprep.subr.bf16.mxu1 %v5466_v51  ;;  %2881 = vmatprep.mubr.bf16.mxu0 %v6053_v41  ;;  %v5524_v51 = vld [vmem:[%s7395_s1 + $0xb50] ss:$24 sps:$4 sm:$0xff]  }
 0x146   :  { %2924 = vmatprep.mubr.bf16.mxu1 %v6057_v42 }
 0x147   :  { %2852 = vmatpush1.bf16.msra.mxu0 %v5461_v52  ;;  %v6930_v52 = vpop.f32.mrf.mxu1 }
 0x148   :  { %2895 = vmatpush1.bf16.msra.mxu1 %v5464_v55  ;;  %2853 = vmatprep.subr.bf16.mxu0 %v5469_v56  ;;  %v5529_v55 = vld [vmem:[%s7395_s1 + $0x824] ss:$24 sps:$4 sm:$0xff]  }
 0x149   :  { %2896 = vmatprep.subr.bf16.mxu1 %v5472_v57  ;;  %v5532_v56 = vld [vmem:[%s7395_s1 + $0xb24] ss:$24 sps:$4 sm:$0xff]   ;;  %v436_v57 = vrot.slane %v6922_v47, %v435_v46  ;;  %v5570_v46 = vld [vmem:[%s7397_s3 + $0xb0] sm:$0xff]  }
 0x14b   :  { %2854 = vmatpush1.bf16.msra.mxu0 %v5467_v58  ;;  %v6939_v58 = vpop.f32.mrf.mxu0 }
 0x14c   :  { %2897 = vmatpush1.bf16.msra.mxu1 %v5470_v59  ;;  %2855 = vmatprep.subr.bf16.mxu0 %v5475_v60  ;;  %v2460_v59 = vadd.f32 %v2459_v34, %v436_v57  ;;  %v5527_v60 = vld [vmem:[%s7395_s1 + $0x820] ss:$24 sps:$4 sm:$0xff]   ;;  %v5553_v34 = vld [vmem:[%s7397_s3 + $0x70] sm:$0xff]  }
 0x14d   :  { %2898 = vmatprep.subr.bf16.mxu1 %v5478_v61  ;;  %v5530_v61 = vld [vmem:[%s7395_s1 + $0xb20] ss:$24 sps:$4 sm:$0xff]  }
 0x14f   :  { %2856 = vmatpush1.bf16.msra.mxu0 %v5473_v62  ;;  %v2584_v62 = vpop.f32.mrf.mxu1 }
 0x150   :  { %2899 = vmatpush1.bf16.msra.mxu1 %v5476_v63  ;;  %2857 = vmatprep.subr.bf16.mxu0 %v5481_v0  ;;  %v5535_v63 = vld [vmem:[%s7395_s1 + $0x7f4] ss:$24 sps:$4 sm:$0xff]  }
 0x151   :  { %2900 = vmatprep.subr.bf16.mxu1 %v5484_v1  ;;  %v5538_v0 = vld [vmem:[%s7395_s1 + $0xaf4] ss:$24 sps:$4 sm:$0xff]   ;;  %v2456_v1 = vadd.f32 %v6864_v19, %v436_v57 }
 0x152   :  { %v5550_v19 = vld [vmem:[%s7395_s1 + $0xa94] ss:$24 sps:$4 sm:$0xff]  }
 0x153   :  { %2858 = vmatpush1.bf16.msra.mxu0 %v5479_v2  ;;  %v2545_v2 = vpop.f32.mrf.mxu0 }
 0x154   :  { %2901 = vmatpush1.bf16.msra.mxu1 %v5482_v3  ;;  %2859 = vmatprep.subr.bf16.mxu0 %v5487_v4  ;;  %v2503_v3 = vadd.f32 %v2502_v48, %v2460_v59  ;;  %v5533_v4 = vld [vmem:[%s7395_s1 + $0x7f0] ss:$24 sps:$4 sm:$0xff]   ;;  %v5558_v59 = vld [vmem:[%s7397_s3 + $0x20] sm:$0xff]  }
 0x155   :  { %2902 = vmatprep.subr.bf16.mxu1 %v5490_v5  ;;  %v5536_v5 = vld [vmem:[%s7395_s1 + $0xaf0] ss:$24 sps:$4 sm:$0xff]  }
 0x156   :  { %v5571_v48 = vld [vmem:[%s7397_s3 + $0xe8] sm:$0xff]  }
 0x157   :  { %2860 = vmatpush1.bf16.msra.mxu0 %v5485_v6  ;;  %v6960_v6 = vpop.f32.mrf.mxu1 }
 0x158   :  { %2903 = vmatpush1.bf16.msra.mxu1 %v5488_v7  ;;  %2861 = vmatprep.subr.bf16.mxu0 %v5493_v10  ;;  %v5541_v7 = vld [vmem:[%s7395_s1 + $0x7c4] ss:$24 sps:$4 sm:$0xff]  }
 0x159   :  { %2904 = vmatprep.subr.bf16.mxu1 %v5496_v11  ;;  %v5544_v10 = vld [vmem:[%s7395_s1 + $0xac4] ss:$24 sps:$4 sm:$0xff]   ;;  %v2499_v11 = vadd.f32 %v2498_v31, %v2456_v1  ;;  %v431_v31 = vsub.s32 0, %v6900_v37 }
 0x15b   :  { %2862 = vmatpush1.bf16.msra.mxu0 %v5491_v12  ;;  %v2546_v12 = vadd.f32 %v2545_v2, %v2503_v3  ;;  %v5577_v2 = vld [vmem:[%s7397_s3 + $0xd0] sm:$0xff]   ;;  %v439_v3 = vsub.s32 2, %v6900_v37 }
 0x15c   :  { %2905 = vmatpush1.bf16.msra.mxu1 %v5494_v13  ;;  %2863 = vmatprep.subr.bf16.mxu0 %v5499_v15  ;;  %v2542_v13 = vadd.f32 %v2541_v49, %v2499_v11  ;;  %v5539_v15 = vld [vmem:[%s7395_s1 + $0x7c0] ss:$24 sps:$4 sm:$0xff]   ;;  %v5564_v11 = vld [vmem:[%s7397_s3 + $0x8] sm:$0xff]  }
 0x15d   :  { %2906 = vmatprep.subr.bf16.mxu1 %v5502_v16  ;;  %v5542_v16 = vld [vmem:[%s7395_s1 + $0xac0] ss:$24 sps:$4 sm:$0xff]  }
 0x15f   :  { %2864 = vmatpush1.bf16.msra.mxu0 %v5497_v17  ;;  %v2588_v17 = vpop.f32.mrf.mxu1 }
 0x160   :  { %2907 = vmatpush1.bf16.msra.mxu1 %v5500_v18  ;;  %2865 = vmatprep.subr.bf16.mxu0 %v5505_v22  ;;  %v5547_v18 = vld [vmem:[%s7395_s1 + $0x794] ss:$24 sps:$4 sm:$0xff]   ;;  %v2589_v22 = vadd.f32 %v2588_v17, %v2546_v12  ;;  %v5566_v17 = vld [vmem:[%s7397_s3] sm:$0xff]  }
 0x161   :  { %2908 = vmatprep.subr.bf16.mxu1 %v5508_v23  ;;  %v2585_v23 = vadd.f32 %v2584_v62, %v2542_v13  ;;  %v5579_v12 = vld [vmem:[%s7397_s3 + $0xc8] sm:$0xff]   ;;  %v5565_v13 = vld [vmem:[%s7397_s3 + $0x40] sm:$0xff]  }
 0x162   :  { %v2942_v30 = vmax.f32 %v2589_v22, 0.0  ;;  %v5585_v22 = vld [vmem:[%s7399_s5 + $0x78] sm:$0xff]  }
 0x163   :  { %2866 = vmatpush2.bf16.msra.mxu0 %v5503_v25  ;;  %v5545_v25 = vld [vmem:[%s7395_s1 + $0x790] ss:$24 sps:$4 sm:$0xff]  }
 0x164   :  { %2909 = vmatpush2.bf16.msra.mxu1 %v5506_v26  ;;  %2867 = vmatprep.subr.bf16.mxu0 %v5511_v28  ;;  %v5548_v26 = vld [vmem:[%s7395_s1 + $0xa90] ss:$24 sps:$4 sm:$0xff]   ;;  %v5551_v28 = vld [vmem:[%s7397_s3 + $0x78] sm:$0xff]  }
 0x165   :  { %2910 = vmatprep.subr.bf16.mxu1 %v5514_v29  ;;  %v5567_v29 = vld [vmem:[%s7397_s3 + $0xf8] sm:$0xff]  }
 0x167   :  { %2868 = vmatpush2.bf16.msra.mxu0 %v5509_v32  ;;  %v2936_v32 = vmax.f32 %v2585_v23, 0.0  ;;  %v5584_v23 = vld [vmem:[%s7397_s3 + $0x138] sm:$0xff]  }
 0x168   :  { %2911 = vmatpush2.bf16.msra.mxu1 %v5512_v33  ;;  %2869 = vmatprep.subr.bf16.mxu0 %v5517_v35  ;;  %v5552_v33 = vld [vmem:[%s7397_s3 + $0x38] sm:$0xff]  }
 0x169   :  { %2912 = vmatprep.subr.bf16.mxu1 %v5520_v36  ;;  %v5568_v35 = vld [vmem:[%s7397_s3 + $0xb8] sm:$0xff]   ;;  %v2948_v36 = vpack.c.bf16 %v2942_v30, %v2936_v32  ;;  %v5592_v30 = vld [vmem:[%s7397_s3 + $0x128] sm:$0xff]   ;;  %v5596_v32 = vld [vmem:[%s7397_s3 + $0x120] sm:$0xff]  }
 0x16b   :  { %2870 = vmatpush2.bf16.msra.mxu0 %v5515_v40  ;;  %v5569_v40 = vld [vmem:[%s7397_s3 + $0xf0] sm:$0xff]  }
 0x16c   :  { %2913 = vmatpush2.bf16.msra.mxu1 %v5518_v43  ;;  %2871 = vmatprep.subr.bf16.mxu0 %v5523_v44  ;;  %v432_v43 = vrot.slane %v6922_v47, %v431_v31  ;;  %v5554_v44 = vld [vmem:[%s7397_s3 + $0x30] sm:$0xff]   ;;  %v5595_v31 = vld [vmem:[%s7397_s3 + $0x160] sm:$0xff]  }
 0x16d   :  { %2914 = vmatprep.subr.bf16.mxu1 %v5526_v45  ;;  %v5555_v45 = vld [vmem:[%s7397_s3 + $0x68] sm:$0xff]  }
 0x16e   :  { %v2454_v49 = vadd.f32 %v6850_v14, %v432_v43  ;;  %v5573_v14 = vld [vmem:[%s7397_s3 + $0xe0] sm:$0xff]  }
 0x16f   :  { %2872 = vmatpush2.bf16.msra.mxu0 %v5521_v50  ;;  %v2458_v50 = vadd.f32 %v6880_v27, %v432_v43 }
 0x170   :  { %2915 = vmatpush2.bf16.msra.mxu1 %v5524_v51  ;;  %2873 = vmatprep.subr.bf16.mxu0 %v5529_v55  ;;  %v5556_v51 = vld [vmem:[%s7397_s3 + $0x28] sm:$0xff]   ;;  %v5557_v55 = vld [vmem:[%s7397_s3 + $0x60] sm:$0xff]   ;;  %v2497_v27 = vadd.f32 %v6872_v24, %v2454_v49 }
 0x171   :  { %2916 = vmatprep.subr.bf16.mxu1 %v5532_v56  ;;  %v5572_v56 = vld [vmem:[%s7397_s3 + $0xa8] sm:$0xff]   ;;  %v2501_v57 = vadd.f32 %v6902_v38, %v2458_v50  ;;  %v5575_v38 = vld [vmem:[%s7397_s3 + $0xd8] sm:$0xff]  }
 0x172   :  { %v2540_v62 = vadd.f32 %v6904_v39, %v2497_v27  ;;  %v5576_v39 = vld [vmem:[%s7397_s3 + $0x98] sm:$0xff]  }
 0x173   :  { %2874 = vmatpush2.bf16.msra.mxu0 %v5527_v60  ;;  %v5559_v60 = vld [vmem:[%s7397_s3 + $0x58] sm:$0xff]   ;;  %v2544_v24 = vadd.f32 %v6939_v58, %v2501_v57 }
 0x174   :  { %2917 = vmatpush2.bf16.msra.mxu1 %v5530_v61  ;;  %2875 = vmatprep.subr.bf16.mxu0 %v5535_v63  ;;  %v5574_v61 = vld [vmem:[%s7397_s3 + $0xa0] sm:$0xff]   ;;  %v5560_v63 = vld [vmem:[%s7397_s3 + $0x18] sm:$0xff]   ;;  %v2583_v58 = vadd.f32 %v6930_v52, %v2540_v62  ;;  %v443_v52 = vsub.s32 3, %v6900_v37 }
 0x175   :  { %2918 = vmatprep.subr.bf16.mxu1 %v5538_v0  ;;  %v5561_v0 = vld [vmem:[%s7397_s3 + $0x50] sm:$0xff]   ;;  %v2587_v1 = vadd.f32 %v6960_v6, %v2544_v24 }
 0x176   :  { %v5578_v6 = vld [vmem:[%s7397_s3 + $0x90] sm:$0xff]   ;;  %v444_v43 = vrot.slane %v6922_v47, %v443_v52  ;;  %v5608_v52 = vld [vmem:[%s7397_s3 + $0x108] sm:$0xff]  }
 0x177   :  { %2876 = vmatpush2.bf16.msra.mxu0 %v5533_v4  ;;  %v5562_v4 = vld [vmem:[%s7397_s3 + $0x10] sm:$0xff]  }
 0x178   :  { %2919 = vmatpush2.bf16.msra.mxu1 %v5536_v5  ;;  %2877 = vmatprep.subr.bf16.mxu0 %v5541_v7  ;;  %v5563_v5 = vld [vmem:[%s7397_s3 + $0x48] sm:$0xff]   ;;  %v2935_v7 = vmax.f32 %v2583_v58, 0.0 }
 0x179   :  { %2920 = vmatprep.subr.bf16.mxu1 %v5544_v10  ;;  %v2941_v10 = vmax.f32 %v2587_v1, 0.0 }
 0x17b   :  { %2878 = vmatpush2.bf16.msra.mxu0 %v5539_v15  ;;  %v5580_v15 = vld [vmem:[%s7397_s3 + $0x88] sm:$0xff]  }
 0x17c   :  { %2921 = vmatpush2.bf16.msra.mxu1 %v5542_v16  ;;  %2879 = vmatprep.subr.bf16.mxu0 %v5547_v18  ;;  %v5581_v16 = vld [vmem:[%s7397_s3 + $0xc0] sm:$0xff]  }
 0x17d   :  { %2922 = vmatprep.subr.bf16.mxu1 %v5550_v19  ;;  %v5582_v18 = vld [vmem:[%s7397_s3 + $0x80] sm:$0xff]   ;;  %v5583_v19 = vld [vmem:[%s7397_s3 + $0x178] sm:$0xff]  }
 0x17f   :  { %2880 = vmatpush2.bf16.msra.mxu0 %v5545_v25  ;;  %v5587_v25 = vld [vmem:[%s7397_s3 + $0x170] sm:$0xff]  }
 0x180   :  { %2923 = vmatpush2.bf16.msra.mxu1 %v5548_v26  ;;  %4790 = vmatprep.subr.bf16.mxu0 %v5551_v28  ;;  %v2947_v26 = vpack.c.bf16 %v2941_v10, %v2935_v7  ;;  %v5588_v28 = vld [vmem:[%s7397_s3 + $0x130] sm:$0xff]  }
 0x181   :  { %4812 = vmatprep.subr.bf16.mxu1 %v5567_v29  ;;  %v5591_v29 = vld [vmem:[%s7397_s3 + $0x168] sm:$0xff]  }
 0x182   :  { %2882 = vmatmul.mubr.bf16.vlgmr.msra.gmra.mxu0 %v6174_v20 }
 0x183   :  { %2925 = vmatmul.mubr.bf16.vlgmr.msra.gmra.mxu1 %v6178_v21  ;;  %4791 = vmatpush3.bf16.msra.mxu0 %v5552_v33  ;;  %v5599_v33 = vld [vmem:[%s7397_s3 + $0x158] sm:$0xff]  }
 0x184   :  { %3376 = vmatprep.mubr.bf16.mxu0 %v2948_v36  ;;  %4792 = vmatprep.subr.bf16.mxu0 %v5553_v34  ;;  %v2625_v34 = vpop.f32.mrf.mxu0 }
 0x185   :  { %4813 = vmatpush3.bf16.msra.mxu1 %v5568_v35  ;;  %v2668_v35 = vpop.f32.mrf.mxu1 }
 0x186   :  { %4814 = vmatprep.subr.bf16.mxu1 %v5569_v40  ;;  %v2627_v36 = vpop.f32.mrf.mxu0 }
 0x187   :  { %4793 = vmatpush3.bf16.msra.mxu0 %v5554_v44  ;;  %v2670_v40 = vpop.f32.mrf.mxu1  ;;  %v440_v44 = vrot.slane %v6922_v47, %v439_v3 }
 0x188   :  { %4794 = vmatprep.subr.bf16.mxu0 %v5555_v45  ;;  %v2629_v45 = vpop.f32.mrf.mxu0 }
 0x189   :  { %4815 = vmatpush3.bf16.msra.mxu1 %v5570_v46  ;;  %v2672_v46 = vpop.f32.mrf.mxu1  ;;  %v2626_v49 = vadd.f32 %v2625_v34, %v440_v44  ;;  %v5601_v34 = vld [vmem:[%s7399_s5 + $0x58] sm:$0xff]  }
 0x18a   :  { %4816 = vmatprep.subr.bf16.mxu1 %v5571_v48  ;;  %v2628_v48 = vadd.f32 %v2627_v36, %v444_v43  ;;  %v2631_v50 = vpop.f32.mrf.mxu0  ;;  %v5605_v36 = vld [vmem:[%s7399_s5 + $0x50] sm:$0xff]  }
 0x18b   :  { %4795 = vmatpush3.bf16.msra.mxu0 %v5556_v51  ;;  %v2674_v51 = vpop.f32.mrf.mxu1 }
 0x18c   :  { %4796 = vmatprep.subr.bf16.mxu0 %v5557_v55  ;;  %v5600_v55 = vld [vmem:[%s7397_s3 + $0x118] sm:$0xff]   ;;  %v2671_v57 = vadd.f32 %v2670_v40, %v2628_v48  ;;  %v5606_v40 = vld [vmem:[%s7399_s5 + $0x10] sm:$0xff]  }
 0x18d   :  { %4817 = vmatpush3.bf16.msra.mxu1 %v5572_v56  ;;  %v2630_v56 = vadd.f32 %v2629_v45, %v440_v44  ;;  %v5610_v44 = vld [vmem:[%s7399_s5 + $0x8] sm:$0xff]   ;;  %v5613_v45 = vld [vmem:[%s7399_s5 + $0x40] sm:$0xff]   ;;  %v5617_v48 = vld [vmem:[%s7399_s5 + $0x178] sm:$0xff]  }
 0x18e   :  { %4818 = vmatprep.subr.bf16.mxu1 %v5573_v14 }
 0x18f   :  { %4797 = vmatpush3.bf16.msra.mxu0 %v5558_v59  ;;  %v2632_v59 = vadd.f32 %v2631_v50, %v444_v43  ;;  %v5609_v43 = vld [vmem:[%s7399_s5 + $0x48] sm:$0xff]   ;;  %v5621_v50 = vld [vmem:[%s7399_s5 + $0x170] sm:$0xff]  }
 0x190   :  { %4798 = vmatprep.subr.bf16.mxu0 %v5559_v60  ;;  %v5603_v60 = vld [vmem:[%s7397_s3 + $0x150] sm:$0xff]  }
 0x191   :  { %4819 = vmatpush3.bf16.msra.mxu1 %v5574_v61  ;;  %v2669_v61 = vadd.f32 %v2668_v35, %v2626_v49  ;;  %v5602_v35 = vld [vmem:[%s7399_s5 + $0x18] sm:$0xff]  }
 0x192   :  { %4820 = vmatprep.subr.bf16.mxu1 %v5575_v38  ;;  %v5604_v38 = vld [vmem:[%s7397_s3 + $0x110] sm:$0xff]   ;;  %v5618_v49 = vld [vmem:[%s7399_s5 + $0x138] sm:$0xff]  }
 0x193   :  { %4799 = vmatpush3.bf16.msra.mxu0 %v5560_v63  ;;  %v2673_v63 = vadd.f32 %v2672_v46, %v2630_v56  ;;  %v5614_v46 = vld [vmem:[%s7399_s5] sm:$0xff]   ;;  %v5626_v56 = vld [vmem:[%s7399_s5 + $0x128] sm:$0xff]  }
 0x194   :  { %4800 = vmatprep.subr.bf16.mxu0 %v5561_v0 }
 0x195   :  { %4821 = vmatpush3.bf16.msra.mxu1 %v5576_v39 }
 0x196   :  { %4822 = vmatprep.subr.bf16.mxu1 %v5577_v2  ;;  %v2675_v2 = vadd.f32 %v2674_v51, %v2632_v59  ;;  %v5622_v51 = vld [vmem:[%s7399_s5 + $0x130] sm:$0xff]  }
 0x197   :  { %4801 = vmatpush3.bf16.msra.mxu0 %v5562_v4  ;;  %v5607_v4 = vld [vmem:[%s7397_s3 + $0x148] sm:$0xff]   ;;  %v5638_v59 = vld [vmem:[%s7399_s5 + $0x110] sm:$0xff]  }
 0x198   :  { %4802 = vmatprep.subr.bf16.mxu0 %v5563_v5 }
 0x199   :  { %4823 = vmatpush3.bf16.msra.mxu1 %v5578_v6 }
 0x19a   :  { %4824 = vmatprep.subr.bf16.mxu1 %v5579_v12 }
 0x19b   :  { %4803 = vmatpush3.bf16.msra.mxu0 %v5564_v11 }
 0x19c   :  { %4804 = vmatprep.subr.bf16.mxu0 %v5565_v13 }
 0x19d   :  { %4825 = vmatpush3.bf16.msra.mxu1 %v5580_v15  ;;  %v5611_v15 = vld [vmem:[%s7397_s3 + $0x140] sm:$0xff]  }
 0x19e   :  { %4826 = vmatprep.subr.bf16.mxu1 %v5581_v16 }
 0x19f   :  { %4805 = vmatpush3.bf16.msra.mxu0 %v5566_v17  ;;  %v5612_v17 = vld [vmem:[%s7397_s3 + $0x100] sm:$0xff]  }
 0x1a0   :  { %4834 = vmatprep.subr.bf16.mxu0 %v5583_v19 }
 0x1a1   :  { %4827 = vmatpush3.bf16.msra.mxu1 %v5582_v18 }
 0x1a2   :  { %4856 = vmatprep.subr.bf16.mxu1 %v5585_v22  ;;  %3377 = vmatmul.mubr.bf16.vlgmr.msra.gmra.mxu0 %v2947_v26  ;;  %v5615_v26 = vld [vmem:[%s7399_s5 + $0xf8] sm:$0xff]  }
 0x1a3   :  { %4835 = vmatpush3.bf16.msra.mxu0 %v5584_v23 }
 0x1a4   :  { %4836 = vmatprep.subr.bf16.mxu0 %v5587_v25  ;;  %v5586_v25 = vld [vmem:[%s7399_s5 + $0x38] sm:$0xff]  }
 0x1a7   :  { %4837 = vmatpush3.bf16.msra.mxu0 %v5588_v28 }
 0x1a8   :  { %4838 = vmatprep.subr.bf16.mxu0 %v5591_v29  ;;  %v5589_v29 = vld [vmem:[%s7399_s5 + $0x70] sm:$0xff]  }
 0x1ab   :  { %4839 = vmatpush3.bf16.msra.mxu0 %v5592_v30  ;;  %v5590_v30 = vld [vmem:[%s7399_s5 + $0x30] sm:$0xff]  }
 0x1ac   :  { %4840 = vmatprep.subr.bf16.mxu0 %v5595_v31  ;;  %v5593_v31 = vld [vmem:[%s7399_s5 + $0x68] sm:$0xff]  }
 0x1af   :  { %4841 = vmatpush3.bf16.msra.mxu0 %v5596_v32  ;;  %v5594_v32 = vld [vmem:[%s7399_s5 + $0x28] sm:$0xff]  }
 0x1b0   :  { %4842 = vmatprep.subr.bf16.mxu0 %v5599_v33  ;;  %v5597_v33 = vld [vmem:[%s7399_s5 + $0x60] sm:$0xff]  }
 0x1b3   :  { %4843 = vmatpush3.bf16.msra.mxu0 %v5600_v55  ;;  %v5625_v55 = vld [vmem:[%s7399_s5 + $0x168] sm:$0xff]  }
 0x1b4   :  { %4844 = vmatprep.subr.bf16.mxu0 %v5603_v60  ;;  %v5641_v60 = vld [vmem:[%s7399_s5 + $0x148] sm:$0xff]  }
 0x1b7   :  { %4845 = vmatpush3.bf16.msra.mxu0 %v5604_v38 }
 0x1b8   :  { %4846 = vmatprep.subr.bf16.mxu0 %v5607_v4 }
 0x1bb   :  { %4847 = vmatpush3.bf16.msra.mxu0 %v5608_v52 }
 0x1bc   :  { %4848 = vmatprep.subr.bf16.mxu0 %v5611_v15 }
 0x1bf   :  { %4849 = vmatpush3.bf16.msra.mxu0 %v5612_v17 }
 0x1c0   :  { %4878 = vmatprep.subr.bf16.mxu0 %v5615_v26 }
 0x1c2   :  { %v2711_v14 = vpop.f32.mrf.mxu0 }
 0x1c3   :  { %v2754_v27 = vpop.f32.mrf.mxu1  ;;  %v2712_v39 = vadd.f32 %v2711_v14, %v2669_v61  ;;  %v5633_v14 = vld [vmem:[%s7399_s5 + $0x158] sm:$0xff]   ;;  %v5642_v61 = vld [vmem:[%s7399_s5 + $0x108] sm:$0xff]  }
 0x1c4   :  { %v2713_v62 = vpop.f32.mrf.mxu0 }
 0x1c5   :  { %v2756_v24 = vpop.f32.mrf.mxu1  ;;  %v2714_v0 = vadd.f32 %v2713_v62, %v2671_v57  ;;  %v2755_v11 = vadd.f32 %v2754_v27, %v2712_v39  ;;  %v5634_v27 = vld [vmem:[%s7399_s5 + $0x118] sm:$0xff]   ;;  %v5637_v57 = vld [vmem:[%s7399_s5 + $0x150] sm:$0xff]   ;;  %v5645_v62 = vld [vmem:[%s7399_s5 + $0x140] sm:$0xff]   ;;  %v447_v39 = vsub.s32 4, %v6900_v37 }
 0x1c6   :  { %v2715_v58 = vpop.f32.mrf.mxu0 }
 0x1c7   :  { %v2758_v1 = vpop.f32.mrf.mxu1  ;;  %v2716_v3 = vadd.f32 %v2715_v58, %v2673_v63  ;;  %v2757_v6 = vadd.f32 %v2756_v24, %v2714_v0  ;;  %v2937_v22 = vmax.f32 %v2755_v11, 0.0  ;;  %v5646_v24 = vld [vmem:[%s7399_s5 + $0x100] sm:$0xff]   ;;  %v451_v0 = vsub.s32 5, %v6900_v37 }
 0x1c8   :  { %v2717_v5 = vpop.f32.mrf.mxu0 }
 0x1c9   :  { %v2759_v7 = vadd.f32 %v2758_v1, %v2716_v3  ;;  %v2718_v10 = vadd.f32 %v2717_v5, %v2675_v2  ;;  %v2760_v12 = vpop.f32.mrf.mxu1  ;;  %v2938_v18 = vmax.f32 %v2757_v6, 0.0  ;;  %v452_v2 = vrot.slane %v6922_v47, %v451_v0  ;;  %v5655_v0 = vld [vmem:[%s7399_s5 + $0x1d8] sm:$0xff]  }
 0x1ca   :  { %v448_v3 = vrot.slane %v6922_v47, %v447_v39  ;;  %v5656_v39 = vld [vmem:[%s7399_s5 + $0x198] sm:$0xff]  }
 0x1cb   :  { %v2761_v13 = vadd.f32 %v2760_v12, %v2718_v10  ;;  %v2943_v16 = vmax.f32 %v2759_v7, 0.0 }
 0x1cd   :  { %v2944_v19 = vmax.f32 %v2761_v13, 0.0  ;;  %v2949_v28 = vpack.c.bf16 %v2943_v16, %v2937_v22 }
 0x1cf   :  { %v2950_v23 = vpack.c.bf16 %v2944_v19, %v2938_v18 }
 0x1d1   :  { %3417 = vmatprep.mubr.bf16.mxu1 %v2950_v23 }
 0x1d2   :  { %3418 = vmatmul.mubr.bf16.vlgmr.msra.gmra.mxu1 %v2949_v28 }
 0x1d3   :  { %4857 = vmatpush3.bf16.msra.mxu1 %v5586_v25  ;;  %4020 = vmatprep.mubr.bf16.mxu1 %v5887_v53  ;;  %v5598_v53 = vld [vmem:[%s7399_s5 + $0x20] sm:$0xff]  }
 0x1d4   :  { %4858 = vmatprep.subr.bf16.mxu1 %v5589_v29 }
 0x1d7   :  { %4859 = vmatpush3.bf16.msra.mxu1 %v5590_v30 }
 0x1d8   :  { %4860 = vmatprep.subr.bf16.mxu1 %v5593_v31 }
 0x1db   :  { %4861 = vmatpush3.bf16.msra.mxu1 %v5594_v32 }
 0x1dc   :  { %4862 = vmatprep.subr.bf16.mxu1 %v5597_v33 }
 0x1df   :  { %4863 = vmatpush3.bf16.msra.mxu1 %v5598_v53 }
 0x1e0   :  { %4864 = vmatprep.subr.bf16.mxu1 %v5601_v34 }
 0x1e3   :  { %4865 = vmatpush3.bf16.msra.mxu1 %v5602_v35 }
 0x1e4   :  { %4866 = vmatprep.subr.bf16.mxu1 %v5605_v36 }
 0x1e7   :  { %4867 = vmatpush3.bf16.msra.mxu1 %v5606_v40 }
 0x1e8   :  { %4868 = vmatprep.subr.bf16.mxu1 %v5609_v43 }
 0x1eb   :  { %4869 = vmatpush3.bf16.msra.mxu1 %v5610_v44  ;;  %v5616_v44 = vld [vmem:[%s7399_s5 + $0xb8] sm:$0xff]  }
 0x1ec   :  { %4870 = vmatprep.subr.bf16.mxu1 %v5613_v45 }
 0x1ef   :  { %4871 = vmatpush3.bf16.msra.mxu1 %v5614_v46  ;;  %v5619_v46 = vld [vmem:[%s7399_s5 + $0xf0] sm:$0xff]  }
 0x1f0   :  { %4900 = vmatprep.subr.bf16.mxu1 %v5617_v48  ;;  %v5620_v48 = vld [vmem:[%s7399_s5 + $0xb0] sm:$0xff]  }
 0x1f2   :  { %4021 = vmatmul.mubr.bf16.vlgmr.msra.gmra.mxu1 %v5944_v8  ;;  %v5629_v8 = vld [vmem:[%s7399_s5 + $0x160] sm:$0xff]  }
 0x1f3   :  { %4901 = vmatpush3.bf16.msra.mxu1 %v5618_v49  ;;  %4102 = vmatprep.mubr.bf16.mxu1 %v6053_v41  ;;  %v5630_v41 = vld [vmem:[%s7399_s5 + $0x120] sm:$0xff]   ;;  %v5623_v49 = vld [vmem:[%s7399_s5 + $0xe8] sm:$0xff]  }
 0x1f4   :  { %4902 = vmatprep.subr.bf16.mxu1 %v5621_v50  ;;  %v5624_v50 = vld [vmem:[%s7399_s5 + $0xa8] sm:$0xff]  }
 0x1f7   :  { %4903 = vmatpush3.bf16.msra.mxu1 %v5622_v51  ;;  %v5627_v51 = vld [vmem:[%s7399_s5 + $0xe0] sm:$0xff]  }
 0x1f8   :  { %4904 = vmatprep.subr.bf16.mxu1 %v5625_v55  ;;  %v5631_v55 = vld [vmem:[%s7399_s5 + $0xd8] sm:$0xff]  }
 0x1fb   :  { %4905 = vmatpush3.bf16.msra.mxu1 %v5626_v56  ;;  %v5632_v56 = vld [vmem:[%s7399_s5 + $0x98] sm:$0xff]  }
 0x1fc   :  { %4906 = vmatprep.subr.bf16.mxu1 %v5629_v8  ;;  %v5635_v8 = vld [vmem:[%s7399_s5 + $0xd0] sm:$0xff]  }
 0x1ff   :  { %4907 = vmatpush3.bf16.msra.mxu1 %v5630_v41  ;;  %v5636_v41 = vld [vmem:[%s7399_s5 + $0x90] sm:$0xff]  }
 0x200   :  { %4908 = vmatprep.subr.bf16.mxu1 %v5633_v14  ;;  %v5639_v14 = vld [vmem:[%s7399_s5 + $0xc8] sm:$0xff]  }
 0x202   :  { %v2797_v38 = vpop.f32.mrf.mxu0 }
 0x203   :  { %4909 = vmatpush3.bf16.msra.mxu1 %v5634_v27  ;;  %v2840_v63 = vpop.f32.mrf.mxu1  ;;  %v2798_v6 = vadd.f32 %v2797_v38, %v448_v3  ;;  %v5640_v27 = vld [vmem:[%s7399_s5 + $0x88] sm:$0xff]  }
 0x204   :  { %4910 = vmatprep.subr.bf16.mxu1 %v5637_v57  ;;  %v2799_v58 = vpop.f32.mrf.mxu0  ;;  %v5643_v57 = vld [vmem:[%s7399_s5 + $0xc0] sm:$0xff]   ;;  %v5651_v38 = vld [vmem:[%s7399_s5 + $0x1e8] sm:$0xff]  }
 0x205   :  { %v2842_v1 = vpop.f32.mrf.mxu1  ;;  %v2800_v52 = vadd.f32 %v2799_v58, %v452_v2  ;;  %v2841_v16 = vadd.f32 %v2840_v63, %v2798_v6  ;;  %v5652_v63 = vld [vmem:[%s7399_s5 + $0x1a8] sm:$0xff]   ;;  %v5657_v58 = vld [vmem:[%s7399_s5 + $0x1d0] sm:$0xff]   ;;  %v5663_v6 = vld [vmem:[%s7400_s7 + $0x38] sm:$0xff]  }
 0x206   :  { %v2801_v4 = vpop.f32.mrf.mxu0 }
 0x207   :  { %4911 = vmatpush3.bf16.msra.mxu1 %v5638_v59  ;;  %v2844_v5 = vpop.f32.mrf.mxu1  ;;  %v2802_v11 = vadd.f32 %v2801_v4, %v448_v3  ;;  %v2843_v13 = vadd.f32 %v2842_v1, %v2800_v52  ;;  %v5644_v59 = vld [vmem:[%s7399_s5 + $0x80] sm:$0xff]   ;;  %v5658_v1 = vld [vmem:[%s7399_s5 + $0x190] sm:$0xff]   ;;  %v5660_v3 = vld [vmem:[%s7399_s5 + $0x188] sm:$0xff]   ;;  %v5671_v52 = vmov 0.0  }
 0x208   :  { %4912 = vmatprep.subr.bf16.mxu1 %v5641_v60  ;;  %v2803_v7 = vpop.f32.mrf.mxu0  ;;  %v5647_v60 = vld [vmem:[%s7399_s5 + $0x1f8] sm:$0xff]   ;;  %v5661_v4 = vld [vmem:[%s7399_s5 + $0x1c0] sm:$0xff]  }
 0x209   :  { %v2846_v10 = vpop.f32.mrf.mxu1  ;;  %v2804_v15 = vadd.f32 %v2803_v7, %v452_v2  ;;  %v2845_v18 = vadd.f32 %v2844_v5, %v2802_v11  ;;  %v5659_v2 = vld [vmem:[%s7399_s5 + $0x1c8] sm:$0xff]   ;;  %v5662_v5 = vld [vmem:[%s7399_s5 + $0x180] sm:$0xff]   ;;  %v5664_v7 = vld [vmem:[%s7400_s7 + $0x30] sm:$0xff]  }
 0x20a   :  { %v5667_v11 = vld [vmem:[%s7400_s7 + $0x18] sm:$0xff]  }
 0x20b   :  { %4913 = vmatpush3.bf16.msra.mxu1 %v5642_v61  ;;  %v2847_v47 = vadd.f32 %v2846_v10, %v2804_v15  ;;  %v5648_v61 = vld [vmem:[%s7399_s5 + $0x1b8] sm:$0xff]   ;;  %v5665_v10 = vld [vmem:[%s7400_s7 + $0x28] sm:$0xff]  }
 0x20c   :  { %4914 = vmatprep.subr.bf16.mxu1 %v5645_v62  ;;  %v5649_v62 = vld [vmem:[%s7399_s5 + $0x1f0] sm:$0xff]  }
 0x20f   :  { %4915 = vmatpush3.bf16.msra.mxu1 %v5646_v24  ;;  %v5650_v24 = vld [vmem:[%s7399_s5 + $0x1b0] sm:$0xff]  }
 0x210   :  { %4953 = vmatprep.subr.bf16.mxu1 %v5671_v52 }
 0x212   :  { %4103 = vmatmul.mubr.bf16.vlgmr.msra.gmra.mxu1 %v6174_v20 }
 0x213   :  { %4954 = vmatpush3.bf16.msra.mxu1 %v5663_v6  ;;  %4969 = vmatprep.mubr.msk.bf16.mxu1 %vm5672_vm0, %v5671_v52 }
 0x214   :  { %4955 = vmatprep.subr.bf16.mxu1 %v5671_v52 }
 0x217   :  { %4956 = vmatpush3.bf16.msra.mxu1 %v5664_v7 }
 0x218   :  { %4957 = vmatprep.subr.bf16.mxu1 %v5671_v52 }
 0x21b   :  { %4958 = vmatpush3.bf16.msra.mxu1 %v5665_v10 }
 0x21c   :  { %4959 = vmatprep.subr.bf16.mxu1 %v5671_v52 }
 0x242   :  { %v2883_v20 = vpop.f32.mrf.mxu0 }
 0x243   :  { %v2926_v12 = vpop.f32.mrf.mxu1  ;;  %v2884_v22 = vadd.f32 %v2883_v20, %v2841_v16  ;;  %v5668_v20 = vld [vmem:[%s7400_s7 + $0x10] sm:$0xff]  }
 0x244   :  { %v2885_v17 = vpop.f32.mrf.mxu0 }
 0x245   :  { %v2928_v37 = vpop.f32.mrf.mxu1  ;;  %v2886_v19 = vadd.f32 %v2885_v17, %v2843_v13  ;;  %v2927_v32 = vadd.f32 %v2926_v12, %v2884_v22  ;;  %v5669_v12 = vld [vmem:[%s7400_s7 + $0x8] sm:$0xff]   ;;  %v5670_v13 = vld [vmem:[%s7400_s7] sm:$0xff]  }
 0x246   :  { %v2887_v23 = vpop.f32.mrf.mxu0 }
 0x247   :  { %v2930_v25 = vpop.f32.mrf.mxu1  ;;  %v2888_v26 = vadd.f32 %v2887_v23, %v2845_v18  ;;  %v2929_v29 = vadd.f32 %v2928_v37, %v2886_v19  ;;  %v2939_v40 = vmax.f32 %v2927_v32, 0.0  ;;  %v4667_v23 = vld [vmem:[%s7401_s4] ss:$0 sm:$0xff] }
 0x248   :  { %v2889_v28 = vpop.f32.mrf.mxu0 }
 0x249   :  { %v2931_v30 = vadd.f32 %v2930_v25, %v2888_v26  ;;  %v2890_v31 = vadd.f32 %v2889_v28, %v2847_v47  ;;  %v2932_v33 = vpop.f32.mrf.mxu1  ;;  %v2940_v35 = vmax.f32 %v2929_v29, 0.0 }
 0x24b   :  { %v2933_v53 = vadd.f32 %v2932_v33, %v2890_v31  ;;  %v2945_v34 = vmax.f32 %v2931_v30, 0.0 }
 0x24d   :  { %v2946_v36 = vmax.f32 %v2933_v53, 0.0  ;;  %v2951_v45 = vpack.c.bf16 %v2945_v34, %v2939_v40 }
 0x24f   :  { %v2952_v43 = vpack.c.bf16 %v2946_v36, %v2940_v35 }
 0x251   :  { %3458 = vmatprep.mubr.bf16.mxu0 %v2952_v43 }
 0x252   :  { %3459 = vmatmul.mubr.bf16.vlgmr.msra.gmra.mxu0 %v2951_v45 }
 0x253   :  { %4879 = vmatpush3.bf16.msra.mxu0 %v5616_v44  ;;  %4061 = vmatprep.mubr.bf16.mxu0 %v5889_v54  ;;  %v5628_v54 = vld [vmem:[%s7399_s5 + $0xa0] sm:$0xff]  }
 0x254   :  { %4880 = vmatprep.subr.bf16.mxu0 %v5619_v46 }
 0x257   :  { %4881 = vmatpush3.bf16.msra.mxu0 %v5620_v48 }
 0x258   :  { %4882 = vmatprep.subr.bf16.mxu0 %v5623_v49 }
 0x25b   :  { %4883 = vmatpush3.bf16.msra.mxu0 %v5624_v50 }
 0x25c   :  { %4884 = vmatprep.subr.bf16.mxu0 %v5627_v51 }
 0x25f   :  { %4885 = vmatpush3.bf16.msra.mxu0 %v5628_v54 }
 0x260   :  { %4886 = vmatprep.subr.bf16.mxu0 %v5631_v55 }
 0x262   :  { %v4806_v15 = vpop.f32.mrf.mxu0 }
 0x263   :  { %4887 = vmatpush3.bf16.msra.mxu0 %v5632_v56 }
 0x264   :  { %4888 = vmatprep.subr.bf16.mxu0 %v5635_v8  ;;  %v4807_v17 = vpop.f32.mrf.mxu0 }
 0x265   :  { %v4808_v22 = vadd.f32 %v4807_v17, %v4806_v15 }
 0x266   :  { %v4809_v18 = vpop.f32.mrf.mxu0 }
 0x267   :  { %4889 = vmatpush3.bf16.msra.mxu0 %v5636_v41  ;;  %v3379_v29 = vadd.f32 %v4808_v22, %v4667_v23 }
 0x268   :  { %4890 = vmatprep.subr.bf16.mxu0 %v5639_v14  ;;  %v4810_v25 = vpop.f32.mrf.mxu0  ;;  %v4716_v14 = vld [vmem:[%s7403_s6] ss:$0 sm:$0xff] }
 0x269   :  { %v4811_v30 = vadd.f32 %v4810_v25, %v4809_v18 }
 0x26b   :  { %4891 = vmatpush3.bf16.msra.mxu0 %v5640_v27  ;;  %v3382_v35 = vadd.f32 %v4811_v30, %v4667_v23 }
 0x26c   :  { %4892 = vmatprep.subr.bf16.mxu0 %v5643_v57 }
 0x26f   :  { %4893 = vmatpush3.bf16.msra.mxu0 %v5644_v59 }
 0x270   :  { %4922 = vmatprep.subr.bf16.mxu0 %v5647_v60 }
 0x272   :  { %4062 = vmatmul.mubr.bf16.vlgmr.msra.gmra.mxu0 %v5946_v9  ;;  %v5653_v9 = vld [vmem:[%s7399_s5 + $0x1e0] sm:$0xff]  }
 0x273   :  { %4923 = vmatpush3.bf16.msra.mxu0 %v5648_v61  ;;  %4143 = vmatprep.mubr.bf16.mxu0 %v6057_v42  ;;  %v5654_v42 = vld [vmem:[%s7399_s5 + $0x1a0] sm:$0xff]  }
 0x274   :  { %4924 = vmatprep.subr.bf16.mxu0 %v5649_v62 }
 0x277   :  { %4925 = vmatpush3.bf16.msra.mxu0 %v5650_v24 }
 0x278   :  { %4926 = vmatprep.subr.bf16.mxu0 %v5651_v38 }
 0x27b   :  { %4927 = vmatpush3.bf16.msra.mxu0 %v5652_v63 }
 0x27c   :  { %4928 = vmatprep.subr.bf16.mxu0 %v5653_v9 }
 0x27f   :  { %4929 = vmatpush3.bf16.msra.mxu0 %v5654_v42 }
 0x280   :  { %4930 = vmatprep.subr.bf16.mxu0 %v5655_v0 }
 0x283   :  { %4931 = vmatpush3.bf16.msra.mxu0 %v5656_v39 }
 0x284   :  { %4932 = vmatprep.subr.bf16.mxu0 %v5657_v58 }
 0x287   :  { %4933 = vmatpush3.bf16.msra.mxu0 %v5658_v1 }
 0x288   :  { %4934 = vmatprep.subr.bf16.mxu0 %v5659_v2 }
 0x28b   :  { %4935 = vmatpush3.bf16.msra.mxu0 %v5660_v3 }
 0x28c   :  { %4936 = vmatprep.subr.bf16.mxu0 %v5661_v4 }
 0x28f   :  { %4937 = vmatpush3.bf16.msra.mxu0 %v5662_v5 }
 0x292   :  { %4144 = vmatmul.mubr.bf16.vlgmr.msra.gmra.mxu0 %v6178_v21  ;;  %v5666_v21 = vld [vmem:[%s7400_s7 + $0x20] sm:$0xff]   ;;  %v4828_v16 = vpop.f32.mrf.mxu1 }
 0x293   :  { %4960 = vmatpush3.bf16.msra.mxu1 %v5666_v21  ;;  %v4781_v21 = vld [vmem:[%s7404_s8] ss:$0 sm:$0xff] }
 0x294   :  { %4961 = vmatprep.subr.bf16.mxu1 %v5671_v52  ;;  %v4829_v37 = vpop.f32.mrf.mxu1 }
 0x295   :  { %v4830_v47 = vadd.f32 %v4829_v37, %v4828_v16 }
 0x296   :  { %v4831_v19 = vpop.f32.mrf.mxu1 }
 0x297   :  { %4962 = vmatpush3.bf16.msra.mxu1 %v5667_v11  ;;  %v3420_v32 = vadd.f32 %v4830_v47, %v3379_v29 }
 0x298   :  { %4963 = vmatprep.subr.bf16.mxu1 %v5671_v52  ;;  %v4832_v26 = vpop.f32.mrf.mxu1 }
 0x299   :  { %v4833_v33 = vadd.f32 %v4832_v26, %v4831_v19 }
 0x29b   :  { %4964 = vmatpush3.bf16.msra.mxu1 %v5668_v20  ;;  %v3423_v43 = vadd.f32 %v4833_v33, %v3382_v35 }
 0x29c   :  { %4965 = vmatprep.subr.bf16.mxu1 %v5671_v52 }
 0x29f   :  { %4966 = vmatpush3.bf16.msra.mxu1 %v5669_v12 }
 0x2a0   :  { %4967 = vmatprep.subr.bf16.mxu1 %v5671_v52 }
 0x2a3   :  { %4968 = vmatpush3.bf16.msra.mxu1 %v5670_v13 }
 0x2b2   :  { %v4872_v46 = vpop.f32.mrf.mxu1 }
 0x2b4   :  { %v4873_v48 = vpop.f32.mrf.mxu1 }
 0x2b5   :  { %v4874_v41 = vadd.f32 %v4873_v48, %v4872_v46 }
 0x2b6   :  { %v4875_v49 = vpop.f32.mrf.mxu1 }
 0x2b7   :  { %v4023_v60 = vadd.f32 %v4874_v41, %v4716_v14 }
 0x2b8   :  { %v4876_v50 = vpop.f32.mrf.mxu1 }
 0x2b9   :  { %v4877_v59 = vadd.f32 %v4876_v50, %v4875_v49 }
 0x2bb   :  { %v4026_v63 = vadd.f32 %v4877_v59, %v4716_v14 }
 0x2d2   :  { %v4916_v55 = vpop.f32.mrf.mxu1 }
 0x2d4   :  { %v4917_v8 = vpop.f32.mrf.mxu1 }
 0x2d5   :  { %v4918_v0 = vadd.f32 %v4917_v8, %v4916_v55 }
 0x2d6   :  { %v4919_v57 = vpop.f32.mrf.mxu1 }
 0x2d8   :  { %v4920_v24 = vpop.f32.mrf.mxu1 }
 0x2d9   :  { %v4921_v58 = vadd.f32 %v4920_v24, %v4919_v57 }
 0x312   :  { %v4850_v28 = vpop.f32.mrf.mxu0 }
 0x314   :  { %v4851_v31 = vpop.f32.mrf.mxu0 }
 0x315   :  { %v4852_v53 = vadd.f32 %v4851_v31, %v4850_v28 }
 0x316   :  { %v4853_v34 = vpop.f32.mrf.mxu0 }
 0x317   :  { %v3461_v36 = vadd.f32 %v4852_v53, %v3420_v32 }
 0x318   :  { %v4854_v40 = vpop.f32.mrf.mxu0 }
 0x319   :  { %3467 = vst [vmem:[%s7402_s9] sm:$0xff] %v3461_v36  ;;  %v4855_v44 = vadd.f32 %v4854_v40, %v4853_v34 }
 0x31b   :  { %v3464_v45 = vadd.f32 %v4855_v44, %v3423_v43 }
 0x31d   :  { %3468 = vst [vmem:[%s7402_s9 + $0x8] sm:$0xff] %v3464_v45 }
 0x332   :  { %v4894_v51 = vpop.f32.mrf.mxu0 }
 0x334   :  { %v4895_v54 = vpop.f32.mrf.mxu0 }
 0x335   :  { %v4896_v61 = vadd.f32 %v4895_v54, %v4894_v51 }
 0x336   :  { %v4897_v56 = vpop.f32.mrf.mxu0 }
 0x337   :  { %v4064_v42 = vadd.f32 %v4896_v61, %v4023_v60 }
 0x338   :  { %v4898_v27 = vpop.f32.mrf.mxu0 }
 0x339   :  { %v4899_v62 = vadd.f32 %v4898_v27, %v4897_v56  ;;  %v4105_v4 = vadd.f32 %v4918_v0, %v4064_v42 }
 0x33b   :  { %v4067_v39 = vadd.f32 %v4899_v62, %v4026_v63 }
 0x33d   :  { %v4108_v5 = vadd.f32 %v4921_v58, %v4067_v39 }
 0x352   :  { %v4938_v38 = vpop.f32.mrf.mxu0 }
 0x354   :  { %v4939_v9 = vpop.f32.mrf.mxu0 }
 0x355   :  { %v4940_v2 = vadd.f32 %v4939_v9, %v4938_v38 }
 0x356   :  { %v4941_v1 = vpop.f32.mrf.mxu0 }
 0x357   :  { %v4146_v6 = vadd.f32 %v4940_v2, %v4105_v4 }
 0x358   :  { %v4942_v3 = vpop.f32.mrf.mxu0 }
 0x359   :  { %v4943_v52 = vadd.f32 %v4942_v3, %v4941_v1 }
 0x35b   :  { %v4149_v7 = vadd.f32 %v4943_v52, %v4108_v5 }
 0x35d   :  { %v4152_v10 = vpack.c.bf16 %v4149_v7, %v4146_v6 }
 0x35f   :  { %4970 = vmatmul.mubr.bf16.vlgmr.msra.gmra.mxu1 %v4152_v10 }
 0x41f   :  { %v4258_v11 = vpop.f32.mrf.mxu1 }
 0x420   :  { %v4259_v20 = vadd.f32 %v4781_v21, %v4258_v11 }
 0x421   :  { %v4971_v12 = vpop.f32.mrf.mxu1 }
 0x422   :  { %4265 = vst [vmem:[%s7405_s10] sm:$0xff] %v4259_v20 }
 0x423   :  { %v4261_v13 = vpop.f32.mrf.mxu1 }
 0x424   :  { %v4262_v15 = vadd.f32 %v4781_v21, %v4261_v13 }
 0x425   :  { %v4972_v16 = vpop.f32.mrf.mxu1 }
 0x426   :  { %4266 = vst [vmem:[%s7405_s10 + $0x8] sm:$0xff] %v4262_v15 }

</bundles_post_ra>
